<compile_context>
chip_gen: v5e
topology: v5e:2x2
jax: 0.10.0
libtpu: 0.0.40
codegen_flags: <defaults>
</compile_context>

<pallas_src>
import functools

import jax
import jax.numpy as jnp
from jax.experimental import pallas as pl
from jax.experimental.pallas import tpu as pltpu

# ----------------------- small synthetic ViT config ------------------------
B = 2            # batch
C = 3            # image channels
IMG = 32         # input resolution (== visual.input_resolution -> Resize/CenterCrop identity)
PATCH = 8
GRID = IMG // PATCH
NPATCH = GRID * GRID             # 16 patches
SEQ = NPATCH + 1                 # +1 class token -> 17
SEQ_PAD = ((SEQ + 7) // 8) * 8   # 24 (sublane-aligned per-sample row block)
CPP = C * PATCH * PATCH          # 192
D = 64                           # transformer width
NH = 4                           # attention heads
HD = D // NH                     # 16
MLP = 4 * D                      # 256
NLAYERS = 2
OUT_DIM = 32                     # == text_projection.shape[1] (self.dim)

# preprocessing constants (from _transform)
CENTER = (0.4914, 0.4822, 0.4465)
STD = (0.2023, 0.1994, 0.201)
CLIP_MEAN = (0.48145466, 0.4578275, 0.40821073)
CLIP_STD = (0.26862954, 0.26130258, 0.27577711)


# ------------------- the single fused forward-pass kernel ------------------
def _vit_kernel(nb,                      # static: samples folded into this grid step
                patches_ref, wpatch_ref, pos_ref, mask_ref,
                lnpre_g_ref, lnpre_b_ref,
                ln1g_ref, ln1b_ref, wqkv_ref, bqkv_ref,
                wo_ref, bo_ref, ln2g_ref, ln2b_ref,
                w1_ref, b1_ref, w2_ref, b2_ref,
                lnpost_g_ref, lnpost_b_ref, proj_ref,
                out_ref):

    def ln(h, g, b):
        # single-pass variance: mean(x*x) - mu^2
        mu = jnp.mean(h, axis=-1, keepdims=True)
        var = jnp.mean(h * h, axis=-1, keepdims=True) - mu * mu
        return (h - mu) * jax.lax.rsqrt(var + 1e-5) * g + b

    def mm(a, w):
        # bf16 MXU operands (weights already bf16), f32 accumulation.
        return jnp.dot(a.astype(jnp.bfloat16), w, preferred_element_type=jnp.float32)

    # --- patch embedding: preprocess affine + effective bias + cls already folded into
    #     wpatch / pos host-side, so this is just one matmul + one add ---
    x = mm(patches_ref[...], wpatch_ref[...]) + pos_ref[...]        # (nb*SEQ_PAD, D) f32

    # ln_pre
    x = ln(x, lnpre_g_ref[...], lnpre_b_ref[...])

    att_mask = mask_ref[...]                                        # (1, SEQ_PAD): 0 / -1e30
    scale = 1.0 / (HD ** 0.5)

    for l in range(NLAYERS):
        # --- multi-head self-attention: fused QKV + single output projection ---
        h = ln(x, ln1g_ref[l], ln1b_ref[l])
        qkv = (mm(h, wqkv_ref[l]) + bqkv_ref[l]).astype(jnp.bfloat16)   # (rows, 3D) bf16, one cast
        ctx_rows = []
        for b in range(nb):                                  # static per-sample attention
            qkv_b = qkv[b * SEQ_PAD:(b + 1) * SEQ_PAD]
            heads = []
            for hh in range(NH):
                q = qkv_b[:, hh * HD:(hh + 1) * HD]
                k = qkv_b[:, D + hh * HD: D + (hh + 1) * HD]
                v = qkv_b[:, 2 * D + hh * HD: 2 * D + (hh + 1) * HD]
                s = jax.lax.dot_general(q, k, (((1,), (1,)), ((), ())),
                                        preferred_element_type=jnp.float32)
                s = s * scale + att_mask                     # mask padded key rows
                s = s - jnp.max(s, axis=-1, keepdims=True)
                e = jnp.exp(s)
                inv = pl.reciprocal(jnp.sum(e, axis=-1, keepdims=True), approx=True)
                heads.append(mm(e * inv, v))                 # (SEQ_PAD, HD) f32, stays in regs
            ctx_rows.append(jnp.concatenate(heads, axis=-1))
        ctx = ctx_rows[0] if nb == 1 else jnp.concatenate(ctx_rows, axis=0)
        x = x + mm(ctx, wo_ref[l]) + bo_ref[l]               # single out-proj

        # --- MLP with QuickGELU (CLIP) ---
        h2 = ln(x, ln2g_ref[l], ln2b_ref[l])
        u = mm(h2, w1_ref[l]) + b1_ref[l]
        u = u * jax.nn.sigmoid(1.702 * u)
        x = x + mm(u, w2_ref[l]) + b2_ref[l]

    # --- ln_post on the class token(s) + final projection ---
    if nb == 1:
        cls_tok = x[0:1, :]
    else:
        cls_tok = jnp.concatenate(
            [x[b * SEQ_PAD:b * SEQ_PAD + 1, :] for b in range(nb)], axis=0)
    cls_tok = ln(cls_tok, lnpost_g_ref[...], lnpost_b_ref[...])     # (nb, D)
    out_ref[...] = mm(cls_tok, proj_ref[...]).reshape(nb, 1, OUT_DIM)


def _rep_spec(shape):
    """BlockSpec for a weight shared across the grid (whole array, block index 0)."""
    n = len(shape)
    return pl.BlockSpec(shape, lambda g, _n=n: (0,) * _n)


def _fold_batch_default():
    """Fold the batch into one grid step on single-TensorCore chips (v5e/v6e); keep a
    parallel batch grid on multi-core chips (v7x, v4/v5p megacore)."""
    try:
        kind = jax.devices()[0].device_kind.lower()
    except Exception:
        return False
    multi_core = any(tag in kind for tag in ("v7", "v4", "v5p"))
    return not multi_core


# ------------------------------ forward pass --------------------------------
def vit_img_wrap_forward(image, params, *, fold_batch=None):
    """image: float32 [B, C, IMG, IMG] (NCHW). Returns float32 [B, OUT_DIM]."""
    Bsz = image.shape[0]
    if fold_batch is None:
        fold_batch = _fold_batch_default()
    nb = Bsz if fold_batch else 1          # samples per grid step
    grid = (Bsz // nb,)

    # --- fold the preprocess affine into the patch-embed weight (host-side algebra) ---
    # Normalize(-c/s, 1/s) -> y = x*s + c ; Normalize(m, sig) -> (y - m)/sig
    # Resize(bicubic) + CenterCrop are identity here since input resolution == IMG.
    scale_c = jnp.array(STD, jnp.float32) / jnp.array(CLIP_STD, jnp.float32)
    bias_c = (jnp.array(CENTER, jnp.float32) - jnp.array(CLIP_MEAN, jnp.float32)) / \
        jnp.array(CLIP_STD, jnp.float32)
    scale_k = jnp.repeat(scale_c, PATCH * PATCH)                     # (CPP,), (c, ph, pw) order
    bias_k = jnp.repeat(bias_c, PATCH * PATCH)                       # (CPP,)

    w_patch = params["w_patch"]                                      # (CPP, D) f32
    w_patch_eff = (w_patch * scale_k[:, None]).astype(jnp.bfloat16)  # diag(scale) @ w
    b_patch = bias_k @ w_patch                                       # (D,) effective bias

    # --- fold cls token and patch-embed bias into the positional embedding ---
    pos = params["pos"]                                              # (SEQ, D)
    pos_eff = jnp.zeros((SEQ_PAD, D), jnp.float32)
    pos_eff = pos_eff.at[0].set(pos[0] + params["cls"])              # cls slot (patch row is 0)
    pos_eff = pos_eff.at[1:SEQ].set(pos[1:] + b_patch)
    pos_full = jnp.tile(pos_eff, (nb, 1))                            # (nb*SEQ_PAD, D)

    # --- extract non-overlapping patches: NCHW -> [B*SEQ_PAD, C*P*P] (bf16), cls/pad rows = 0 ---
    x = image.reshape(Bsz, C, GRID, PATCH, GRID, PATCH)
    x = x.transpose(0, 2, 4, 1, 3, 5).reshape(Bsz, NPATCH, CPP)
    patches = jnp.zeros((Bsz, SEQ_PAD, CPP), jnp.float32).at[:, 1:SEQ].set(x)
    patches = patches.reshape(Bsz * SEQ_PAD, CPP).astype(jnp.bfloat16)

    # key mask: padded rows never contribute to softmax
    key_mask = jnp.where(jnp.arange(SEQ_PAD) < SEQ, 0.0, -1e30).astype(jnp.float32)
    key_mask = key_mask.reshape(1, SEQ_PAD)

    blk = params["blocks"]
    bf = lambda w: w.astype(jnp.bfloat16)    # matmul weights go in as bf16

    args = (
        patches, w_patch_eff, pos_full, key_mask,
        params["ln_pre_g"].reshape(1, D), params["ln_pre_b"].reshape(1, D),
        blk["ln1_g"], blk["ln1_b"], bf(blk["w_qkv"]), blk["b_qkv"],
        bf(blk["w_o"]), blk["b_o"], blk["ln2_g"], blk["ln2_b"],
        bf(blk["w1"]), blk["b1"], bf(blk["w2"]), blk["b2"],
        params["ln_post_g"].reshape(1, D), params["ln_post_b"].reshape(1, D),
        bf(params["proj"]),
    )

    in_specs = [pl.BlockSpec((nb * SEQ_PAD, CPP), lambda g: (g, 0))] + \
               [_rep_spec(a.shape) for a in args[1:]]

    out = pl.pallas_call(
        functools.partial(_vit_kernel, nb),
        out_shape=jax.ShapeDtypeStruct((Bsz, 1, OUT_DIM), jnp.float32),
        grid=grid,
        in_specs=in_specs,
        out_specs=pl.BlockSpec((nb, 1, OUT_DIM), lambda g: (g, 0, 0)),
        compiler_params=pltpu.CompilerParams(dimension_semantics=("parallel",)),
    )(*args)
    return out.reshape(Bsz, OUT_DIM).astype(jnp.float32)      # .float()


# ------------------------------ parameters ---------------------------------
def init_params(key):
    ks = iter(jax.random.split(key, 64))

    def nrm(shape, scale=0.02):
        return (scale * jax.random.normal(next(ks), shape)).astype(jnp.float32)

    params = {
        "w_patch": nrm((CPP, D)),          # conv1 weight reshaped [D,C,P,P] -> [C*P*P, D]
        "cls": nrm((D,)),
        "pos": nrm((SEQ, D)),
        "ln_pre_g": jnp.ones((D,), jnp.float32),
        "ln_pre_b": jnp.zeros((D,), jnp.float32),
        "ln_post_g": jnp.ones((D,), jnp.float32),
        "ln_post_b": jnp.zeros((D,), jnp.float32),
        "proj": nrm((D, OUT_DIM)),
    }
    # per-layer weights stacked along a leading NLAYERS axis (loaded once, indexed in-kernel)
    params["blocks"] = {
        "ln1_g": jnp.ones((NLAYERS, 1, D), jnp.float32),
        "ln1_b": jnp.zeros((NLAYERS, 1, D), jnp.float32),
        "w_qkv": nrm((NLAYERS, D, 3 * D)),   # columns: [Q | K | V], head-major within each
        "b_qkv": nrm((NLAYERS, 1, 3 * D)),
        "w_o": nrm((NLAYERS, D, D)),
        "b_o": jnp.zeros((NLAYERS, 1, D), jnp.float32),
        "ln2_g": jnp.ones((NLAYERS, 1, D), jnp.float32),
        "ln2_b": jnp.zeros((NLAYERS, 1, D), jnp.float32),
        "w1": nrm((NLAYERS, D, MLP)),
        "b1": jnp.zeros((NLAYERS, 1, MLP), jnp.float32),
        "w2": nrm((NLAYERS, MLP, D)),
        "b2": jnp.zeros((NLAYERS, 1, D), jnp.float32),
    }
    return params


if __name__ == "__main__":
    key = jax.random.PRNGKey(0)
    pkey, xkey = jax.random.split(key)
    params = init_params(pkey)
    image = jax.random.normal(xkey, (B, C, IMG, IMG), jnp.float32)

    fwd = jax.jit(lambda img: vit_img_wrap_forward(img, params))
    out = fwd(image)
    jax.block_until_ready(out)
    assert out.shape == (B, OUT_DIM) and out.dtype == jnp.float32
    assert bool(jnp.all(jnp.isfinite(out)))
    print("KERNEL_OK")
</pallas_src>

<mosaic_0001>
module attributes {stable_mosaic.version = 11 : i64} {
  func.func @_vit_kernel(%arg0: i32, %arg1: memref<48x192xbf16, #tpu.memory_space<vmem>>, %arg2: memref<192x64xbf16, #tpu.memory_space<vmem>>, %arg3: memref<48x64xf32, #tpu.memory_space<vmem>>, %arg4: memref<1x24xf32, #tpu.memory_space<vmem>>, %arg5: memref<1x64xf32, #tpu.memory_space<vmem>>, %arg6: memref<1x64xf32, #tpu.memory_space<vmem>>, %arg7: memref<2x1x64xf32, #tpu.memory_space<vmem>>, %arg8: memref<2x1x64xf32, #tpu.memory_space<vmem>>, %arg9: memref<2x64x192xbf16, #tpu.memory_space<vmem>>, %arg10: memref<2x1x192xf32, #tpu.memory_space<vmem>>, %arg11: memref<2x64x64xbf16, #tpu.memory_space<vmem>>, %arg12: memref<2x1x64xf32, #tpu.memory_space<vmem>>, %arg13: memref<2x1x64xf32, #tpu.memory_space<vmem>>, %arg14: memref<2x1x64xf32, #tpu.memory_space<vmem>>, %arg15: memref<2x64x256xbf16, #tpu.memory_space<vmem>>, %arg16: memref<2x1x256xf32, #tpu.memory_space<vmem>>, %arg17: memref<2x256x64xbf16, #tpu.memory_space<vmem>>, %arg18: memref<2x1x64xf32, #tpu.memory_space<vmem>>, %arg19: memref<1x64xf32, #tpu.memory_space<vmem>>, %arg20: memref<1x64xf32, #tpu.memory_space<vmem>>, %arg21: memref<64x32xbf16, #tpu.memory_space<vmem>>, %arg22: memref<2x1x32xf32, #tpu.memory_space<vmem>>) attributes {dimension_semantics = [#tpu.dimension_semantics<parallel>], iteration_bounds = array<i64: 1>, scalar_prefetch = 0 : i64, scratch_operands = 0 : i64, tpu.core_type = #tpu.core_type<tc>, window_params = [{transform_indices = @transform_0, window_bounds = array<i64: 48, 192>}, {pipeline_mode = #tpu.pipeline_mode<synchronous>, transform_indices = @transform_1, window_bounds = array<i64: 192, 64>}, {pipeline_mode = #tpu.pipeline_mode<synchronous>, transform_indices = @transform_2, window_bounds = array<i64: 48, 64>}, {pipeline_mode = #tpu.pipeline_mode<synchronous>, transform_indices = @transform_3, window_bounds = array<i64: 1, 24>}, {pipeline_mode = #tpu.pipeline_mode<synchronous>, transform_indices = @transform_4, window_bounds = array<i64: 1, 64>}, {pipeline_mode = #tpu.pipeline_mode<synchronous>, transform_indices = @transform_5, window_bounds = array<i64: 1, 64>}, {pipeline_mode = #tpu.pipeline_mode<synchronous>, transform_indices = @transform_6, window_bounds = array<i64: 2, 1, 64>}, {pipeline_mode = #tpu.pipeline_mode<synchronous>, transform_indices = @transform_7, window_bounds = array<i64: 2, 1, 64>}, {pipeline_mode = #tpu.pipeline_mode<synchronous>, transform_indices = @transform_8, window_bounds = array<i64: 2, 64, 192>}, {pipeline_mode = #tpu.pipeline_mode<synchronous>, transform_indices = @transform_9, window_bounds = array<i64: 2, 1, 192>}, {pipeline_mode = #tpu.pipeline_mode<synchronous>, transform_indices = @transform_10, window_bounds = array<i64: 2, 64, 64>}, {pipeline_mode = #tpu.pipeline_mode<synchronous>, transform_indices = @transform_11, window_bounds = array<i64: 2, 1, 64>}, {pipeline_mode = #tpu.pipeline_mode<synchronous>, transform_indices = @transform_12, window_bounds = array<i64: 2, 1, 64>}, {pipeline_mode = #tpu.pipeline_mode<synchronous>, transform_indices = @transform_13, window_bounds = array<i64: 2, 1, 64>}, {pipeline_mode = #tpu.pipeline_mode<synchronous>, transform_indices = @transform_14, window_bounds = array<i64: 2, 64, 256>}, {pipeline_mode = #tpu.pipeline_mode<synchronous>, transform_indices = @transform_15, window_bounds = array<i64: 2, 1, 256>}, {pipeline_mode = #tpu.pipeline_mode<synchronous>, transform_indices = @transform_16, window_bounds = array<i64: 2, 256, 64>}, {pipeline_mode = #tpu.pipeline_mode<synchronous>, transform_indices = @transform_17, window_bounds = array<i64: 2, 1, 64>}, {pipeline_mode = #tpu.pipeline_mode<synchronous>, transform_indices = @transform_18, window_bounds = array<i64: 1, 64>}, {pipeline_mode = #tpu.pipeline_mode<synchronous>, transform_indices = @transform_19, window_bounds = array<i64: 1, 64>}, {pipeline_mode = #tpu.pipeline_mode<synchronous>, transform_indices = @transform_20, window_bounds = array<i64: 64, 32>}, {transform_indices = @transform_21, window_bounds = array<i64: 2, 1, 32>}]} {
    %c0 = arith.constant 0 : index
    %c0_0 = arith.constant 0 : index
    %0 = vector.load %arg1[%c0, %c0_0] : memref<48x192xbf16, #tpu.memory_space<vmem>>, vector<48x192xbf16>
    %c0_1 = arith.constant 0 : index
    %c0_2 = arith.constant 0 : index
    %1 = vector.load %arg2[%c0_1, %c0_2] : memref<192x64xbf16, #tpu.memory_space<vmem>>, vector<192x64xbf16>
    %cst = arith.constant dense<0.000000e+00> : vector<48x64xf32>
    %2 = tpu.matmul %0, %1, %cst {dimension_numbers = #tpu.dot_dimension_numbers<[1], [0], [0], [1], [0, 0, 1, 1], [], []>} : vector<48x192xbf16>, vector<192x64xbf16>, vector<48x64xf32> -> vector<48x64xf32>
    %c0_3 = arith.constant 0 : index
    %c0_4 = arith.constant 0 : index
    %3 = vector.load %arg3[%c0_3, %c0_4] : memref<48x64xf32, #tpu.memory_space<vmem>>, vector<48x64xf32>
    %4 = arith.addf %2, %3 : vector<48x64xf32>
    %c0_5 = arith.constant 0 : index
    %c0_6 = arith.constant 0 : index
    %5 = vector.load %arg5[%c0_5, %c0_6] : memref<1x64xf32, #tpu.memory_space<vmem>>, vector<1x64xf32>
    %c0_7 = arith.constant 0 : index
    %c0_8 = arith.constant 0 : index
    %6 = vector.load %arg6[%c0_7, %c0_8] : memref<1x64xf32, #tpu.memory_space<vmem>>, vector<1x64xf32>
    %cst_9 = arith.constant dense<0.000000e+00> : vector<48xf32>
    %7 = vector.multi_reduction <add>, %4, %cst_9 [1] : vector<48x64xf32> to vector<48xf32>
    %8 = vector.shape_cast %7 : vector<48xf32> to vector<48x1xf32>
    %cst_10 = arith.constant 6.400000e+01 : f32
    %9 = vector.broadcast %cst_10 : f32 to vector<48x1xf32>
    %10 = arith.divf %8, %9 : vector<48x1xf32>
    %11 = arith.mulf %4, %4 : vector<48x64xf32>
    %cst_11 = arith.constant dense<0.000000e+00> : vector<48xf32>
    %12 = vector.multi_reduction <add>, %11, %cst_11 [1] : vector<48x64xf32> to vector<48xf32>
    %13 = vector.shape_cast %12 : vector<48xf32> to vector<48x1xf32>
    %cst_12 = arith.constant 6.400000e+01 : f32
    %14 = vector.broadcast %cst_12 : f32 to vector<48x1xf32>
    %15 = arith.divf %13, %14 : vector<48x1xf32>
    %16 = arith.mulf %10, %10 : vector<48x1xf32>
    %17 = arith.subf %15, %16 : vector<48x1xf32>
    %18 = vector.broadcast %10 : vector<48x1xf32> to vector<48x64xf32>
    %19 = arith.subf %4, %18 : vector<48x64xf32>
    %cst_13 = arith.constant 9.99999974E-6 : f32
    %20 = vector.broadcast %cst_13 : f32 to vector<48x1xf32>
    %21 = arith.addf %17, %20 : vector<48x1xf32>
    %22 = math.rsqrt %21 : vector<48x1xf32>
    %23 = vector.broadcast %22 : vector<48x1xf32> to vector<48x64xf32>
    %24 = arith.mulf %19, %23 : vector<48x64xf32>
    %25 = vector.broadcast %5 : vector<1x64xf32> to vector<48x64xf32>
    %26 = arith.mulf %24, %25 : vector<48x64xf32>
    %27 = vector.broadcast %6 : vector<1x64xf32> to vector<48x64xf32>
    %28 = arith.addf %26, %27 : vector<48x64xf32>
    %c0_14 = arith.constant 0 : index
    %c0_15 = arith.constant 0 : index
    %29 = vector.load %arg4[%c0_14, %c0_15] : memref<1x24xf32, #tpu.memory_space<vmem>>, vector<1x24xf32>
    %c0_16 = arith.constant 0 : index
    %c0_17 = arith.constant 0 : index
    %c0_18 = arith.constant 0 : index
    %30 = vector.load %arg7[%c0_16, %c0_17, %c0_18] : memref<2x1x64xf32, #tpu.memory_space<vmem>>, vector<1x1x64xf32>
    %31 = vector.shape_cast %30 : vector<1x1x64xf32> to vector<1x64xf32>
    %c0_19 = arith.constant 0 : index
    %c0_20 = arith.constant 0 : index
    %c0_21 = arith.constant 0 : index
    %32 = vector.load %arg8[%c0_19, %c0_20, %c0_21] : memref<2x1x64xf32, #tpu.memory_space<vmem>>, vector<1x1x64xf32>
    %33 = vector.shape_cast %32 : vector<1x1x64xf32> to vector<1x64xf32>
    %cst_22 = arith.constant dense<0.000000e+00> : vector<48xf32>
    %34 = vector.multi_reduction <add>, %28, %cst_22 [1] : vector<48x64xf32> to vector<48xf32>
    %35 = vector.shape_cast %34 : vector<48xf32> to vector<48x1xf32>
    %cst_23 = arith.constant 6.400000e+01 : f32
    %36 = vector.broadcast %cst_23 : f32 to vector<48x1xf32>
    %37 = arith.divf %35, %36 : vector<48x1xf32>
    %38 = arith.mulf %28, %28 : vector<48x64xf32>
    %cst_24 = arith.constant dense<0.000000e+00> : vector<48xf32>
    %39 = vector.multi_reduction <add>, %38, %cst_24 [1] : vector<48x64xf32> to vector<48xf32>
    %40 = vector.shape_cast %39 : vector<48xf32> to vector<48x1xf32>
    %cst_25 = arith.constant 6.400000e+01 : f32
    %41 = vector.broadcast %cst_25 : f32 to vector<48x1xf32>
    %42 = arith.divf %40, %41 : vector<48x1xf32>
    %43 = arith.mulf %37, %37 : vector<48x1xf32>
    %44 = arith.subf %42, %43 : vector<48x1xf32>
    %45 = vector.broadcast %37 : vector<48x1xf32> to vector<48x64xf32>
    %46 = arith.subf %28, %45 : vector<48x64xf32>
    %cst_26 = arith.constant 9.99999974E-6 : f32
    %47 = vector.broadcast %cst_26 : f32 to vector<48x1xf32>
    %48 = arith.addf %44, %47 : vector<48x1xf32>
    %49 = math.rsqrt %48 : vector<48x1xf32>
    %50 = vector.broadcast %49 : vector<48x1xf32> to vector<48x64xf32>
    %51 = arith.mulf %46, %50 : vector<48x64xf32>
    %52 = vector.broadcast %31 : vector<1x64xf32> to vector<48x64xf32>
    %53 = arith.mulf %51, %52 : vector<48x64xf32>
    %54 = vector.broadcast %33 : vector<1x64xf32> to vector<48x64xf32>
    %55 = arith.addf %53, %54 : vector<48x64xf32>
    %c0_27 = arith.constant 0 : index
    %c0_28 = arith.constant 0 : index
    %c0_29 = arith.constant 0 : index
    %56 = vector.load %arg9[%c0_27, %c0_28, %c0_29] : memref<2x64x192xbf16, #tpu.memory_space<vmem>>, vector<1x64x192xbf16>
    %57 = vector.shape_cast %56 : vector<1x64x192xbf16> to vector<64x192xbf16>
    %58 = arith.truncf %55 : vector<48x64xf32> to vector<48x64xbf16>
    %cst_30 = arith.constant dense<0.000000e+00> : vector<48x192xf32>
    %59 = tpu.matmul %58, %57, %cst_30 {dimension_numbers = #tpu.dot_dimension_numbers<[1], [0], [0], [1], [0, 0, 1, 1], [], []>} : vector<48x64xbf16>, vector<64x192xbf16>, vector<48x192xf32> -> vector<48x192xf32>
    %c0_31 = arith.constant 0 : index
    %c0_32 = arith.constant 0 : index
    %c0_33 = arith.constant 0 : index
    %60 = vector.load %arg10[%c0_31, %c0_32, %c0_33] : memref<2x1x192xf32, #tpu.memory_space<vmem>>, vector<1x1x192xf32>
    %61 = vector.shape_cast %60 : vector<1x1x192xf32> to vector<1x192xf32>
    %62 = vector.broadcast %61 : vector<1x192xf32> to vector<48x192xf32>
    %63 = arith.addf %59, %62 : vector<48x192xf32>
    %64 = arith.truncf %63 : vector<48x192xf32> to vector<48x192xbf16>
    %65 = vector.extract_strided_slice %64 {offsets = [0, 0], sizes = [24, 192], strides = [1, 1]} : vector<48x192xbf16> to vector<24x192xbf16>
    %66 = vector.extract_strided_slice %65 {offsets = [0, 0], sizes = [24, 16], strides = [1, 1]} : vector<24x192xbf16> to vector<24x16xbf16>
    %67 = vector.extract_strided_slice %65 {offsets = [0, 64], sizes = [24, 16], strides = [1, 1]} : vector<24x192xbf16> to vector<24x16xbf16>
    %68 = vector.extract_strided_slice %65 {offsets = [0, 128], sizes = [24, 16], strides = [1, 1]} : vector<24x192xbf16> to vector<24x16xbf16>
    %cst_34 = arith.constant dense<0.000000e+00> : vector<24x24xf32>
    %69 = tpu.matmul %66, %67, %cst_34 {dimension_numbers = #tpu.dot_dimension_numbers<[1], [1], [0], [0], [0, 0, 1, 0], [], []>} : vector<24x16xbf16>, vector<24x16xbf16>, vector<24x24xf32> -> vector<24x24xf32>
    %cst_35 = arith.constant 2.500000e-01 : f32
    %70 = vector.broadcast %cst_35 : f32 to vector<24x24xf32>
    %71 = arith.mulf %69, %70 : vector<24x24xf32>
    %72 = vector.broadcast %29 : vector<1x24xf32> to vector<24x24xf32>
    %73 = arith.addf %71, %72 : vector<24x24xf32>
    %cst_36 = arith.constant dense<0xFF800000> : vector<24xf32>
    %74 = vector.multi_reduction <maximumf>, %73, %cst_36 [1] : vector<24x24xf32> to vector<24xf32>
    %75 = vector.shape_cast %74 : vector<24xf32> to vector<24x1xf32>
    %76 = vector.broadcast %75 : vector<24x1xf32> to vector<24x24xf32>
    %77 = arith.subf %73, %76 : vector<24x24xf32>
    %78 = math.exp %77 : vector<24x24xf32>
    %cst_37 = arith.constant dense<0.000000e+00> : vector<24xf32>
    %79 = vector.multi_reduction <add>, %78, %cst_37 [1] : vector<24x24xf32> to vector<24xf32>
    %80 = vector.shape_cast %79 : vector<24xf32> to vector<24x1xf32>
    %81 = tpu.reciprocal %80 {approx = true} : vector<24x1xf32> -> vector<24x1xf32>
    %82 = vector.broadcast %81 : vector<24x1xf32> to vector<24x24xf32>
    %83 = arith.mulf %78, %82 : vector<24x24xf32>
    %84 = arith.truncf %83 : vector<24x24xf32> to vector<24x24xbf16>
    %cst_38 = arith.constant dense<0.000000e+00> : vector<24x16xf32>
    %85 = tpu.matmul %84, %68, %cst_38 {dimension_numbers = #tpu.dot_dimension_numbers<[1], [0], [0], [1], [0, 0, 1, 1], [], []>} : vector<24x24xbf16>, vector<24x16xbf16>, vector<24x16xf32> -> vector<24x16xf32>
    %86 = vector.extract_strided_slice %65 {offsets = [0, 16], sizes = [24, 16], strides = [1, 1]} : vector<24x192xbf16> to vector<24x16xbf16>
    %87 = vector.extract_strided_slice %65 {offsets = [0, 80], sizes = [24, 16], strides = [1, 1]} : vector<24x192xbf16> to vector<24x16xbf16>
    %88 = vector.extract_strided_slice %65 {offsets = [0, 144], sizes = [24, 16], strides = [1, 1]} : vector<24x192xbf16> to vector<24x16xbf16>
    %cst_39 = arith.constant dense<0.000000e+00> : vector<24x24xf32>
    %89 = tpu.matmul %86, %87, %cst_39 {dimension_numbers = #tpu.dot_dimension_numbers<[1], [1], [0], [0], [0, 0, 1, 0], [], []>} : vector<24x16xbf16>, vector<24x16xbf16>, vector<24x24xf32> -> vector<24x24xf32>
    %cst_40 = arith.constant 2.500000e-01 : f32
    %90 = vector.broadcast %cst_40 : f32 to vector<24x24xf32>
    %91 = arith.mulf %89, %90 : vector<24x24xf32>
    %92 = vector.broadcast %29 : vector<1x24xf32> to vector<24x24xf32>
    %93 = arith.addf %91, %92 : vector<24x24xf32>
    %cst_41 = arith.constant dense<0xFF800000> : vector<24xf32>
    %94 = vector.multi_reduction <maximumf>, %93, %cst_41 [1] : vector<24x24xf32> to vector<24xf32>
    %95 = vector.shape_cast %94 : vector<24xf32> to vector<24x1xf32>
    %96 = vector.broadcast %95 : vector<24x1xf32> to vector<24x24xf32>
    %97 = arith.subf %93, %96 : vector<24x24xf32>
    %98 = math.exp %97 : vector<24x24xf32>
    %cst_42 = arith.constant dense<0.000000e+00> : vector<24xf32>
    %99 = vector.multi_reduction <add>, %98, %cst_42 [1] : vector<24x24xf32> to vector<24xf32>
    %100 = vector.shape_cast %99 : vector<24xf32> to vector<24x1xf32>
    %101 = tpu.reciprocal %100 {approx = true} : vector<24x1xf32> -> vector<24x1xf32>
    %102 = vector.broadcast %101 : vector<24x1xf32> to vector<24x24xf32>
    %103 = arith.mulf %98, %102 : vector<24x24xf32>
    %104 = arith.truncf %103 : vector<24x24xf32> to vector<24x24xbf16>
    %cst_43 = arith.constant dense<0.000000e+00> : vector<24x16xf32>
    %105 = tpu.matmul %104, %88, %cst_43 {dimension_numbers = #tpu.dot_dimension_numbers<[1], [0], [0], [1], [0, 0, 1, 1], [], []>} : vector<24x24xbf16>, vector<24x16xbf16>, vector<24x16xf32> -> vector<24x16xf32>
    %106 = vector.extract_strided_slice %65 {offsets = [0, 32], sizes = [24, 16], strides = [1, 1]} : vector<24x192xbf16> to vector<24x16xbf16>
    %107 = vector.extract_strided_slice %65 {offsets = [0, 96], sizes = [24, 16], strides = [1, 1]} : vector<24x192xbf16> to vector<24x16xbf16>
    %108 = vector.extract_strided_slice %65 {offsets = [0, 160], sizes = [24, 16], strides = [1, 1]} : vector<24x192xbf16> to vector<24x16xbf16>
    %cst_44 = arith.constant dense<0.000000e+00> : vector<24x24xf32>
    %109 = tpu.matmul %106, %107, %cst_44 {dimension_numbers = #tpu.dot_dimension_numbers<[1], [1], [0], [0], [0, 0, 1, 0], [], []>} : vector<24x16xbf16>, vector<24x16xbf16>, vector<24x24xf32> -> vector<24x24xf32>
    %cst_45 = arith.constant 2.500000e-01 : f32
    %110 = vector.broadcast %cst_45 : f32 to vector<24x24xf32>
    %111 = arith.mulf %109, %110 : vector<24x24xf32>
    %112 = vector.broadcast %29 : vector<1x24xf32> to vector<24x24xf32>
    %113 = arith.addf %111, %112 : vector<24x24xf32>
    %cst_46 = arith.constant dense<0xFF800000> : vector<24xf32>
    %114 = vector.multi_reduction <maximumf>, %113, %cst_46 [1] : vector<24x24xf32> to vector<24xf32>
    %115 = vector.shape_cast %114 : vector<24xf32> to vector<24x1xf32>
    %116 = vector.broadcast %115 : vector<24x1xf32> to vector<24x24xf32>
    %117 = arith.subf %113, %116 : vector<24x24xf32>
    %118 = math.exp %117 : vector<24x24xf32>
    %cst_47 = arith.constant dense<0.000000e+00> : vector<24xf32>
    %119 = vector.multi_reduction <add>, %118, %cst_47 [1] : vector<24x24xf32> to vector<24xf32>
    %120 = vector.shape_cast %119 : vector<24xf32> to vector<24x1xf32>
    %121 = tpu.reciprocal %120 {approx = true} : vector<24x1xf32> -> vector<24x1xf32>
    %122 = vector.broadcast %121 : vector<24x1xf32> to vector<24x24xf32>
    %123 = arith.mulf %118, %122 : vector<24x24xf32>
    %124 = arith.truncf %123 : vector<24x24xf32> to vector<24x24xbf16>
    %cst_48 = arith.constant dense<0.000000e+00> : vector<24x16xf32>
    %125 = tpu.matmul %124, %108, %cst_48 {dimension_numbers = #tpu.dot_dimension_numbers<[1], [0], [0], [1], [0, 0, 1, 1], [], []>} : vector<24x24xbf16>, vector<24x16xbf16>, vector<24x16xf32> -> vector<24x16xf32>
    %126 = vector.extract_strided_slice %65 {offsets = [0, 48], sizes = [24, 16], strides = [1, 1]} : vector<24x192xbf16> to vector<24x16xbf16>
    %127 = vector.extract_strided_slice %65 {offsets = [0, 112], sizes = [24, 16], strides = [1, 1]} : vector<24x192xbf16> to vector<24x16xbf16>
    %128 = vector.extract_strided_slice %65 {offsets = [0, 176], sizes = [24, 16], strides = [1, 1]} : vector<24x192xbf16> to vector<24x16xbf16>
    %cst_49 = arith.constant dense<0.000000e+00> : vector<24x24xf32>
    %129 = tpu.matmul %126, %127, %cst_49 {dimension_numbers = #tpu.dot_dimension_numbers<[1], [1], [0], [0], [0, 0, 1, 0], [], []>} : vector<24x16xbf16>, vector<24x16xbf16>, vector<24x24xf32> -> vector<24x24xf32>
    %cst_50 = arith.constant 2.500000e-01 : f32
    %130 = vector.broadcast %cst_50 : f32 to vector<24x24xf32>
    %131 = arith.mulf %129, %130 : vector<24x24xf32>
    %132 = vector.broadcast %29 : vector<1x24xf32> to vector<24x24xf32>
    %133 = arith.addf %131, %132 : vector<24x24xf32>
    %cst_51 = arith.constant dense<0xFF800000> : vector<24xf32>
    %134 = vector.multi_reduction <maximumf>, %133, %cst_51 [1] : vector<24x24xf32> to vector<24xf32>
    %135 = vector.shape_cast %134 : vector<24xf32> to vector<24x1xf32>
    %136 = vector.broadcast %135 : vector<24x1xf32> to vector<24x24xf32>
    %137 = arith.subf %133, %136 : vector<24x24xf32>
    %138 = math.exp %137 : vector<24x24xf32>
    %cst_52 = arith.constant dense<0.000000e+00> : vector<24xf32>
    %139 = vector.multi_reduction <add>, %138, %cst_52 [1] : vector<24x24xf32> to vector<24xf32>
    %140 = vector.shape_cast %139 : vector<24xf32> to vector<24x1xf32>
    %141 = tpu.reciprocal %140 {approx = true} : vector<24x1xf32> -> vector<24x1xf32>
    %142 = vector.broadcast %141 : vector<24x1xf32> to vector<24x24xf32>
    %143 = arith.mulf %138, %142 : vector<24x24xf32>
    %144 = arith.truncf %143 : vector<24x24xf32> to vector<24x24xbf16>
    %cst_53 = arith.constant dense<0.000000e+00> : vector<24x16xf32>
    %145 = tpu.matmul %144, %128, %cst_53 {dimension_numbers = #tpu.dot_dimension_numbers<[1], [0], [0], [1], [0, 0, 1, 1], [], []>} : vector<24x24xbf16>, vector<24x16xbf16>, vector<24x16xf32> -> vector<24x16xf32>
    %146 = tpu.concatenate %85, %105, %125, %145 in 1 : vector<24x16xf32>, vector<24x16xf32>, vector<24x16xf32>, vector<24x16xf32> -> vector<24x64xf32>
    %147 = vector.extract_strided_slice %64 {offsets = [24, 0], sizes = [24, 192], strides = [1, 1]} : vector<48x192xbf16> to vector<24x192xbf16>
    %148 = vector.extract_strided_slice %147 {offsets = [0, 0], sizes = [24, 16], strides = [1, 1]} : vector<24x192xbf16> to vector<24x16xbf16>
    %149 = vector.extract_strided_slice %147 {offsets = [0, 64], sizes = [24, 16], strides = [1, 1]} : vector<24x192xbf16> to vector<24x16xbf16>
    %150 = vector.extract_strided_slice %147 {offsets = [0, 128], sizes = [24, 16], strides = [1, 1]} : vector<24x192xbf16> to vector<24x16xbf16>
    %cst_54 = arith.constant dense<0.000000e+00> : vector<24x24xf32>
    %151 = tpu.matmul %148, %149, %cst_54 {dimension_numbers = #tpu.dot_dimension_numbers<[1], [1], [0], [0], [0, 0, 1, 0], [], []>} : vector<24x16xbf16>, vector<24x16xbf16>, vector<24x24xf32> -> vector<24x24xf32>
    %cst_55 = arith.constant 2.500000e-01 : f32
    %152 = vector.broadcast %cst_55 : f32 to vector<24x24xf32>
    %153 = arith.mulf %151, %152 : vector<24x24xf32>
    %154 = vector.broadcast %29 : vector<1x24xf32> to vector<24x24xf32>
    %155 = arith.addf %153, %154 : vector<24x24xf32>
    %cst_56 = arith.constant dense<0xFF800000> : vector<24xf32>
    %156 = vector.multi_reduction <maximumf>, %155, %cst_56 [1] : vector<24x24xf32> to vector<24xf32>
    %157 = vector.shape_cast %156 : vector<24xf32> to vector<24x1xf32>
    %158 = vector.broadcast %157 : vector<24x1xf32> to vector<24x24xf32>
    %159 = arith.subf %155, %158 : vector<24x24xf32>
    %160 = math.exp %159 : vector<24x24xf32>
    %cst_57 = arith.constant dense<0.000000e+00> : vector<24xf32>
    %161 = vector.multi_reduction <add>, %160, %cst_57 [1] : vector<24x24xf32> to vector<24xf32>
    %162 = vector.shape_cast %161 : vector<24xf32> to vector<24x1xf32>
    %163 = tpu.reciprocal %162 {approx = true} : vector<24x1xf32> -> vector<24x1xf32>
    %164 = vector.broadcast %163 : vector<24x1xf32> to vector<24x24xf32>
    %165 = arith.mulf %160, %164 : vector<24x24xf32>
    %166 = arith.truncf %165 : vector<24x24xf32> to vector<24x24xbf16>
    %cst_58 = arith.constant dense<0.000000e+00> : vector<24x16xf32>
    %167 = tpu.matmul %166, %150, %cst_58 {dimension_numbers = #tpu.dot_dimension_numbers<[1], [0], [0], [1], [0, 0, 1, 1], [], []>} : vector<24x24xbf16>, vector<24x16xbf16>, vector<24x16xf32> -> vector<24x16xf32>
    %168 = vector.extract_strided_slice %147 {offsets = [0, 16], sizes = [24, 16], strides = [1, 1]} : vector<24x192xbf16> to vector<24x16xbf16>
    %169 = vector.extract_strided_slice %147 {offsets = [0, 80], sizes = [24, 16], strides = [1, 1]} : vector<24x192xbf16> to vector<24x16xbf16>
    %170 = vector.extract_strided_slice %147 {offsets = [0, 144], sizes = [24, 16], strides = [1, 1]} : vector<24x192xbf16> to vector<24x16xbf16>
    %cst_59 = arith.constant dense<0.000000e+00> : vector<24x24xf32>
    %171 = tpu.matmul %168, %169, %cst_59 {dimension_numbers = #tpu.dot_dimension_numbers<[1], [1], [0], [0], [0, 0, 1, 0], [], []>} : vector<24x16xbf16>, vector<24x16xbf16>, vector<24x24xf32> -> vector<24x24xf32>
    %cst_60 = arith.constant 2.500000e-01 : f32
    %172 = vector.broadcast %cst_60 : f32 to vector<24x24xf32>
    %173 = arith.mulf %171, %172 : vector<24x24xf32>
    %174 = vector.broadcast %29 : vector<1x24xf32> to vector<24x24xf32>
    %175 = arith.addf %173, %174 : vector<24x24xf32>
    %cst_61 = arith.constant dense<0xFF800000> : vector<24xf32>
    %176 = vector.multi_reduction <maximumf>, %175, %cst_61 [1] : vector<24x24xf32> to vector<24xf32>
    %177 = vector.shape_cast %176 : vector<24xf32> to vector<24x1xf32>
    %178 = vector.broadcast %177 : vector<24x1xf32> to vector<24x24xf32>
    %179 = arith.subf %175, %178 : vector<24x24xf32>
    %180 = math.exp %179 : vector<24x24xf32>
    %cst_62 = arith.constant dense<0.000000e+00> : vector<24xf32>
    %181 = vector.multi_reduction <add>, %180, %cst_62 [1] : vector<24x24xf32> to vector<24xf32>
    %182 = vector.shape_cast %181 : vector<24xf32> to vector<24x1xf32>
    %183 = tpu.reciprocal %182 {approx = true} : vector<24x1xf32> -> vector<24x1xf32>
    %184 = vector.broadcast %183 : vector<24x1xf32> to vector<24x24xf32>
    %185 = arith.mulf %180, %184 : vector<24x24xf32>
    %186 = arith.truncf %185 : vector<24x24xf32> to vector<24x24xbf16>
    %cst_63 = arith.constant dense<0.000000e+00> : vector<24x16xf32>
    %187 = tpu.matmul %186, %170, %cst_63 {dimension_numbers = #tpu.dot_dimension_numbers<[1], [0], [0], [1], [0, 0, 1, 1], [], []>} : vector<24x24xbf16>, vector<24x16xbf16>, vector<24x16xf32> -> vector<24x16xf32>
    %188 = vector.extract_strided_slice %147 {offsets = [0, 32], sizes = [24, 16], strides = [1, 1]} : vector<24x192xbf16> to vector<24x16xbf16>
    %189 = vector.extract_strided_slice %147 {offsets = [0, 96], sizes = [24, 16], strides = [1, 1]} : vector<24x192xbf16> to vector<24x16xbf16>
    %190 = vector.extract_strided_slice %147 {offsets = [0, 160], sizes = [24, 16], strides = [1, 1]} : vector<24x192xbf16> to vector<24x16xbf16>
    %cst_64 = arith.constant dense<0.000000e+00> : vector<24x24xf32>
    %191 = tpu.matmul %188, %189, %cst_64 {dimension_numbers = #tpu.dot_dimension_numbers<[1], [1], [0], [0], [0, 0, 1, 0], [], []>} : vector<24x16xbf16>, vector<24x16xbf16>, vector<24x24xf32> -> vector<24x24xf32>
    %cst_65 = arith.constant 2.500000e-01 : f32
    %192 = vector.broadcast %cst_65 : f32 to vector<24x24xf32>
    %193 = arith.mulf %191, %192 : vector<24x24xf32>
    %194 = vector.broadcast %29 : vector<1x24xf32> to vector<24x24xf32>
    %195 = arith.addf %193, %194 : vector<24x24xf32>
    %cst_66 = arith.constant dense<0xFF800000> : vector<24xf32>
    %196 = vector.multi_reduction <maximumf>, %195, %cst_66 [1] : vector<24x24xf32> to vector<24xf32>
    %197 = vector.shape_cast %196 : vector<24xf32> to vector<24x1xf32>
    %198 = vector.broadcast %197 : vector<24x1xf32> to vector<24x24xf32>
    %199 = arith.subf %195, %198 : vector<24x24xf32>
    %200 = math.exp %199 : vector<24x24xf32>
    %cst_67 = arith.constant dense<0.000000e+00> : vector<24xf32>
    %201 = vector.multi_reduction <add>, %200, %cst_67 [1] : vector<24x24xf32> to vector<24xf32>
    %202 = vector.shape_cast %201 : vector<24xf32> to vector<24x1xf32>
    %203 = tpu.reciprocal %202 {approx = true} : vector<24x1xf32> -> vector<24x1xf32>
    %204 = vector.broadcast %203 : vector<24x1xf32> to vector<24x24xf32>
    %205 = arith.mulf %200, %204 : vector<24x24xf32>
    %206 = arith.truncf %205 : vector<24x24xf32> to vector<24x24xbf16>
    %cst_68 = arith.constant dense<0.000000e+00> : vector<24x16xf32>
    %207 = tpu.matmul %206, %190, %cst_68 {dimension_numbers = #tpu.dot_dimension_numbers<[1], [0], [0], [1], [0, 0, 1, 1], [], []>} : vector<24x24xbf16>, vector<24x16xbf16>, vector<24x16xf32> -> vector<24x16xf32>
    %208 = vector.extract_strided_slice %147 {offsets = [0, 48], sizes = [24, 16], strides = [1, 1]} : vector<24x192xbf16> to vector<24x16xbf16>
    %209 = vector.extract_strided_slice %147 {offsets = [0, 112], sizes = [24, 16], strides = [1, 1]} : vector<24x192xbf16> to vector<24x16xbf16>
    %210 = vector.extract_strided_slice %147 {offsets = [0, 176], sizes = [24, 16], strides = [1, 1]} : vector<24x192xbf16> to vector<24x16xbf16>
    %cst_69 = arith.constant dense<0.000000e+00> : vector<24x24xf32>
    %211 = tpu.matmul %208, %209, %cst_69 {dimension_numbers = #tpu.dot_dimension_numbers<[1], [1], [0], [0], [0, 0, 1, 0], [], []>} : vector<24x16xbf16>, vector<24x16xbf16>, vector<24x24xf32> -> vector<24x24xf32>
    %cst_70 = arith.constant 2.500000e-01 : f32
    %212 = vector.broadcast %cst_70 : f32 to vector<24x24xf32>
    %213 = arith.mulf %211, %212 : vector<24x24xf32>
    %214 = vector.broadcast %29 : vector<1x24xf32> to vector<24x24xf32>
    %215 = arith.addf %213, %214 : vector<24x24xf32>
    %cst_71 = arith.constant dense<0xFF800000> : vector<24xf32>
    %216 = vector.multi_reduction <maximumf>, %215, %cst_71 [1] : vector<24x24xf32> to vector<24xf32>
    %217 = vector.shape_cast %216 : vector<24xf32> to vector<24x1xf32>
    %218 = vector.broadcast %217 : vector<24x1xf32> to vector<24x24xf32>
    %219 = arith.subf %215, %218 : vector<24x24xf32>
    %220 = math.exp %219 : vector<24x24xf32>
    %cst_72 = arith.constant dense<0.000000e+00> : vector<24xf32>
    %221 = vector.multi_reduction <add>, %220, %cst_72 [1] : vector<24x24xf32> to vector<24xf32>
    %222 = vector.shape_cast %221 : vector<24xf32> to vector<24x1xf32>
    %223 = tpu.reciprocal %222 {approx = true} : vector<24x1xf32> -> vector<24x1xf32>
    %224 = vector.broadcast %223 : vector<24x1xf32> to vector<24x24xf32>
    %225 = arith.mulf %220, %224 : vector<24x24xf32>
    %226 = arith.truncf %225 : vector<24x24xf32> to vector<24x24xbf16>
    %cst_73 = arith.constant dense<0.000000e+00> : vector<24x16xf32>
    %227 = tpu.matmul %226, %210, %cst_73 {dimension_numbers = #tpu.dot_dimension_numbers<[1], [0], [0], [1], [0, 0, 1, 1], [], []>} : vector<24x24xbf16>, vector<24x16xbf16>, vector<24x16xf32> -> vector<24x16xf32>
    %228 = tpu.concatenate %167, %187, %207, %227 in 1 : vector<24x16xf32>, vector<24x16xf32>, vector<24x16xf32>, vector<24x16xf32> -> vector<24x64xf32>
    %229 = tpu.concatenate %146, %228 in 0 : vector<24x64xf32>, vector<24x64xf32> -> vector<48x64xf32>
    %c0_74 = arith.constant 0 : index
    %c0_75 = arith.constant 0 : index
    %c0_76 = arith.constant 0 : index
    %230 = vector.load %arg11[%c0_74, %c0_75, %c0_76] : memref<2x64x64xbf16, #tpu.memory_space<vmem>>, vector<1x64x64xbf16>
    %231 = vector.shape_cast %230 : vector<1x64x64xbf16> to vector<64x64xbf16>
    %232 = arith.truncf %229 : vector<48x64xf32> to vector<48x64xbf16>
    %cst_77 = arith.constant dense<0.000000e+00> : vector<48x64xf32>
    %233 = tpu.matmul %232, %231, %cst_77 {dimension_numbers = #tpu.dot_dimension_numbers<[1], [0], [0], [1], [0, 0, 1, 1], [], []>} : vector<48x64xbf16>, vector<64x64xbf16>, vector<48x64xf32> -> vector<48x64xf32>
    %234 = arith.addf %28, %233 : vector<48x64xf32>
    %c0_78 = arith.constant 0 : index
    %c0_79 = arith.constant 0 : index
    %c0_80 = arith.constant 0 : index
    %235 = vector.load %arg12[%c0_78, %c0_79, %c0_80] : memref<2x1x64xf32, #tpu.memory_space<vmem>>, vector<1x1x64xf32>
    %236 = vector.shape_cast %235 : vector<1x1x64xf32> to vector<1x64xf32>
    %237 = vector.broadcast %236 : vector<1x64xf32> to vector<48x64xf32>
    %238 = arith.addf %234, %237 : vector<48x64xf32>
    %c0_81 = arith.constant 0 : index
    %c0_82 = arith.constant 0 : index
    %c0_83 = arith.constant 0 : index
    %239 = vector.load %arg13[%c0_81, %c0_82, %c0_83] : memref<2x1x64xf32, #tpu.memory_space<vmem>>, vector<1x1x64xf32>
    %240 = vector.shape_cast %239 : vector<1x1x64xf32> to vector<1x64xf32>
    %c0_84 = arith.constant 0 : index
    %c0_85 = arith.constant 0 : index
    %c0_86 = arith.constant 0 : index
    %241 = vector.load %arg14[%c0_84, %c0_85, %c0_86] : memref<2x1x64xf32, #tpu.memory_space<vmem>>, vector<1x1x64xf32>
    %242 = vector.shape_cast %241 : vector<1x1x64xf32> to vector<1x64xf32>
    %cst_87 = arith.constant dense<0.000000e+00> : vector<48xf32>
    %243 = vector.multi_reduction <add>, %238, %cst_87 [1] : vector<48x64xf32> to vector<48xf32>
    %244 = vector.shape_cast %243 : vector<48xf32> to vector<48x1xf32>
    %cst_88 = arith.constant 6.400000e+01 : f32
    %245 = vector.broadcast %cst_88 : f32 to vector<48x1xf32>
    %246 = arith.divf %244, %245 : vector<48x1xf32>
    %247 = arith.mulf %238, %238 : vector<48x64xf32>
    %cst_89 = arith.constant dense<0.000000e+00> : vector<48xf32>
    %248 = vector.multi_reduction <add>, %247, %cst_89 [1] : vector<48x64xf32> to vector<48xf32>
    %249 = vector.shape_cast %248 : vector<48xf32> to vector<48x1xf32>
    %cst_90 = arith.constant 6.400000e+01 : f32
    %250 = vector.broadcast %cst_90 : f32 to vector<48x1xf32>
    %251 = arith.divf %249, %250 : vector<48x1xf32>
    %252 = arith.mulf %246, %246 : vector<48x1xf32>
    %253 = arith.subf %251, %252 : vector<48x1xf32>
    %254 = vector.broadcast %246 : vector<48x1xf32> to vector<48x64xf32>
    %255 = arith.subf %238, %254 : vector<48x64xf32>
    %cst_91 = arith.constant 9.99999974E-6 : f32
    %256 = vector.broadcast %cst_91 : f32 to vector<48x1xf32>
    %257 = arith.addf %253, %256 : vector<48x1xf32>
    %258 = math.rsqrt %257 : vector<48x1xf32>
    %259 = vector.broadcast %258 : vector<48x1xf32> to vector<48x64xf32>
    %260 = arith.mulf %255, %259 : vector<48x64xf32>
    %261 = vector.broadcast %240 : vector<1x64xf32> to vector<48x64xf32>
    %262 = arith.mulf %260, %261 : vector<48x64xf32>
    %263 = vector.broadcast %242 : vector<1x64xf32> to vector<48x64xf32>
    %264 = arith.addf %262, %263 : vector<48x64xf32>
    %c0_92 = arith.constant 0 : index
    %c0_93 = arith.constant 0 : index
    %c0_94 = arith.constant 0 : index
    %265 = vector.load %arg15[%c0_92, %c0_93, %c0_94] : memref<2x64x256xbf16, #tpu.memory_space<vmem>>, vector<1x64x256xbf16>
    %266 = vector.shape_cast %265 : vector<1x64x256xbf16> to vector<64x256xbf16>
    %267 = arith.truncf %264 : vector<48x64xf32> to vector<48x64xbf16>
    %cst_95 = arith.constant dense<0.000000e+00> : vector<48x256xf32>
    %268 = tpu.matmul %267, %266, %cst_95 {dimension_numbers = #tpu.dot_dimension_numbers<[1], [0], [0], [1], [0, 0, 1, 1], [], []>} : vector<48x64xbf16>, vector<64x256xbf16>, vector<48x256xf32> -> vector<48x256xf32>
    %c0_96 = arith.constant 0 : index
    %c0_97 = arith.constant 0 : index
    %c0_98 = arith.constant 0 : index
    %269 = vector.load %arg16[%c0_96, %c0_97, %c0_98] : memref<2x1x256xf32, #tpu.memory_space<vmem>>, vector<1x1x256xf32>
    %270 = vector.shape_cast %269 : vector<1x1x256xf32> to vector<1x256xf32>
    %271 = vector.broadcast %270 : vector<1x256xf32> to vector<48x256xf32>
    %272 = arith.addf %268, %271 : vector<48x256xf32>
    %cst_99 = arith.constant 1.702000e+00 : f32
    %273 = vector.broadcast %cst_99 : f32 to vector<48x256xf32>
    %274 = arith.mulf %273, %272 : vector<48x256xf32>
    %275 = arith.negf %274 : vector<48x256xf32>
    %276 = math.exp %275 : vector<48x256xf32>
    %cst_100 = arith.constant 1.000000e+00 : f32
    %277 = vector.broadcast %cst_100 : f32 to vector<48x256xf32>
    %278 = arith.addf %277, %276 : vector<48x256xf32>
    %279 = arith.divf %277, %278 : vector<48x256xf32>
    %280 = arith.mulf %272, %279 : vector<48x256xf32>
    %c0_101 = arith.constant 0 : index
    %c0_102 = arith.constant 0 : index
    %c0_103 = arith.constant 0 : index
    %281 = vector.load %arg17[%c0_101, %c0_102, %c0_103] : memref<2x256x64xbf16, #tpu.memory_space<vmem>>, vector<1x256x64xbf16>
    %282 = vector.shape_cast %281 : vector<1x256x64xbf16> to vector<256x64xbf16>
    %283 = arith.truncf %280 : vector<48x256xf32> to vector<48x256xbf16>
    %cst_104 = arith.constant dense<0.000000e+00> : vector<48x64xf32>
    %284 = tpu.matmul %283, %282, %cst_104 {dimension_numbers = #tpu.dot_dimension_numbers<[1], [0], [0], [1], [0, 0, 1, 1], [], []>} : vector<48x256xbf16>, vector<256x64xbf16>, vector<48x64xf32> -> vector<48x64xf32>
    %285 = arith.addf %238, %284 : vector<48x64xf32>
    %c0_105 = arith.constant 0 : index
    %c0_106 = arith.constant 0 : index
    %c0_107 = arith.constant 0 : index
    %286 = vector.load %arg18[%c0_105, %c0_106, %c0_107] : memref<2x1x64xf32, #tpu.memory_space<vmem>>, vector<1x1x64xf32>
    %287 = vector.shape_cast %286 : vector<1x1x64xf32> to vector<1x64xf32>
    %288 = vector.broadcast %287 : vector<1x64xf32> to vector<48x64xf32>
    %289 = arith.addf %285, %288 : vector<48x64xf32>
    %c1 = arith.constant 1 : index
    %c0_108 = arith.constant 0 : index
    %c0_109 = arith.constant 0 : index
    %290 = vector.load %arg7[%c1, %c0_108, %c0_109] : memref<2x1x64xf32, #tpu.memory_space<vmem>>, vector<1x1x64xf32>
    %291 = vector.shape_cast %290 : vector<1x1x64xf32> to vector<1x64xf32>
    %c1_110 = arith.constant 1 : index
    %c0_111 = arith.constant 0 : index
    %c0_112 = arith.constant 0 : index
    %292 = vector.load %arg8[%c1_110, %c0_111, %c0_112] : memref<2x1x64xf32, #tpu.memory_space<vmem>>, vector<1x1x64xf32>
    %293 = vector.shape_cast %292 : vector<1x1x64xf32> to vector<1x64xf32>
    %cst_113 = arith.constant dense<0.000000e+00> : vector<48xf32>
    %294 = vector.multi_reduction <add>, %289, %cst_113 [1] : vector<48x64xf32> to vector<48xf32>
    %295 = vector.shape_cast %294 : vector<48xf32> to vector<48x1xf32>
    %cst_114 = arith.constant 6.400000e+01 : f32
    %296 = vector.broadcast %cst_114 : f32 to vector<48x1xf32>
    %297 = arith.divf %295, %296 : vector<48x1xf32>
    %298 = arith.mulf %289, %289 : vector<48x64xf32>
    %cst_115 = arith.constant dense<0.000000e+00> : vector<48xf32>
    %299 = vector.multi_reduction <add>, %298, %cst_115 [1] : vector<48x64xf32> to vector<48xf32>
    %300 = vector.shape_cast %299 : vector<48xf32> to vector<48x1xf32>
    %cst_116 = arith.constant 6.400000e+01 : f32
    %301 = vector.broadcast %cst_116 : f32 to vector<48x1xf32>
    %302 = arith.divf %300, %301 : vector<48x1xf32>
    %303 = arith.mulf %297, %297 : vector<48x1xf32>
    %304 = arith.subf %302, %303 : vector<48x1xf32>
    %305 = vector.broadcast %297 : vector<48x1xf32> to vector<48x64xf32>
    %306 = arith.subf %289, %305 : vector<48x64xf32>
    %cst_117 = arith.constant 9.99999974E-6 : f32
    %307 = vector.broadcast %cst_117 : f32 to vector<48x1xf32>
    %308 = arith.addf %304, %307 : vector<48x1xf32>
    %309 = math.rsqrt %308 : vector<48x1xf32>
    %310 = vector.broadcast %309 : vector<48x1xf32> to vector<48x64xf32>
    %311 = arith.mulf %306, %310 : vector<48x64xf32>
    %312 = vector.broadcast %291 : vector<1x64xf32> to vector<48x64xf32>
    %313 = arith.mulf %311, %312 : vector<48x64xf32>
    %314 = vector.broadcast %293 : vector<1x64xf32> to vector<48x64xf32>
    %315 = arith.addf %313, %314 : vector<48x64xf32>
    %c1_118 = arith.constant 1 : index
    %c0_119 = arith.constant 0 : index
    %c0_120 = arith.constant 0 : index
    %316 = vector.load %arg9[%c1_118, %c0_119, %c0_120] : memref<2x64x192xbf16, #tpu.memory_space<vmem>>, vector<1x64x192xbf16>
    %317 = vector.shape_cast %316 : vector<1x64x192xbf16> to vector<64x192xbf16>
    %318 = arith.truncf %315 : vector<48x64xf32> to vector<48x64xbf16>
    %cst_121 = arith.constant dense<0.000000e+00> : vector<48x192xf32>
    %319 = tpu.matmul %318, %317, %cst_121 {dimension_numbers = #tpu.dot_dimension_numbers<[1], [0], [0], [1], [0, 0, 1, 1], [], []>} : vector<48x64xbf16>, vector<64x192xbf16>, vector<48x192xf32> -> vector<48x192xf32>
    %c1_122 = arith.constant 1 : index
    %c0_123 = arith.constant 0 : index
    %c0_124 = arith.constant 0 : index
    %320 = vector.load %arg10[%c1_122, %c0_123, %c0_124] : memref<2x1x192xf32, #tpu.memory_space<vmem>>, vector<1x1x192xf32>
    %321 = vector.shape_cast %320 : vector<1x1x192xf32> to vector<1x192xf32>
    %322 = vector.broadcast %321 : vector<1x192xf32> to vector<48x192xf32>
    %323 = arith.addf %319, %322 : vector<48x192xf32>
    %324 = arith.truncf %323 : vector<48x192xf32> to vector<48x192xbf16>
    %325 = vector.extract_strided_slice %324 {offsets = [0, 0], sizes = [24, 192], strides = [1, 1]} : vector<48x192xbf16> to vector<24x192xbf16>
    %326 = vector.extract_strided_slice %325 {offsets = [0, 0], sizes = [24, 16], strides = [1, 1]} : vector<24x192xbf16> to vector<24x16xbf16>
    %327 = vector.extract_strided_slice %325 {offsets = [0, 64], sizes = [24, 16], strides = [1, 1]} : vector<24x192xbf16> to vector<24x16xbf16>
    %328 = vector.extract_strided_slice %325 {offsets = [0, 128], sizes = [24, 16], strides = [1, 1]} : vector<24x192xbf16> to vector<24x16xbf16>
    %cst_125 = arith.constant dense<0.000000e+00> : vector<24x24xf32>
    %329 = tpu.matmul %326, %327, %cst_125 {dimension_numbers = #tpu.dot_dimension_numbers<[1], [1], [0], [0], [0, 0, 1, 0], [], []>} : vector<24x16xbf16>, vector<24x16xbf16>, vector<24x24xf32> -> vector<24x24xf32>
    %cst_126 = arith.constant 2.500000e-01 : f32
    %330 = vector.broadcast %cst_126 : f32 to vector<24x24xf32>
    %331 = arith.mulf %329, %330 : vector<24x24xf32>
    %332 = vector.broadcast %29 : vector<1x24xf32> to vector<24x24xf32>
    %333 = arith.addf %331, %332 : vector<24x24xf32>
    %cst_127 = arith.constant dense<0xFF800000> : vector<24xf32>
    %334 = vector.multi_reduction <maximumf>, %333, %cst_127 [1] : vector<24x24xf32> to vector<24xf32>
    %335 = vector.shape_cast %334 : vector<24xf32> to vector<24x1xf32>
    %336 = vector.broadcast %335 : vector<24x1xf32> to vector<24x24xf32>
    %337 = arith.subf %333, %336 : vector<24x24xf32>
    %338 = math.exp %337 : vector<24x24xf32>
    %cst_128 = arith.constant dense<0.000000e+00> : vector<24xf32>
    %339 = vector.multi_reduction <add>, %338, %cst_128 [1] : vector<24x24xf32> to vector<24xf32>
    %340 = vector.shape_cast %339 : vector<24xf32> to vector<24x1xf32>
    %341 = tpu.reciprocal %340 {approx = true} : vector<24x1xf32> -> vector<24x1xf32>
    %342 = vector.broadcast %341 : vector<24x1xf32> to vector<24x24xf32>
    %343 = arith.mulf %338, %342 : vector<24x24xf32>
    %344 = arith.truncf %343 : vector<24x24xf32> to vector<24x24xbf16>
    %cst_129 = arith.constant dense<0.000000e+00> : vector<24x16xf32>
    %345 = tpu.matmul %344, %328, %cst_129 {dimension_numbers = #tpu.dot_dimension_numbers<[1], [0], [0], [1], [0, 0, 1, 1], [], []>} : vector<24x24xbf16>, vector<24x16xbf16>, vector<24x16xf32> -> vector<24x16xf32>
    %346 = vector.extract_strided_slice %325 {offsets = [0, 16], sizes = [24, 16], strides = [1, 1]} : vector<24x192xbf16> to vector<24x16xbf16>
    %347 = vector.extract_strided_slice %325 {offsets = [0, 80], sizes = [24, 16], strides = [1, 1]} : vector<24x192xbf16> to vector<24x16xbf16>
    %348 = vector.extract_strided_slice %325 {offsets = [0, 144], sizes = [24, 16], strides = [1, 1]} : vector<24x192xbf16> to vector<24x16xbf16>
    %cst_130 = arith.constant dense<0.000000e+00> : vector<24x24xf32>
    %349 = tpu.matmul %346, %347, %cst_130 {dimension_numbers = #tpu.dot_dimension_numbers<[1], [1], [0], [0], [0, 0, 1, 0], [], []>} : vector<24x16xbf16>, vector<24x16xbf16>, vector<24x24xf32> -> vector<24x24xf32>
    %cst_131 = arith.constant 2.500000e-01 : f32
    %350 = vector.broadcast %cst_131 : f32 to vector<24x24xf32>
    %351 = arith.mulf %349, %350 : vector<24x24xf32>
    %352 = vector.broadcast %29 : vector<1x24xf32> to vector<24x24xf32>
    %353 = arith.addf %351, %352 : vector<24x24xf32>
    %cst_132 = arith.constant dense<0xFF800000> : vector<24xf32>
    %354 = vector.multi_reduction <maximumf>, %353, %cst_132 [1] : vector<24x24xf32> to vector<24xf32>
    %355 = vector.shape_cast %354 : vector<24xf32> to vector<24x1xf32>
    %356 = vector.broadcast %355 : vector<24x1xf32> to vector<24x24xf32>
    %357 = arith.subf %353, %356 : vector<24x24xf32>
    %358 = math.exp %357 : vector<24x24xf32>
    %cst_133 = arith.constant dense<0.000000e+00> : vector<24xf32>
    %359 = vector.multi_reduction <add>, %358, %cst_133 [1] : vector<24x24xf32> to vector<24xf32>
    %360 = vector.shape_cast %359 : vector<24xf32> to vector<24x1xf32>
    %361 = tpu.reciprocal %360 {approx = true} : vector<24x1xf32> -> vector<24x1xf32>
    %362 = vector.broadcast %361 : vector<24x1xf32> to vector<24x24xf32>
    %363 = arith.mulf %358, %362 : vector<24x24xf32>
    %364 = arith.truncf %363 : vector<24x24xf32> to vector<24x24xbf16>
    %cst_134 = arith.constant dense<0.000000e+00> : vector<24x16xf32>
    %365 = tpu.matmul %364, %348, %cst_134 {dimension_numbers = #tpu.dot_dimension_numbers<[1], [0], [0], [1], [0, 0, 1, 1], [], []>} : vector<24x24xbf16>, vector<24x16xbf16>, vector<24x16xf32> -> vector<24x16xf32>
    %366 = vector.extract_strided_slice %325 {offsets = [0, 32], sizes = [24, 16], strides = [1, 1]} : vector<24x192xbf16> to vector<24x16xbf16>
    %367 = vector.extract_strided_slice %325 {offsets = [0, 96], sizes = [24, 16], strides = [1, 1]} : vector<24x192xbf16> to vector<24x16xbf16>
    %368 = vector.extract_strided_slice %325 {offsets = [0, 160], sizes = [24, 16], strides = [1, 1]} : vector<24x192xbf16> to vector<24x16xbf16>
    %cst_135 = arith.constant dense<0.000000e+00> : vector<24x24xf32>
    %369 = tpu.matmul %366, %367, %cst_135 {dimension_numbers = #tpu.dot_dimension_numbers<[1], [1], [0], [0], [0, 0, 1, 0], [], []>} : vector<24x16xbf16>, vector<24x16xbf16>, vector<24x24xf32> -> vector<24x24xf32>
    %cst_136 = arith.constant 2.500000e-01 : f32
    %370 = vector.broadcast %cst_136 : f32 to vector<24x24xf32>
    %371 = arith.mulf %369, %370 : vector<24x24xf32>
    %372 = vector.broadcast %29 : vector<1x24xf32> to vector<24x24xf32>
    %373 = arith.addf %371, %372 : vector<24x24xf32>
    %cst_137 = arith.constant dense<0xFF800000> : vector<24xf32>
    %374 = vector.multi_reduction <maximumf>, %373, %cst_137 [1] : vector<24x24xf32> to vector<24xf32>
    %375 = vector.shape_cast %374 : vector<24xf32> to vector<24x1xf32>
    %376 = vector.broadcast %375 : vector<24x1xf32> to vector<24x24xf32>
    %377 = arith.subf %373, %376 : vector<24x24xf32>
    %378 = math.exp %377 : vector<24x24xf32>
    %cst_138 = arith.constant dense<0.000000e+00> : vector<24xf32>
    %379 = vector.multi_reduction <add>, %378, %cst_138 [1] : vector<24x24xf32> to vector<24xf32>
    %380 = vector.shape_cast %379 : vector<24xf32> to vector<24x1xf32>
    %381 = tpu.reciprocal %380 {approx = true} : vector<24x1xf32> -> vector<24x1xf32>
    %382 = vector.broadcast %381 : vector<24x1xf32> to vector<24x24xf32>
    %383 = arith.mulf %378, %382 : vector<24x24xf32>
    %384 = arith.truncf %383 : vector<24x24xf32> to vector<24x24xbf16>
    %cst_139 = arith.constant dense<0.000000e+00> : vector<24x16xf32>
    %385 = tpu.matmul %384, %368, %cst_139 {dimension_numbers = #tpu.dot_dimension_numbers<[1], [0], [0], [1], [0, 0, 1, 1], [], []>} : vector<24x24xbf16>, vector<24x16xbf16>, vector<24x16xf32> -> vector<24x16xf32>
    %386 = vector.extract_strided_slice %325 {offsets = [0, 48], sizes = [24, 16], strides = [1, 1]} : vector<24x192xbf16> to vector<24x16xbf16>
    %387 = vector.extract_strided_slice %325 {offsets = [0, 112], sizes = [24, 16], strides = [1, 1]} : vector<24x192xbf16> to vector<24x16xbf16>
    %388 = vector.extract_strided_slice %325 {offsets = [0, 176], sizes = [24, 16], strides = [1, 1]} : vector<24x192xbf16> to vector<24x16xbf16>
    %cst_140 = arith.constant dense<0.000000e+00> : vector<24x24xf32>
    %389 = tpu.matmul %386, %387, %cst_140 {dimension_numbers = #tpu.dot_dimension_numbers<[1], [1], [0], [0], [0, 0, 1, 0], [], []>} : vector<24x16xbf16>, vector<24x16xbf16>, vector<24x24xf32> -> vector<24x24xf32>
    %cst_141 = arith.constant 2.500000e-01 : f32
    %390 = vector.broadcast %cst_141 : f32 to vector<24x24xf32>
    %391 = arith.mulf %389, %390 : vector<24x24xf32>
    %392 = vector.broadcast %29 : vector<1x24xf32> to vector<24x24xf32>
    %393 = arith.addf %391, %392 : vector<24x24xf32>
    %cst_142 = arith.constant dense<0xFF800000> : vector<24xf32>
    %394 = vector.multi_reduction <maximumf>, %393, %cst_142 [1] : vector<24x24xf32> to vector<24xf32>
    %395 = vector.shape_cast %394 : vector<24xf32> to vector<24x1xf32>
    %396 = vector.broadcast %395 : vector<24x1xf32> to vector<24x24xf32>
    %397 = arith.subf %393, %396 : vector<24x24xf32>
    %398 = math.exp %397 : vector<24x24xf32>
    %cst_143 = arith.constant dense<0.000000e+00> : vector<24xf32>
    %399 = vector.multi_reduction <add>, %398, %cst_143 [1] : vector<24x24xf32> to vector<24xf32>
    %400 = vector.shape_cast %399 : vector<24xf32> to vector<24x1xf32>
    %401 = tpu.reciprocal %400 {approx = true} : vector<24x1xf32> -> vector<24x1xf32>
    %402 = vector.broadcast %401 : vector<24x1xf32> to vector<24x24xf32>
    %403 = arith.mulf %398, %402 : vector<24x24xf32>
    %404 = arith.truncf %403 : vector<24x24xf32> to vector<24x24xbf16>
    %cst_144 = arith.constant dense<0.000000e+00> : vector<24x16xf32>
    %405 = tpu.matmul %404, %388, %cst_144 {dimension_numbers = #tpu.dot_dimension_numbers<[1], [0], [0], [1], [0, 0, 1, 1], [], []>} : vector<24x24xbf16>, vector<24x16xbf16>, vector<24x16xf32> -> vector<24x16xf32>
    %406 = tpu.concatenate %345, %365, %385, %405 in 1 : vector<24x16xf32>, vector<24x16xf32>, vector<24x16xf32>, vector<24x16xf32> -> vector<24x64xf32>
    %407 = vector.extract_strided_slice %324 {offsets = [24, 0], sizes = [24, 192], strides = [1, 1]} : vector<48x192xbf16> to vector<24x192xbf16>
    %408 = vector.extract_strided_slice %407 {offsets = [0, 0], sizes = [24, 16], strides = [1, 1]} : vector<24x192xbf16> to vector<24x16xbf16>
    %409 = vector.extract_strided_slice %407 {offsets = [0, 64], sizes = [24, 16], strides = [1, 1]} : vector<24x192xbf16> to vector<24x16xbf16>
    %410 = vector.extract_strided_slice %407 {offsets = [0, 128], sizes = [24, 16], strides = [1, 1]} : vector<24x192xbf16> to vector<24x16xbf16>
    %cst_145 = arith.constant dense<0.000000e+00> : vector<24x24xf32>
    %411 = tpu.matmul %408, %409, %cst_145 {dimension_numbers = #tpu.dot_dimension_numbers<[1], [1], [0], [0], [0, 0, 1, 0], [], []>} : vector<24x16xbf16>, vector<24x16xbf16>, vector<24x24xf32> -> vector<24x24xf32>
    %cst_146 = arith.constant 2.500000e-01 : f32
    %412 = vector.broadcast %cst_146 : f32 to vector<24x24xf32>
    %413 = arith.mulf %411, %412 : vector<24x24xf32>
    %414 = vector.broadcast %29 : vector<1x24xf32> to vector<24x24xf32>
    %415 = arith.addf %413, %414 : vector<24x24xf32>
    %cst_147 = arith.constant dense<0xFF800000> : vector<24xf32>
    %416 = vector.multi_reduction <maximumf>, %415, %cst_147 [1] : vector<24x24xf32> to vector<24xf32>
    %417 = vector.shape_cast %416 : vector<24xf32> to vector<24x1xf32>
    %418 = vector.broadcast %417 : vector<24x1xf32> to vector<24x24xf32>
    %419 = arith.subf %415, %418 : vector<24x24xf32>
    %420 = math.exp %419 : vector<24x24xf32>
    %cst_148 = arith.constant dense<0.000000e+00> : vector<24xf32>
    %421 = vector.multi_reduction <add>, %420, %cst_148 [1] : vector<24x24xf32> to vector<24xf32>
    %422 = vector.shape_cast %421 : vector<24xf32> to vector<24x1xf32>
    %423 = tpu.reciprocal %422 {approx = true} : vector<24x1xf32> -> vector<24x1xf32>
    %424 = vector.broadcast %423 : vector<24x1xf32> to vector<24x24xf32>
    %425 = arith.mulf %420, %424 : vector<24x24xf32>
    %426 = arith.truncf %425 : vector<24x24xf32> to vector<24x24xbf16>
    %cst_149 = arith.constant dense<0.000000e+00> : vector<24x16xf32>
    %427 = tpu.matmul %426, %410, %cst_149 {dimension_numbers = #tpu.dot_dimension_numbers<[1], [0], [0], [1], [0, 0, 1, 1], [], []>} : vector<24x24xbf16>, vector<24x16xbf16>, vector<24x16xf32> -> vector<24x16xf32>
    %428 = vector.extract_strided_slice %407 {offsets = [0, 16], sizes = [24, 16], strides = [1, 1]} : vector<24x192xbf16> to vector<24x16xbf16>
    %429 = vector.extract_strided_slice %407 {offsets = [0, 80], sizes = [24, 16], strides = [1, 1]} : vector<24x192xbf16> to vector<24x16xbf16>
    %430 = vector.extract_strided_slice %407 {offsets = [0, 144], sizes = [24, 16], strides = [1, 1]} : vector<24x192xbf16> to vector<24x16xbf16>
    %cst_150 = arith.constant dense<0.000000e+00> : vector<24x24xf32>
    %431 = tpu.matmul %428, %429, %cst_150 {dimension_numbers = #tpu.dot_dimension_numbers<[1], [1], [0], [0], [0, 0, 1, 0], [], []>} : vector<24x16xbf16>, vector<24x16xbf16>, vector<24x24xf32> -> vector<24x24xf32>
    %cst_151 = arith.constant 2.500000e-01 : f32
    %432 = vector.broadcast %cst_151 : f32 to vector<24x24xf32>
    %433 = arith.mulf %431, %432 : vector<24x24xf32>
    %434 = vector.broadcast %29 : vector<1x24xf32> to vector<24x24xf32>
    %435 = arith.addf %433, %434 : vector<24x24xf32>
    %cst_152 = arith.constant dense<0xFF800000> : vector<24xf32>
    %436 = vector.multi_reduction <maximumf>, %435, %cst_152 [1] : vector<24x24xf32> to vector<24xf32>
    %437 = vector.shape_cast %436 : vector<24xf32> to vector<24x1xf32>
    %438 = vector.broadcast %437 : vector<24x1xf32> to vector<24x24xf32>
    %439 = arith.subf %435, %438 : vector<24x24xf32>
    %440 = math.exp %439 : vector<24x24xf32>
    %cst_153 = arith.constant dense<0.000000e+00> : vector<24xf32>
    %441 = vector.multi_reduction <add>, %440, %cst_153 [1] : vector<24x24xf32> to vector<24xf32>
    %442 = vector.shape_cast %441 : vector<24xf32> to vector<24x1xf32>
    %443 = tpu.reciprocal %442 {approx = true} : vector<24x1xf32> -> vector<24x1xf32>
    %444 = vector.broadcast %443 : vector<24x1xf32> to vector<24x24xf32>
    %445 = arith.mulf %440, %444 : vector<24x24xf32>
    %446 = arith.truncf %445 : vector<24x24xf32> to vector<24x24xbf16>
    %cst_154 = arith.constant dense<0.000000e+00> : vector<24x16xf32>
    %447 = tpu.matmul %446, %430, %cst_154 {dimension_numbers = #tpu.dot_dimension_numbers<[1], [0], [0], [1], [0, 0, 1, 1], [], []>} : vector<24x24xbf16>, vector<24x16xbf16>, vector<24x16xf32> -> vector<24x16xf32>
    %448 = vector.extract_strided_slice %407 {offsets = [0, 32], sizes = [24, 16], strides = [1, 1]} : vector<24x192xbf16> to vector<24x16xbf16>
    %449 = vector.extract_strided_slice %407 {offsets = [0, 96], sizes = [24, 16], strides = [1, 1]} : vector<24x192xbf16> to vector<24x16xbf16>
    %450 = vector.extract_strided_slice %407 {offsets = [0, 160], sizes = [24, 16], strides = [1, 1]} : vector<24x192xbf16> to vector<24x16xbf16>
    %cst_155 = arith.constant dense<0.000000e+00> : vector<24x24xf32>
    %451 = tpu.matmul %448, %449, %cst_155 {dimension_numbers = #tpu.dot_dimension_numbers<[1], [1], [0], [0], [0, 0, 1, 0], [], []>} : vector<24x16xbf16>, vector<24x16xbf16>, vector<24x24xf32> -> vector<24x24xf32>
    %cst_156 = arith.constant 2.500000e-01 : f32
    %452 = vector.broadcast %cst_156 : f32 to vector<24x24xf32>
    %453 = arith.mulf %451, %452 : vector<24x24xf32>
    %454 = vector.broadcast %29 : vector<1x24xf32> to vector<24x24xf32>
    %455 = arith.addf %453, %454 : vector<24x24xf32>
    %cst_157 = arith.constant dense<0xFF800000> : vector<24xf32>
    %456 = vector.multi_reduction <maximumf>, %455, %cst_157 [1] : vector<24x24xf32> to vector<24xf32>
    %457 = vector.shape_cast %456 : vector<24xf32> to vector<24x1xf32>
    %458 = vector.broadcast %457 : vector<24x1xf32> to vector<24x24xf32>
    %459 = arith.subf %455, %458 : vector<24x24xf32>
    %460 = math.exp %459 : vector<24x24xf32>
    %cst_158 = arith.constant dense<0.000000e+00> : vector<24xf32>
    %461 = vector.multi_reduction <add>, %460, %cst_158 [1] : vector<24x24xf32> to vector<24xf32>
    %462 = vector.shape_cast %461 : vector<24xf32> to vector<24x1xf32>
    %463 = tpu.reciprocal %462 {approx = true} : vector<24x1xf32> -> vector<24x1xf32>
    %464 = vector.broadcast %463 : vector<24x1xf32> to vector<24x24xf32>
    %465 = arith.mulf %460, %464 : vector<24x24xf32>
    %466 = arith.truncf %465 : vector<24x24xf32> to vector<24x24xbf16>
    %cst_159 = arith.constant dense<0.000000e+00> : vector<24x16xf32>
    %467 = tpu.matmul %466, %450, %cst_159 {dimension_numbers = #tpu.dot_dimension_numbers<[1], [0], [0], [1], [0, 0, 1, 1], [], []>} : vector<24x24xbf16>, vector<24x16xbf16>, vector<24x16xf32> -> vector<24x16xf32>
    %468 = vector.extract_strided_slice %407 {offsets = [0, 48], sizes = [24, 16], strides = [1, 1]} : vector<24x192xbf16> to vector<24x16xbf16>
    %469 = vector.extract_strided_slice %407 {offsets = [0, 112], sizes = [24, 16], strides = [1, 1]} : vector<24x192xbf16> to vector<24x16xbf16>
    %470 = vector.extract_strided_slice %407 {offsets = [0, 176], sizes = [24, 16], strides = [1, 1]} : vector<24x192xbf16> to vector<24x16xbf16>
    %cst_160 = arith.constant dense<0.000000e+00> : vector<24x24xf32>
    %471 = tpu.matmul %468, %469, %cst_160 {dimension_numbers = #tpu.dot_dimension_numbers<[1], [1], [0], [0], [0, 0, 1, 0], [], []>} : vector<24x16xbf16>, vector<24x16xbf16>, vector<24x24xf32> -> vector<24x24xf32>
    %cst_161 = arith.constant 2.500000e-01 : f32
    %472 = vector.broadcast %cst_161 : f32 to vector<24x24xf32>
    %473 = arith.mulf %471, %472 : vector<24x24xf32>
    %474 = vector.broadcast %29 : vector<1x24xf32> to vector<24x24xf32>
    %475 = arith.addf %473, %474 : vector<24x24xf32>
    %cst_162 = arith.constant dense<0xFF800000> : vector<24xf32>
    %476 = vector.multi_reduction <maximumf>, %475, %cst_162 [1] : vector<24x24xf32> to vector<24xf32>
    %477 = vector.shape_cast %476 : vector<24xf32> to vector<24x1xf32>
    %478 = vector.broadcast %477 : vector<24x1xf32> to vector<24x24xf32>
    %479 = arith.subf %475, %478 : vector<24x24xf32>
    %480 = math.exp %479 : vector<24x24xf32>
    %cst_163 = arith.constant dense<0.000000e+00> : vector<24xf32>
    %481 = vector.multi_reduction <add>, %480, %cst_163 [1] : vector<24x24xf32> to vector<24xf32>
    %482 = vector.shape_cast %481 : vector<24xf32> to vector<24x1xf32>
    %483 = tpu.reciprocal %482 {approx = true} : vector<24x1xf32> -> vector<24x1xf32>
    %484 = vector.broadcast %483 : vector<24x1xf32> to vector<24x24xf32>
    %485 = arith.mulf %480, %484 : vector<24x24xf32>
    %486 = arith.truncf %485 : vector<24x24xf32> to vector<24x24xbf16>
    %cst_164 = arith.constant dense<0.000000e+00> : vector<24x16xf32>
    %487 = tpu.matmul %486, %470, %cst_164 {dimension_numbers = #tpu.dot_dimension_numbers<[1], [0], [0], [1], [0, 0, 1, 1], [], []>} : vector<24x24xbf16>, vector<24x16xbf16>, vector<24x16xf32> -> vector<24x16xf32>
    %488 = tpu.concatenate %427, %447, %467, %487 in 1 : vector<24x16xf32>, vector<24x16xf32>, vector<24x16xf32>, vector<24x16xf32> -> vector<24x64xf32>
    %489 = tpu.concatenate %406, %488 in 0 : vector<24x64xf32>, vector<24x64xf32> -> vector<48x64xf32>
    %c1_165 = arith.constant 1 : index
    %c0_166 = arith.constant 0 : index
    %c0_167 = arith.constant 0 : index
    %490 = vector.load %arg11[%c1_165, %c0_166, %c0_167] : memref<2x64x64xbf16, #tpu.memory_space<vmem>>, vector<1x64x64xbf16>
    %491 = vector.shape_cast %490 : vector<1x64x64xbf16> to vector<64x64xbf16>
    %492 = arith.truncf %489 : vector<48x64xf32> to vector<48x64xbf16>
    %cst_168 = arith.constant dense<0.000000e+00> : vector<48x64xf32>
    %493 = tpu.matmul %492, %491, %cst_168 {dimension_numbers = #tpu.dot_dimension_numbers<[1], [0], [0], [1], [0, 0, 1, 1], [], []>} : vector<48x64xbf16>, vector<64x64xbf16>, vector<48x64xf32> -> vector<48x64xf32>
    %494 = arith.addf %289, %493 : vector<48x64xf32>
    %c1_169 = arith.constant 1 : index
    %c0_170 = arith.constant 0 : index
    %c0_171 = arith.constant 0 : index
    %495 = vector.load %arg12[%c1_169, %c0_170, %c0_171] : memref<2x1x64xf32, #tpu.memory_space<vmem>>, vector<1x1x64xf32>
    %496 = vector.shape_cast %495 : vector<1x1x64xf32> to vector<1x64xf32>
    %497 = vector.broadcast %496 : vector<1x64xf32> to vector<48x64xf32>
    %498 = arith.addf %494, %497 : vector<48x64xf32>
    %c1_172 = arith.constant 1 : index
    %c0_173 = arith.constant 0 : index
    %c0_174 = arith.constant 0 : index
    %499 = vector.load %arg13[%c1_172, %c0_173, %c0_174] : memref<2x1x64xf32, #tpu.memory_space<vmem>>, vector<1x1x64xf32>
    %500 = vector.shape_cast %499 : vector<1x1x64xf32> to vector<1x64xf32>
    %c1_175 = arith.constant 1 : index
    %c0_176 = arith.constant 0 : index
    %c0_177 = arith.constant 0 : index
    %501 = vector.load %arg14[%c1_175, %c0_176, %c0_177] : memref<2x1x64xf32, #tpu.memory_space<vmem>>, vector<1x1x64xf32>
    %502 = vector.shape_cast %501 : vector<1x1x64xf32> to vector<1x64xf32>
    %cst_178 = arith.constant dense<0.000000e+00> : vector<48xf32>
    %503 = vector.multi_reduction <add>, %498, %cst_178 [1] : vector<48x64xf32> to vector<48xf32>
    %504 = vector.shape_cast %503 : vector<48xf32> to vector<48x1xf32>
    %cst_179 = arith.constant 6.400000e+01 : f32
    %505 = vector.broadcast %cst_179 : f32 to vector<48x1xf32>
    %506 = arith.divf %504, %505 : vector<48x1xf32>
    %507 = arith.mulf %498, %498 : vector<48x64xf32>
    %cst_180 = arith.constant dense<0.000000e+00> : vector<48xf32>
    %508 = vector.multi_reduction <add>, %507, %cst_180 [1] : vector<48x64xf32> to vector<48xf32>
    %509 = vector.shape_cast %508 : vector<48xf32> to vector<48x1xf32>
    %cst_181 = arith.constant 6.400000e+01 : f32
    %510 = vector.broadcast %cst_181 : f32 to vector<48x1xf32>
    %511 = arith.divf %509, %510 : vector<48x1xf32>
    %512 = arith.mulf %506, %506 : vector<48x1xf32>
    %513 = arith.subf %511, %512 : vector<48x1xf32>
    %514 = vector.broadcast %506 : vector<48x1xf32> to vector<48x64xf32>
    %515 = arith.subf %498, %514 : vector<48x64xf32>
    %cst_182 = arith.constant 9.99999974E-6 : f32
    %516 = vector.broadcast %cst_182 : f32 to vector<48x1xf32>
    %517 = arith.addf %513, %516 : vector<48x1xf32>
    %518 = math.rsqrt %517 : vector<48x1xf32>
    %519 = vector.broadcast %518 : vector<48x1xf32> to vector<48x64xf32>
    %520 = arith.mulf %515, %519 : vector<48x64xf32>
    %521 = vector.broadcast %500 : vector<1x64xf32> to vector<48x64xf32>
    %522 = arith.mulf %520, %521 : vector<48x64xf32>
    %523 = vector.broadcast %502 : vector<1x64xf32> to vector<48x64xf32>
    %524 = arith.addf %522, %523 : vector<48x64xf32>
    %c1_183 = arith.constant 1 : index
    %c0_184 = arith.constant 0 : index
    %c0_185 = arith.constant 0 : index
    %525 = vector.load %arg15[%c1_183, %c0_184, %c0_185] : memref<2x64x256xbf16, #tpu.memory_space<vmem>>, vector<1x64x256xbf16>
    %526 = vector.shape_cast %525 : vector<1x64x256xbf16> to vector<64x256xbf16>
    %527 = arith.truncf %524 : vector<48x64xf32> to vector<48x64xbf16>
    %cst_186 = arith.constant dense<0.000000e+00> : vector<48x256xf32>
    %528 = tpu.matmul %527, %526, %cst_186 {dimension_numbers = #tpu.dot_dimension_numbers<[1], [0], [0], [1], [0, 0, 1, 1], [], []>} : vector<48x64xbf16>, vector<64x256xbf16>, vector<48x256xf32> -> vector<48x256xf32>
    %c1_187 = arith.constant 1 : index
    %c0_188 = arith.constant 0 : index
    %c0_189 = arith.constant 0 : index
    %529 = vector.load %arg16[%c1_187, %c0_188, %c0_189] : memref<2x1x256xf32, #tpu.memory_space<vmem>>, vector<1x1x256xf32>
    %530 = vector.shape_cast %529 : vector<1x1x256xf32> to vector<1x256xf32>
    %531 = vector.broadcast %530 : vector<1x256xf32> to vector<48x256xf32>
    %532 = arith.addf %528, %531 : vector<48x256xf32>
    %cst_190 = arith.constant 1.702000e+00 : f32
    %533 = vector.broadcast %cst_190 : f32 to vector<48x256xf32>
    %534 = arith.mulf %533, %532 : vector<48x256xf32>
    %535 = arith.negf %534 : vector<48x256xf32>
    %536 = math.exp %535 : vector<48x256xf32>
    %cst_191 = arith.constant 1.000000e+00 : f32
    %537 = vector.broadcast %cst_191 : f32 to vector<48x256xf32>
    %538 = arith.addf %537, %536 : vector<48x256xf32>
    %539 = arith.divf %537, %538 : vector<48x256xf32>
    %540 = arith.mulf %532, %539 : vector<48x256xf32>
    %c1_192 = arith.constant 1 : index
    %c0_193 = arith.constant 0 : index
    %c0_194 = arith.constant 0 : index
    %541 = vector.load %arg17[%c1_192, %c0_193, %c0_194] : memref<2x256x64xbf16, #tpu.memory_space<vmem>>, vector<1x256x64xbf16>
    %542 = vector.shape_cast %541 : vector<1x256x64xbf16> to vector<256x64xbf16>
    %543 = arith.truncf %540 : vector<48x256xf32> to vector<48x256xbf16>
    %cst_195 = arith.constant dense<0.000000e+00> : vector<48x64xf32>
    %544 = tpu.matmul %543, %542, %cst_195 {dimension_numbers = #tpu.dot_dimension_numbers<[1], [0], [0], [1], [0, 0, 1, 1], [], []>} : vector<48x256xbf16>, vector<256x64xbf16>, vector<48x64xf32> -> vector<48x64xf32>
    %545 = arith.addf %498, %544 : vector<48x64xf32>
    %c1_196 = arith.constant 1 : index
    %c0_197 = arith.constant 0 : index
    %c0_198 = arith.constant 0 : index
    %546 = vector.load %arg18[%c1_196, %c0_197, %c0_198] : memref<2x1x64xf32, #tpu.memory_space<vmem>>, vector<1x1x64xf32>
    %547 = vector.shape_cast %546 : vector<1x1x64xf32> to vector<1x64xf32>
    %548 = vector.broadcast %547 : vector<1x64xf32> to vector<48x64xf32>
    %549 = arith.addf %545, %548 : vector<48x64xf32>
    %550 = vector.extract_strided_slice %549 {offsets = [0, 0], sizes = [1, 64], strides = [1, 1]} : vector<48x64xf32> to vector<1x64xf32>
    %551 = vector.extract_strided_slice %549 {offsets = [24, 0], sizes = [1, 64], strides = [1, 1]} : vector<48x64xf32> to vector<1x64xf32>
    %552 = tpu.concatenate %550, %551 in 0 : vector<1x64xf32>, vector<1x64xf32> -> vector<2x64xf32>
    %c0_199 = arith.constant 0 : index
    %c0_200 = arith.constant 0 : index
    %553 = vector.load %arg19[%c0_199, %c0_200] : memref<1x64xf32, #tpu.memory_space<vmem>>, vector<1x64xf32>
    %c0_201 = arith.constant 0 : index
    %c0_202 = arith.constant 0 : index
    %554 = vector.load %arg20[%c0_201, %c0_202] : memref<1x64xf32, #tpu.memory_space<vmem>>, vector<1x64xf32>
    %cst_203 = arith.constant dense<0.000000e+00> : vector<2xf32>
    %555 = vector.multi_reduction <add>, %552, %cst_203 [1] : vector<2x64xf32> to vector<2xf32>
    %556 = vector.shape_cast %555 : vector<2xf32> to vector<2x1xf32>
    %cst_204 = arith.constant 6.400000e+01 : f32
    %557 = vector.broadcast %cst_204 : f32 to vector<2x1xf32>
    %558 = arith.divf %556, %557 : vector<2x1xf32>
    %559 = arith.mulf %552, %552 : vector<2x64xf32>
    %cst_205 = arith.constant dense<0.000000e+00> : vector<2xf32>
    %560 = vector.multi_reduction <add>, %559, %cst_205 [1] : vector<2x64xf32> to vector<2xf32>
    %561 = vector.shape_cast %560 : vector<2xf32> to vector<2x1xf32>
    %cst_206 = arith.constant 6.400000e+01 : f32
    %562 = vector.broadcast %cst_206 : f32 to vector<2x1xf32>
    %563 = arith.divf %561, %562 : vector<2x1xf32>
    %564 = arith.mulf %558, %558 : vector<2x1xf32>
    %565 = arith.subf %563, %564 : vector<2x1xf32>
    %566 = vector.broadcast %558 : vector<2x1xf32> to vector<2x64xf32>
    %567 = arith.subf %552, %566 : vector<2x64xf32>
    %cst_207 = arith.constant 9.99999974E-6 : f32
    %568 = vector.broadcast %cst_207 : f32 to vector<2x1xf32>
    %569 = arith.addf %565, %568 : vector<2x1xf32>
    %570 = math.rsqrt %569 : vector<2x1xf32>
    %571 = vector.broadcast %570 : vector<2x1xf32> to vector<2x64xf32>
    %572 = arith.mulf %567, %571 : vector<2x64xf32>
    %573 = vector.broadcast %553 : vector<1x64xf32> to vector<2x64xf32>
    %574 = arith.mulf %572, %573 : vector<2x64xf32>
    %575 = vector.broadcast %554 : vector<1x64xf32> to vector<2x64xf32>
    %576 = arith.addf %574, %575 : vector<2x64xf32>
    %c0_208 = arith.constant 0 : index
    %c0_209 = arith.constant 0 : index
    %577 = vector.load %arg21[%c0_208, %c0_209] : memref<64x32xbf16, #tpu.memory_space<vmem>>, vector<64x32xbf16>
    %578 = arith.truncf %576 : vector<2x64xf32> to vector<2x64xbf16>
    %cst_210 = arith.constant dense<0.000000e+00> : vector<2x32xf32>
    %579 = tpu.matmul %578, %577, %cst_210 {dimension_numbers = #tpu.dot_dimension_numbers<[1], [0], [0], [1], [0, 0, 1, 1], [], []>} : vector<2x64xbf16>, vector<64x32xbf16>, vector<2x32xf32> -> vector<2x32xf32>
    %580 = vector.shape_cast %579 : vector<2x32xf32> to vector<2x1x32xf32>
    %c0_211 = arith.constant 0 : index
    %c0_212 = arith.constant 0 : index
    %c0_213 = arith.constant 0 : index
    %581 = vector.load %arg22[%c0_211, %c0_212, %c0_213] : memref<2x1x32xf32, #tpu.memory_space<vmem>>, vector<2x1x32xf32>
    tpu.vector_store %arg22[%c0_211, %c0_212, %c0_213], %580 {strides = array<i32>} : memref<2x1x32xf32, #tpu.memory_space<vmem>>, vector<2x1x32xf32>,
    return
  }
  func.func @transform_0(%arg0: i32) -> (i32, i32) {
    %c0_i32 = arith.constant 0 : i32
    %c0_i32_0 = arith.constant 0 : i32
    return %arg0, %c0_i32 : i32, i32
  }
  func.func @transform_1(%arg0: i32) -> (i32, i32) {
    %c0_i32 = arith.constant 0 : i32
    %c0_i32_0 = arith.constant 0 : i32
    %c0_i32_1 = arith.constant 0 : i32
    return %c0_i32, %c0_i32_0 : i32, i32
  }
  func.func @transform_2(%arg0: i32) -> (i32, i32) {
    %c0_i32 = arith.constant 0 : i32
    %c0_i32_0 = arith.constant 0 : i32
    %c0_i32_1 = arith.constant 0 : i32
    return %c0_i32, %c0_i32_0 : i32, i32
  }
  func.func @transform_3(%arg0: i32) -> (i32, i32) {
    %c0_i32 = arith.constant 0 : i32
    %c0_i32_0 = arith.constant 0 : i32
    %c0_i32_1 = arith.constant 0 : i32
    return %c0_i32, %c0_i32_0 : i32, i32
  }
  func.func @transform_4(%arg0: i32) -> (i32, i32) {
    %c0_i32 = arith.constant 0 : i32
    %c0_i32_0 = arith.constant 0 : i32
    %c0_i32_1 = arith.constant 0 : i32
    return %c0_i32, %c0_i32_0 : i32, i32
  }
  func.func @transform_5(%arg0: i32) -> (i32, i32) {
    %c0_i32 = arith.constant 0 : i32
    %c0_i32_0 = arith.constant 0 : i32
    %c0_i32_1 = arith.constant 0 : i32
    return %c0_i32, %c0_i32_0 : i32, i32
  }
  func.func @transform_6(%arg0: i32) -> (i32, i32, i32) {
    %c0_i32 = arith.constant 0 : i32
    %c0_i32_0 = arith.constant 0 : i32
    %c0_i32_1 = arith.constant 0 : i32
    %c0_i32_2 = arith.constant 0 : i32
    return %c0_i32, %c0_i32_0, %c0_i32_1 : i32, i32, i32
  }
  func.func @transform_7(%arg0: i32) -> (i32, i32, i32) {
    %c0_i32 = arith.constant 0 : i32
    %c0_i32_0 = arith.constant 0 : i32
    %c0_i32_1 = arith.constant 0 : i32
    %c0_i32_2 = arith.constant 0 : i32
    return %c0_i32, %c0_i32_0, %c0_i32_1 : i32, i32, i32
  }
  func.func @transform_8(%arg0: i32) -> (i32, i32, i32) {
    %c0_i32 = arith.constant 0 : i32
    %c0_i32_0 = arith.constant 0 : i32
    %c0_i32_1 = arith.constant 0 : i32
    %c0_i32_2 = arith.constant 0 : i32
    return %c0_i32, %c0_i32_0, %c0_i32_1 : i32, i32, i32
  }
  func.func @transform_9(%arg0: i32) -> (i32, i32, i32) {
    %c0_i32 = arith.constant 0 : i32
    %c0_i32_0 = arith.constant 0 : i32
    %c0_i32_1 = arith.constant 0 : i32
    %c0_i32_2 = arith.constant 0 : i32
    return %c0_i32, %c0_i32_0, %c0_i32_1 : i32, i32, i32
  }
  func.func @transform_10(%arg0: i32) -> (i32, i32, i32) {
    %c0_i32 = arith.constant 0 : i32
    %c0_i32_0 = arith.constant 0 : i32
    %c0_i32_1 = arith.constant 0 : i32
    %c0_i32_2 = arith.constant 0 : i32
    return %c0_i32, %c0_i32_0, %c0_i32_1 : i32, i32, i32
  }
  func.func @transform_11(%arg0: i32) -> (i32, i32, i32) {
    %c0_i32 = arith.constant 0 : i32
    %c0_i32_0 = arith.constant 0 : i32
    %c0_i32_1 = arith.constant 0 : i32
    %c0_i32_2 = arith.constant 0 : i32
    return %c0_i32, %c0_i32_0, %c0_i32_1 : i32, i32, i32
  }
  func.func @transform_12(%arg0: i32) -> (i32, i32, i32) {
    %c0_i32 = arith.constant 0 : i32
    %c0_i32_0 = arith.constant 0 : i32
    %c0_i32_1 = arith.constant 0 : i32
    %c0_i32_2 = arith.constant 0 : i32
    return %c0_i32, %c0_i32_0, %c0_i32_1 : i32, i32, i32
  }
  func.func @transform_13(%arg0: i32) -> (i32, i32, i32) {
    %c0_i32 = arith.constant 0 : i32
    %c0_i32_0 = arith.constant 0 : i32
    %c0_i32_1 = arith.constant 0 : i32
    %c0_i32_2 = arith.constant 0 : i32
    return %c0_i32, %c0_i32_0, %c0_i32_1 : i32, i32, i32
  }
  func.func @transform_14(%arg0: i32) -> (i32, i32, i32) {
    %c0_i32 = arith.constant 0 : i32
    %c0_i32_0 = arith.constant 0 : i32
    %c0_i32_1 = arith.constant 0 : i32
    %c0_i32_2 = arith.constant 0 : i32
    return %c0_i32, %c0_i32_0, %c0_i32_1 : i32, i32, i32
  }
  func.func @transform_15(%arg0: i32) -> (i32, i32, i32) {
    %c0_i32 = arith.constant 0 : i32
    %c0_i32_0 = arith.constant 0 : i32
    %c0_i32_1 = arith.constant 0 : i32
    %c0_i32_2 = arith.constant 0 : i32
    return %c0_i32, %c0_i32_0, %c0_i32_1 : i32, i32, i32
  }
  func.func @transform_16(%arg0: i32) -> (i32, i32, i32) {
    %c0_i32 = arith.constant 0 : i32
    %c0_i32_0 = arith.constant 0 : i32
    %c0_i32_1 = arith.constant 0 : i32
    %c0_i32_2 = arith.constant 0 : i32
    return %c0_i32, %c0_i32_0, %c0_i32_1 : i32, i32, i32
  }
  func.func @transform_17(%arg0: i32) -> (i32, i32, i32) {
    %c0_i32 = arith.constant 0 : i32
    %c0_i32_0 = arith.constant 0 : i32
    %c0_i32_1 = arith.constant 0 : i32
    %c0_i32_2 = arith.constant 0 : i32
    return %c0_i32, %c0_i32_0, %c0_i32_1 : i32, i32, i32
  }
  func.func @transform_18(%arg0: i32) -> (i32, i32) {
    %c0_i32 = arith.constant 0 : i32
    %c0_i32_0 = arith.constant 0 : i32
    %c0_i32_1 = arith.constant 0 : i32
    return %c0_i32, %c0_i32_0 : i32, i32
  }
  func.func @transform_19(%arg0: i32) -> (i32, i32) {
    %c0_i32 = arith.constant 0 : i32
    %c0_i32_0 = arith.constant 0 : i32
    %c0_i32_1 = arith.constant 0 : i32
    return %c0_i32, %c0_i32_0 : i32, i32
  }
  func.func @transform_20(%arg0: i32) -> (i32, i32) {
    %c0_i32 = arith.constant 0 : i32
    %c0_i32_0 = arith.constant 0 : i32
    %c0_i32_1 = arith.constant 0 : i32
    return %c0_i32, %c0_i32_0 : i32, i32
  }
  func.func @transform_21(%arg0: i32) -> (i32, i32, i32) {
    %c0_i32 = arith.constant 0 : i32
    %c0_i32_0 = arith.constant 0 : i32
    %c0_i32_1 = arith.constant 0 : i32
    return %arg0, %c0_i32, %c0_i32_0 : i32, i32, i32
  }
}

</mosaic_0001>

<bundles_post_ra>
// kernel: _lambda_.1
= control target key start
LH: loop header
LB: loop body
LE: loop exit
PB: predicated region body
PF: predicated region fallthrough
CT: control target
= control target key end

     0   :  { %s8285_s0 = inlined_call_operand.vmem [shape: bf16[48,192], index: 0, kind: input, shape index: {}]   ;;  %s8286_s1 = inlined_call_operand.vmem [shape: bf16[192,64], index: 1, kind: input, shape index: {}]   ;;  %s8287_s2 = inlined_call_operand.vmem [shape: f32[48,64], index: 2, kind: input, shape index: {}]   ;;  %s8288_s3 = inlined_call_operand.vmem [shape: f32[1,24], index: 3, kind: input, shape index: {}]   ;;  %s8289_s4 = inlined_call_operand.vmem [shape: f32[1,64], index: 4, kind: input, shape index: {}, may-alias: {4,18}]   ;;  %s8290_s5 = inlined_call_operand.vmem [shape: f32[1,64], index: 5, kind: input, shape index: {}, may-alias: {5,19}]   ;;  %s8291_s6 = inlined_call_operand.vmem [shape: f32[2,1,64], index: 6, kind: input, shape index: {}, may-alias: {6,12}]   ;;  %s8292_s7 = inlined_call_operand.vmem [shape: f32[2,1,64], index: 7, kind: input, shape index: {}, may-alias: {7,11,13,17}]   ;;  %s8293_s8 = inlined_call_operand.vmem [shape: bf16[2,64,192], index: 8, kind: input, shape index: {}]   ;;  %s8294_s9 = inlined_call_operand.vmem [shape: f32[2,1,192], index: 9, kind: input, shape index: {}]   ;;  %s8295_s10 = inlined_call_operand.vmem [shape: bf16[2,64,64], index: 10, kind: input, shape index: {}]   ;;  %s8296_s11 = inlined_call_operand.vmem [shape: f32[2,1,64], index: 11, kind: input, shape index: {}, may-alias: {7,11,13,17}]   ;;  %s8297_s12 = inlined_call_operand.vmem [shape: f32[2,1,64], index: 12, kind: input, shape index: {}, may-alias: {6,12}]   ;;  %s8298_s13 = inlined_call_operand.vmem [shape: f32[2,1,64], index: 13, kind: input, shape index: {}, may-alias: {7,11,13,17}]   ;;  %s8299_s14 = inlined_call_operand.vmem [shape: bf16[2,64,256], index: 14, kind: input, shape index: {}]   ;;  %s8300_s15 = inlined_call_operand.vmem [shape: f32[2,1,256], index: 15, kind: input, shape index: {}]   ;;  %s8301_s16 = inlined_call_operand.vmem [shape: bf16[2,256,64], index: 16, kind: input, shape index: {}]   ;;  %s8302_s17 = inlined_call_operand.vmem [shape: f32[2,1,64], index: 17, kind: input, shape index: {}, may-alias: {7,11,13,17}]   ;;  %s8303_s18 = inlined_call_operand.vmem [shape: f32[1,64], index: 18, kind: input, shape index: {}, may-alias: {4,18}]   ;;  %s8304_s19 = inlined_call_operand.vmem [shape: f32[1,64], index: 19, kind: input, shape index: {}, may-alias: {5,19}]   ;;  %s8305_s20 = inlined_call_operand.vmem [shape: bf16[64,32], index: 20, kind: input, shape index: {}]   ;;  %s8306_s21 = inlined_call_operand.hbm [shape: f32[2,1,32], index: 21, kind: output, shape index: {}]  }
   0x1   :  { %8318 = sst [smem:[#allocation5_spill]] %s8285_s0 }
   0x2   :  { %8319 = sst [smem:[#allocation6_spill]] %s8286_s1 }
   0x3   :  { %8320 = sst [smem:[#allocation7_spill]] %s8287_s2 }
   0x4   :  { %8321 = sst [smem:[#allocation8_spill]] %s8288_s3 }
   0x5   :  { %8322 = sst [smem:[#allocation9_spill]] %s8289_s4 }
   0x6   :  { %8323 = sst [smem:[#allocation10_spill]] %s8290_s5 }
   0x7   :  { %s8324_s26 = sld [smem:[#allocation6_spill]] }
   0x8   :  { %s8325_s28 = sld [smem:[#allocation5_spill]] }
   0xd   :  { %v5295_v0 = vld [vmem:[%s8324_s26 + $0x38] sm:$0xff]  ;;  %v5294_v2 = vld [vmem:[%s8324_s26 + $0x30] sm:$0xff]  ;;  %v5293_v4 = vld [vmem:[%s8324_s26 + $0x28] sm:$0xff] }
   0xe   :  { %v5299_v1 = vld [vmem:[%s8324_s26 + $0x58] sm:$0xff]  ;;  %215 = vmatpush.bf16.msra.mxu0 %v5295_v0  ;;  %v5298_v3 = vld [vmem:[%s8324_s26 + $0x50] sm:$0xff]  ;;  %v5297_v5 = vld [vmem:[%s8324_s26 + $0x48] sm:$0xff] }
   0xf   :  { %243 = vmatpush.bf16.msra.mxu1 %v5299_v1  ;;  %v5292_v6 = vld [vmem:[%s8324_s26 + $0x20] sm:$0xff]  ;;  %v4724_v9 = vld [vmem:[%s8325_s28 + $0x8] sm:$0xf0] }
  0x10   :  { %v5296_v7 = vld [vmem:[%s8324_s26 + $0x40] sm:$0xff] }
  0x11   :  { %v5282_v8 = vld [vmem:[%s8325_s28 + $0x4] sm:$0xf] }
  0x12   :  { %216 = vmatpush.bf16.msra.mxu0 %v5294_v2 }
  0x13   :  { %244 = vmatpush.bf16.msra.mxu1 %v5298_v3 }
  0x16   :  { %217 = vmatpush.bf16.msra.mxu0 %v5293_v4 }
  0x17   :  { %245 = vmatpush.bf16.msra.mxu1 %v5297_v5 }
  0x18   :  { %26 = vsyncpa [#allocation3], 0  ;;  %v5291_v10 = vld [vmem:[%s8324_s26 + $0x18] sm:$0xff]  ;;  %v4727_v11 = vor.u32 %v5282_v8, %v4724_v9  ;;  %vm205_vm0 = vcmask 523264   ;;  %v5290_v12 = vld [vmem:[%s8324_s26 + $0x10] sm:$0xff]  ;;  %s8327_s30 = sld [smem:[#allocation9_spill]] }
  0x19   :  { %v5289_v13 = vld [vmem:[%s8324_s26 + $0x8] sm:$0xff]  ;;  %v5288_v14 = vld [vmem:[%s8324_s26] sm:$0xff]  ;;  %v5284_v17 = vld [vmem:[%s8325_s28 + $0x14] sm:$0xf]  ;;  %s8326_s26 = sld [smem:[#allocation7_spill]]  ;;  %s5873_s29 = smov 64  }
  0x1a   :  { %218 = vmatpush.bf16.msra.mxu0 %v5292_v6  ;;  %v4722_v15 = vld [vmem:[%s8325_s28] sm:$0xf]  ;;  %v5283_v16 = vld [vmem:[%s8325_s28 + $0x4] sm:$0xf0]  ;;  %v4732_v18 = vld [vmem:[%s8325_s28 + $0x18] sm:$0xf0] }
  0x1b   :  { %246 = vmatpush.bf16.msra.mxu1 %v5296_v7  ;;  %v4723_v19 = vor.u32 %v5283_v16, %v4722_v15  ;;  %v4735_v20 = vor.u32 %v5284_v17, %v4732_v18  ;;  %v4730_v21 = vld [vmem:[%s8325_s28 + $0x10] sm:$0xf]  ;;  %v5285_v22 = vld [vmem:[%s8325_s28 + $0x14] sm:$0xf0]  ;;  %v5286_v23 = vld [vmem:[%s8325_s28 + $0x24] sm:$0xf] }
  0x1c   :  { %v4740_v24 = vld [vmem:[%s8325_s28 + $0x28] sm:$0xf0]  ;;  %v4731_v25 = vor.u32 %v5285_v22, %v4730_v21  ;;  %v4738_v27 = vld [vmem:[%s8325_s28 + $0x20] sm:$0xf]  ;;  %v5287_v28 = vld [vmem:[%s8325_s28 + $0x24] sm:$0xf0] }
  0x1d   :  { %v4743_v26 = vor.u32 %v5286_v23, %v4740_v24  ;;  %v4739_v29 = vor.u32 %v5287_v28, %v4738_v27  ;;  %s8328_s28 = sld [smem:[#allocation10_spill]]  ;;  %s5874_s0 = smov 112  }
  0x1e   :  { %219 = vmatpush.bf16.msra.mxu0 %v5291_v10  ;;  %4792 = vmatmul.msk.bf16.vlgmr.msra.gmra.mxu1 %vm205_vm0, %v4727_v11  ;;  %s5875_s4 = smov 48   ;;  %s8315_s5 = smov 32  }
  0x1f   :  { %v100_v31 = vld [vmem:[%s8326_s26] sm:$0xff]  ;;  %v101_v38 = vld [vmem:[%s8326_s26 + $0x8] sm:$0xff]  ;;  %v102_v46 = vld [vmem:[%s8326_s26 + $0x10] sm:$0xff]  ;;  %s8329_s1 = sld [smem:[#allocation8_spill]] }
  0x20   :  { %v103_v53 = vld [vmem:[%s8326_s26 + $0x18] sm:$0xff]  ;;  %v104_v61 = vld [vmem:[%s8326_s26 + $0x20] sm:$0xff]  ;;  %v105_v5 = vld [vmem:[%s8326_s26 + $0x28] sm:$0xff]  ;;  %s8313_s26 = smov 96  }
  0x22   :  { %220 = vmatpush.bf16.msra.mxu0 %v5290_v12  ;;  %v5872_v12 = vmov 64.0  }
  0x23   :  { %5493 = vrcp.f32 %v5872_v12 }
  0x26   :  { %221 = vmatpush.bf16.msra.mxu0 %v5289_v13 }
  0x29   :  { %v5494_v13 = vpop.eup %5493 }
  0x2a   :  { %222 = vmatpush.bf16.msra.mxu0 %v5288_v14  ;;  %v284_v14 = vmul.f32 64.0, %v5494_v13  ;;  %vm288_vm1 = vweird.f32 %v5494_v13 }
  0x2c   :  { %v285_v15 = vsub.f32 1.0, %v284_v14 }
  0x2d   :  { %223 = vmatmul.bf16.vlgmr.msra.gmra.mxu0 %v4723_v19 }
  0x2e   :  { %4793 = vmatmul.msk.bf16.gmra.mxu1 %vm205_vm0, %v4735_v20  ;;  %v286_v16 = vmul.f32 %v5494_v13, %v285_v15 }
  0x30   :  { %v287_v17 = vadd.f32 %v5494_v13, %v286_v16 }
  0x32   :  { %v6124_v18 = vsel %vm288_vm1, %v5494_v13, %v287_v17 }
  0x3d   :  { %228 = vmatmul.bf16.gmra.mxu0 %v4731_v25 }
  0x3e   :  { %4794 = vmatmul.msk.bf16.gmra.mxu1 %vm205_vm0, %v4743_v26 }
  0x4d   :  { %233 = vmatmul.bf16.gmra.mxu0 %v4739_v29 }
  0x9b   :  { %v248_v30 = vpop.f32.mrf.mxu1 }
  0xa3   :  { %v250_v35 = vpop.f32.mrf.mxu1 }
  0xaa   :  { %v224_v32 = vpop.f32.mrf.mxu0 }
  0xab   :  { %v225_v33 = vadd.f32 %v224_v32, %v100_v31  ;;  %v253_v43 = vpop.f32.mrf.mxu1 }
  0xad   :  { %v6070_v34 = vadd.f32 %v248_v30, %v225_v33 }
  0xaf   :  { %v265_v36 = vsel %vm205_vm0, %v6070_v34, 0.0  ;;  %v296_v37 = vmul.f32 %v6070_v34, %v6070_v34 }
  0xb0   :  { %266 = vadd.xlane.f32.xlu0 %v265_v36 }
  0xb1   :  { %v302_v39 = vsel %vm205_vm0, %v296_v37, 0.0 }
  0xb2   :  { %v226_v40 = vpop.f32.mrf.mxu0  ;;  %303 = vadd.xlane.f32.xlu1 %v302_v39 }
  0xb3   :  { %v227_v41 = vadd.f32 %v226_v40, %v101_v38  ;;  %v255_v54 = vpop.f32.mrf.mxu1 }
  0xb5   :  { %v6080_v42 = vadd.f32 %v250_v35, %v227_v41 }
  0xb7   :  { %v268_v44 = vsel %vm205_vm0, %v6080_v42, 0.0  ;;  %v297_v45 = vmul.f32 %v6080_v42, %v6080_v42 }
  0xb8   :  { %269 = vadd.xlane.f32.xlu0 %v268_v44 }
  0xb9   :  { %v305_v47 = vsel %vm205_vm0, %v297_v45, 0.0 }
  0xba   :  { %v229_v48 = vpop.f32.mrf.mxu0  ;;  %306 = vadd.xlane.f32.xlu1 %v305_v47 }
  0xbb   :  { %v230_v49 = vadd.f32 %v229_v48, %v102_v46  ;;  %v258_v0 = vpop.f32.mrf.mxu1 }
  0xbd   :  { %v6090_v50 = vadd.f32 %v253_v43, %v230_v49 }
  0xbf   :  { %v271_v51 = vsel %vm205_vm0, %v6090_v50, 0.0  ;;  %v298_v52 = vmul.f32 %v6090_v50, %v6090_v50 }
  0xc0   :  { %272 = vadd.xlane.f32.xlu2 %v271_v51 }
  0xc1   :  { %v308_v55 = vsel %vm205_vm0, %v298_v52, 0.0 }
  0xc2   :  { %v231_v56 = vpop.f32.mrf.mxu0  ;;  %309 = vadd.xlane.f32.xlu0 %v308_v55 }
  0xc3   :  { %v232_v57 = vadd.f32 %v231_v56, %v103_v53  ;;  %v260_v8 = vpop.f32.mrf.mxu1 }
  0xc5   :  { %v6100_v58 = vadd.f32 %v255_v54, %v232_v57  ;;  %v6143_v54 = vld [vmem:[%s8327_s30] ss:$0 sm:$0xff]  ;;  %s5876_s30 = smov 16  }
  0xc7   :  { %v274_v59 = vsel %vm205_vm0, %v6100_v58, 0.0  ;;  %v299_v60 = vmul.f32 %v6100_v58, %v6100_v58 }
  0xc8   :  { %275 = vadd.xlane.f32.xlu2 %v274_v59 }
  0xc9   :  { %v311_v62 = vsel %vm205_vm0, %v299_v60, 0.0 }
  0xca   :  { %v234_v63 = vpop.f32.mrf.mxu0  ;;  %312 = vadd.xlane.f32.xlu1 %v311_v62 }
  0xcb   :  { %v235_v1 = vadd.f32 %v234_v63, %v104_v61 }
  0xcd   :  { %v6110_v2 = vadd.f32 %v258_v0, %v235_v1 }
  0xcf   :  { %v277_v3 = vsel %vm205_vm0, %v6110_v2, 0.0  ;;  %v300_v4 = vmul.f32 %v6110_v2, %v6110_v2 }
  0xd0   :  { %278 = vadd.xlane.f32.xlu2 %v277_v3 }
  0xd1   :  { %v314_v6 = vsel %vm205_vm0, %v300_v4, 0.0 }
  0xd2   :  { %315 = vadd.xlane.f32.xlu0 %v314_v6  ;;  %v236_v7 = vpop.f32.mrf.mxu0 }
  0xd3   :  { %v237_v9 = vadd.f32 %v236_v7, %v105_v5 }
  0xd5   :  { %v6120_v10 = vadd.f32 %v260_v8, %v237_v9 }
  0xd7   :  { %v280_v11 = vsel %vm205_vm0, %v6120_v10, 0.0 }
  0xda   :  { %281 = vadd.xlane.f32.xlu0 %v280_v11 }
 0x123   :  { %v267_v19 = vpop.xlane.xlu0 %266 }
 0x124   :  { %v290_v20 = vmul.f32 %v6124_v18, %v267_v19 }
 0x125   :  { %v304_v21 = vpop.xlane.xlu1 %303 }
 0x126   :  { %v326_v22 = vmul.f32 %v290_v20, %v290_v20  ;;  %v320_v23 = vmul.f32 %v304_v21, %v6124_v18  ;;  %v338_v52 = vsub.f32 %v6070_v34, %v290_v20  ;;  %v6151_v34 = vld [vmem:[%s8328_s28] ss:$0 sm:$0xff]  ;;  %s8311_s28 = smov 80  }
 0x128   :  { %v332_v24 = vsub.f32 %v320_v23, %v326_v22 }
 0x12a   :  { %v344_v25 = vadd.f32 1e-05, %v332_v24 }
 0x12b   :  { %v270_v26 = vpop.xlane.xlu0 %269 }
 0x12c   :  { %5495 = vrsqrt.f32 %v344_v25  ;;  %v291_v27 = vmul.f32 %v6124_v18, %v270_v26  ;;  %vm356_vm3 = vweird.f32 %v344_v25 }
 0x12d   :  { %v307_v28 = vpop.xlane.xlu1 %306 }
 0x12e   :  { %v327_v29 = vmul.f32 %v291_v27, %v291_v27  ;;  %v321_v30 = vmul.f32 %v307_v28, %v6124_v18  ;;  %v339_v9 = vsub.f32 %v6080_v42, %v291_v27  ;;  %v301_v42 = vmul.f32 %v6120_v10, %v6120_v10 }
 0x130   :  { %v333_v31 = vsub.f32 %v321_v30, %v327_v29  ;;  %v317_v29 = vsel %vm205_vm0, %v301_v42, 0.0  ;;  %v5304_v42 = vld [vmem:[%s8293_s8 + $0x24] sm:$0xf] }
 0x132   :  { %v5496_v32 = vpop.eup %5495  ;;  %v345_v33 = vadd.f32 1e-05, %v333_v31 }
 0x133   :  { %v351_v35 = vmul.f32 %v5496_v32, %v344_v25  ;;  %v273_v36 = vpop.xlane.xlu2 %272  ;;  %vm357_vm2 = vweird.f32 %v5496_v32 }
 0x134   :  { %5497 = vrsqrt.f32 %v345_v33  ;;  %v6131_v37 = vmul.f32 %v6124_v18, %v273_v36  ;;  %vm358_vm4 = vmor %vm356_vm3, %vm357_vm2  ;;  %vm366_vm6 = vweird.f32 %v345_v33 }
 0x135   :  { %v352_v38 = vmul.f32 %v5496_v32, %v351_v35  ;;  %v310_v39 = vpop.xlane.xlu0 %309 }
 0x136   :  { %v328_v40 = vmul.f32 %v6131_v37, %v6131_v37  ;;  %v322_v41 = vmul.f32 %v310_v39, %v6124_v18  ;;  %v340_v30 = vsub.f32 %v6090_v50, %v6131_v37 }
 0x137   :  { %v353_v43 = vmul.f32 0.5, %v352_v38 }
 0x138   :  { %v334_v44 = vsub.f32 %v322_v41, %v328_v40 }
 0x139   :  { %v354_v45 = vsub.f32 1.5, %v353_v43 }
 0x13a   :  { %v5498_v46 = vpop.eup %5497  ;;  %v346_v47 = vadd.f32 1e-05, %v334_v44 }
 0x13b   :  { %v355_v48 = vmul.f32 %v5496_v32, %v354_v45  ;;  %v361_v49 = vmul.f32 %v5498_v46, %v345_v33  ;;  %v276_v51 = vpop.xlane.xlu2 %275  ;;  %vm367_vm5 = vweird.f32 %v5498_v46 }
 0x13c   :  { %5499 = vrsqrt.f32 %v346_v47  ;;  %v6138_v53 = vmul.f32 %v6124_v18, %v276_v51  ;;  %vm368_vm7 = vmor %vm366_vm6, %vm367_vm5  ;;  %vm376_vm8 = vweird.f32 %v346_v47 }
 0x13d   :  { %v359_v55 = vsel %vm358_vm4, %v5496_v32, %v355_v48  ;;  %v362_v56 = vmul.f32 %v5498_v46, %v361_v49  ;;  %v313_v57 = vpop.xlane.xlu1 %312 }
 0x13e   :  { %v329_v59 = vmul.f32 %v6138_v53, %v6138_v53  ;;  %v323_v60 = vmul.f32 %v313_v57, %v6124_v18  ;;  %v410_v61 = vmul.f32 %v359_v55, %v338_v52 }
 0x13f   :  { %v363_v62 = vmul.f32 0.5, %v362_v56 }
 0x140   :  { %v335_v63 = vsub.f32 %v323_v60, %v329_v59  ;;  %v419_v0 = vmul.f32 %v6143_v54, %v410_v61 }
 0x141   :  { %v364_v1 = vsub.f32 1.5, %v363_v62 }
 0x142   :  { %v5500_v3 = vpop.eup %5499  ;;  %v347_v4 = vadd.f32 1e-05, %v335_v63  ;;  %v6155_v5 = vadd.f32 %v6151_v34, %v419_v0 }
 0x143   :  { %v365_v6 = vmul.f32 %v5498_v46, %v364_v1  ;;  %v371_v7 = vmul.f32 %v5500_v3, %v346_v47  ;;  %v279_v8 = vpop.xlane.xlu2 %278  ;;  %vm377_vm9 = vweird.f32 %v5500_v3 }
 0x144   :  { %5501 = vrsqrt.f32 %v347_v4  ;;  %v6159_v11 = vmul.f32 %v6124_v18, %v279_v8  ;;  %v437_v12 = vsel %vm205_vm0, %v6155_v5, 0.0  ;;  %vm378_vm10 = vmor %vm376_vm8, %vm377_vm9  ;;  %vm386_vm11 = vweird.f32 %v347_v4 }
 0x145   :  { %v369_v13 = vsel %vm368_vm7, %v5498_v46, %v365_v6  ;;  %v372_v14 = vmul.f32 %v5500_v3, %v371_v7  ;;  %438 = vadd.xlane.f32.xlu1 %v437_v12  ;;  %v316_v15 = vpop.xlane.xlu0 %315  ;;  %v461_v50 = vmul.f32 %v6155_v5, %v6155_v5  ;;  %v341_v46 = vsub.f32 %v6100_v58, %v6138_v53  ;;  %v5307_v12 = vld [vmem:[%s8293_s8 + $0x34] sm:$0xf0] }
 0x146   :  { %v330_v16 = vmul.f32 %v6159_v11, %v6159_v11  ;;  %v324_v17 = vmul.f32 %v316_v15, %v6124_v18  ;;  %v411_v19 = vmul.f32 %v369_v13, %v339_v9  ;;  %v342_v61 = vsub.f32 %v6110_v2, %v6159_v11  ;;  %v4821_v11 = vld [vmem:[%s8293_s8 + $0x30] sm:$0xf]  ;;  %v5306_v13 = vld [vmem:[%s8293_s8 + $0x34] sm:$0xf]  ;;  %v4823_v15 = vld [vmem:[%s8293_s8 + $0x38] sm:$0xf0] }
 0x147   :  { %v373_v20 = vmul.f32 0.5, %v372_v14  ;;  %v467_v47 = vsel %vm205_vm0, %v461_v50, 0.0  ;;  %v4822_v14 = vor.u32 %v5307_v12, %v4821_v11 }
 0x148   :  { %v336_v21 = vsub.f32 %v324_v17, %v330_v16  ;;  %v420_v22 = vmul.f32 %v6143_v54, %v411_v19  ;;  %v4826_v17 = vor.u32 %v5306_v13, %v4823_v15  ;;  %v4813_v19 = vld [vmem:[%s8293_s8 + $0x20] sm:$0xf] }
 0x149   :  { %v374_v23 = vsub.f32 1.5, %v373_v20  ;;  %669 = vmatpush.bf16.msra.mxu2 %v4822_v14  ;;  %v5305_v20 = vld [vmem:[%s8293_s8 + $0x24] sm:$0xf0] }
 0x14a   :  { %v5502_v24 = vpop.eup %5501  ;;  %v348_v25 = vadd.f32 1e-05, %v336_v21  ;;  %v6170_v26 = vadd.f32 %v6151_v34, %v420_v22  ;;  %693 = vmatpush.bf16.msra.mxu3 %v4826_v17  ;;  %v4814_v21 = vor.u32 %v5305_v20, %v4813_v19  ;;  %v4815_v22 = vld [vmem:[%s8293_s8 + $0x28] sm:$0xf0] }
 0x14b   :  { %v375_v27 = vmul.f32 %v5500_v3, %v374_v23  ;;  %v381_v28 = vmul.f32 %v5502_v24, %v347_v4  ;;  %vm387_vm12 = vweird.f32 %v5502_v24  ;;  %v4818_v23 = vor.u32 %v5304_v42, %v4815_v22 }
 0x14c   :  { %5503 = vrsqrt.f32 %v348_v25  ;;  %v440_v31 = vsel %vm205_vm0, %v6170_v26, 0.0  ;;  %v462_v32 = vmul.f32 %v6170_v26, %v6170_v26  ;;  %vm388_vm13 = vmor %vm386_vm11, %vm387_vm12  ;;  %vm396_vm14 = vweird.f32 %v348_v25 }
 0x14d   :  { %v379_v33 = vsel %vm378_vm10, %v5500_v3, %v375_v27  ;;  %v382_v35 = vmul.f32 %v5502_v24, %v381_v28  ;;  %318 = vadd.xlane.f32.xlu1 %v317_v29  ;;  %441 = vadd.xlane.f32.xlu2 %v440_v31  ;;  %v282_v16 = vpop.xlane.xlu0 %281  ;;  %v4805_v28 = vld [vmem:[%s8293_s8 + $0x10] sm:$0xf]  ;;  %v5303_v29 = vld [vmem:[%s8293_s8 + $0x14] sm:$0xf0] }
 0x14e   :  { %v470_v36 = vsel %vm205_vm0, %v462_v32, 0.0  ;;  %v412_v38 = vmul.f32 %v379_v33, %v340_v30  ;;  %670 = vmatpush.bf16.msra.mxu2 %v4814_v21  ;;  %694 = vmatpush.bf16.msra.mxu3 %v4818_v23  ;;  %v5302_v30 = vld [vmem:[%s8293_s8 + $0x14] sm:$0xf] }
 0x14f   :  { %v383_v39 = vmul.f32 0.5, %v382_v35  ;;  %471 = vadd.xlane.f32.xlu0 %v470_v36  ;;  %v4806_v35 = vor.u32 %v5303_v29, %v4805_v28  ;;  %v4807_v36 = vld [vmem:[%s8293_s8 + $0x18] sm:$0xf0] }
 0x150   :  { %v421_v37 = vmul.f32 %v6143_v54, %v412_v38 }
 0x151   :  { %v384_v40 = vsub.f32 1.5, %v383_v39  ;;  %v4810_v39 = vor.u32 %v5302_v30, %v4807_v36 }
 0x152   :  { %v5504_v41 = vpop.eup %5503  ;;  %v6184_v43 = vadd.f32 %v6151_v34, %v421_v37  ;;  %671 = vmatpush.bf16.msra.mxu2 %v4806_v35 }
 0x153   :  { %v385_v44 = vmul.f32 %v5502_v24, %v384_v40  ;;  %v391_v45 = vmul.f32 %v5504_v41, %v348_v25  ;;  %vm397_vm15 = vweird.f32 %v5504_v41  ;;  %695 = vmatpush.bf16.msra.mxu3 %v4810_v39 }
 0x154   :  { %v443_v48 = vsel %vm205_vm0, %v6184_v43, 0.0  ;;  %v463_v49 = vmul.f32 %v6184_v43, %v6184_v43  ;;  %vm398_vm1 = vmor %vm396_vm14, %vm397_vm15 }
 0x155   :  { %v389_v51 = vsel %vm388_vm13, %v5502_v24, %v385_v44  ;;  %v392_v52 = vmul.f32 %v5504_v41, %v391_v45  ;;  %468 = vadd.xlane.f32.xlu2 %v467_v47  ;;  %444 = vadd.xlane.f32.xlu1 %v443_v48  ;;  %v6239_v24 = vmul.f32 %v6124_v18, %v282_v16  ;;  %v5301_v47 = vld [vmem:[%s8293_s8 + $0x4] sm:$0xf0] }
 0x156   :  { %v473_v55 = vsel %vm205_vm0, %v463_v49, 0.0  ;;  %v413_v56 = vmul.f32 %v389_v51, %v341_v46  ;;  %v4797_v46 = vld [vmem:[%s8293_s8] sm:$0xf]  ;;  %v5300_v49 = vld [vmem:[%s8293_s8 + $0x4] sm:$0xf] }
 0x157   :  { %v393_v57 = vmul.f32 0.5, %v392_v52  ;;  %474 = vadd.xlane.f32.xlu0 %v473_v55  ;;  %v331_v31 = vmul.f32 %v6239_v24, %v6239_v24  ;;  %v4798_v48 = vor.u32 %v5301_v47, %v4797_v46  ;;  %v4799_v51 = vld [vmem:[%s8293_s8 + $0x8] sm:$0xf0]  ;;  %v343_v29 = vsub.f32 %v6120_v10, %v6239_v24  ;;  %v6311_v47 = vld [vmem:[%s8291_s6] ss:$0 sm:$0xff] }
 0x158   :  { %v422_v58 = vmul.f32 %v6143_v54, %v413_v56  ;;  %v4802_v55 = vor.u32 %v5300_v49, %v4799_v51 }
 0x159   :  { %v394_v53 = vsub.f32 1.5, %v393_v57  ;;  %672 = vmatpush.bf16.msra.mxu2 %v4798_v48 }
 0x15a   :  { %v6196_v59 = vadd.f32 %v6151_v34, %v422_v58  ;;  %696 = vmatpush.bf16.msra.mxu3 %v4802_v55 }
 0x15b   :  { %v395_v60 = vmul.f32 %v5504_v41, %v394_v53 }
 0x15c   :  { %v446_v62 = vsel %vm205_vm0, %v6196_v59, 0.0  ;;  %v464_v63 = vmul.f32 %v6196_v59, %v6196_v59 }
 0x15d   :  { %v399_v0 = vsel %vm398_vm1, %v5504_v41, %v395_v60  ;;  %447 = vadd.xlane.f32.xlu2 %v446_v62 }
 0x15e   :  { %v476_v1 = vsel %vm205_vm0, %v464_v63, 0.0  ;;  %v414_v3 = vmul.f32 %v399_v0, %v342_v61 }
 0x15f   :  { %477 = vadd.xlane.f32.xlu1 %v476_v1 }
 0x160   :  { %v423_v4 = vmul.f32 %v6143_v54, %v414_v3 }
 0x162   :  { %v6207_v6 = vadd.f32 %v6151_v34, %v423_v4 }
 0x164   :  { %v449_v2 = vsel %vm205_vm0, %v6207_v6, 0.0  ;;  %v465_v7 = vmul.f32 %v6207_v6, %v6207_v6 }
 0x165   :  { %450 = vadd.xlane.f32.xlu2 %v449_v2 }
 0x166   :  { %v479_v8 = vsel %vm205_vm0, %v465_v7, 0.0 }
 0x167   :  { %480 = vadd.xlane.f32.xlu1 %v479_v8 }
 0x1b8   :  { %v439_v9 = vpop.xlane.xlu1 %438 }
 0x1b9   :  { %v6263_v41 = vmul.f32 %v439_v9, %v6124_v18 }
 0x1bb   :  { %v491_v58 = vmul.f32 %v6263_v41, %v6263_v41 }
 0x1c0   :  { %v319_v25 = vpop.xlane.xlu1 %318  ;;  %v442_v27 = vpop.xlane.xlu2 %441 }
 0x1c1   :  { %v325_v32 = vmul.f32 %v319_v25, %v6124_v18  ;;  %v6254_v33 = vmul.f32 %v442_v27, %v6124_v18 }
 0x1c2   :  { %v472_v38 = vpop.xlane.xlu0 %471 }
 0x1c3   :  { %v337_v50 = vsub.f32 %v325_v32, %v331_v31  ;;  %v492_v37 = vmul.f32 %v6254_v33, %v6254_v33  ;;  %v486_v40 = vmul.f32 %v472_v38, %v6124_v18  ;;  %v504_v10 = vsub.f32 %v6170_v26, %v6254_v33 }
 0x1c4   :  { %v503_v33 = vsub.f32 %v6155_v5, %v6263_v41 }
 0x1c5   :  { %v349_v44 = vadd.f32 1e-05, %v337_v50  ;;  %v498_v45 = vsub.f32 %v486_v40, %v492_v37 }
 0x1c7   :  { %5505 = vrsqrt.f32 %v349_v44  ;;  %v510_v52 = vadd.f32 1e-05, %v498_v45  ;;  %vm406_vm3 = vweird.f32 %v349_v44 }
 0x1c8   :  { %v469_v56 = vpop.xlane.xlu2 %468  ;;  %v445_v57 = vpop.xlane.xlu1 %444 }
 0x1c9   :  { %5507 = vrsqrt.f32 %v510_v52  ;;  %v485_v53 = vmul.f32 %v469_v56, %v6124_v18  ;;  %v6281_v60 = vmul.f32 %v445_v57, %v6124_v18  ;;  %vm531_vm6 = vweird.f32 %v510_v52 }
 0x1ca   :  { %v475_v61 = vpop.xlane.xlu0 %474 }
 0x1cb   :  { %v497_v62 = vsub.f32 %v485_v53, %v491_v58  ;;  %v493_v63 = vmul.f32 %v6281_v60, %v6281_v60  ;;  %v487_v0 = vmul.f32 %v475_v61, %v6124_v18  ;;  %v6323_v58 = vld [vmem:[%s8292_s7] ss:$0 sm:$0xff] }
 0x1cd   :  { %v5506_v1 = vpop.eup %5505  ;;  %v509_v3 = vadd.f32 1e-05, %v497_v62  ;;  %v499_v4 = vsub.f32 %v487_v0, %v493_v63 }
 0x1ce   :  { %v401_v2 = vmul.f32 %v5506_v1, %v349_v44  ;;  %vm407_vm2 = vweird.f32 %v5506_v1 }
 0x1cf   :  { %v5508_v7 = vpop.eup %5507  ;;  %5509 = vrsqrt.f32 %v509_v3  ;;  %v6286_v8 = vadd.f32 1e-05, %v499_v4  ;;  %vm408_vm4 = vmor %vm406_vm3, %vm407_vm2  ;;  %vm521_vm9 = vweird.f32 %v509_v3 }
 0x1d0   :  { %v402_v9 = vmul.f32 %v5506_v1, %v401_v2  ;;  %v526_v11 = vmul.f32 %v5508_v7, %v510_v52  ;;  %v448_v12 = vpop.xlane.xlu2 %447  ;;  %vm532_vm5 = vweird.f32 %v5508_v7 }
 0x1d1   :  { %5511 = vrsqrt.f32 %v6286_v8  ;;  %v6290_v13 = vmul.f32 %v448_v12, %v6124_v18  ;;  %vm533_vm7 = vmor %vm531_vm6, %vm532_vm5  ;;  %vm541_vm14 = vweird.f32 %v6286_v8  ;;  %v505_v12 = vsub.f32 %v6184_v43, %v6281_v60 }
 0x1d2   :  { %v403_v14 = vmul.f32 0.5, %v402_v9  ;;  %v527_v15 = vmul.f32 %v5508_v7, %v526_v11  ;;  %v478_v16 = vpop.xlane.xlu1 %477 }
 0x1d3   :  { %v494_v17 = vmul.f32 %v6290_v13, %v6290_v13  ;;  %v488_v19 = vmul.f32 %v478_v16, %v6124_v18 }
 0x1d4   :  { %v404_v20 = vsub.f32 1.5, %v403_v14  ;;  %v528_v42 = vmul.f32 0.5, %v527_v15 }
 0x1d5   :  { %v5510_v21 = vpop.eup %5509  ;;  %v500_v22 = vsub.f32 %v488_v19, %v494_v17 }
 0x1d6   :  { %v405_v23 = vmul.f32 %v5506_v1, %v404_v20  ;;  %v529_v25 = vsub.f32 1.5, %v528_v42  ;;  %v516_v27 = vmul.f32 %v5510_v21, %v509_v3  ;;  %vm522_vm8 = vweird.f32 %v5510_v21 }
 0x1d7   :  { %v6295_v28 = vpop.eup %5511  ;;  %v512_v30 = vadd.f32 1e-05, %v500_v22  ;;  %vm523_vm10 = vmor %vm521_vm9, %vm522_vm8  ;;  %vm819_vm8 = vcmask 1043456   ;;  %vm731_vm9 = vcmask 130048  }
 0x1d8   :  { %v409_v31 = vsel %vm408_vm4, %v5506_v1, %v405_v23  ;;  %v530_v32 = vmul.f32 %v5508_v7, %v529_v25  ;;  %v517_v35 = vmul.f32 %v5510_v21, %v516_v27  ;;  %v536_v36 = vmul.f32 %v6295_v28, %v6286_v8  ;;  %v451_v20 = vpop.xlane.xlu2 %450 }
 0x1d9   :  { %5513 = vrsqrt.f32 %v512_v30  ;;  %v415_v39 = vmul.f32 %v409_v31, %v343_v29  ;;  %vm542_vm12 = vweird.f32 %v6295_v28  ;;  %vm551_vm13 = vweird.f32 %v512_v30 }
 0x1da   :  { %v518_v38 = vmul.f32 0.5, %v517_v35  ;;  %v537_v50 = vmul.f32 %v6295_v28, %v536_v36  ;;  %v534_v37 = vsel %vm533_vm7, %v5508_v7, %v530_v32  ;;  %vm543_vm1 = vmor %vm541_vm14, %vm542_vm12  ;;  %v506_v7 = vsub.f32 %v6196_v59, %v6290_v13 }
 0x1db   :  { %v424_v40 = vmul.f32 %v6143_v54, %v415_v39  ;;  %v576_v46 = vmul.f32 %v534_v37, %v504_v10  ;;  %v459_v42 = vmul.f32 %v451_v20, %v6124_v18  ;;  %vm8317_vm12 = vcmask 392192  }
 0x1dc   :  { %v519_v24 = vsub.f32 1.5, %v518_v38  ;;  %v538_v49 = vmul.f32 0.5, %v537_v50 }
 0x1dd   :  { %v6306_v45 = vadd.f32 %v6151_v34, %v424_v40  ;;  %v585_v57 = vmul.f32 %v6311_v47, %v576_v46  ;;  %v495_v60 = vmul.f32 %v459_v42, %v459_v42 }
 0x1de   :  { %v520_v44 = vmul.f32 %v5510_v21, %v519_v24  ;;  %v539_v41 = vsub.f32 1.5, %v538_v49  ;;  %v507_v49 = vsub.f32 %v6207_v6, %v459_v42 }
 0x1df   :  { %v5514_v48 = vpop.eup %5513  ;;  %v452_v54 = vsel %vm205_vm0, %v6306_v45, 0.0  ;;  %v466_v34 = vmul.f32 %v6306_v45, %v6306_v45  ;;  %v594_v1 = vadd.f32 %v6323_v58, %v585_v57 }
 0x1e0   :  { %v546_v51 = vmul.f32 %v5514_v48, %v512_v30  ;;  %453 = vadd.xlane.f32.xlu0 %v452_v54  ;;  %v524_v52 = vsel %vm523_vm10, %v5510_v21, %v520_v44  ;;  %vm552_vm11 = vweird.f32 %v5514_v48  ;;  %v540_v3 = vmul.f32 %v6295_v28, %v539_v41  ;;  %v481_v21 = vpop.xlane.xlu1 %480 }
 0x1e1   :  { %v575_v56 = vmul.f32 %v524_v52, %v503_v33  ;;  %v482_v53 = vsel %vm205_vm0, %v466_v34, 0.0  ;;  %vm553_vm15 = vmor %vm551_vm13, %vm552_vm11  ;;  %v489_v22 = vmul.f32 %v481_v21, %v6124_v18  ;;  %vm771_vm10 = vcmask 195584  }
 0x1e2   :  { %v547_v55 = vmul.f32 %v5514_v48, %v546_v51  ;;  %483 = vadd.xlane.f32.xlu2 %v482_v53  ;;  %v544_v11 = vsel %vm543_vm1, %v6295_v28, %v540_v3  ;;  %v610_v51 = vld [vmem:[%s8294_s9] sm:$0x3]  ;;  %vm1213_vm11 = vcmask 261120  }
 0x1e3   :  { %v584_v62 = vmul.f32 %v6311_v47, %v575_v56  ;;  %v577_v15 = vmul.f32 %v544_v11, %v505_v12  ;;  %v501_v23 = vsub.f32 %v489_v22, %v495_v60  ;;  %v6354_v57 = vperm.slane %v610_v51, 0 }
 0x1e4   :  { %v548_v61 = vmul.f32 0.5, %v547_v55  ;;  %v6356_v41 = vperm.slane %v610_v51, 1 }
 0x1e5   :  { %v593_v0 = vadd.f32 %v6323_v58, %v584_v62  ;;  %v586_v8 = vmul.f32 %v6311_v47, %v577_v15  ;;  %v513_v25 = vadd.f32 1e-05, %v501_v23 }
 0x1e6   :  { %v549_v63 = vsub.f32 1.5, %v548_v61 }
 0x1e7   :  { %v607_v2 = vpack.c.bf16 %v594_v1, %v593_v0  ;;  %v595_v13 = vadd.f32 %v6323_v58, %v586_v8  ;;  %5515 = vrsqrt.f32 %v513_v25  ;;  %vm561_vm3 = vweird.f32 %v513_v25 }
 0x1e8   :  { %v550_v4 = vmul.f32 %v5514_v48, %v549_v63 }
 0x1e9   :  { %4827 = vmatmul.msk.bf16.vlgmr.msra.gmra.mxu2 %vm205_vm0, %v607_v2  ;;  %4830 = vmatmul.msk.bf16.vlgmr.msra.gmra.mxu3 %vm205_vm0, %v607_v2 }
 0x1ea   :  { %v554_v9 = vsel %vm553_vm15, %v5514_v48, %v550_v4 }
 0x1eb   :  { %v578_v14 = vmul.f32 %v554_v9, %v506_v7 }
 0x1ed   :  { %v587_v16 = vmul.f32 %v6311_v47, %v578_v14  ;;  %v5516_v27 = vpop.eup %5515 }
 0x1ee   :  { %v556_v29 = vmul.f32 %v5516_v27, %v513_v25  ;;  %vm562_vm2 = vweird.f32 %v5516_v27 }
 0x1ef   :  { %v596_v17 = vadd.f32 %v6323_v58, %v587_v16  ;;  %vm563_vm4 = vmor %vm561_vm3, %vm562_vm2 }
 0x1f0   :  { %v557_v36 = vmul.f32 %v5516_v27, %v556_v29 }
 0x1f1   :  { %v608_v19 = vpack.c.bf16 %v596_v17, %v595_v13 }
 0x1f2   :  { %v558_v50 = vmul.f32 0.5, %v557_v36 }
 0x1f4   :  { %v559_v37 = vsub.f32 1.5, %v558_v50 }
 0x1f6   :  { %v560_v24 = vmul.f32 %v5516_v27, %v559_v37 }
 0x1f8   :  { %v564_v48 = vsel %vm563_vm4, %v5516_v27, %v560_v24 }
 0x1f9   :  { %4828 = vmatmul.msk.bf16.gmra.mxu2 %vm205_vm0, %v608_v19  ;;  %4831 = vmatmul.msk.bf16.gmra.mxu3 %vm205_vm0, %v608_v19  ;;  %v579_v54 = vmul.f32 %v564_v48, %v507_v49 }
 0x1fb   :  { %v588_v62 = vmul.f32 %v6311_v47, %v579_v54 }
 0x1fd   :  { %v597_v3 = vadd.f32 %v6323_v58, %v588_v62 }
 0x253   :  { %v454_v28 = vpop.xlane.xlu0 %453 }
 0x254   :  { %v460_v30 = vmul.f32 %v454_v28, %v6124_v18 }
 0x255   :  { %v484_v32 = vpop.xlane.xlu2 %483 }
 0x256   :  { %v496_v31 = vmul.f32 %v460_v30, %v460_v30  ;;  %v490_v35 = vmul.f32 %v484_v32, %v6124_v18  ;;  %v508_v56 = vsub.f32 %v6306_v45, %v460_v30 }
 0x258   :  { %v502_v38 = vsub.f32 %v490_v35, %v496_v31 }
 0x25a   :  { %v514_v39 = vadd.f32 1e-05, %v502_v38 }
 0x25c   :  { %5517 = vrsqrt.f32 %v514_v39  ;;  %vm571_vm6 = vweird.f32 %v514_v39 }
 0x262   :  { %v5518_v10 = vpop.eup %5517 }
 0x263   :  { %v566_v40 = vmul.f32 %v5518_v10, %v514_v39  ;;  %vm572_vm5 = vweird.f32 %v5518_v10 }
 0x264   :  { %vm573_vm7 = vmor %vm571_vm6, %vm572_vm5 }
 0x265   :  { %v567_v44 = vmul.f32 %v5518_v10, %v566_v40 }
 0x267   :  { %v568_v46 = vmul.f32 0.5, %v567_v44 }
 0x269   :  { %v569_v33 = vsub.f32 1.5, %v568_v46 }
 0x26b   :  { %v570_v34 = vmul.f32 %v5518_v10, %v569_v33 }
 0x26c   :  { %v674_v52 = vpop.f32.mrf.mxu2  ;;  %v698_v55 = vpop.f32.mrf.mxu3 }
 0x26d   :  { %v574_v53 = vsel %vm573_vm7, %v5518_v10, %v570_v34  ;;  %v675_v63 = vadd.f32 %v674_v52, %v6354_v57  ;;  %v699_v0 = vadd.f32 %v698_v55, %v6356_v41 }
 0x26e   :  { %v580_v61 = vmul.f32 %v574_v53, %v508_v56 }
 0x26f   :  { %v713_v9 = vpack.c.bf16 %v699_v0, %v675_v63 }
 0x270   :  { %v589_v1 = vmul.f32 %v6311_v47, %v580_v61 }
 0x271   :  { %v722_v16 = vunpack.c.l.b16 %v713_v9  ;;  %v807_v27 = vunpack.c.h.b16 %v713_v9 }
 0x272   :  { %v598_v4 = vadd.f32 %v6323_v58, %v589_v1 }
 0x274   :  { %v676_v2 = vpop.f32.mrf.mxu2  ;;  %v700_v7 = vpop.f32.mrf.mxu3  ;;  %v609_v14 = vpack.c.bf16 %v598_v4, %v597_v3 }
 0x275   :  { %v677_v11 = vadd.f32 %v676_v2, %v6354_v57  ;;  %v701_v12 = vadd.f32 %v700_v7, %v6356_v41 }
 0x276   :  { %4829 = vmatmul.msk.bf16.gmra.mxu2 %vm205_vm0, %v609_v14  ;;  %4832 = vmatmul.msk.bf16.gmra.mxu3 %vm205_vm0, %v609_v14 }
 0x277   :  { %v714_v15 = vpack.c.bf16 %v701_v12, %v677_v11 }
 0x279   :  { %v723_v8 = vunpack.c.l.b16 %v714_v15  ;;  %v808_v23 = vunpack.c.h.b16 %v714_v15 }
 0x27b   :  { %v6368_v47 = vpack.c.b16 %v723_v8, %v722_v16  ;;  %v6386_v28 = vpack.c.b16 %v808_v23, %v807_v27 }
 0x27c   :  { %v679_v17 = vpop.f32.mrf.mxu2  ;;  %v703_v13 = vpop.f32.mrf.mxu3 }
 0x27d   :  { %v680_v58 = vadd.f32 %v679_v17, %v6354_v57  ;;  %v704_v19 = vadd.f32 %v703_v13, %v6356_v41  ;;  %727 = vrot.lane.b32.xlu2 %v6368_v47, %s5873_s29 }
 0x27f   :  { %v715_v20 = vpack.c.bf16 %v704_v19, %v680_v58 }
 0x281   :  { %v724_v42 = vunpack.c.l.b16 %v715_v20  ;;  %v809_v21 = vunpack.c.h.b16 %v715_v20 }
 0x283   :  { %v6374_v60 = vpack.c.b16 %v724_v42, %v724_v42  ;;  %v6376_v22 = vpack.c.b16 %v809_v21, %v809_v21 }
 0x284   :  { %v681_v30 = vpop.f32.mrf.mxu2  ;;  %v705_v31 = vpop.f32.mrf.mxu3 }
 0x285   :  { %841 = vrot.lane.b32.xlu2 %v6368_v47, %s5874_s0  ;;  %847 = vrot.lane.b32.xlu1 %v6374_v60, %s5875_s4  ;;  %v821_v25 = vsel %vm819_vm8, %v6376_v22, 0  ;;  %v682_v35 = vadd.f32 %v681_v30, %v6354_v57  ;;  %v706_v36 = vadd.f32 %v705_v31, %v6356_v41 }
 0x286   :  { %729 = vrot.lane.b32.xlu0 %v6374_v60, %s5873_s29  ;;  %829 = vmatpush.bf16.msrb.mxu2 %v821_v25 }
 0x287   :  { %v716_v40 = vpack.c.bf16 %v706_v36, %v682_v35  ;;  %v6495_v35 = vld [vmem:[%s8329_s1] ss:$0 sm:$0xff] }
 0x289   :  { %v1224_v49 = vunpack.c.l.b16 %v716_v40  ;;  %v1304_v33 = vunpack.c.h.b16 %v716_v40 }
 0x28a   :  { %830 = vmatpush.bf16.msrb.mxu2 %v6386_v28 }
 0x28d   :  { %1069 = vrot.lane.b32.xlu2 %v6374_v60, %s5876_s30  ;;  %958 = vrot.lane.b32.xlu1 %v6374_v60, %s8315_s5 }
 0x28e   :  { %845 = vrot.lane.b32.xlu0 %v6368_v47, %s5875_s4 }
 0x295   :  { %952 = vrot.lane.b32.xlu2 %v6368_v47, %s8313_s26  ;;  %956 = vrot.lane.b32.xlu1 %v6368_v47, %s8315_s5 }
 0x296   :  { %843 = vrot.lane.b32.xlu0 %v6374_v60, %s5874_s0 }
 0x29d   :  { %1063 = vrot.lane.b32.xlu1 %v6368_v47, %s8311_s28 }
 0x29e   :  { %1067 = vrot.lane.b32.xlu0 %v6368_v47, %s5876_s30 }
 0x2a5   :  { %1065 = vrot.lane.b32.xlu1 %v6374_v60, %s8311_s28 }
 0x2a6   :  { %954 = vrot.lane.b32.xlu0 %v6374_v60, %s8313_s26 }
 0x2d7   :  { %v728_v29 = vpop.permute.xlu2 %727 }
 0x2d8   :  { %v739_v62 = vsel %vm731_vm9, %v728_v29, 0 }
 0x2df   :  { %v842_v32 = vpop.permute.xlu2 %841 }
 0x2e7   :  { %v1070_v52 = vpop.permute.xlu2 %1069 }
 0x2e8   :  { %v1081_v3 = vsel %vm731_vm9, %v1070_v52, 0 }
 0x2ef   :  { %v953_v16 = vpop.permute.xlu2 %952 }
 0x2f7   :  { %v848_v38 = vpop.permute.xlu1 %847 }
 0x2f8   :  { %v730_v39 = vpop.permute.xlu0 %729  ;;  %v859_v50 = vsel %vm731_vm9, %v848_v38, 0 }
 0x2f9   :  { %v742_v37 = vsel %vm731_vm9, %v730_v39, 0  ;;  %867 = vmatpush.bf16.xpose.msrb.mxu3 %v859_v50  ;;  %v684_v10 = vpop.f32.mrf.mxu2  ;;  %v708_v24 = vpop.f32.mrf.mxu3 }
 0x2fa   :  { %750 = vmatpush.bf16.xpose.msrb.mxu1 %v742_v37  ;;  %v685_v44 = vadd.f32 %v684_v10, %v6354_v57  ;;  %v709_v46 = vadd.f32 %v708_v24, %v6356_v41 }
 0x2fc   :  { %v717_v48 = vpack.c.bf16 %v709_v46, %v685_v44 }
 0x2fe   :  { %v1225_v51 = vunpack.c.l.b16 %v717_v48  ;;  %v1305_v54 = vunpack.c.h.b16 %v717_v48 }
 0x2ff   :  { %v959_v34 = vpop.permute.xlu1 %958 }
 0x300   :  { %v970_v55 = vsel %vm731_vm9, %v959_v34, 0  ;;  %v846_v56 = vpop.permute.xlu0 %845  ;;  %v6416_v53 = vpack.c.b16 %v1225_v51, %v1224_v49  ;;  %v6418_v61 = vpack.c.b16 %v1305_v54, %v1304_v33 }
 0x301   :  { %v856_v63 = vsel %vm731_vm9, %v846_v56, 0  ;;  %v686_v0 = vpop.f32.mrf.mxu2  ;;  %v710_v1 = vpop.f32.mrf.mxu3 }
 0x302   :  { %751 = vmatpush.bf16.xpose.msrb.mxu1 %v739_v62  ;;  %868 = vmatpush.bf16.xpose.msrb.mxu3 %v856_v63  ;;  %v687_v4 = vadd.f32 %v686_v0, %v6354_v57  ;;  %v711_v2 = vadd.f32 %v710_v1, %v6356_v41 }
 0x303   :  { %1341 = vrot.lane.b32.xlu1 %v6416_v53, %s5875_s4 }
 0x304   :  { %v718_v7 = vpack.c.bf16 %v711_v2, %v687_v4 }
 0x306   :  { %v1226_v9 = vunpack.c.l.b16 %v718_v7  ;;  %v1306_v13 = vunpack.c.h.b16 %v718_v7 }
 0x307   :  { %v957_v11 = vpop.permute.xlu1 %956 }
 0x308   :  { %v844_v12 = vpop.permute.xlu0 %843  ;;  %v6427_v14 = vpack.c.b16 %v1226_v9, %v1226_v9  ;;  %v967_v57 = vsel %vm731_vm9, %v957_v11, 0  ;;  %v6479_v58 = vpack.c.b16 %v1306_v13, %v1306_v13 }
 0x309   :  { %4833 = vmatmul.msk.bf16.vlgmr.msrb.gmra.mxu1 %vm731_vm9, %v6368_v47  ;;  %4837 = vmatmul.msk.bf16.vlgmr.msrb.gmra.mxu3 %vm731_vm9, %v842_v32 }
 0x30a   :  { %978 = vmatpush.bf16.xpose.msra.mxu1 %v970_v55  ;;  %1089 = vmatpush.bf16.xpose.msra.mxu3 %v1081_v3 }
 0x30b   :  { %1343 = vrot.lane.b32.xlu0 %v6427_v14, %s5875_s4  ;;  %1231 = vrot.lane.b32.xlu2 %v6427_v14, %s5873_s29 }
 0x30c   :  { %1339 = vrot.lane.b32.xlu1 %v6427_v14, %s5874_s0 }
 0x30f   :  { %v1064_v8 = vpop.permute.xlu1 %1063 }
 0x310   :  { %v1068_v41 = vpop.permute.xlu0 %1067 }
 0x311   :  { %v1078_v15 = vsel %vm731_vm9, %v1068_v41, 0 }
 0x312   :  { %979 = vmatpush.bf16.xpose.msra.mxu1 %v967_v57  ;;  %1090 = vmatpush.bf16.xpose.msra.mxu3 %v1078_v15 }
 0x313   :  { %1337 = vrot.lane.b32.xlu0 %v6416_v53, %s5874_s0  ;;  %1229 = vrot.lane.b32.xlu2 %v6416_v53, %s5873_s29 }
 0x314   :  { %1563 = vrot.lane.b32.xlu1 %v6416_v53, %s5876_s30 }
 0x317   :  { %v1066_v47 = vpop.permute.xlu1 %1065 }
 0x318   :  { %v955_v17 = vpop.permute.xlu0 %954 }
 0x319   :  { %4834 = vmatmul.msk.bf16.gmra.mxu1 %vm731_vm9, %v6374_v60  ;;  %4838 = vmatmul.msk.bf16.gmra.mxu3 %vm731_vm9, %v844_v12 }
 0x31b   :  { %1565 = vrot.lane.b32.xlu0 %v6427_v14, %s5876_s30  ;;  %1454 = vrot.lane.b32.xlu2 %v6427_v14, %s8315_s5 }
 0x31c   :  { %922 = vrot.lane.b32.xlu1 %v6376_v22, %s5874_s0 }
 0x323   :  { %1448 = vrot.lane.b32.xlu0 %v6416_v53, %s8313_s26  ;;  %1452 = vrot.lane.b32.xlu2 %v6416_v53, %s8315_s5 }
 0x324   :  { %1142 = vrot.lane.b32.xlu1 %v6386_v28, %s8311_s28 }
 0x329   :  { %4841 = vmatmul.msk.bf16.vlgmr.msra.gmra.mxu1 %vm731_vm9, %v953_v16  ;;  %4845 = vmatmul.msk.bf16.vlgmr.msra.gmra.mxu3 %vm731_vm9, %v1064_v8 }
 0x32b   :  { %1033 = vrot.lane.b32.xlu0 %v6376_v22, %s8313_s26  ;;  %1559 = vrot.lane.b32.xlu2 %v6416_v53, %s8311_s28 }
 0x32c   :  { %1450 = vrot.lane.b32.xlu1 %v6427_v14, %s8313_s26 }
 0x333   :  { %1031 = vrot.lane.b32.xlu0 %v6386_v28, %s8313_s26  ;;  %920 = vrot.lane.b32.xlu2 %v6386_v28, %s5874_s0 }
 0x339   :  { %4842 = vmatmul.msk.bf16.gmra.mxu1 %vm731_vm9, %v955_v17  ;;  %4846 = vmatmul.msk.bf16.gmra.mxu3 %vm731_vm9, %v1066_v47 }
 0x33b   :  { %1561 = vrot.lane.b32.xlu0 %v6427_v14, %s8311_s28  ;;  %1144 = vrot.lane.b32.xlu2 %v6376_v22, %s8311_s28 }
 0x343   :  { %1418 = vrot.lane.b32.xlu0 %v6479_v58, %s5874_s0 }
 0x365   :  { %v1232_v19 = vpop.permute.xlu2 %1231 }
 0x366   :  { %v1243_v20 = vsel %vm731_vm9, %v1232_v19, 0 }
 0x367   :  { %1251 = vmatpush.bf16.xpose.msrb.mxu1 %v1243_v20 }
 0x36d   :  { %v1230_v42 = vpop.permute.xlu2 %1229 }
 0x36e   :  { %v1240_v21 = vsel %vm731_vm9, %v1230_v42, 0 }
 0x36f   :  { %1252 = vmatpush.bf16.xpose.msrb.mxu1 %v1240_v21 }
 0x375   :  { %v1342_v60 = vpop.permute.xlu1 %1341  ;;  %v1455_v23 = vpop.permute.xlu2 %1454 }
 0x376   :  { %v1466_v25 = vsel %vm731_vm9, %v1455_v23, 0  ;;  %4849 = vmatmul.msk.bf16.vlgmr.msrb.gmra.mxu1 %vm731_vm9, %v6416_v53  ;;  %v1352_v39 = vsel %vm731_vm9, %v1342_v60, 0 }
 0x377   :  { %1474 = vmatpush.bf16.xpose.msra.mxu1 %v1466_v25 }
 0x37d   :  { %v1453_v22 = vpop.permute.xlu2 %1452  ;;  %v1344_v27 = vpop.permute.xlu0 %1343 }
 0x37e   :  { %v1340_v28 = vpop.permute.xlu1 %1339  ;;  %v1355_v29 = vsel %vm731_vm9, %v1344_v27, 0  ;;  %v1463_v30 = vsel %vm731_vm9, %v1453_v22, 0 }
 0x37f   :  { %1363 = vmatpush.bf16.xpose.msrb.mxu3 %v1355_v29  ;;  %1475 = vmatpush.bf16.xpose.msra.mxu1 %v1463_v30 }
 0x385   :  { %v6490_v31 = vpop.permute.xlu2 %1559  ;;  %v1338_v32 = vpop.permute.xlu0 %1337 }
 0x386   :  { %v1564_v36 = vpop.permute.xlu1 %1563  ;;  %v753_v38 = vpop.f32.mrf.mxu1  ;;  %4850 = vmatmul.msk.bf16.gmra.mxu1 %vm731_vm9, %v6427_v14 }
 0x387   :  { %v762_v50 = vmul.f32 0.25, %v753_v38  ;;  %1364 = vmatpush.bf16.xpose.msrb.mxu3 %v1352_v39  ;;  %v1574_v4 = vsel %vm731_vm9, %v1564_v36, 0 }
 0x389   :  { %v6501_v37 = vadd.f32 %v6495_v35, %v762_v50 }
 0x38b   :  { %v772_v10 = vsel %vm771_vm10, %v6501_v37, -inf }
 0x38c   :  { %773 = vmax.xlane.f32.xlu2 %v772_v10  ;;  %v870_v24 = vpop.f32.mrf.mxu3 }
 0x38d   :  { %v879_v40 = vmul.f32 0.25, %v870_v24  ;;  %v921_v44 = vpop.permute.xlu2 %920  ;;  %v1566_v46 = vpop.permute.xlu0 %1565 }
 0x38e   :  { %v923_v48 = vpop.permute.xlu1 %922  ;;  %v1577_v49 = vsel %vm731_vm9, %v1566_v46, 0  ;;  %v755_v33 = vpop.f32.mrf.mxu1  ;;  %4853 = vmatmul.msk.bf16.vlgmr.msrb.gmra.mxu3 %vm731_vm9, %v1338_v32 }
 0x38f   :  { %v763_v51 = vmul.f32 0.25, %v755_v33  ;;  %v932_v54 = vsel %vm819_vm8, %v923_v48, 0  ;;  %1585 = vmatpush.bf16.xpose.msra.mxu3 %v1577_v49  ;;  %v6509_v34 = vadd.f32 %v6495_v35, %v879_v40 }
 0x390   :  { %940 = vmatpush.bf16.msrb.mxu0 %v932_v54 }
 0x391   :  { %v885_v52 = vsel %vm771_vm10, %v6509_v34, -inf  ;;  %v6514_v55 = vadd.f32 %v6495_v35, %v763_v51 }
 0x392   :  { %886 = vmax.xlane.f32.xlu0 %v885_v52 }
 0x393   :  { %v775_v56 = vsel %vm771_vm10, %v6514_v55, -inf }
 0x394   :  { %941 = vmatpush.bf16.msrb.mxu0 %v921_v44  ;;  %776 = vmax.xlane.f32.xlu1 %v775_v56  ;;  %v872_v53 = vpop.f32.mrf.mxu3 }
 0x395   :  { %v880_v62 = vmul.f32 0.25, %v872_v53  ;;  %v1145_v63 = vpop.permute.xlu2 %1144  ;;  %v1449_v0 = vpop.permute.xlu0 %1448 }
 0x396   :  { %v1154_v1 = vsel %vm819_vm8, %v1145_v63, 0  ;;  %v758_v3 = vpop.f32.mrf.mxu1  ;;  %4857 = vmatmul.msk.bf16.vlgmr.msra.gmra.mxu1 %vm731_vm9, %v1449_v0  ;;  %v1143_v9 = vpop.permute.xlu1 %1142 }
 0x397   :  { %1586 = vmatpush.bf16.xpose.msra.mxu3 %v1574_v4  ;;  %v6522_v2 = vadd.f32 %v6495_v35, %v880_v62  ;;  %v764_v50 = vmul.f32 0.25, %v758_v3 }
 0x398   :  { %1162 = vmatpush.bf16.msra.mxu0 %v1154_v1 }
 0x399   :  { %v888_v7 = vsel %vm771_vm10, %v6522_v2, -inf  ;;  %v6555_v10 = vadd.f32 %v6495_v35, %v764_v50 }
 0x39a   :  { %889 = vmax.xlane.f32.xlu2 %v888_v7 }
 0x39b   :  { %v778_v40 = vsel %vm771_vm10, %v6555_v10, -inf }
 0x39c   :  { %1163 = vmatpush.bf16.msra.mxu0 %v1143_v9  ;;  %v875_v11 = vpop.f32.mrf.mxu3 }
 0x39d   :  { %v881_v12 = vmul.f32 0.25, %v875_v11  ;;  %v1034_v14 = vpop.permute.xlu0 %1033 }
 0x39e   :  { %v1043_v57 = vsel %vm819_vm8, %v1034_v14, 0  ;;  %v760_v41 = vpop.f32.mrf.mxu1  ;;  %4854 = vmatmul.msk.bf16.gmra.mxu3 %vm731_vm9, %v1340_v28  ;;  %v1451_v47 = vpop.permute.xlu1 %1450 }
 0x39f   :  { %1051 = vmatpush.bf16.msra.mxu2 %v1043_v57  ;;  %v6529_v15 = vadd.f32 %v6495_v35, %v881_v12 }
 0x3a1   :  { %v891_v16 = vsel %vm771_vm10, %v6529_v15, -inf }
 0x3a2   :  { %892 = vmax.xlane.f32.xlu0 %v891_v16 }
 0x3a4   :  { %v877_v8 = vpop.f32.mrf.mxu3 }
 0x3a5   :  { %v1032_v17 = vpop.permute.xlu0 %1031 }
 0x3a6   :  { %v981_v13 = vpop.f32.mrf.mxu1  ;;  %1052 = vmatpush.bf16.msra.mxu2 %v1032_v17  ;;  %4858 = vmatmul.msk.bf16.gmra.mxu1 %vm731_vm9, %v1451_v47 }
 0x3a7   :  { %v990_v19 = vmul.f32 0.25, %v981_v13 }
 0x3a9   :  { %v6535_v20 = vadd.f32 %v6495_v35, %v990_v19 }
 0x3ab   :  { %v996_v42 = vsel %vm771_vm10, %v6535_v20, -inf }
 0x3ac   :  { %997 = vmax.xlane.f32.xlu2 %v996_v42  ;;  %v1092_v21 = vpop.f32.mrf.mxu3 }
 0x3ad   :  { %v1101_v60 = vmul.f32 0.25, %v1092_v21  ;;  %1416 = vrot.lane.b32.xlu1 %v6418_v61, %s5874_s0  ;;  %v1562_v38 = vpop.permute.xlu0 %1561 }
 0x3ae   :  { %v983_v23 = vpop.f32.mrf.mxu1  ;;  %4861 = vmatmul.msk.bf16.vlgmr.msra.gmra.mxu3 %vm731_vm9, %v6490_v31 }
 0x3af   :  { %v6544_v25 = vadd.f32 %v6495_v35, %v1101_v60  ;;  %v991_v24 = vmul.f32 0.25, %v983_v23 }
 0x3b1   :  { %v1107_v22 = vsel %vm771_vm10, %v6544_v25, -inf  ;;  %v6560_v44 = vadd.f32 %v6495_v35, %v991_v24 }
 0x3b2   :  { %1108 = vmax.xlane.f32.xlu0 %v1107_v22 }
 0x3b3   :  { %v999_v48 = vsel %vm771_vm10, %v6560_v44, -inf }
 0x3b4   :  { %v1094_v27 = vpop.f32.mrf.mxu3 }
 0x3b5   :  { %v1102_v28 = vmul.f32 0.25, %v1094_v27  ;;  %v6589_v47 = vpop.permute.xlu0 %1418 }
 0x3b6   :  { %v986_v29 = vpop.f32.mrf.mxu1 }
 0x3b7   :  { %v6549_v30 = vadd.f32 %v6495_v35, %v1102_v28  ;;  %v992_v46 = vmul.f32 0.25, %v986_v29 }
 0x3b9   :  { %v1110_v32 = vsel %vm771_vm10, %v6549_v30, -inf  ;;  %v6565_v49 = vadd.f32 %v6495_v35, %v992_v46 }
 0x3ba   :  { %1111 = vmax.xlane.f32.xlu2 %v1110_v32 }
 0x3bb   :  { %v1002_v51 = vsel %vm771_vm10, %v6565_v49, -inf }
 0x3bc   :  { %v1097_v36 = vpop.f32.mrf.mxu3 }
 0x3bd   :  { %v1103_v33 = vmul.f32 0.25, %v1097_v36 }
 0x3be   :  { %v988_v31 = vpop.f32.mrf.mxu1  ;;  %4862 = vmatmul.msk.bf16.gmra.mxu3 %vm731_vm9, %v1562_v38 }
 0x3bf   :  { %v6570_v54 = vadd.f32 %v6495_v35, %v1103_v33 }
 0x3c1   :  { %v1113_v52 = vsel %vm771_vm10, %v6570_v54, -inf }
 0x3c4   :  { %v1099_v39 = vpop.f32.mrf.mxu3 }
 0x3d7   :  { %779 = vmax.xlane.f32.xlu1 %v778_v40 }
 0x3df   :  { %1000 = vmax.xlane.f32.xlu1 %v999_v48 }
 0x3e7   :  { %1003 = vmax.xlane.f32.xlu1 %v1002_v51 }
 0x3ef   :  { %1114 = vmax.xlane.f32.xlu1 %v1113_v52 }
 0x3f3   :  { %v1254_v56 = vpop.f32.mrf.mxu1 }
 0x3f4   :  { %v1263_v53 = vmul.f32 0.25, %v1254_v56 }
 0x3f6   :  { %v6575_v62 = vadd.f32 %v6495_v35, %v1263_v53 }
 0x3f8   :  { %v1269_v63 = vsel %vm771_vm10, %v6575_v62, -inf }
 0x3f9   :  { %1270 = vmax.xlane.f32.xlu0 %v1269_v63 }
 0x3fb   :  { %v1256_v0 = vpop.f32.mrf.mxu1 }
 0x3fc   :  { %v1264_v1 = vmul.f32 0.25, %v1256_v0 }
 0x3fe   :  { %v6580_v3 = vadd.f32 %v6495_v35, %v1264_v1 }
 0x3ff   :  { %v774_v27 = vpop.xlane.xlu2 %773 }
 0x400   :  { %v1272_v4 = vsel %vm771_vm10, %v6580_v3, -inf  ;;  %v781_v31 = vsub.f32 %v6501_v37, %v774_v27 }
 0x401   :  { %1273 = vmax.xlane.f32.xlu2 %v1272_v4 }
 0x402   :  { %v784_v40 = vmul.f32 1.442695, %v781_v31 }
 0x403   :  { %v1259_v7 = vpop.f32.mrf.mxu1 }
 0x404   :  { %v1265_v41 = vmul.f32 0.25, %v1259_v7  ;;  %5519 = vpow2.f32 %v784_v40 }
 0x405   :  { %v887_v28 = vpop.xlane.xlu0 %886 }
 0x406   :  { %v6592_v13 = vadd.f32 %v6495_v35, %v1265_v41  ;;  %v894_v37 = vsub.f32 %v6509_v34, %v887_v28 }
 0x407   :  { %v777_v53 = vpop.xlane.xlu1 %776 }
 0x408   :  { %v1275_v60 = vsel %vm771_vm10, %v6592_v13, -inf  ;;  %v897_v0 = vmul.f32 1.442695, %v894_v37 }
 0x40a   :  { %5521 = vpow2.f32 %v897_v0 }
 0x40b   :  { %v1261_v9 = vpop.f32.mrf.mxu1 }
 0x40c   :  { %v6620_v9 = vpop.eup %5519 }
 0x40d   :  { %v890_v48 = vpop.xlane.xlu2 %889 }
 0x411   :  { %v1366_v11 = vpop.f32.mrf.mxu3 }
 0x412   :  { %v1375_v12 = vmul.f32 0.25, %v1366_v11  ;;  %v782_v11 = vsub.f32 %v6514_v55, %v777_v53 }
 0x413   :  { %v1477_v14 = vpop.f32.mrf.mxu1 }
 0x414   :  { %v6585_v57 = vadd.f32 %v6495_v35, %v1375_v12  ;;  %v1486_v21 = vmul.f32 0.25, %v1477_v14 }
 0x415   :  { %v6612_v33 = vpop.xlane.xlu0 %892 }
 0x416   :  { %v1381_v16 = vsel %vm771_vm10, %v6585_v57, -inf  ;;  %v6602_v32 = vadd.f32 %v6495_v35, %v1486_v21 }
 0x417   :  { %1382 = vmax.xlane.f32.xlu0 %v1381_v16  ;;  %v790_v16 = vsel %vm771_vm10, %v6620_v9, 0.0 }
 0x418   :  { %v1492_v24 = vsel %vm771_vm10, %v6602_v32, -inf }
 0x419   :  { %v1368_v8 = vpop.f32.mrf.mxu3 }
 0x41a   :  { %v1376_v17 = vmul.f32 0.25, %v1368_v8  ;;  %v786_v8 = vmul.f32 1.442695, %v782_v11 }
 0x41b   :  { %v1479_v19 = vpop.f32.mrf.mxu1 }
 0x41c   :  { %v6595_v42 = vadd.f32 %v6495_v35, %v1376_v17  ;;  %v1487_v39 = vmul.f32 0.25, %v1479_v19  ;;  %5523 = vpow2.f32 %v786_v8 }
 0x41e   :  { %v1384_v23 = vsel %vm771_vm10, %v6595_v42, -inf  ;;  %v6615_v51 = vadd.f32 %v6495_v35, %v1487_v39 }
 0x41f   :  { %1276 = vmax.xlane.f32.xlu0 %v1275_v60  ;;  %1385 = vmax.xlane.f32.xlu1 %v1384_v23  ;;  %v998_v1 = vpop.xlane.xlu2 %997  ;;  %v6634_v23 = vpop.eup %5521 }
 0x420   :  { %v1495_v56 = vsel %vm771_vm10, %v6615_v51, -inf  ;;  %v1005_v40 = vsub.f32 %v6535_v20, %v998_v1  ;;  %v896_v20 = vsub.f32 %v6529_v15, %v6612_v33 }
 0x421   :  { %v1371_v22 = vpop.f32.mrf.mxu3 }
 0x422   :  { %v1377_v29 = vmul.f32 0.25, %v1371_v22  ;;  %v901_v11 = vmul.f32 1.442695, %v896_v20 }
 0x423   :  { %v1482_v36 = vpop.f32.mrf.mxu1 }
 0x424   :  { %v6605_v38 = vadd.f32 %v6495_v35, %v1377_v29  ;;  %v1488_v34 = vmul.f32 0.25, %v1482_v36  ;;  %v903_v36 = vsel %vm771_vm10, %v6634_v23, 0.0 }
 0x425   :  { %v1109_v4 = vpop.xlane.xlu0 %1108 }
 0x426   :  { %v1387_v50 = vsel %vm771_vm10, %v6605_v38, -inf  ;;  %v1116_v14 = vsub.f32 %v6544_v25, %v1109_v4  ;;  %v6632_v60 = vadd.f32 %v6495_v35, %v1488_v34  ;;  %v895_v25 = vsub.f32 %v6522_v2, %v890_v48 }
 0x427   :  { %1388 = vmax.xlane.f32.xlu0 %v1387_v50  ;;  %1493 = vmax.xlane.f32.xlu1 %v1492_v24  ;;  %v6649_v50 = vpop.eup %5523  ;;  %v6651_v24 = vpop.permute.xlu1 %1416 }
 0x428   :  { %v1119_v17 = vmul.f32 1.442695, %v1116_v14  ;;  %v1498_v29 = vsel %vm771_vm10, %v6632_v60, -inf  ;;  %v899_v31 = vmul.f32 1.442695, %v895_v25 }
 0x429   :  { %v1373_v46 = vpop.f32.mrf.mxu3 }
 0x42a   :  { %5525 = vpow2.f32 %v1119_v17  ;;  %v793_v46 = vsel %vm771_vm10, %v6649_v50, 0.0 }
 0x42b   :  { %v1484_v52 = vpop.f32.mrf.mxu1  ;;  %5527 = vpow2.f32 %v899_v31 }
 0x42c   :  { %v1008_v52 = vmul.f32 1.442695, %v1005_v40 }
 0x42d   :  { %v1112_v21 = vpop.xlane.xlu2 %1111 }
 0x42e   :  { %v1117_v27 = vsub.f32 %v6549_v30, %v1112_v21 }
 0x42f   :  { %1496 = vmax.xlane.f32.xlu0 %v1495_v56 }
 0x430   :  { %v1121_v2 = vmul.f32 1.442695, %v1117_v27  ;;  %v6653_v30 = vpop.eup %5525 }
 0x431   :  { %v1588_v63 = vpop.f32.mrf.mxu3  ;;  %v1125_v48 = vsel %vm771_vm10, %v6653_v30, 0.0  ;;  %v6660_v56 = vpop.eup %5527 }
 0x432   :  { %v1597_v7 = vmul.f32 0.25, %v1588_v63  ;;  %5529 = vpow2.f32 %v1121_v2  ;;  %v906_v4 = vsel %vm771_vm10, %v6660_v56, 0.0 }
 0x433   :  { %5531 = vpow2.f32 %v1008_v52 }
 0x434   :  { %v6624_v12 = vadd.f32 %v6495_v35, %v1597_v7 }
 0x436   :  { %v1603_v41 = vsel %vm771_vm10, %v6624_v12, -inf }
 0x437   :  { %1604 = vmax.xlane.f32.xlu2 %v1603_v41  ;;  %791 = vadd.xlane.f32.xlu0 %v790_v16 }
 0x438   :  { %v6662_v63 = vpop.eup %5529 }
 0x439   :  { %v1590_v19 = vpop.f32.mrf.mxu3  ;;  %v1128_v7 = vsel %vm771_vm10, %v6662_v63, 0.0  ;;  %v6671_v34 = vpop.eup %5531 }
 0x43a   :  { %v1598_v55 = vmul.f32 0.25, %v1590_v19 }
 0x43c   :  { %v6638_v22 = vadd.f32 %v6495_v35, %v1598_v55 }
 0x43e   :  { %v1606_v28 = vsel %vm771_vm10, %v6638_v22, -inf }
 0x43f   :  { %1607 = vmax.xlane.f32.xlu1 %v1606_v28  ;;  %1499 = vmax.xlane.f32.xlu2 %v1498_v29 }
 0x440   :  { %904 = vadd.xlane.f32.xlu0 %v903_v36 }
 0x441   :  { %v6647_v39 = vpop.f32.mrf.mxu3 }
 0x447   :  { %794 = vadd.xlane.f32.xlu2 %v793_v46  ;;  %1126 = vadd.xlane.f32.xlu1 %v1125_v48 }
 0x449   :  { %v1595_v37 = vpop.f32.mrf.mxu3 }
 0x44a   :  { %v780_v53 = vpop.xlane.xlu1 %779 }
 0x44b   :  { %v783_v0 = vsub.f32 %v6555_v10, %v780_v53  ;;  %v1014_v10 = vsel %vm771_vm10, %v6671_v34, 0.0 }
 0x44d   :  { %v788_v1 = vmul.f32 1.442695, %v783_v0 }
 0x44f   :  { %5533 = vpow2.f32 %v788_v1  ;;  %907 = vadd.xlane.f32.xlu2 %v906_v4  ;;  %1129 = vadd.xlane.f32.xlu1 %v1128_v7 }
 0x450   :  { %5535 = vpow2.f32 %v901_v11 }
 0x452   :  { %v1001_v14 = vpop.xlane.xlu1 %1000 }
 0x453   :  { %v1006_v15 = vsub.f32 %v6560_v44, %v1001_v14 }
 0x455   :  { %v6673_v41 = vpop.eup %5533  ;;  %v1010_v16 = vmul.f32 1.442695, %v1006_v15 }
 0x456   :  { %v796_v33 = vsel %vm771_vm10, %v6673_v41, 0.0  ;;  %v6680_v17 = vpop.eup %5535 }
 0x457   :  { %1015 = vadd.xlane.f32.xlu2 %v1014_v10  ;;  %797 = vadd.xlane.f32.xlu0 %v796_v33  ;;  %5537 = vpow2.f32 %v1010_v16  ;;  %v909_v55 = vsel %vm771_vm10, %v6680_v17, 0.0 }
 0x45a   :  { %v1004_v8 = vpop.xlane.xlu1 %1003 }
 0x45b   :  { %v1007_v19 = vsub.f32 %v6565_v49, %v1004_v8 }
 0x45d   :  { %v1012_v21 = vmul.f32 1.442695, %v1007_v19  ;;  %v6685_v25 = vpop.eup %5537 }
 0x45e   :  { %v1017_v36 = vsel %vm771_vm10, %v6685_v25, 0.0 }
 0x45f   :  { %5539 = vpow2.f32 %v1012_v21  ;;  %910 = vadd.xlane.f32.xlu0 %v909_v55 }
 0x462   :  { %v1115_v44 = vpop.xlane.xlu1 %1114 }
 0x463   :  { %v1118_v27 = vsub.f32 %v6570_v54, %v1115_v44 }
 0x465   :  { %v6688_v28 = vpop.eup %5539  ;;  %v1123_v29 = vmul.f32 1.442695, %v1118_v27 }
 0x466   :  { %v1020_v49 = vsel %vm771_vm10, %v6688_v28, 0.0 }
 0x467   :  { %5541 = vpow2.f32 %v1123_v29  ;;  %1018 = vadd.xlane.f32.xlu0 %v1017_v36  ;;  %1021 = vadd.xlane.f32.xlu1 %v1020_v49  ;;  %v1599_v49 = vmul.f32 0.25, %v6647_v39 }
 0x46c   :  { %v1271_v31 = vpop.xlane.xlu0 %1270 }
 0x46d   :  { %v6694_v2 = vpop.eup %5541  ;;  %v1278_v40 = vsub.f32 %v6575_v62, %v1271_v31 }
 0x46e   :  { %v1131_v54 = vsel %vm771_vm10, %v6694_v2, 0.0 }
 0x46f   :  { %v1281_v46 = vmul.f32 1.442695, %v1278_v40  ;;  %1132 = vadd.xlane.f32.xlu0 %v1131_v54  ;;  %v6733_v54 = vadd.f32 %v6495_v35, %v1599_v49 }
 0x471   :  { %5543 = vpow2.f32 %v1281_v46 }
 0x474   :  { %v1274_v48 = vpop.xlane.xlu2 %1273 }
 0x475   :  { %v1279_v52 = vsub.f32 %v6580_v3, %v1274_v48 }
 0x477   :  { %v6700_v37 = vpop.eup %5543  ;;  %v1283_v53 = vmul.f32 1.442695, %v1279_v52 }
 0x478   :  { %v1287_v0 = vsel %vm771_vm10, %v6700_v37, 0.0 }
 0x479   :  { %5545 = vpow2.f32 %v1283_v53  ;;  %1288 = vadd.xlane.f32.xlu0 %v1287_v0  ;;  %v1609_v53 = vsel %vm771_vm10, %v6733_v54, -inf }
 0x47f   :  { %v6704_v20 = vpop.eup %5545 }
 0x480   :  { %1529 = vrot.lane.b32.xlu1 %v6479_v58, %s8313_s26  ;;  %v1290_v62 = vsel %vm771_vm10, %v6704_v20, 0.0 }
 0x481   :  { %1291 = vadd.xlane.f32.xlu2 %v1290_v62 }
 0x48a   :  { %v1383_v1 = vpop.xlane.xlu0 %1382 }
 0x48b   :  { %v1390_v3 = vsub.f32 %v6585_v57, %v1383_v1 }
 0x48d   :  { %v1393_v4 = vmul.f32 1.442695, %v1390_v3 }
 0x48f   :  { %5547 = vpow2.f32 %v1393_v4 }
 0x492   :  { %v1386_v7 = vpop.xlane.xlu1 %1385  ;;  %v1277_v11 = vpop.xlane.xlu0 %1276 }
 0x493   :  { %v1391_v14 = vsub.f32 %v6595_v42, %v1386_v7  ;;  %v1280_v33 = vsub.f32 %v6592_v13, %v1277_v11 }
 0x495   :  { %v6712_v15 = vpop.eup %5547  ;;  %v1395_v10 = vmul.f32 1.442695, %v1391_v14  ;;  %v1285_v8 = vmul.f32 1.442695, %v1280_v33 }
 0x496   :  { %v1399_v16 = vsel %vm771_vm10, %v6712_v15, 0.0 }
 0x497   :  { %5549 = vpow2.f32 %v1395_v10  ;;  %1400 = vadd.xlane.f32.xlu0 %v1399_v16 }
 0x498   :  { %5551 = vpow2.f32 %v1285_v8 }
 0x49a   :  { %v1494_v19 = vpop.xlane.xlu1 %1493  ;;  %v1389_v21 = vpop.xlane.xlu0 %1388 }
 0x49b   :  { %v1501_v57 = vsub.f32 %v6602_v32, %v1494_v19  ;;  %v1392_v42 = vsub.f32 %v6605_v38, %v1389_v21 }
 0x49d   :  { %v6718_v55 = vpop.eup %5549  ;;  %v1504_v44 = vmul.f32 1.442695, %v1501_v57  ;;  %v1397_v13 = vmul.f32 1.442695, %v1392_v42 }
 0x49e   :  { %v1402_v27 = vsel %vm771_vm10, %v6718_v55, 0.0  ;;  %v6723_v29 = vpop.eup %5551 }
 0x49f   :  { %5553 = vpow2.f32 %v1504_v44  ;;  %1403 = vadd.xlane.f32.xlu2 %v1402_v27  ;;  %v1293_v31 = vsel %vm771_vm10, %v6723_v29, 0.0  ;;  %v1317_v27 = vsel %vm819_vm8, %v6479_v58, 0 }
 0x4a0   :  { %5555 = vpow2.f32 %v1397_v13 }
 0x4a2   :  { %v1497_v38 = vpop.xlane.xlu0 %1496 }
 0x4a3   :  { %v1502_v52 = vsub.f32 %v6615_v51, %v1497_v38  ;;  %v1428_v38 = vsel %vm819_vm8, %v6589_v47, 0 }
 0x4a5   :  { %v6725_v36 = vpop.eup %5553  ;;  %v1506_v62 = vmul.f32 1.442695, %v1502_v52 }
 0x4a6   :  { %v1510_v32 = vsel %vm771_vm10, %v6725_v36, 0.0  ;;  %v6735_v46 = vpop.eup %5555 }
 0x4a7   :  { %1511 = vadd.xlane.f32.xlu0 %v1510_v32  ;;  %1294 = vadd.xlane.f32.xlu2 %v1293_v31  ;;  %v1405_v0 = vsel %vm771_vm10, %v6735_v46, 0.0 }
 0x4aa   :  { %v1605_v40 = vpop.xlane.xlu2 %1604  ;;  %v792_v4 = vpop.xlane.xlu0 %791 }
 0x4ab   :  { %v1612_v48 = vsub.f32 %v6624_v12, %v1605_v40 }
 0x4ad   :  { %v1615_v39 = vmul.f32 1.442695, %v1612_v48 }
 0x4af   :  { %5557 = vpow2.f32 %v1615_v39  ;;  %1610 = vmax.xlane.f32.xlu0 %v1609_v53  ;;  %1406 = vadd.xlane.f32.xlu2 %v1405_v0 }
 0x4b0   :  { %5559 = vpow2.f32 %v1506_v62 }
 0x4b2   :  { %v1608_v1 = vpop.xlane.xlu1 %1607  ;;  %v6743_v35 = vpop.xlane.xlu2 %1499 }
 0x4b3   :  { %v1613_v3 = vsub.f32 %v6638_v22, %v1608_v1  ;;  %v905_v33 = vpop.xlane.xlu0 %904 }
 0x4b5   :  { %v6746_v12 = vpop.eup %5557  ;;  %v1617_v51 = vmul.f32 1.442695, %v1613_v3 }
 0x4b6   :  { %v1621_v7 = vsel %vm771_vm10, %v6746_v12, 0.0  ;;  %v6750_v14 = vpop.eup %5559 }
 0x4b7   :  { %5561 = vpow2.f32 %v1617_v51  ;;  %1622 = vadd.xlane.f32.xlu2 %v1621_v7  ;;  %v1513_v16 = vsel %vm771_vm10, %v6750_v14, 0.0 }
 0x4b8   :  { %5563 = vrcp.f32 %v792_v4 }
 0x4ba   :  { %v795_v11 = vpop.xlane.xlu2 %794 }
 0x4bb   :  { %5565 = vrcp.f32 %v795_v11 }
 0x4bc   :  { %5567 = vrcp.f32 %v905_v33 }
 0x4bd   :  { %v6752_v10 = vpop.eup %5561 }
 0x4be   :  { %v1624_v22 = vsel %vm771_vm10, %v6752_v10, 0.0  ;;  %v5564_v8 = vpop.eup %5563 }
 0x4bf   :  { %1625 = vadd.xlane.f32.xlu1 %v1624_v22  ;;  %1514 = vadd.xlane.f32.xlu2 %v1513_v16  ;;  %v802_v21 = vmul.f32 %v5564_v8, %v6620_v9 }
 0x4c1   :  { %v5566_v19 = vpop.eup %5565 }
 0x4c2   :  { %v803_v57 = vmul.f32 %v5566_v19, %v6649_v50  ;;  %v908_v44 = vpop.xlane.xlu2 %907  ;;  %v5568_v13 = vpop.eup %5567 }
 0x4c3   :  { %5569 = vrcp.f32 %v908_v44  ;;  %1640 = vrot.lane.b32.xlu0 %v6479_v58, %s8311_s28  ;;  %v915_v32 = vmul.f32 %v5568_v13, %v6634_v23  ;;  %v1127_v58 = vpop.xlane.xlu1 %1126 }
 0x4c4   :  { %v805_v42 = vpack.c.bf16 %v803_v57, %v802_v21 }
 0x4c6   :  { %4835 = vmatmul.msk.bf16.vlgmr.msrb.gmra.mxu2 %vm771_vm10, %v805_v42 }
 0x4c7   :  { %1325 = vmatpush.bf16.msrb.mxu2 %v1317_v27 }
 0x4c9   :  { %v5570_v49 = vpop.eup %5569 }
 0x4ca   :  { %v916_v9 = vmul.f32 %v5570_v49, %v6660_v56  ;;  %v798_v31 = vpop.xlane.xlu0 %797  ;;  %v1016_v52 = vpop.xlane.xlu2 %1015 }
 0x4cb   :  { %1326 = vmatpush.bf16.msrb.mxu2 %v6418_v61  ;;  %5571 = vrcp.f32 %v798_v31  ;;  %v1130_v0 = vpop.xlane.xlu1 %1129 }
 0x4cc   :  { %v918_v50 = vpack.c.bf16 %v916_v9, %v915_v32 }
 0x4ce   :  { %4839 = vmatmul.msk.bf16.vlgmr.msrb.gmra.mxu0 %vm771_vm10, %v918_v50 }
 0x4cf   :  { %1436 = vmatpush.bf16.msrb.mxu0 %v1428_v38 }
 0x4d1   :  { %v5572_v40 = vpop.eup %5571 }
 0x4d2   :  { %v911_v48 = vpop.xlane.xlu0 %910  ;;  %v804_v23 = vmul.f32 %v5572_v40, %v6673_v41 }
 0x4d3   :  { %1437 = vmatpush.bf16.msrb.mxu0 %v6651_v24  ;;  %5573 = vrcp.f32 %v911_v48 }
 0x4d4   :  { %v806_v56 = vpack.c.bf16 %v804_v23, %v804_v23  ;;  %5575 = vrcp.f32 %v1016_v52 }
 0x4d6   :  { %4836 = vmatmul.msk.bf16.gmra.mxu2 %vm771_vm10, %v806_v56 }
 0x4d7   :  { %1527 = vrot.lane.b32.xlu2 %v6418_v61, %s8313_s26  ;;  %s8349_s26 = smov 96  }
 0x4d9   :  { %v5574_v39 = vpop.eup %5573 }
 0x4da   :  { %v1019_v47 = vpop.xlane.xlu0 %1018  ;;  %v917_v53 = vmul.f32 %v5574_v39, %v6680_v17  ;;  %v5576_v24 = vpop.eup %5575 }
 0x4db   :  { %5577 = vrcp.f32 %v1019_v47  ;;  %v1026_v1 = vmul.f32 %v5576_v24, %v6671_v34  ;;  %v1022_v51 = vpop.xlane.xlu1 %1021 }
 0x4dc   :  { %v919_v62 = vpack.c.bf16 %v917_v53, %v917_v53  ;;  %5579 = vrcp.f32 %v1130_v0 }
 0x4dd   :  { %5581 = vrcp.f32 %v1127_v58 }
 0x4de   :  { %4840 = vmatmul.msk.bf16.gmra.mxu0 %vm771_vm10, %v919_v62  ;;  %5583 = vrcp.f32 %v1022_v51 }
 0x4df   :  { %1638 = vrot.lane.b32.xlu2 %v6418_v61, %s8311_s28  ;;  %s8350_s28 = smov 80  }
 0x4e1   :  { %v5578_v41 = vpop.eup %5577 }
 0x4e2   :  { %v1027_v3 = vmul.f32 %v5578_v41, %v6685_v25  ;;  %v5580_v4 = vpop.eup %5579  ;;  %v1133_v61 = vpop.xlane.xlu0 %1132 }
 0x4e3   :  { %v5582_v17 = vpop.eup %5581  ;;  %v1138_v11 = vmul.f32 %v5580_v4, %v6662_v63  ;;  %5585 = vrcp.f32 %v1133_v61  ;;  %v1503_v63 = vsub.f32 %v6632_v60, %v6743_v35 }
 0x4e4   :  { %v1029_v7 = vpack.c.bf16 %v1027_v3, %v1026_v1  ;;  %v1137_v33 = vmul.f32 %v5582_v17, %v6653_v30  ;;  %v5584_v16 = vpop.eup %5583 }
 0x4e5   :  { %v1028_v34 = vmul.f32 %v5584_v16, %v6688_v28  ;;  %v1508_v42 = vmul.f32 1.442695, %v1503_v63 }
 0x4e6   :  { %4843 = vmatmul.msk.bf16.vlgmr.msra.gmra.mxu2 %vm771_vm10, %v1029_v7  ;;  %v1140_v22 = vpack.c.bf16 %v1138_v11, %v1137_v33 }
 0x4e7   :  { %v1030_v57 = vpack.c.bf16 %v1028_v34, %v1028_v34 }
 0x4e9   :  { %v5586_v19 = vpop.eup %5585 }
 0x4ea   :  { %v1139_v30 = vmul.f32 %v5586_v19, %v6694_v2 }
 0x4ec   :  { %v1289_v44 = vpop.xlane.xlu0 %1288  ;;  %v1141_v27 = vpack.c.bf16 %v1139_v30, %v1139_v30 }
 0x4ee   :  { %4847 = vmatmul.msk.bf16.vlgmr.msra.gmra.mxu0 %vm771_vm10, %v1140_v22 }
 0x4f2   :  { %v1530_v25 = vpop.permute.xlu1 %1529 }
 0x4f3   :  { %v1539_v8 = vsel %vm819_vm8, %v1530_v25, 0 }
 0x4f4   :  { %1547 = vmatpush.bf16.msra.mxu2 %v1539_v8  ;;  %v1292_v21 = vpop.xlane.xlu2 %1291 }
 0x4f5   :  { %5587 = vrcp.f32 %v1292_v21 }
 0x4f6   :  { %4844 = vmatmul.msk.bf16.gmra.mxu2 %vm771_vm10, %v1030_v57  ;;  %5589 = vrcp.f32 %v1289_v44 }
 0x4f7   :  { %5591 = vpow2.f32 %v1508_v42 }
 0x4fb   :  { %v5588_v28 = vpop.eup %5587 }
 0x4fc   :  { %v5590_v13 = vpop.eup %5589  ;;  %v1300_v49 = vmul.f32 %v5588_v28, %v6704_v20 }
 0x4fd   :  { %v1299_v32 = vmul.f32 %v5590_v13, %v6700_v37  ;;  %v6795_v9 = vpop.eup %5591 }
 0x4fe   :  { %4848 = vmatmul.msk.bf16.gmra.mxu0 %vm771_vm10, %v1141_v27  ;;  %v1516_v2 = vsel %vm771_vm10, %v6795_v9, 0.0 }
 0x4ff   :  { %v1302_v60 = vpack.c.bf16 %v1300_v49, %v1299_v32 }
 0x506   :  { %4851 = vmatmul.msk.bf16.vlgmr.msrb.gmra.mxu2 %vm771_vm10, %v1302_v60 }
 0x508   :  { %1517 = vadd.xlane.f32.xlu2 %v1516_v2 }
 0x50a   :  { %v1401_v35 = vpop.xlane.xlu0 %1400 }
 0x50b   :  { %5593 = vrcp.f32 %v1401_v35 }
 0x511   :  { %v5594_v50 = vpop.eup %5593 }
 0x512   :  { %v1404_v31 = vpop.xlane.xlu2 %1403  ;;  %v1411_v40 = vmul.f32 %v5594_v50, %v6712_v15 }
 0x513   :  { %5595 = vrcp.f32 %v1404_v31 }
 0x519   :  { %v5596_v38 = vpop.eup %5595 }
 0x51a   :  { %v1412_v20 = vmul.f32 %v5596_v38, %v6718_v55  ;;  %v1295_v37 = vpop.xlane.xlu2 %1294  ;;  %v1512_v58 = vpop.xlane.xlu0 %1511 }
 0x51b   :  { %5597 = vrcp.f32 %v1295_v37 }
 0x51c   :  { %v1414_v48 = vpack.c.bf16 %v1412_v20, %v1411_v40 }
 0x51e   :  { %4855 = vmatmul.msk.bf16.vlgmr.msrb.gmra.mxu0 %vm771_vm10, %v1414_v48 }
 0x521   :  { %v5598_v23 = vpop.eup %5597 }
 0x522   :  { %v1407_v56 = vpop.xlane.xlu2 %1406  ;;  %v1611_v52 = vpop.xlane.xlu0 %1610  ;;  %v1301_v39 = vmul.f32 %v5598_v23, %v6723_v29 }
 0x523   :  { %5599 = vrcp.f32 %v1407_v56  ;;  %v1614_v47 = vsub.f32 %v6733_v54, %v1611_v52 }
 0x524   :  { %v1303_v53 = vpack.c.bf16 %v1301_v39, %v1301_v39 }
 0x525   :  { %v1619_v0 = vmul.f32 1.442695, %v1614_v47 }
 0x526   :  { %4852 = vmatmul.msk.bf16.gmra.mxu2 %vm771_vm10, %v1303_v53  ;;  %v5311_v53 = vld [vmem:[%s8295_s10 + $0x18] sm:$0xff] }
 0x527   :  { %5601 = vpow2.f32 %v1619_v0  ;;  %1763 = vmatpush.bf16.msrb.mxu1 %v5311_v53 }
 0x528   :  { %5603 = vrcp.f32 %v1512_v58 }
 0x529   :  { %v5600_v15 = vpop.eup %5599 }
 0x52a   :  { %v1623_v55 = vpop.xlane.xlu2 %1622  ;;  %v1413_v62 = vmul.f32 %v5600_v15, %v6735_v46 }
 0x52c   :  { %v1415_v24 = vpack.c.bf16 %v1413_v62, %v1413_v62 }
 0x52d   :  { %v6807_v41 = vpop.eup %5601 }
 0x52e   :  { %4856 = vmatmul.msk.bf16.gmra.mxu0 %vm771_vm10, %v1415_v24  ;;  %v1627_v29 = vsel %vm771_vm10, %v6807_v41, 0.0  ;;  %v5604_v51 = vpop.eup %5603 }
 0x52f   :  { %1628 = vadd.xlane.f32.xlu1 %v1627_v29  ;;  %v1522_v17 = vmul.f32 %v5604_v51, %v6725_v36 }
 0x532   :  { %v1515_v54 = vpop.xlane.xlu2 %1514  ;;  %v1626_v1 = vpop.xlane.xlu1 %1625 }
 0x533   :  { %5605 = vrcp.f32 %v1515_v54 }
 0x534   :  { %5607 = vrcp.f32 %v1626_v1 }
 0x535   :  { %v1641_v3 = vpop.permute.xlu0 %1640  ;;  %5609 = vrcp.f32 %v1623_v55  ;;  %v5310_v55 = vld [vmem:[%s8295_s10 + $0x10] sm:$0xff] }
 0x536   :  { %v1650_v4 = vsel %vm819_vm8, %v1641_v3, 0  ;;  %1764 = vmatpush.bf16.msrb.mxu1 %v5310_v55  ;;  %v5309_v3 = vld [vmem:[%s8295_s10 + $0x8] sm:$0xff] }
 0x537   :  { %1658 = vmatpush.bf16.msra.mxu0 %v1650_v4  ;;  %v5308_v4 = vld [vmem:[%s8295_s10] sm:$0xff] }
 0x539   :  { %v5606_v46 = vpop.eup %5605 }
 0x53a   :  { %v1528_v7 = vpop.permute.xlu2 %1527  ;;  %v1523_v11 = vmul.f32 %v5606_v46, %v6750_v14  ;;  %v5608_v33 = vpop.eup %5607  ;;  %1765 = vmatpush.bf16.msrb.mxu1 %v5309_v3 }
 0x53b   :  { %1548 = vmatpush.bf16.msra.mxu2 %v1528_v7  ;;  %v5610_v61 = vpop.eup %5609  ;;  %v1634_v16 = vmul.f32 %v5608_v33, %v6752_v10 }
 0x53c   :  { %v1525_v22 = vpack.c.bf16 %v1523_v11, %v1522_v17  ;;  %v1633_v34 = vmul.f32 %v5610_v61, %v6746_v12 }
 0x53e   :  { %4859 = vmatmul.msk.bf16.vlgmr.msra.gmra.mxu2 %vm771_vm10, %v1525_v22  ;;  %v1636_v8 = vpack.c.bf16 %v1634_v16, %v1633_v34  ;;  %1766 = vmatpush.bf16.msrb.mxu1 %v5308_v4 }
 0x542   :  { %v1639_v25 = vpop.permute.xlu2 %1638 }
 0x543   :  { %1659 = vmatpush.bf16.msra.mxu0 %v1639_v25 }
 0x546   :  { %4863 = vmatmul.msk.bf16.vlgmr.msra.gmra.mxu0 %vm771_vm10, %v1636_v8 }
 0x549   :  { %v6819_v19 = vpop.f32.mrf.mxu2 }
 0x54b   :  { %v943_v36 = vpop.f32.mrf.mxu0 }
 0x551   :  { %v6821_v21 = vpop.f32.mrf.mxu2 }
 0x553   :  { %v945_v14 = vpop.f32.mrf.mxu0 }
 0x554   :  { %v5386_v57 = vpack.i.bf16 %v945_v14, %v943_v36 }
 0x556   :  { %5387 = vrot.lane.b32.xlu0 %v5386_v57, %s5876_s30 }
 0x559   :  { %v6824_v63 = vpop.f32.mrf.mxu2 }
 0x55b   :  { %v948_v44 = vpop.f32.mrf.mxu0 }
 0x561   :  { %v839_v10 = vpop.f32.mrf.mxu2 }
 0x563   :  { %v950_v30 = vpop.f32.mrf.mxu0 }
 0x569   :  { %v1054_v12 = vpop.f32.mrf.mxu2 }
 0x56b   :  { %v1165_v42 = vpop.f32.mrf.mxu0 }
 0x571   :  { %v1056_v27 = vpop.f32.mrf.mxu2 }
 0x572   :  { %v5391_v28 = vpack.i.bf16 %v1056_v27, %v1054_v12 }
 0x573   :  { %v1167_v13 = vpop.f32.mrf.mxu0 }
 0x574   :  { %v5396_v49 = vpack.i.bf16 %v1167_v13, %v1165_v42  ;;  %5392 = vrot.lane.b32.xlu1 %v5391_v28, %s8315_s5 }
 0x576   :  { %5397 = vrot.lane.b32.xlu0 %v5396_v49, %s5875_s4 }
 0x579   :  { %v1059_v32 = vpop.f32.mrf.mxu2 }
 0x57b   :  { %v1518_v60 = vpop.xlane.xlu2 %1517  ;;  %v1170_v2 = vpop.f32.mrf.mxu0 }
 0x57c   :  { %5611 = vrcp.f32 %v1518_v60 }
 0x581   :  { %v1061_v31 = vpop.f32.mrf.mxu2 }
 0x582   :  { %v5612_v35 = vpop.eup %5611 }
 0x583   :  { %v1172_v50 = vpop.f32.mrf.mxu0  ;;  %v1524_v38 = vmul.f32 %v5612_v35, %v6795_v9 }
 0x585   :  { %v1526_v40 = vpack.c.bf16 %v1524_v38, %v1524_v38 }
 0x587   :  { %4860 = vmatmul.msk.bf16.gmra.mxu2 %vm771_vm10, %v1526_v40 }
 0x589   :  { %v6830_v20 = vpop.f32.mrf.mxu2 }
 0x591   :  { %v6833_v48 = vpop.f32.mrf.mxu2 }
 0x59b   :  { %v1439_v37 = vpop.f32.mrf.mxu0 }
 0x59c   :  { %v5401_v58 = vpack.i.bf16 %v1439_v37, %v948_v44 }
 0x59e   :  { %5402 = vrot.lane.b32.xlu0 %v5401_v58, %s5876_s30 }
 0x5a2   :  { %v1629_v23 = vpop.xlane.xlu1 %1628 }
 0x5a3   :  { %5613 = vrcp.f32 %v1629_v23  ;;  %v1441_v56 = vpop.f32.mrf.mxu0 }
 0x5a9   :  { %v5614_v52 = vpop.eup %5613  ;;  %v6835_v39 = vpop.f32.mrf.mxu2 }
 0x5aa   :  { %v1635_v47 = vmul.f32 %v5614_v52, %v6807_v41 }
 0x5ab   :  { %v1444_v9 = vpop.f32.mrf.mxu0 }
 0x5ac   :  { %v5416_v0 = vpack.i.bf16 %v1444_v9, %v1441_v56  ;;  %v1637_v15 = vpack.c.bf16 %v1635_v47, %v1635_v47 }
 0x5ae   :  { %5417 = vrot.lane.b32.xlu1 %v5416_v0, %s5876_s30  ;;  %4864 = vmatmul.msk.bf16.gmra.mxu0 %vm771_vm10, %v1637_v15 }
 0x5b1   :  { %v1335_v62 = vpop.f32.mrf.mxu2 }
 0x5b3   :  { %v1446_v24 = vpop.f32.mrf.mxu0 }
 0x5c1   :  { %v1550_v41 = vpop.f32.mrf.mxu2 }
 0x5c2   :  { %v5406_v29 = vpack.i.bf16 %v1550_v41, %v1059_v32 }
 0x5c3   :  { %v1661_v54 = vpop.f32.mrf.mxu0 }
 0x5c4   :  { %v5411_v1 = vpack.i.bf16 %v1661_v54, %v1170_v2  ;;  %5407 = vrot.lane.b32.xlu0 %v5406_v29, %s8315_s5 }
 0x5c6   :  { %5412 = vrot.lane.b32.xlu2 %v5411_v1, %s5875_s4 }
 0x5c8   :  { %v5388_v51 = vpop.permute.xlu0 %5387 }
 0x5c9   :  { %v5390_v46 = vunpack.i.h.bf16 %v5388_v51  ;;  %v5389_v7 = vunpack.i.l.bf16 %v5388_v51  ;;  %v1552_v10 = vpop.f32.mrf.mxu2 }
 0x5cb   :  { %v1211_v61 = vsel %vm731_vm9, %v6821_v21, %v5390_v46  ;;  %v1210_v16 = vsel %vm731_vm9, %v6819_v19, %v5389_v7  ;;  %v1663_v19 = vpop.f32.mrf.mxu0 }
 0x5e6   :  { %v5393_v17 = vpop.permute.xlu1 %5392 }
 0x5e7   :  { %v5395_v11 = vunpack.i.h.bf16 %v5393_v17  ;;  %v5394_v33 = vunpack.i.l.bf16 %v5393_v17 }
 0x5e8   :  { %v5398_v22 = vpop.permute.xlu0 %5397 }
 0x5e9   :  { %v5400_v34 = vunpack.i.h.bf16 %v5398_v22  ;;  %v5399_v25 = vunpack.i.l.bf16 %v5398_v22  ;;  %v1214_v8 = vsel %vm1213_vm11, %v1210_v16, %v5394_v33  ;;  %v1215_v36 = vsel %vm1213_vm11, %v1211_v61, %v5395_v11 }
 0x5eb   :  { %v1218_v14 = vsel %vm8317_vm12, %v1214_v8, %v5399_v25  ;;  %v1219_v57 = vsel %vm8317_vm12, %v1215_v36, %v5400_v34 }
 0x5ec   :  { %v1723_v44 = vpack.c.bf16 %v1219_v57, %v1218_v14 }
 0x5ee   :  { %4881 = vmatmul.msk.bf16.vlgmr.msrb.gmra.mxu1 %vm205_vm0, %v1723_v44 }
 0x60a   :  { %v1555_v30 = vpop.f32.mrf.mxu2 }
 0x60b   :  { %v5421_v12 = vpack.i.bf16 %v1555_v30, %v1552_v10 }
 0x60d   :  { %5422 = vrot.lane.b32.xlu0 %v5421_v12, %s8315_s5 }
 0x610   :  { %v5403_v28 = vpop.permute.xlu0 %5402 }
 0x611   :  { %v5405_v49 = vunpack.i.h.bf16 %v5403_v28  ;;  %v5404_v32 = vunpack.i.l.bf16 %v5403_v28 }
 0x612   :  { %v1557_v21 = vpop.f32.mrf.mxu2 }
 0x613   :  { %v1706_v50 = vsel %vm731_vm9, %v6830_v20, %v5405_v49  ;;  %v1212_v38 = vsel %vm731_vm9, %v6824_v63, %v5404_v32  ;;  %v6877_v20 = vld [vmem:[%s8296_s11] ss:$0 sm:$0xff] }
 0x614   :  { %v4902_v32 = vld [vmem:[%s8299_s14 + $0x20] sm:$0xf] }
 0x620   :  { %v5413_v60 = vpop.permute.xlu2 %5412  ;;  %v5418_v1 = vpop.permute.xlu1 %5417 }
 0x621   :  { %v5415_v40 = vunpack.i.h.bf16 %v5413_v60  ;;  %v5414_v37 = vunpack.i.l.bf16 %v5413_v60  ;;  %v5420_v4 = vunpack.i.h.bf16 %v5418_v1  ;;  %v5419_v51 = vunpack.i.l.bf16 %v5418_v1  ;;  %v5317_v60 = vld [vmem:[%s8299_s14 + $0x24] sm:$0xf0] }
 0x623   :  { %v1708_v17 = vsel %vm731_vm9, %v6835_v39, %v5420_v4  ;;  %v1707_v11 = vsel %vm731_vm9, %v6833_v48, %v5419_v51 }
 0x62b   :  { %v1666_v42 = vpop.f32.mrf.mxu0 }
 0x62c   :  { %v5426_v27 = vpack.i.bf16 %v1666_v42, %v1663_v19  ;;  %v4910_v42 = vld [vmem:[%s8299_s14 + $0x30] sm:$0xf] }
 0x62e   :  { %5427 = vrot.lane.b32.xlu1 %v5426_v27, %s5875_s4  ;;  %v5318_v27 = vld [vmem:[%s8299_s14 + $0x34] sm:$0xf] }
 0x633   :  { %v1668_v13 = vpop.f32.mrf.mxu0 }
 0x634   :  { %v4912_v13 = vld [vmem:[%s8299_s14 + $0x38] sm:$0xf0] }
 0x635   :  { %v4915_v49 = vor.u32 %v5318_v27, %v4912_v13  ;;  %v6987_v27 = vld [vmem:[%s8298_s13] ss:$0 sm:$0xff] }
 0x636   :  { %v5408_v2 = vpop.permute.xlu0 %5407 }
 0x637   :  { %v5410_v35 = vunpack.i.h.bf16 %v5408_v2  ;;  %v5409_v31 = vunpack.i.l.bf16 %v5408_v2  ;;  %2057 = vmatpush.bf16.msrb.mxu3 %v4915_v49  ;;  %v5316_v2 = vld [vmem:[%s8299_s14 + $0x24] sm:$0xf] }
 0x639   :  { %v1216_v58 = vsel %vm1213_vm11, %v1212_v38, %v5409_v31  ;;  %v1709_v23 = vsel %vm1213_vm11, %v1706_v50, %v5410_v35  ;;  %v4903_v35 = vor.u32 %v5317_v60, %v4902_v32  ;;  %v4904_v31 = vld [vmem:[%s8299_s14 + $0x28] sm:$0xf0] }
 0x63a   :  { %v1220_v56 = vsel %vm8317_vm12, %v1216_v58, %v5414_v37  ;;  %v1712_v52 = vsel %vm8317_vm12, %v1709_v23, %v5415_v40  ;;  %v4907_v38 = vor.u32 %v5316_v2, %v4904_v31  ;;  %v4894_v58 = vld [vmem:[%s8299_s14 + $0x10] sm:$0xf]  ;;  %v5315_v23 = vld [vmem:[%s8299_s14 + $0x14] sm:$0xf0] }
 0x63b   :  { %v1724_v47 = vpack.c.bf16 %v1712_v52, %v1220_v56  ;;  %v5314_v56 = vld [vmem:[%s8299_s14 + $0x14] sm:$0xf] }
 0x63c   :  { %2058 = vmatpush.bf16.msrb.mxu3 %v4907_v38 }
 0x63d   :  { %4882 = vmatmul.msk.bf16.gmra.mxu1 %vm205_vm0, %v1724_v47 }
 0x66b   :  { %v1768_v9 = vpop.f32.mrf.mxu1 }
 0x66c   :  { %v1783_v63 = vadd.f32 %v1768_v9, %v6155_v5  ;;  %v4895_v9 = vor.u32 %v5315_v23, %v4894_v58 }
 0x66e   :  { %v6881_v53 = vadd.f32 %v6877_v20, %v1783_v63  ;;  %v4896_v63 = vld [vmem:[%s8299_s14 + $0x18] sm:$0xf0] }
 0x670   :  { %v1801_v0 = vsel %vm205_vm0, %v6881_v53, 0.0  ;;  %v1825_v15 = vmul.f32 %v6881_v53, %v6881_v53 }
 0x671   :  { %1802 = vadd.xlane.f32.xlu0 %v1801_v0  ;;  %v4899_v0 = vor.u32 %v5314_v56, %v4896_v63 }
 0x672   :  { %v1831_v55 = vsel %vm205_vm0, %v1825_v15, 0.0 }
 0x673   :  { %1832 = vadd.xlane.f32.xlu2 %v1831_v55  ;;  %v1770_v62 = vpop.f32.mrf.mxu1  ;;  %v4886_v55 = vld [vmem:[%s8299_s14] sm:$0xf]  ;;  %2059 = vmatpush.bf16.msrb.mxu3 %v4899_v0 }
 0x674   :  { %v1784_v24 = vadd.f32 %v1770_v62, %v6170_v26  ;;  %v5313_v62 = vld [vmem:[%s8299_s14 + $0x4] sm:$0xf0] }
 0x676   :  { %v6890_v41 = vadd.f32 %v6877_v20, %v1784_v24  ;;  %v5312_v24 = vld [vmem:[%s8299_s14 + $0x4] sm:$0xf] }
 0x678   :  { %v1804_v5 = vsel %vm205_vm0, %v6890_v41, 0.0  ;;  %v1826_v29 = vmul.f32 %v6890_v41, %v6890_v41 }
 0x679   :  { %1805 = vadd.xlane.f32.xlu1 %v1804_v5  ;;  %v4887_v5 = vor.u32 %v5313_v62, %v4886_v55 }
 0x67a   :  { %v1834_v54 = vsel %vm205_vm0, %v1826_v29, 0.0  ;;  %v4888_v29 = vld [vmem:[%s8299_s14 + $0x8] sm:$0xf0] }
 0x67b   :  { %1835 = vadd.xlane.f32.xlu0 %v1834_v54  ;;  %v4891_v1 = vor.u32 %v5312_v24, %v4888_v29 }
 0x67d   :  { %2060 = vmatpush.bf16.msrb.mxu3 %v4891_v1 }
 0x67f   :  { %v5423_v3 = vpop.permute.xlu0 %5422 }
 0x680   :  { %v5425_v46 = vunpack.i.h.bf16 %v5423_v3  ;;  %v5424_v7 = vunpack.i.l.bf16 %v5423_v3 }
 0x682   :  { %v1711_v61 = vsel %vm1213_vm11, %v1708_v17, %v5425_v46  ;;  %v1710_v16 = vsel %vm1213_vm11, %v1707_v11, %v5424_v7 }
 0x6a0   :  { %v5428_v26 = vpop.permute.xlu1 %5427 }
 0x6a1   :  { %v5430_v33 = vunpack.i.h.bf16 %v5428_v26  ;;  %v5429_v22 = vunpack.i.l.bf16 %v5428_v26 }
 0x6a3   :  { %v1713_v34 = vsel %vm8317_vm12, %v1710_v16, %v5429_v22  ;;  %v1714_v25 = vsel %vm8317_vm12, %v1711_v61, %v5430_v33 }
 0x6a4   :  { %v1725_v8 = vpack.c.bf16 %v1714_v25, %v1713_v34 }
 0x6a6   :  { %4883 = vmatmul.msk.bf16.gmra.mxu1 %vm205_vm0, %v1725_v8 }
 0x6ba   :  { %v1773_v36 = vpop.f32.mrf.mxu1 }
 0x6bb   :  { %v1785_v14 = vadd.f32 %v1773_v36, %v6184_v43 }
 0x6bd   :  { %v6908_v39 = vadd.f32 %v6877_v20, %v1785_v14 }
 0x6bf   :  { %v1807_v48 = vsel %vm205_vm0, %v6908_v39, 0.0  ;;  %v1827_v57 = vmul.f32 %v6908_v39, %v6908_v39 }
 0x6c0   :  { %1808 = vadd.xlane.f32.xlu1 %v1807_v48 }
 0x6c1   :  { %v1837_v44 = vsel %vm205_vm0, %v1827_v57, 0.0 }
 0x6c2   :  { %1838 = vadd.xlane.f32.xlu2 %v1837_v44  ;;  %v1775_v10 = vpop.f32.mrf.mxu1 }
 0x6c3   :  { %v1786_v30 = vadd.f32 %v1775_v10, %v6196_v59  ;;  %v5319_v59 = vld [vmem:[%s8299_s14 + $0x34] sm:$0xf0]  ;;  %v6980_v10 = vld [vmem:[%s8297_s12] ss:$0 sm:$0xff] }
 0x6c4   :  { %v4911_v28 = vor.u32 %v5319_v59, %v4910_v42 }
 0x6c5   :  { %v6917_v12 = vadd.f32 %v6877_v20, %v1786_v30 }
 0x6c6   :  { %2033 = vmatpush.bf16.msrb.mxu2 %v4911_v28 }
 0x6c7   :  { %v1810_v43 = vsel %vm205_vm0, %v6917_v12, 0.0  ;;  %v1828_v21 = vmul.f32 %v6917_v12, %v6917_v12 }
 0x6c8   :  { %1811 = vadd.xlane.f32.xlu0 %v1810_v43 }
 0x6c9   :  { %v1840_v19 = vsel %vm205_vm0, %v1828_v21, 0.0 }
 0x6ca   :  { %1841 = vadd.xlane.f32.xlu1 %v1840_v19  ;;  %2034 = vmatpush.bf16.msrb.mxu2 %v4903_v35 }
 0x6ce   :  { %2035 = vmatpush.bf16.msrb.mxu2 %v4895_v9 }
 0x6d2   :  { %2036 = vmatpush.bf16.msrb.mxu2 %v4887_v5 }
 0x6e4   :  { %v1803_v50 = vpop.xlane.xlu0 %1802 }
 0x6e5   :  { %v1819_v40 = vmul.f32 %v1803_v50, %v6124_v18 }
 0x6e6   :  { %v1833_v37 = vpop.xlane.xlu2 %1832 }
 0x6e7   :  { %v1855_v52 = vmul.f32 %v1819_v40, %v1819_v40  ;;  %v1849_v47 = vmul.f32 %v1833_v37, %v6124_v18  ;;  %v1867_v57 = vsub.f32 %v6881_v53, %v1819_v40 }
 0x6e9   :  { %v1861_v15 = vsub.f32 %v1849_v47, %v1855_v52 }
 0x6eb   :  { %v1873_v54 = vadd.f32 1e-05, %v1861_v15 }
 0x6ec   :  { %v1806_v3 = vpop.xlane.xlu1 %1805 }
 0x6ed   :  { %5615 = vrsqrt.f32 %v1873_v54  ;;  %v1820_v4 = vmul.f32 %v1806_v3, %v6124_v18  ;;  %vm1885_vm14 = vweird.f32 %v1873_v54 }
 0x6ee   :  { %v1836_v51 = vpop.xlane.xlu0 %1835 }
 0x6ef   :  { %v1856_v46 = vmul.f32 %v1820_v4, %v1820_v4  ;;  %v1850_v7 = vmul.f32 %v1836_v51, %v6124_v18  ;;  %v1868_v21 = vsub.f32 %v6890_v41, %v1820_v4 }
 0x6f1   :  { %v1862_v26 = vsub.f32 %v1850_v7, %v1856_v46 }
 0x6f3   :  { %v5616_v17 = vpop.eup %5615  ;;  %v1874_v11 = vadd.f32 1e-05, %v1862_v26 }
 0x6f4   :  { %v1880_v33 = vmul.f32 %v5616_v17, %v1873_v54  ;;  %vm1886_vm13 = vweird.f32 %v5616_v17 }
 0x6f5   :  { %5617 = vrsqrt.f32 %v1874_v11  ;;  %vm1887_vm15 = vmor %vm1885_vm14, %vm1886_vm13  ;;  %vm1895_vm2 = vweird.f32 %v1874_v11 }
 0x6f6   :  { %v1881_v22 = vmul.f32 %v5616_v17, %v1880_v33 }
 0x6f8   :  { %v1882_v61 = vmul.f32 0.5, %v1881_v22 }
 0x6fa   :  { %v1883_v16 = vsub.f32 1.5, %v1882_v61 }
 0x6fb   :  { %v5618_v34 = vpop.eup %5617 }
 0x6fc   :  { %v1884_v25 = vmul.f32 %v5616_v17, %v1883_v16  ;;  %v1890_v8 = vmul.f32 %v5618_v34, %v1874_v11  ;;  %vm1896_vm1 = vweird.f32 %v5618_v34 }
 0x6fd   :  { %vm1897_vm3 = vmor %vm1895_vm2, %vm1896_vm1 }
 0x6fe   :  { %v1891_v36 = vmul.f32 %v5618_v34, %v1890_v8  ;;  %v1888_v14 = vsel %vm1887_vm15, %v5616_v17, %v1884_v25 }
 0x6ff   :  { %v1939_v30 = vmul.f32 %v1888_v14, %v1867_v57 }
 0x700   :  { %v1892_v48 = vmul.f32 0.5, %v1891_v36 }
 0x701   :  { %v1948_v42 = vmul.f32 %v6980_v10, %v1939_v30 }
 0x702   :  { %v1893_v44 = vsub.f32 1.5, %v1892_v48 }
 0x703   :  { %v1957_v13 = vadd.f32 %v6987_v27, %v1948_v42  ;;  %v5326_v42 = vld [vmem:[%s8301_s16 + $0x30] sm:$0xff] }
 0x704   :  { %v1894_v43 = vmul.f32 %v5618_v34, %v1893_v44 }
 0x706   :  { %v1898_v19 = vsel %vm1897_vm3, %v5618_v34, %v1894_v43 }
 0x707   :  { %v1940_v59 = vmul.f32 %v1898_v19, %v1868_v21  ;;  %v5327_v21 = vld [vmem:[%s8301_s16 + $0x38] sm:$0xff] }
 0x708   :  { %v5335_v19 = vld [vmem:[%s8301_s16 + $0x78] sm:$0xff]  ;;  %2463 = vmatpush.bf16.msrb.mxu0 %v5327_v21 }
 0x709   :  { %v1949_v28 = vmul.f32 %v6980_v10, %v1940_v59  ;;  %2487 = vmatpush.bf16.msra.mxu1 %v5335_v19  ;;  %v5334_v59 = vld [vmem:[%s8301_s16 + $0x70] sm:$0xff] }
 0x70b   :  { %v1958_v49 = vadd.f32 %v6987_v27, %v1949_v28  ;;  %v5325_v28 = vld [vmem:[%s8301_s16 + $0x28] sm:$0xff] }
 0x70c   :  { %2464 = vmatpush.bf16.msrb.mxu0 %v5326_v42 }
 0x70d   :  { %v1971_v32 = vpack.c.bf16 %v1958_v49, %v1957_v13  ;;  %2488 = vmatpush.bf16.msra.mxu1 %v5334_v59  ;;  %v5333_v13 = vld [vmem:[%s8301_s16 + $0x68] sm:$0xff]  ;;  %v1974_v49 = vld [vmem:[%s8300_s15] sm:$0x3] }
 0x70f   :  { %4916 = vmatmul.msk.bf16.vlgmr.msrb.gmra.mxu2 %vm205_vm0, %v1971_v32  ;;  %4919 = vmatmul.msk.bf16.vlgmr.msrb.gmra.mxu3 %vm205_vm0, %v1971_v32  ;;  %v5324_v32 = vld [vmem:[%s8301_s16 + $0x20] sm:$0xff] }
 0x710   :  { %2465 = vmatpush.bf16.msrb.mxu0 %v5325_v28 }
 0x711   :  { %2489 = vmatpush.bf16.msra.mxu1 %v5333_v13 }
 0x714   :  { %2466 = vmatpush.bf16.msrb.mxu0 %v5324_v32 }
 0x723   :  { %v1778_v60 = vpop.f32.mrf.mxu1 }
 0x724   :  { %v1787_v2 = vadd.f32 %v1778_v60, %v6207_v6  ;;  %v5332_v60 = vld [vmem:[%s8301_s16 + $0x60] sm:$0xff] }
 0x725   :  { %2490 = vmatpush.bf16.msra.mxu1 %v5332_v60 }
 0x726   :  { %v6996_v35 = vadd.f32 %v6877_v20, %v1787_v2  ;;  %v7051_v2 = vperm.slane %v1974_v49, 0 }
 0x728   :  { %v1813_v31 = vsel %vm205_vm0, %v6996_v35, 0.0  ;;  %v1829_v50 = vmul.f32 %v6996_v35, %v6996_v35 }
 0x729   :  { %1814 = vadd.xlane.f32.xlu0 %v1813_v31  ;;  %v7053_v31 = vperm.slane %v1974_v49, 1 }
 0x72a   :  { %v1843_v38 = vsel %vm205_vm0, %v1829_v50, 0.0 }
 0x72b   :  { %1844 = vadd.xlane.f32.xlu1 %v1843_v38  ;;  %v1780_v40 = vpop.f32.mrf.mxu1 }
 0x72c   :  { %v1788_v37 = vadd.f32 %v1780_v40, %v6306_v45  ;;  %v5323_v40 = vld [vmem:[%s8301_s16 + $0x18] sm:$0xff] }
 0x72d   :  { %2467 = vmatpush.bf16.msrb.mxu0 %v5323_v40 }
 0x72e   :  { %v7005_v58 = vadd.f32 %v6877_v20, %v1788_v37  ;;  %v5331_v37 = vld [vmem:[%s8301_s16 + $0x58] sm:$0xff] }
 0x72f   :  { %2491 = vmatpush.bf16.msra.mxu1 %v5331_v37 }
 0x730   :  { %v1816_v6 = vsel %vm205_vm0, %v7005_v58, 0.0  ;;  %v1830_v23 = vmul.f32 %v7005_v58, %v7005_v58 }
 0x731   :  { %1817 = vadd.xlane.f32.xlu2 %v1816_v6 }
 0x732   :  { %v1846_v56 = vsel %vm205_vm0, %v1830_v23, 0.0 }
 0x733   :  { %1847 = vadd.xlane.f32.xlu0 %v1846_v56  ;;  %v1809_v52 = vpop.xlane.xlu1 %1808 }
 0x734   :  { %v1821_v47 = vmul.f32 %v1809_v52, %v6124_v18 }
 0x735   :  { %v1839_v9 = vpop.xlane.xlu2 %1838 }
 0x736   :  { %v1857_v63 = vmul.f32 %v1821_v47, %v1821_v47  ;;  %v1851_v45 = vmul.f32 %v1839_v9, %v6124_v18  ;;  %v1869_v61 = vsub.f32 %v6908_v39, %v1821_v47  ;;  %v5322_v47 = vld [vmem:[%s8301_s16 + $0x10] sm:$0xff] }
 0x737   :  { %v5330_v9 = vld [vmem:[%s8301_s16 + $0x50] sm:$0xff]  ;;  %2468 = vmatpush.bf16.msrb.mxu0 %v5322_v47 }
 0x738   :  { %v1863_v0 = vsub.f32 %v1851_v45, %v1857_v63  ;;  %2492 = vmatpush.bf16.msra.mxu1 %v5330_v9 }
 0x73a   :  { %v1875_v20 = vadd.f32 1e-05, %v1863_v0 }
 0x73b   :  { %v1812_v15 = vpop.xlane.xlu0 %1811 }
 0x73c   :  { %5619 = vrsqrt.f32 %v1875_v20  ;;  %v1822_v55 = vmul.f32 %v1812_v15, %v6124_v18  ;;  %vm1905_vm5 = vweird.f32 %v1875_v20  ;;  %v5321_v15 = vld [vmem:[%s8301_s16 + $0x8] sm:$0xff] }
 0x73d   :  { %v1842_v62 = vpop.xlane.xlu1 %1841  ;;  %2469 = vmatpush.bf16.msrb.mxu0 %v5321_v15 }
 0x73e   :  { %v1858_v24 = vmul.f32 %v1822_v55, %v1822_v55  ;;  %v1852_v5 = vmul.f32 %v1842_v62, %v6124_v18  ;;  %v1870_v8 = vsub.f32 %v6917_v12, %v1822_v55  ;;  %v5329_v55 = vld [vmem:[%s8301_s16 + $0x48] sm:$0xff] }
 0x73f   :  { %2493 = vmatpush.bf16.msra.mxu1 %v5329_v55 }
 0x740   :  { %v1864_v29 = vsub.f32 %v1852_v5, %v1858_v24 }
 0x742   :  { %v5620_v54 = vpop.eup %5619  ;;  %v1876_v1 = vadd.f32 1e-05, %v1864_v29 }
 0x743   :  { %v1900_v3 = vmul.f32 %v5620_v54, %v1875_v20  ;;  %vm1906_vm4 = vweird.f32 %v5620_v54 }
 0x744   :  { %5621 = vrsqrt.f32 %v1876_v1  ;;  %vm1907_vm6 = vmor %vm1905_vm5, %vm1906_vm4  ;;  %vm1915_vm13 = vweird.f32 %v1876_v1 }
 0x745   :  { %v1901_v4 = vmul.f32 %v5620_v54, %v1900_v3 }
 0x747   :  { %v1902_v51 = vmul.f32 0.5, %v1901_v4  ;;  %v5320_v4 = vld [vmem:[%s8301_s16] sm:$0xff] }
 0x748   :  { %2470 = vmatpush.bf16.msrb.mxu0 %v5320_v4 }
 0x749   :  { %v1903_v46 = vsub.f32 1.5, %v1902_v51  ;;  %v5328_v51 = vld [vmem:[%s8301_s16 + $0x40] sm:$0xff] }
 0x74a   :  { %v5622_v7 = vpop.eup %5621  ;;  %2494 = vmatpush.bf16.msra.mxu1 %v5328_v51 }
 0x74b   :  { %v1904_v26 = vmul.f32 %v5620_v54, %v1903_v46  ;;  %v1910_v17 = vmul.f32 %v5622_v7, %v1876_v1  ;;  %vm1916_vm7 = vweird.f32 %v5622_v7 }
 0x74c   :  { %vm1917_vm14 = vmor %vm1915_vm13, %vm1916_vm7 }
 0x74d   :  { %v1911_v11 = vmul.f32 %v5622_v7, %v1910_v17  ;;  %v1908_v33 = vsel %vm1907_vm6, %v5620_v54, %v1904_v26 }
 0x74e   :  { %v1941_v34 = vmul.f32 %v1908_v33, %v1869_v61 }
 0x74f   :  { %v1912_v22 = vmul.f32 0.5, %v1911_v11 }
 0x750   :  { %v1950_v48 = vmul.f32 %v6980_v10, %v1941_v34 }
 0x751   :  { %v1913_v16 = vsub.f32 1.5, %v1912_v22 }
 0x752   :  { %v1959_v44 = vadd.f32 %v6987_v27, %v1950_v48 }
 0x753   :  { %v1914_v25 = vmul.f32 %v5622_v7, %v1913_v16 }
 0x755   :  { %v1918_v36 = vsel %vm1917_vm14, %v5622_v7, %v1914_v25 }
 0x756   :  { %v1942_v14 = vmul.f32 %v1918_v36, %v1870_v8 }
 0x758   :  { %v1951_v57 = vmul.f32 %v6980_v10, %v1942_v14 }
 0x75a   :  { %v1960_v30 = vadd.f32 %v6987_v27, %v1951_v57 }
 0x75c   :  { %v1972_v43 = vpack.c.bf16 %v1960_v30, %v1959_v44 }
 0x75e   :  { %4917 = vmatmul.msk.bf16.gmra.mxu2 %vm205_vm0, %v1972_v43  ;;  %4920 = vmatmul.msk.bf16.gmra.mxu3 %vm205_vm0, %v1972_v43 }
 0x792   :  { %v2038_v50 = vpop.f32.mrf.mxu2  ;;  %v2062_v38 = vpop.f32.mrf.mxu3 }
 0x793   :  { %v7062_v6 = vadd.f32 %v2038_v50, %v7051_v2  ;;  %v7065_v23 = vadd.f32 %v2062_v38, %v7053_v31 }
 0x795   :  { %v4922_v56 = vmul.f32 -1.702, %v7062_v6  ;;  %v4923_v52 = vmul.f32 -1.702, %v7065_v23 }
 0x797   :  { %v2101_v63 = vmul.f32 1.442695, %v4922_v56  ;;  %v2103_v45 = vmul.f32 1.442695, %v4923_v52 }
 0x799   :  { %5623 = vpow2.f32 %v2101_v63 }
 0x79a   :  { %5625 = vpow2.f32 %v2103_v45  ;;  %v2040_v0 = vpop.f32.mrf.mxu2  ;;  %v2064_v20 = vpop.f32.mrf.mxu3 }
 0x79b   :  { %v7082_v62 = vadd.f32 %v2040_v0, %v7051_v2  ;;  %v7085_v24 = vadd.f32 %v2064_v20, %v7053_v31 }
 0x79c   :  { %v1815_v5 = vpop.xlane.xlu0 %1814 }
 0x79d   :  { %v4924_v29 = vmul.f32 -1.702, %v7082_v62  ;;  %v4925_v54 = vmul.f32 -1.702, %v7085_v24  ;;  %v7090_v1 = vmul.f32 %v1815_v5, %v6124_v18 }
 0x79e   :  { %v1845_v3 = vpop.xlane.xlu1 %1844 }
 0x79f   :  { %v5624_v46 = vpop.eup %5623  ;;  %v2105_v7 = vmul.f32 1.442695, %v4924_v29  ;;  %v2107_v11 = vmul.f32 1.442695, %v4925_v54  ;;  %v1859_v33 = vmul.f32 %v7090_v1, %v7090_v1  ;;  %v1853_v22 = vmul.f32 %v1845_v3, %v6124_v18 }
 0x7a0   :  { %v5626_v26 = vpop.eup %5625  ;;  %v2125_v17 = vadd.f32 1.0, %v5624_v46  ;;  %v1871_v56 = vsub.f32 %v6996_v35, %v7090_v1 }
 0x7a1   :  { %v7101_v61 = vadd.f32 1.0, %v5626_v26  ;;  %5627 = vpow2.f32 %v2105_v7  ;;  %v1865_v16 = vsub.f32 %v1853_v22, %v1859_v33 }
 0x7a2   :  { %5629 = vrcp.f32 %v2125_v17  ;;  %v2146_v38 = vand.u32 2147483647, %v2125_v17  ;;  %v2148_v40 = vand.u32 2147483648, %v2125_v17  ;;  %vm2142_vm15 = vweird.f32 %v2125_v17 }
 0x7a3   :  { %5631 = vrcp.f32 %v7101_v61  ;;  %v7107_v8 = vadd.f32 1e-05, %v1865_v16  ;;  %v2161_v37 = vand.u32 2147483647, %v7101_v61  ;;  %vm2157_vm2 = vweird.f32 %v7101_v61 }
 0x7a4   :  { %5633 = vpow2.f32 %v2107_v11  ;;  %v1818_v34 = vpop.xlane.xlu2 %1817  ;;  %v2163_v45 = vand.u32 2147483648, %v7101_v61  ;;  %vm7139_vm3 = vcmp.eq.f32.partialorder %v2146_v38, 8.507059e+37  ;;  %v2149_v5 = vor.u32 1.1754944e-38, %v2148_v40 }
 0x7a5   :  { %v7105_v25 = vmul.f32 %v1818_v34, %v6124_v18  ;;  %5635 = vrsqrt.f32 %v7107_v8  ;;  %vm7143_vm4 = vcmp.eq.f32.partialorder %v2161_v37, 8.507059e+37  ;;  %vm1925_vm5 = vweird.f32 %v7107_v8 }
 0x7a6   :  { %v1848_v36 = vpop.xlane.xlu0 %1847 }
 0x7a7   :  { %v5628_v14 = vpop.eup %5627  ;;  %v1860_v48 = vmul.f32 %v7105_v25, %v7105_v25  ;;  %v1854_v57 = vmul.f32 %v1848_v36, %v6124_v18 }
 0x7a8   :  { %v5630_v44 = vpop.eup %5629  ;;  %v7112_v30 = vadd.f32 1.0, %v5628_v14 }
 0x7a9   :  { %v7115_v43 = vpop.eup %5631  ;;  %v2138_v21 = vmul.f32 %v5630_v44, %v2125_v17  ;;  %v1866_v19 = vsub.f32 %v1854_v57, %v1860_v48  ;;  %vm2143_vm1 = vweird.f32 %v5630_v44 }
 0x7aa   :  { %v5634_v42 = vpop.eup %5633  ;;  %v2153_v59 = vmul.f32 %v7115_v43, %v7101_v61  ;;  %5637 = vrcp.f32 %v7112_v30  ;;  %v2178_v20 = vand.u32 2147483648, %v7112_v30  ;;  %vm7149_vm6 = vmor %vm2142_vm15, %vm2143_vm1  ;;  %vm2158_vm7 = vweird.f32 %v7115_v43 }
 0x7ab   :  { %v2139_v28 = vsub.f32 1.0, %v2138_v21  ;;  %v7120_v13 = vadd.f32 1.0, %v5634_v42  ;;  %v7122_v32 = vadd.f32 1e-05, %v1866_v19  ;;  %v7125_v50 = vpop.eup %5635  ;;  %vm2172_vm13 = vweird.f32 %v7112_v30  ;;  %vm7169_vm1 = vmor %vm2157_vm2, %vm2158_vm7 }
 0x7ac   :  { %v2154_v49 = vsub.f32 1.0, %v2153_v59  ;;  %v1920_v52 = vmul.f32 %v7125_v50, %v7107_v8  ;;  %v2176_v26 = vand.u32 2147483647, %v7112_v30  ;;  %v2179_v22 = vor.u32 1.1754944e-38, %v2178_v20 }
 0x7ad   :  { %v2140_v60 = vmul.f32 %v5630_v44, %v2139_v28  ;;  %5639 = vrcp.f32 %v7120_v13  ;;  %v2191_v36 = vand.u32 2147483647, %v7120_v13  ;;  %vm1926_vm15 = vweird.f32 %v7125_v50 }
 0x7ae   :  { %5641 = vrsqrt.f32 %v7122_v32  ;;  %v2155_v63 = vmul.f32 %v7115_v43, %v2154_v49  ;;  %v1921_v15 = vmul.f32 %v7125_v50, %v1920_v52  ;;  %v2193_v21 = vand.u32 2147483648, %v7120_v13  ;;  %vm7185_vm12 = vmor %vm1925_vm5, %vm1926_vm15 }
 0x7af   :  { %v2141_v9 = vadd.f32 %v5630_v44, %v2140_v60  ;;  %v2164_v61 = vor.u32 1.1754944e-38, %v2163_v45  ;;  %vm2177_vm2 = vcmp.eq.f32.partialorder %v2176_v26, 8.507059e+37  ;;  %vm2187_vm7 = vweird.f32 %v7120_v13 }
 0x7b0   :  { %v5638_v47 = vpop.eup %5637  ;;  %v1922_v51 = vmul.f32 0.5, %v1921_v15  ;;  %v2156_v7 = vadd.f32 %v7115_v43, %v2155_v63  ;;  %v2194_v8 = vor.u32 1.1754944e-38, %v2193_v21  ;;  %vm2192_vm5 = vcmp.eq.f32.partialorder %v2191_v36, 8.507059e+37 }
 0x7b1   :  { %v2168_v0 = vmul.f32 %v5638_v47, %v7112_v30  ;;  %v2145_v46 = vsel %vm7149_vm6, %v5630_v44, %v2141_v9  ;;  %vm2173_vm14 = vweird.f32 %v5638_v47 }
 0x7b2   :  { %v1923_v16 = vsub.f32 1.5, %v1922_v51  ;;  %v2150_v48 = vsel %vm7139_vm3, %v2149_v5, %v2145_v46  ;;  %v2160_v42 = vsel %vm7169_vm1, %v7115_v43, %v2156_v7  ;;  %vm2174_vm3 = vmor %vm2172_vm13, %vm2173_vm14 }
 0x7b3   :  { %v5640_v54 = vpop.eup %5639  ;;  %v2169_v4 = vsub.f32 1.0, %v2168_v0  ;;  %v2317_v37 = vmul.f32 %v2150_v48, %v7062_v6 }
 0x7b4   :  { %v2183_v11 = vmul.f32 %v5640_v54, %v7120_v13  ;;  %v5642_v17 = vpop.eup %5641  ;;  %v1924_v19 = vmul.f32 %v7125_v50, %v1923_v16  ;;  %vm2188_vm6 = vweird.f32 %v5640_v54  ;;  %v2165_v13 = vsel %vm7143_vm4, %v2164_v61, %v2160_v42 }
 0x7b5   :  { %v2170_v33 = vmul.f32 %v5638_v47, %v2169_v4  ;;  %v1930_v14 = vmul.f32 %v5642_v17, %v7122_v32  ;;  %vm2189_vm13 = vmor %vm2187_vm7, %vm2188_vm6  ;;  %vm1936_vm14 = vweird.f32 %v5642_v17  ;;  %v2318_v0 = vmul.f32 %v2165_v13, %v7065_v23 }
 0x7b6   :  { %v2184_v34 = vsub.f32 1.0, %v2183_v11  ;;  %v1928_v30 = vsel %vm7185_vm12, %v7125_v50, %v1924_v19  ;;  %vm1935_vm12 = vweird.f32 %v7122_v32 }
 0x7b7   :  { %v2171_v44 = vadd.f32 %v5638_v47, %v2170_v33  ;;  %v1931_v28 = vmul.f32 %v5642_v17, %v1930_v14  ;;  %v1943_v50 = vmul.f32 %v1928_v30, %v1871_v56  ;;  %vm1937_vm4 = vmor %vm1935_vm12, %vm1936_vm14 }
 0x7b8   :  { %v2185_v59 = vmul.f32 %v5640_v54, %v2184_v34 }
 0x7b9   :  { %v2175_v49 = vsel %vm2174_vm3, %v5638_v47, %v2171_v44  ;;  %v1932_v40 = vmul.f32 0.5, %v1931_v28  ;;  %v1952_v29 = vmul.f32 %v6980_v10, %v1943_v50 }
 0x7ba   :  { %v2180_v43 = vsel %vm2177_vm2, %v2179_v22, %v2175_v49  ;;  %v2186_v38 = vadd.f32 %v5640_v54, %v2185_v59 }
 0x7bb   :  { %v2319_v52 = vmul.f32 %v2180_v43, %v7082_v62  ;;  %v1933_v9 = vsub.f32 1.5, %v1932_v40  ;;  %v1872_v62 = vsub.f32 %v7005_v58, %v7105_v25  ;;  %v1961_v23 = vadd.f32 %v6987_v27, %v1952_v29 }
 0x7bc   :  { %v2190_v47 = vsel %vm2189_vm13, %v5640_v54, %v2186_v38 }
 0x7bd   :  { %v2361_v63 = vpack.c.bf16 %v2319_v52, %v2317_v37  ;;  %v2195_v45 = vsel %vm2192_vm5, %v2194_v8, %v2190_v47  ;;  %v1934_v20 = vmul.f32 %v5642_v17, %v1933_v9 }
 0x7be   :  { %v2320_v6 = vmul.f32 %v2195_v45, %v7085_v24 }
 0x7bf   :  { %2471 = vmatmul.bf16.vlgmr.msrb.gmra.mxu0 %v2361_v63  ;;  %v1938_v55 = vsel %vm1937_vm4, %v5642_v17, %v1934_v20 }
 0x7c0   :  { %v2362_v15 = vpack.c.bf16 %v2320_v6, %v2318_v0  ;;  %v1944_v5 = vmul.f32 %v1938_v55, %v1872_v62 }
 0x7c2   :  { %2495 = vmatmul.bf16.vlgmr.msra.gmra.mxu1 %v2362_v15  ;;  %v1953_v1 = vmul.f32 %v6980_v10, %v1944_v5 }
 0x7c4   :  { %v1962_v24 = vadd.f32 %v6987_v27, %v1953_v1 }
 0x7c6   :  { %v1973_v56 = vpack.c.bf16 %v1962_v24, %v1961_v23 }
 0x7c8   :  { %4918 = vmatmul.msk.bf16.gmra.mxu2 %vm205_vm0, %v1973_v56  ;;  %4921 = vmatmul.msk.bf16.gmra.mxu3 %vm205_vm0, %v1973_v56 }
 0x7e1   :  { %v2043_v25 = vpop.f32.mrf.mxu2  ;;  %v2067_v32 = vpop.f32.mrf.mxu3 }
 0x7e2   :  { %v7211_v54 = vadd.f32 %v2043_v25, %v7051_v2  ;;  %v7214_v3 = vadd.f32 %v2067_v32, %v7053_v31 }
 0x7e4   :  { %v4926_v4 = vmul.f32 -1.702, %v7211_v54  ;;  %v4927_v10 = vmul.f32 -1.702, %v7214_v3 }
 0x7e6   :  { %v2109_v51 = vmul.f32 1.442695, %v4926_v4  ;;  %v2111_v46 = vmul.f32 1.442695, %v4927_v10 }
 0x7e8   :  { %5643 = vpow2.f32 %v2109_v51 }
 0x7e9   :  { %5645 = vpow2.f32 %v2111_v46  ;;  %v2045_v27 = vpop.f32.mrf.mxu2  ;;  %v2069_v7 = vpop.f32.mrf.mxu3 }
 0x7ea   :  { %v7219_v26 = vadd.f32 %v2045_v27, %v7051_v2  ;;  %v7222_v11 = vadd.f32 %v2069_v7, %v7053_v31 }
 0x7ec   :  { %v4928_v17 = vmul.f32 -1.702, %v7219_v26  ;;  %v4929_v33 = vmul.f32 -1.702, %v7222_v11 }
 0x7ee   :  { %v5644_v22 = vpop.eup %5643  ;;  %v2113_v16 = vmul.f32 1.442695, %v4928_v17  ;;  %v2115_v14 = vmul.f32 1.442695, %v4929_v33 }
 0x7ef   :  { %v5646_v34 = vpop.eup %5645  ;;  %v2129_v36 = vadd.f32 1.0, %v5644_v22 }
 0x7f0   :  { %v2130_v48 = vadd.f32 1.0, %v5646_v34  ;;  %5647 = vpow2.f32 %v2113_v16 }
 0x7f1   :  { %5649 = vrcp.f32 %v2129_v36  ;;  %vm2202_vm1 = vweird.f32 %v2129_v36  ;;  %v2206_v13 = vand.u32 2147483647, %v2129_v36  ;;  %v2208_v52 = vand.u32 2147483648, %v2129_v36 }
 0x7f2   :  { %5651 = vrcp.f32 %v2130_v48  ;;  %vm2217_vm3 = vweird.f32 %v2130_v48  ;;  %v2221_v47 = vand.u32 2147483647, %v2130_v48  ;;  %v2223_v0 = vand.u32 2147483648, %v2130_v48 }
 0x7f3   :  { %5653 = vpow2.f32 %v2115_v14  ;;  %vm2207_vm13 = vcmp.eq.f32.partialorder %v2206_v13, 8.507059e+37  ;;  %v2209_v55 = vor.u32 1.1754944e-38, %v2208_v52 }
 0x7f4   :  { %v2224_v10 = vor.u32 1.1754944e-38, %v2223_v0 }
 0x7f6   :  { %v5648_v57 = vpop.eup %5647 }
 0x7f7   :  { %v5650_v44 = vpop.eup %5649  ;;  %v2131_v21 = vadd.f32 1.0, %v5648_v57 }
 0x7f8   :  { %v5652_v19 = vpop.eup %5651  ;;  %v2198_v42 = vmul.f32 %v5650_v44, %v2129_v36  ;;  %vm2203_vm15 = vweird.f32 %v5650_v44 }
 0x7f9   :  { %v5654_v59 = vpop.eup %5653  ;;  %v2213_v28 = vmul.f32 %v5652_v19, %v2130_v48  ;;  %5655 = vrcp.f32 %v2131_v21  ;;  %v2238_v63 = vand.u32 2147483648, %v2131_v21  ;;  %vm7226_vm6 = vmor %vm2202_vm1, %vm2203_vm15  ;;  %vm2218_vm2 = vweird.f32 %v5652_v19 }
 0x7fa   :  { %v2199_v61 = vsub.f32 1.0, %v2198_v42  ;;  %v2132_v49 = vadd.f32 1.0, %v5654_v59  ;;  %v2236_v15 = vand.u32 2147483647, %v2131_v21  ;;  %vm2232_vm5 = vweird.f32 %v2131_v21  ;;  %vm7233_vm14 = vmor %vm2217_vm3, %vm2218_vm2 }
 0x7fb   :  { %v2214_v60 = vsub.f32 1.0, %v2213_v28  ;;  %v2239_v23 = vor.u32 1.1754944e-38, %v2238_v63  ;;  %vm2222_vm1 = vcmp.eq.f32.partialorder %v2221_v47, 8.507059e+37 }
 0x7fc   :  { %v2200_v43 = vmul.f32 %v5650_v44, %v2199_v61  ;;  %5657 = vrcp.f32 %v2132_v49  ;;  %v2251_v24 = vand.u32 2147483647, %v2132_v49  ;;  %v2253_v56 = vand.u32 2147483648, %v2132_v49 }
 0x7fd   :  { %v2215_v30 = vmul.f32 %v5652_v19, %v2214_v60  ;;  %vm2237_vm15 = vcmp.eq.f32.partialorder %v2236_v15, 8.507059e+37  ;;  %vm2247_vm3 = vweird.f32 %v2132_v49 }
 0x7fe   :  { %v2201_v40 = vadd.f32 %v5650_v44, %v2200_v43  ;;  %v2254_v22 = vor.u32 1.1754944e-38, %v2253_v56  ;;  %vm2252_vm2 = vcmp.eq.f32.partialorder %v2251_v24, 8.507059e+37 }
 0x7ff   :  { %v5656_v38 = vpop.eup %5655  ;;  %v2216_v50 = vadd.f32 %v5652_v19, %v2215_v30 }
 0x800   :  { %v2228_v37 = vmul.f32 %v5656_v38, %v2131_v21  ;;  %v2205_v20 = vsel %vm7226_vm6, %v5650_v44, %v2201_v40  ;;  %vm2233_vm7 = vweird.f32 %v5656_v38 }
 0x801   :  { %v2210_v25 = vsel %vm2207_vm13, %v2209_v55, %v2205_v20  ;;  %v2220_v32 = vsel %vm7233_vm14, %v5652_v19, %v2216_v50  ;;  %vm2234_vm12 = vmor %vm2232_vm5, %vm2233_vm7 }
 0x802   :  { %v5658_v8 = vpop.eup %5657  ;;  %v2229_v9 = vsub.f32 1.0, %v2228_v37  ;;  %v2321_v7 = vmul.f32 %v2210_v25, %v7211_v54  ;;  %v2225_v17 = vsel %vm2222_vm1, %v2224_v10, %v2220_v32  ;;  %v7246_v54 = vld [vmem:[%s8302_s17] ss:$0 sm:$0xff] }
 0x803   :  { %v2243_v6 = vmul.f32 %v5658_v8, %v2132_v49  ;;  %vm2248_vm4 = vweird.f32 %v5658_v8  ;;  %v2322_v14 = vmul.f32 %v2225_v17, %v7214_v3 }
 0x804   :  { %v2230_v62 = vmul.f32 %v5656_v38, %v2229_v9  ;;  %vm2249_vm6 = vmor %vm2247_vm3, %vm2248_vm4 }
 0x805   :  { %v2244_v5 = vsub.f32 1.0, %v2243_v6 }
 0x806   :  { %v2231_v1 = vadd.f32 %v5656_v38, %v2230_v62 }
 0x807   :  { %v2245_v4 = vmul.f32 %v5658_v8, %v2244_v5 }
 0x808   :  { %v2235_v51 = vsel %vm2234_vm12, %v5656_v38, %v2231_v1 }
 0x809   :  { %v2240_v46 = vsel %vm2237_vm15, %v2239_v23, %v2235_v51  ;;  %v2246_v27 = vadd.f32 %v5658_v8, %v2245_v4 }
 0x80a   :  { %v2323_v33 = vmul.f32 %v2240_v46, %v7219_v26 }
 0x80b   :  { %v2250_v16 = vsel %vm2249_vm6, %v5658_v8, %v2246_v27 }
 0x80c   :  { %v2255_v34 = vsel %vm2252_vm2, %v2254_v22, %v2250_v16  ;;  %v2363_v36 = vpack.c.bf16 %v2323_v33, %v2321_v7 }
 0x80d   :  { %v2324_v48 = vmul.f32 %v2255_v34, %v7222_v11 }
 0x80e   :  { %2476 = vmatmul.bf16.gmra.mxu0 %v2363_v36 }
 0x80f   :  { %v2364_v57 = vpack.c.bf16 %v2324_v48, %v2322_v14 }
 0x811   :  { %2500 = vmatmul.bf16.gmra.mxu1 %v2364_v57 }
 0x83c   :  { %v2472_v44 = vpop.f32.mrf.mxu0 }
 0x83f   :  { %v2496_v21 = vpop.f32.mrf.mxu1 }
 0x840   :  { %v2497_v19 = vadd.f32 %v2496_v21, %v2472_v44 }
 0x842   :  { %v2511_v26 = vadd.f32 %v2497_v19, %v6881_v53 }
 0x844   :  { %v7250_v42 = vadd.f32 %v7246_v54, %v2511_v26  ;;  %v2474_v59 = vpop.f32.mrf.mxu0 }
 0x846   :  { %v2531_v3 = vsel %vm205_vm0, %v7250_v42, 0.0  ;;  %v2555_v11 = vmul.f32 %v7250_v42, %v7250_v42 }
 0x847   :  { %v2498_v28 = vpop.f32.mrf.mxu1  ;;  %2532 = vadd.xlane.f32.xlu2 %v2531_v3 }
 0x848   :  { %v2499_v61 = vadd.f32 %v2498_v28, %v2474_v59  ;;  %v2561_v49 = vsel %vm205_vm0, %v2555_v11, 0.0 }
 0x849   :  { %2562 = vadd.xlane.f32.xlu0 %v2561_v49 }
 0x84a   :  { %v2512_v60 = vadd.f32 %v2499_v61, %v6890_v41 }
 0x84b   :  { %v2048_v43 = vpop.f32.mrf.mxu2  ;;  %v2072_v38 = vpop.f32.mrf.mxu3 }
 0x84c   :  { %v7259_v53 = vadd.f32 %v7246_v54, %v2512_v60  ;;  %v7262_v30 = vadd.f32 %v2048_v43, %v7051_v2  ;;  %v7265_v40 = vadd.f32 %v2072_v38, %v7053_v31 }
 0x84e   :  { %v2534_v37 = vsel %vm205_vm0, %v7259_v53, 0.0  ;;  %v2556_v13 = vmul.f32 %v7259_v53, %v7259_v53  ;;  %v4930_v52 = vmul.f32 -1.702, %v7262_v30  ;;  %v4931_v41 = vmul.f32 -1.702, %v7265_v40 }
 0x84f   :  { %2535 = vadd.xlane.f32.xlu1 %v2534_v37 }
 0x850   :  { %v2564_v8 = vsel %vm205_vm0, %v2556_v13, 0.0  ;;  %v2117_v47 = vmul.f32 1.442695, %v4930_v52  ;;  %v2119_v9 = vmul.f32 1.442695, %v4931_v41 }
 0x851   :  { %2565 = vadd.xlane.f32.xlu2 %v2564_v8 }
 0x852   :  { %5659 = vpow2.f32 %v2117_v47 }
 0x853   :  { %5661 = vpow2.f32 %v2119_v9  ;;  %v2050_v63 = vpop.f32.mrf.mxu2  ;;  %v2074_v45 = vpop.f32.mrf.mxu3 }
 0x854   :  { %v7275_v50 = vadd.f32 %v2050_v63, %v7051_v2  ;;  %v7278_v0 = vadd.f32 %v2074_v45, %v7053_v31 }
 0x856   :  { %v4932_v6 = vmul.f32 -1.702, %v7275_v50  ;;  %v4933_v20 = vmul.f32 -1.702, %v7278_v0 }
 0x858   :  { %v5660_v62 = vpop.eup %5659  ;;  %v2121_v15 = vmul.f32 1.442695, %v4932_v6  ;;  %v2123_v29 = vmul.f32 1.442695, %v4933_v20 }
 0x859   :  { %v5662_v55 = vpop.eup %5661  ;;  %v2133_v5 = vadd.f32 1.0, %v5660_v62 }
 0x85a   :  { %v2134_v1 = vadd.f32 1.0, %v5662_v55  ;;  %5663 = vpow2.f32 %v2121_v15 }
 0x85b   :  { %5665 = vrcp.f32 %v2133_v5  ;;  %vm2262_vm13 = vweird.f32 %v2133_v5  ;;  %v2266_v22 = vand.u32 2147483647, %v2133_v5  ;;  %v2268_v16 = vand.u32 2147483648, %v2133_v5 }
 0x85c   :  { %5667 = vrcp.f32 %v2134_v1  ;;  %vm2277_vm5 = vweird.f32 %v2134_v1  ;;  %v2281_v36 = vand.u32 2147483647, %v2134_v1  ;;  %v2283_v21 = vand.u32 2147483648, %v2134_v1 }
 0x85d   :  { %5669 = vpow2.f32 %v2123_v29  ;;  %vm2267_vm15 = vcmp.eq.f32.partialorder %v2266_v22, 8.507059e+37  ;;  %v2269_v11 = vor.u32 1.1754944e-38, %v2268_v16 }
 0x85e   :  { %v2284_v41 = vor.u32 1.1754944e-38, %v2283_v21 }
 0x860   :  { %v5664_v23 = vpop.eup %5663 }
 0x861   :  { %v5666_v2 = vpop.eup %5665  ;;  %v2135_v24 = vadd.f32 1.0, %v5664_v23 }
 0x862   :  { %v5668_v56 = vpop.eup %5667  ;;  %v2258_v31 = vmul.f32 %v5666_v2, %v2133_v5  ;;  %vm2263_vm7 = vweird.f32 %v5666_v2 }
 0x863   :  { %v5670_v25 = vpop.eup %5669  ;;  %v2273_v32 = vmul.f32 %v5668_v56, %v2134_v1  ;;  %5671 = vrcp.f32 %v2135_v24  ;;  %v2298_v48 = vand.u32 2147483648, %v2135_v24  ;;  %vm7282_vm14 = vmor %vm2262_vm13, %vm2263_vm7  ;;  %vm2278_vm12 = vweird.f32 %v5668_v56 }
 0x864   :  { %v2259_v4 = vsub.f32 1.0, %v2258_v31  ;;  %v2136_v10 = vadd.f32 1.0, %v5670_v25  ;;  %v2296_v3 = vand.u32 2147483647, %v2135_v24  ;;  %vm2292_vm1 = vweird.f32 %v2135_v24  ;;  %vm7289_vm3 = vmor %vm2277_vm5, %vm2278_vm12 }
 0x865   :  { %v2274_v51 = vsub.f32 1.0, %v2273_v32  ;;  %v2299_v60 = vor.u32 1.1754944e-38, %v2298_v48  ;;  %vm2282_vm13 = vcmp.eq.f32.partialorder %v2281_v36, 8.507059e+37  ;;  %v5341_v36 = vld [vmem:[%s8293_s8 + $0x64] sm:$0xf0] }
 0x866   :  { %v2260_v46 = vmul.f32 %v5666_v2, %v2259_v4  ;;  %5673 = vrcp.f32 %v2136_v10  ;;  %v2311_v43 = vand.u32 2147483647, %v2136_v10  ;;  %v2313_v38 = vand.u32 2147483648, %v2136_v10 }
 0x867   :  { %v2275_v7 = vmul.f32 %v5668_v56, %v2274_v51  ;;  %vm2297_vm7 = vcmp.eq.f32.partialorder %v2296_v3, 8.507059e+37  ;;  %vm2307_vm5 = vweird.f32 %v2136_v10  ;;  %v5019_v3 = vld [vmem:[%s8293_s8 + $0x50] sm:$0xf] }
 0x868   :  { %v2261_v17 = vadd.f32 %v5666_v2, %v2260_v46  ;;  %v2314_v20 = vor.u32 1.1754944e-38, %v2313_v38  ;;  %vm2312_vm12 = vcmp.eq.f32.partialorder %v2311_v43, 8.507059e+37 }
 0x869   :  { %v5672_v27 = vpop.eup %5671  ;;  %v2276_v44 = vadd.f32 %v5668_v56, %v2275_v7  ;;  %v5342_v7 = vld [vmem:[%s8293_s8 + $0x74] sm:$0xf] }
 0x86a   :  { %v2288_v33 = vmul.f32 %v5672_v27, %v2135_v24  ;;  %v2265_v26 = vsel %vm7282_vm14, %v5666_v2, %v2261_v17  ;;  %vm2293_vm4 = vweird.f32 %v5672_v27 }
 0x86b   :  { %v2270_v37 = vsel %vm2267_vm15, %v2269_v11, %v2265_v26  ;;  %v2280_v13 = vsel %vm7289_vm3, %v5668_v56, %v2276_v44  ;;  %vm2294_vm6 = vmor %vm2292_vm1, %vm2293_vm4  ;;  %v5029_v44 = vld [vmem:[%s8293_s8 + $0x68] sm:$0xf0]  ;;  %v5339_v11 = vld [vmem:[%s8293_s8 + $0x54] sm:$0xf0] }
 0x86c   :  { %v5674_v34 = vpop.eup %5673  ;;  %v2289_v14 = vsub.f32 1.0, %v2288_v33  ;;  %v2325_v63 = vmul.f32 %v2270_v37, %v7262_v30  ;;  %v2285_v45 = vsel %vm2282_vm13, %v2284_v41, %v2280_v13  ;;  %v5037_v33 = vld [vmem:[%s8293_s8 + $0x78] sm:$0xf0]  ;;  %v5011_v37 = vld [vmem:[%s8293_s8 + $0x40] sm:$0xf] }
 0x86d   :  { %v2303_v19 = vmul.f32 %v5674_v34, %v2136_v10  ;;  %vm2308_vm2 = vweird.f32 %v5674_v34  ;;  %v2326_v5 = vmul.f32 %v2285_v45, %v7265_v40  ;;  %v5040_v22 = vor.u32 %v5342_v7, %v5037_v33  ;;  %v5337_v13 = vld [vmem:[%s8293_s8 + $0x44] sm:$0xf0] }
 0x86e   :  { %v2290_v59 = vmul.f32 %v5672_v27, %v2289_v14  ;;  %vm2309_vm14 = vmor %vm2307_vm5, %vm2308_vm2  ;;  %v5340_v14 = vld [vmem:[%s8293_s8 + $0x64] sm:$0xf]  ;;  %v5012_v41 = vor.u32 %v5337_v13, %v5011_v37 }
 0x86f   :  { %v2304_v28 = vsub.f32 1.0, %v2303_v19  ;;  %2789 = vmatpush.bf16.msra.mxu3 %v5040_v22  ;;  %v5032_v19 = vor.u32 %v5340_v14, %v5029_v44 }
 0x870   :  { %v2291_v49 = vadd.f32 %v5672_v27, %v2290_v59 }
 0x871   :  { %v2305_v52 = vmul.f32 %v5674_v34, %v2304_v28  ;;  %v5338_v28 = vld [vmem:[%s8293_s8 + $0x54] sm:$0xf] }
 0x872   :  { %v2295_v8 = vsel %vm2294_vm6, %v5672_v27, %v2291_v49  ;;  %v5035_v27 = vld [vmem:[%s8293_s8 + $0x70] sm:$0xf]  ;;  %v5020_v49 = vor.u32 %v5339_v11, %v5019_v3 }
 0x873   :  { %v2300_v47 = vsel %vm2297_vm7, %v2299_v60, %v2295_v8  ;;  %v2306_v9 = vadd.f32 %v5674_v34, %v2305_v52  ;;  %2790 = vmatpush.bf16.msra.mxu3 %v5032_v19  ;;  %v5021_v60 = vld [vmem:[%s8293_s8 + $0x58] sm:$0xf0]  ;;  %v5336_v8 = vld [vmem:[%s8293_s8 + $0x44] sm:$0xf] }
 0x874   :  { %v2327_v6 = vmul.f32 %v2300_v47, %v7275_v50  ;;  %v5024_v43 = vor.u32 %v5338_v28, %v5021_v60  ;;  %v5013_v47 = vld [vmem:[%s8293_s8 + $0x48] sm:$0xf0] }
 0x875   :  { %v2310_v62 = vsel %vm2309_vm14, %v5674_v34, %v2306_v9  ;;  %v5027_v34 = vld [vmem:[%s8293_s8 + $0x60] sm:$0xf] }
 0x876   :  { %v2315_v15 = vsel %vm2312_vm12, %v2314_v20, %v2310_v62  ;;  %v2365_v55 = vpack.c.bf16 %v2327_v6, %v2325_v63  ;;  %v5028_v57 = vor.u32 %v5341_v36, %v5027_v34  ;;  %v5016_v63 = vor.u32 %v5336_v8, %v5013_v47 }
 0x877   :  { %v2328_v29 = vmul.f32 %v2315_v15, %v7278_v0  ;;  %2791 = vmatpush.bf16.msra.mxu3 %v5024_v43 }
 0x878   :  { %2481 = vmatmul.bf16.gmra.mxu0 %v2365_v55 }
 0x879   :  { %v2366_v1 = vpack.c.bf16 %v2328_v29, %v2326_v5 }
 0x87b   :  { %2505 = vmatmul.bf16.gmra.mxu1 %v2366_v1  ;;  %2792 = vmatpush.bf16.msra.mxu3 %v5016_v63 }
 0x88b   :  { %v2477_v23 = vpop.f32.mrf.mxu0 }
 0x88e   :  { %v2501_v2 = vpop.f32.mrf.mxu1 }
 0x88f   :  { %v2502_v24 = vadd.f32 %v2501_v2, %v2477_v23 }
 0x891   :  { %v2513_v30 = vadd.f32 %v2502_v24, %v6908_v39 }
 0x893   :  { %v7301_v50 = vadd.f32 %v7246_v54, %v2513_v30  ;;  %v2479_v56 = vpop.f32.mrf.mxu0 }
 0x895   :  { %v2537_v31 = vsel %vm205_vm0, %v7301_v50, 0.0  ;;  %v2557_v40 = vmul.f32 %v7301_v50, %v7301_v50 }
 0x896   :  { %v2503_v25 = vpop.f32.mrf.mxu1  ;;  %2538 = vadd.xlane.f32.xlu1 %v2537_v31 }
 0x897   :  { %v2504_v0 = vadd.f32 %v2503_v25, %v2479_v56  ;;  %v2567_v32 = vsel %vm205_vm0, %v2557_v40, 0.0 }
 0x898   :  { %2568 = vadd.xlane.f32.xlu2 %v2567_v32  ;;  %v7373_v32 = vld [vmem:[%s8291_s6 + $0x1] ss:$0 sm:$0xff] }
 0x899   :  { %v2514_v4 = vadd.f32 %v2504_v0, %v6917_v12  ;;  %v5343_v12 = vld [vmem:[%s8293_s8 + $0x74] sm:$0xf0] }
 0x89a   :  { %v5036_v17 = vor.u32 %v5343_v12, %v5035_v27  ;;  %v7379_v27 = vld [vmem:[%s8292_s7 + $0x1] ss:$0 sm:$0xff] }
 0x89b   :  { %v7310_v39 = vadd.f32 %v7246_v54, %v2514_v4 }
 0x89c   :  { %2765 = vmatpush.bf16.msra.mxu2 %v5036_v17 }
 0x89d   :  { %v2540_v10 = vsel %vm205_vm0, %v7310_v39, 0.0  ;;  %v2558_v51 = vmul.f32 %v7310_v39, %v7310_v39 }
 0x89e   :  { %2541 = vadd.xlane.f32.xlu0 %v2540_v10 }
 0x89f   :  { %v2570_v46 = vsel %vm205_vm0, %v2558_v51, 0.0 }
 0x8a0   :  { %2571 = vadd.xlane.f32.xlu1 %v2570_v46  ;;  %2766 = vmatpush.bf16.msra.mxu2 %v5028_v57 }
 0x8a4   :  { %2767 = vmatpush.bf16.msra.mxu2 %v5020_v49 }
 0x8a8   :  { %2768 = vmatpush.bf16.msra.mxu2 %v5012_v41 }
 0x8ba   :  { %v2533_v16 = vpop.xlane.xlu2 %2532 }
 0x8bb   :  { %v2549_v48 = vmul.f32 %v2533_v16, %v6124_v18 }
 0x8bc   :  { %v2563_v21 = vpop.xlane.xlu0 %2562 }
 0x8bd   :  { %v2585_v26 = vmul.f32 %v2549_v48, %v2549_v48  ;;  %v2579_v59 = vmul.f32 %v2563_v21, %v6124_v18  ;;  %v2597_v25 = vsub.f32 %v7250_v42, %v2549_v48 }
 0x8bf   :  { %v2591_v61 = vsub.f32 %v2579_v59, %v2585_v26 }
 0x8c1   :  { %v2603_v38 = vadd.f32 1e-05, %v2591_v61 }
 0x8c2   :  { %v2536_v52 = vpop.xlane.xlu1 %2535 }
 0x8c3   :  { %5675 = vrsqrt.f32 %v2603_v38  ;;  %v2550_v9 = vmul.f32 %v2536_v52, %v6124_v18  ;;  %vm2615_vm15 = vweird.f32 %v2603_v38 }
 0x8c4   :  { %v2566_v45 = vpop.xlane.xlu2 %2565 }
 0x8c5   :  { %v2586_v6 = vmul.f32 %v2550_v9, %v2550_v9  ;;  %v2580_v20 = vmul.f32 %v2566_v45, %v6124_v18  ;;  %v2598_v51 = vsub.f32 %v7259_v53, %v2550_v9 }
 0x8c7   :  { %v2592_v62 = vsub.f32 %v2580_v20, %v2586_v6 }
 0x8c9   :  { %v5676_v15 = vpop.eup %5675  ;;  %v2604_v55 = vadd.f32 1e-05, %v2592_v62 }
 0x8ca   :  { %v2610_v5 = vmul.f32 %v5676_v15, %v2603_v38  ;;  %vm2616_vm4 = vweird.f32 %v5676_v15 }
 0x8cb   :  { %5677 = vrsqrt.f32 %v2604_v55  ;;  %vm2617_vm1 = vmor %vm2615_vm15, %vm2616_vm4  ;;  %vm2625_vm6 = vweird.f32 %v2604_v55 }
 0x8cc   :  { %v2611_v29 = vmul.f32 %v5676_v15, %v2610_v5 }
 0x8ce   :  { %v2612_v1 = vmul.f32 0.5, %v2611_v29 }
 0x8d0   :  { %v2613_v23 = vsub.f32 1.5, %v2612_v1 }
 0x8d1   :  { %v5678_v2 = vpop.eup %5677 }
 0x8d2   :  { %v2614_v24 = vmul.f32 %v5676_v15, %v2613_v23  ;;  %v2620_v30 = vmul.f32 %v5678_v2, %v2604_v55  ;;  %vm2626_vm3 = vweird.f32 %v5678_v2 }
 0x8d3   :  { %vm2627_vm2 = vmor %vm2625_vm6, %vm2626_vm3 }
 0x8d4   :  { %v2621_v56 = vmul.f32 %v5678_v2, %v2620_v30  ;;  %v2618_v31 = vsel %vm2617_vm1, %v5676_v15, %v2614_v24 }
 0x8d5   :  { %v2669_v4 = vmul.f32 %v2618_v31, %v2597_v25 }
 0x8d6   :  { %v2622_v40 = vmul.f32 0.5, %v2621_v56 }
 0x8d7   :  { %v2678_v12 = vmul.f32 %v7373_v32, %v2669_v4 }
 0x8d8   :  { %v2623_v0 = vsub.f32 1.5, %v2622_v40 }
 0x8d9   :  { %v2687_v33 = vadd.f32 %v7379_v27, %v2678_v12 }
 0x8da   :  { %v2624_v10 = vmul.f32 %v5678_v2, %v2623_v0 }
 0x8dc   :  { %v2628_v46 = vsel %vm2627_vm2, %v5678_v2, %v2624_v10 }
 0x8dd   :  { %v2670_v7 = vmul.f32 %v2628_v46, %v2598_v51 }
 0x8df   :  { %v2679_v17 = vmul.f32 %v7373_v32, %v2670_v7 }
 0x8e1   :  { %v2688_v22 = vadd.f32 %v7379_v27, %v2679_v17  ;;  %v5008_v17 = vld [vmem:[%s8294_s9 + $0x2] sm:$0x3]  ;;  %s8348_s9 = smov 32  }
 0x8e3   :  { %v2702_v16 = vpack.c.bf16 %v2688_v22, %v2687_v33 }
 0x8e5   :  { %5041 = vmatmul.msk.bf16.vlgmr.msra.gmra.mxu2 %vm205_vm0, %v2702_v16  ;;  %5044 = vmatmul.msk.bf16.vlgmr.msra.gmra.mxu3 %vm205_vm0, %v2702_v16  ;;  %v7420_v16 = vperm.slane %v5008_v17, 0 }
 0x8f5   :  { %v2482_v34 = vpop.f32.mrf.mxu0 }
 0x8f8   :  { %v2506_v36 = vpop.f32.mrf.mxu1 }
 0x8f9   :  { %v2507_v14 = vadd.f32 %v2506_v36, %v2482_v34  ;;  %v7422_v34 = vperm.slane %v5008_v17, 1 }
 0x8fb   :  { %v2515_v48 = vadd.f32 %v2507_v14, %v6996_v35 }
 0x8fd   :  { %v7389_v57 = vadd.f32 %v7246_v54, %v2515_v48  ;;  %v2484_v44 = vpop.f32.mrf.mxu0 }
 0x8ff   :  { %v2543_v21 = vsel %vm205_vm0, %v7389_v57, 0.0  ;;  %v2559_v19 = vmul.f32 %v7389_v57, %v7389_v57 }
 0x900   :  { %v2508_v26 = vpop.f32.mrf.mxu1  ;;  %2544 = vadd.xlane.f32.xlu0 %v2543_v21 }
 0x901   :  { %v2509_v59 = vadd.f32 %v2508_v26, %v2484_v44  ;;  %v2573_v3 = vsel %vm205_vm0, %v2559_v19, 0.0 }
 0x902   :  { %2574 = vadd.xlane.f32.xlu1 %v2573_v3 }
 0x903   :  { %v2516_v11 = vadd.f32 %v2509_v59, %v7005_v58 }
 0x905   :  { %v7398_v35 = vadd.f32 %v7246_v54, %v2516_v11 }
 0x907   :  { %v2546_v28 = vsel %vm205_vm0, %v7398_v35, 0.0  ;;  %v2560_v61 = vmul.f32 %v7398_v35, %v7398_v35 }
 0x908   :  { %2547 = vadd.xlane.f32.xlu2 %v2546_v28 }
 0x909   :  { %v2539_v49 = vpop.xlane.xlu1 %2538  ;;  %v2576_v60 = vsel %vm205_vm0, %v2560_v61, 0.0 }
 0x90a   :  { %v2551_v43 = vmul.f32 %v2539_v49, %v6124_v18  ;;  %2577 = vadd.xlane.f32.xlu0 %v2576_v60 }
 0x90b   :  { %v2569_v38 = vpop.xlane.xlu2 %2568 }
 0x90c   :  { %v2587_v37 = vmul.f32 %v2551_v43, %v2551_v43  ;;  %v2581_v58 = vmul.f32 %v2569_v38, %v6124_v18  ;;  %v2599_v30 = vsub.f32 %v7301_v50, %v2551_v43 }
 0x90e   :  { %v2593_v13 = vsub.f32 %v2581_v58, %v2587_v37 }
 0x910   :  { %v2605_v54 = vadd.f32 1e-05, %v2593_v13 }
 0x911   :  { %v2542_v52 = vpop.xlane.xlu0 %2541 }
 0x912   :  { %5679 = vrsqrt.f32 %v2605_v54  ;;  %v2552_v41 = vmul.f32 %v2542_v52, %v6124_v18  ;;  %vm2635_vm13 = vweird.f32 %v2605_v54 }
 0x913   :  { %v2572_v8 = vpop.xlane.xlu1 %2571 }
 0x914   :  { %v2588_v47 = vmul.f32 %v2552_v41, %v2552_v41  ;;  %v2582_v9 = vmul.f32 %v2572_v8, %v6124_v18  ;;  %v2600_v25 = vsub.f32 %v7310_v39, %v2552_v41 }
 0x916   :  { %v2594_v63 = vsub.f32 %v2582_v9, %v2588_v47 }
 0x918   :  { %v5680_v45 = vpop.eup %5679  ;;  %v2606_v6 = vadd.f32 1e-05, %v2594_v63 }
 0x919   :  { %v2630_v20 = vmul.f32 %v5680_v45, %v2605_v54  ;;  %vm2636_vm7 = vweird.f32 %v5680_v45 }
 0x91a   :  { %5681 = vrsqrt.f32 %v2606_v6  ;;  %vm2637_vm5 = vmor %vm2635_vm13, %vm2636_vm7  ;;  %vm2645_vm12 = vweird.f32 %v2606_v6 }
 0x91b   :  { %v2631_v62 = vmul.f32 %v5680_v45, %v2630_v20 }
 0x91d   :  { %v2632_v15 = vmul.f32 0.5, %v2631_v62 }
 0x91f   :  { %v2633_v55 = vsub.f32 1.5, %v2632_v15 }
 0x920   :  { %v5682_v5 = vpop.eup %5681 }
 0x921   :  { %v2634_v29 = vmul.f32 %v5680_v45, %v2633_v55  ;;  %v2640_v1 = vmul.f32 %v5682_v5, %v2606_v6  ;;  %vm2646_vm14 = vweird.f32 %v5682_v5 }
 0x922   :  { %vm2647_vm4 = vmor %vm2645_vm12, %vm2646_vm14 }
 0x923   :  { %v2641_v23 = vmul.f32 %v5682_v5, %v2640_v1  ;;  %v2638_v2 = vsel %vm2637_vm5, %v5680_v45, %v2634_v29 }
 0x924   :  { %v2671_v31 = vmul.f32 %v2638_v2, %v2599_v30 }
 0x925   :  { %v2642_v24 = vmul.f32 0.5, %v2641_v23 }
 0x926   :  { %v2680_v10 = vmul.f32 %v7373_v32, %v2671_v31 }
 0x927   :  { %v2643_v56 = vsub.f32 1.5, %v2642_v24 }
 0x928   :  { %v2689_v46 = vadd.f32 %v7379_v27, %v2680_v10 }
 0x929   :  { %v2644_v40 = vmul.f32 %v5682_v5, %v2643_v56 }
 0x92b   :  { %v2648_v0 = vsel %vm2647_vm4, %v5682_v5, %v2644_v40 }
 0x92c   :  { %v2672_v4 = vmul.f32 %v2648_v0, %v2600_v25 }
 0x92e   :  { %v2681_v51 = vmul.f32 %v7373_v32, %v2672_v4 }
 0x930   :  { %v2690_v12 = vadd.f32 %v7379_v27, %v2681_v51 }
 0x932   :  { %v2703_v7 = vpack.c.bf16 %v2690_v12, %v2689_v46 }
 0x934   :  { %5042 = vmatmul.msk.bf16.gmra.mxu2 %vm205_vm0, %v2703_v7  ;;  %5045 = vmatmul.msk.bf16.gmra.mxu3 %vm205_vm0, %v2703_v7 }
 0x968   :  { %v2770_v33 = vpop.f32.mrf.mxu2  ;;  %v2794_v22 = vpop.f32.mrf.mxu3 }
 0x969   :  { %v2771_v36 = vadd.f32 %v2770_v33, %v7420_v16  ;;  %v2795_v14 = vadd.f32 %v2794_v22, %v7422_v34 }
 0x96b   :  { %v2809_v21 = vpack.c.bf16 %v2795_v14, %v2771_v36 }
 0x96d   :  { %v2818_v11 = vunpack.c.l.b16 %v2809_v21  ;;  %v2898_v60 = vunpack.c.h.b16 %v2809_v21 }
 0x970   :  { %v2772_v48 = vpop.f32.mrf.mxu2  ;;  %v2796_v44 = vpop.f32.mrf.mxu3 }
 0x971   :  { %v2773_v19 = vadd.f32 %v2772_v48, %v7420_v16  ;;  %v2797_v26 = vadd.f32 %v2796_v44, %v7422_v34 }
 0x973   :  { %v2810_v59 = vpack.c.bf16 %v2797_v26, %v2773_v19  ;;  %v2545_v3 = vpop.xlane.xlu0 %2544 }
 0x974   :  { %v2553_v49 = vmul.f32 %v2545_v3, %v6124_v18 }
 0x975   :  { %v2819_v28 = vunpack.c.l.b16 %v2810_v59  ;;  %v2899_v61 = vunpack.c.h.b16 %v2810_v59  ;;  %v2575_v43 = vpop.xlane.xlu1 %2574 }
 0x976   :  { %v2589_v37 = vmul.f32 %v2553_v49, %v2553_v49  ;;  %v2583_v58 = vmul.f32 %v2575_v43, %v6124_v18  ;;  %v2601_v56 = vsub.f32 %v7389_v57, %v2553_v49 }
 0x977   :  { %v7429_v38 = vpack.c.b16 %v2819_v28, %v2818_v11  ;;  %v7432_v13 = vpack.c.b16 %v2899_v61, %v2898_v60 }
 0x978   :  { %v2595_v54 = vsub.f32 %v2583_v58, %v2589_v37 }
 0x979   :  { %2935 = vrot.lane.b32.xlu0 %v7429_v38, %s5875_s4 }
 0x97a   :  { %v2607_v52 = vadd.f32 1e-05, %v2595_v54 }
 0x97b   :  { %v2548_v41 = vpop.xlane.xlu2 %2547 }
 0x97c   :  { %5683 = vrsqrt.f32 %v2607_v52  ;;  %v2554_v8 = vmul.f32 %v2548_v41, %v6124_v18  ;;  %vm2655_vm1 = vweird.f32 %v2607_v52 }
 0x97d   :  { %v2578_v47 = vpop.xlane.xlu0 %2577 }
 0x97e   :  { %v2590_v9 = vmul.f32 %v2554_v8, %v2554_v8  ;;  %v2584_v63 = vmul.f32 %v2578_v47, %v6124_v18  ;;  %v2602_v0 = vsub.f32 %v7398_v35, %v2554_v8 }
 0x980   :  { %v2596_v45 = vsub.f32 %v2584_v63, %v2590_v9 }
 0x981   :  { %2823 = vrot.lane.b32.xlu0 %v7429_v38, %s5873_s29 }
 0x982   :  { %v5684_v6 = vpop.eup %5683  ;;  %v2608_v20 = vadd.f32 1e-05, %v2596_v45 }
 0x983   :  { %v2650_v62 = vmul.f32 %v5684_v6, %v2607_v52  ;;  %vm2656_vm15 = vweird.f32 %v5684_v6 }
 0x984   :  { %5685 = vrsqrt.f32 %v2608_v20  ;;  %vm2657_vm3 = vmor %vm2655_vm1, %vm2656_vm15  ;;  %vm2665_vm2 = vweird.f32 %v2608_v20 }
 0x985   :  { %v2651_v15 = vmul.f32 %v5684_v6, %v2650_v62 }
 0x987   :  { %v2652_v55 = vmul.f32 0.5, %v2651_v15 }
 0x989   :  { %v2653_v5 = vsub.f32 1.5, %v2652_v55 }
 0x98a   :  { %v5686_v29 = vpop.eup %5685 }
 0x98b   :  { %v2654_v1 = vmul.f32 %v5684_v6, %v2653_v5  ;;  %v2660_v23 = vmul.f32 %v5686_v29, %v2608_v20  ;;  %vm2666_vm6 = vweird.f32 %v5686_v29 }
 0x98c   :  { %vm2667_vm7 = vmor %vm2665_vm2, %vm2666_vm6 }
 0x98d   :  { %v2661_v2 = vmul.f32 %v5686_v29, %v2660_v23  ;;  %v2658_v24 = vsel %vm2657_vm3, %v5684_v6, %v2654_v1 }
 0x98e   :  { %v2673_v40 = vmul.f32 %v2658_v24, %v2601_v56 }
 0x98f   :  { %v2662_v30 = vmul.f32 0.5, %v2661_v2 }
 0x990   :  { %v2682_v51 = vmul.f32 %v7373_v32, %v2673_v40 }
 0x991   :  { %v2663_v31 = vsub.f32 1.5, %v2662_v30 }
 0x992   :  { %v2691_v12 = vadd.f32 %v7379_v27, %v2682_v51 }
 0x993   :  { %v2664_v25 = vmul.f32 %v5686_v29, %v2663_v31 }
 0x995   :  { %v2668_v4 = vsel %vm2667_vm7, %v5686_v29, %v2664_v25 }
 0x996   :  { %v2674_v10 = vmul.f32 %v2668_v4, %v2602_v0 }
 0x998   :  { %v2683_v46 = vmul.f32 %v7373_v32, %v2674_v10 }
 0x99a   :  { %v2692_v7 = vadd.f32 %v7379_v27, %v2683_v46 }
 0x99c   :  { %v2704_v17 = vpack.c.bf16 %v2692_v7, %v2691_v12 }
 0x99e   :  { %5043 = vmatmul.msk.bf16.gmra.mxu2 %vm205_vm0, %v2704_v17  ;;  %5046 = vmatmul.msk.bf16.gmra.mxu3 %vm205_vm0, %v2704_v17 }
 0x9b7   :  { %v2775_v33 = vpop.f32.mrf.mxu2  ;;  %v2799_v22 = vpop.f32.mrf.mxu3 }
 0x9b8   :  { %v2776_v36 = vadd.f32 %v2775_v33, %v7420_v16  ;;  %v2800_v14 = vadd.f32 %v2799_v22, %v7422_v34 }
 0x9ba   :  { %v2811_v48 = vpack.c.bf16 %v2800_v14, %v2776_v36 }
 0x9bc   :  { %v2820_v44 = vunpack.c.l.b16 %v2811_v48  ;;  %v2900_v1 = vunpack.c.h.b16 %v2811_v48 }
 0x9be   :  { %v7450_v21 = vpack.c.b16 %v2820_v44, %v2820_v44  ;;  %v2902_v23 = vpack.c.b16 %v2900_v1, %v2900_v1 }
 0x9bf   :  { %v2777_v32 = vpop.f32.mrf.mxu2  ;;  %v2801_v27 = vpop.f32.mrf.mxu3 }
 0x9c0   :  { %2933 = vrot.lane.b32.xlu0 %v7450_v21, %s5874_s0  ;;  %2825 = vrot.lane.b32.xlu1 %v7450_v21, %s5873_s29  ;;  %v2778_v59 = vadd.f32 %v2777_v32, %v7420_v16  ;;  %v2802_v3 = vadd.f32 %v2801_v27, %v7422_v34  ;;  %v2911_v40 = vsel %vm819_vm8, %v2902_v23, 0 }
 0x9c1   :  { %2937 = vrot.lane.b32.xlu2 %v7450_v21, %s5875_s4 }
 0x9c2   :  { %v7479_v49 = vpack.c.bf16 %v2802_v3, %v2778_v59 }
 0x9c4   :  { %v3312_v52 = vunpack.c.l.b16 %v7479_v49  ;;  %v3392_v46 = vunpack.c.h.b16 %v7479_v49 }
 0x9c8   :  { %3157 = vrot.lane.b32.xlu0 %v7429_v38, %s5876_s30  ;;  %3048 = vrot.lane.b32.xlu1 %v7450_v21, %s8348_s9 }
 0x9c9   :  { %2931 = vrot.lane.b32.xlu2 %v7429_v38, %s5874_s0 }
 0x9d0   :  { %3044 = vrot.lane.b32.xlu0 %v7450_v21, %s8349_s26  ;;  %3046 = vrot.lane.b32.xlu1 %v7429_v38, %s8348_s9 }
 0x9d1   :  { %3159 = vrot.lane.b32.xlu2 %v7450_v21, %s5876_s30 }
 0x9d8   :  { %3153 = vrot.lane.b32.xlu1 %v7429_v38, %s8350_s28 }
 0x9d9   :  { %3042 = vrot.lane.b32.xlu2 %v7429_v38, %s8349_s26 }
 0x9e0   :  { %3155 = vrot.lane.b32.xlu1 %v7450_v21, %s8350_s28 }
 0x9eb   :  { %v2936_v11 = vpop.permute.xlu0 %2935 }
 0x9ec   :  { %v2946_v58 = vsel %vm731_vm9, %v2936_v11, 0 }
 0x9f3   :  { %v2824_v63 = vpop.permute.xlu0 %2823 }
 0x9f4   :  { %v2834_v30 = vsel %vm731_vm9, %v2824_v63, 0 }
 0xa1b   :  { %v2938_v19 = vpop.permute.xlu2 %2937 }
 0xa1c   :  { %v2949_v26 = vsel %vm731_vm9, %v2938_v19, 0 }
 0xa1d   :  { %2957 = vmatpush.bf16.xpose.msrb.mxu1 %v2949_v26 }
 0xa21   :  { %v2780_v28 = vpop.f32.mrf.mxu2  ;;  %v2804_v61 = vpop.f32.mrf.mxu3 }
 0xa22   :  { %v2781_v60 = vadd.f32 %v2780_v28, %v7420_v16  ;;  %v2805_v43 = vadd.f32 %v2804_v61, %v7422_v34  ;;  %v7565_v28 = vld [vmem:[%s8329_s1] ss:$0 sm:$0xff] }
 0xa23   :  { %v2932_v37 = vpop.permute.xlu2 %2931 }
 0xa24   :  { %v7484_v54 = vpack.c.bf16 %v2805_v43, %v2781_v60 }
 0xa25   :  { %2958 = vmatpush.bf16.xpose.msrb.mxu1 %v2946_v58 }
 0xa26   :  { %v3313_v41 = vunpack.c.l.b16 %v7484_v54  ;;  %v3393_v51 = vunpack.c.h.b16 %v7484_v54 }
 0xa28   :  { %v7488_v8 = vpack.c.b16 %v3313_v41, %v3312_v52  ;;  %v7545_v7 = vpack.c.b16 %v3393_v51, %v3392_v46 }
 0xa29   :  { %v2782_v47 = vpop.f32.mrf.mxu2  ;;  %v2806_v9 = vpop.f32.mrf.mxu3 }
 0xa2a   :  { %v2783_v45 = vadd.f32 %v2782_v47, %v7420_v16  ;;  %v2807_v6 = vadd.f32 %v2806_v9, %v7422_v34  ;;  %3429 = vrot.lane.b32.xlu1 %v7488_v8, %s5875_s4 }
 0xa2b   :  { %v3160_v20 = vpop.permute.xlu2 %3159 }
 0xa2c   :  { %v2814_v62 = vpack.c.bf16 %v2807_v6, %v2783_v45  ;;  %v3171_v15 = vsel %vm731_vm9, %v3160_v20, 0  ;;  %5051 = vmatmul.msk.bf16.vlgmr.msrb.gmra.mxu1 %vm731_vm9, %v2932_v37 }
 0xa2d   :  { %3179 = vmatpush.bf16.xpose.msra.mxu1 %v3171_v15 }
 0xa2e   :  { %v3314_v55 = vunpack.c.l.b16 %v2814_v62 }
 0xa30   :  { %v7496_v5 = vpack.c.b16 %v3314_v55, %v3314_v55 }
 0xa32   :  { %3431 = vrot.lane.b32.xlu0 %v7496_v5, %s5875_s4  ;;  %3319 = vrot.lane.b32.xlu2 %v7496_v5, %s5873_s29  ;;  %v2934_v16 = vpop.permute.xlu0 %2933  ;;  %v2826_v34 = vpop.permute.xlu1 %2825 }
 0xa33   :  { %3427 = vrot.lane.b32.xlu1 %v7496_v5, %s5874_s0  ;;  %v2837_v29 = vsel %vm731_vm9, %v2826_v34, 0  ;;  %v3043_v10 = vpop.permute.xlu2 %3042 }
 0xa34   :  { %2845 = vmatpush.bf16.xpose.msra.mxu0 %v2837_v29 }
 0xa3a   :  { %3425 = vrot.lane.b32.xlu0 %v7488_v8, %s5874_s0  ;;  %3317 = vrot.lane.b32.xlu2 %v7488_v8, %s5873_s29  ;;  %v3158_v2 = vpop.permute.xlu0 %3157  ;;  %v3049_v24 = vpop.permute.xlu1 %3048 }
 0xa3b   :  { %3651 = vrot.lane.b32.xlu1 %v7488_v8, %s5876_s30  ;;  %v3168_v56 = vsel %vm731_vm9, %v3158_v2, 0  ;;  %v3060_v31 = vsel %vm731_vm9, %v3049_v24, 0 }
 0xa3c   :  { %5052 = vmatmul.msk.bf16.gmra.mxu1 %vm731_vm9, %v2934_v16  ;;  %2846 = vmatpush.bf16.xpose.msra.mxu0 %v2834_v30 }
 0xa3d   :  { %3068 = vmatpush.bf16.xpose.msrb.mxu3 %v3060_v31  ;;  %3180 = vmatpush.bf16.xpose.msra.mxu1 %v3168_v56 }
 0xa42   :  { %3653 = vrot.lane.b32.xlu0 %v7496_v5, %s5876_s30  ;;  %v3047_v25 = vpop.permute.xlu1 %3046  ;;  %3542 = vrot.lane.b32.xlu2 %v7496_v5, %s8348_s9  ;;  %v3045_v17 = vpop.permute.xlu0 %3044 }
 0xa43   :  { %3010 = vrot.lane.b32.xlu1 %v7432_v13, %s5874_s0  ;;  %v3057_v0 = vsel %vm731_vm9, %v3047_v25, 0  ;;  %5047 = vmatmul.msk.bf16.vlgmr.msra.gmra.mxu0 %vm731_vm9, %v7429_v38  ;;  %v3394_v38 = vunpack.c.h.b16 %v2814_v62 }
 0xa44   :  { %2919 = vmatpush.bf16.msrb.mxu0 %v2911_v40 }
 0xa45   :  { %3069 = vmatpush.bf16.xpose.msrb.mxu3 %v3057_v0  ;;  %v7543_v12 = vpack.c.b16 %v3394_v38, %v3394_v38 }
 0xa48   :  { %2920 = vmatpush.bf16.msrb.mxu0 %v7432_v13 }
 0xa4a   :  { %3536 = vrot.lane.b32.xlu0 %v7488_v8, %s8349_s26  ;;  %v3154_v4 = vpop.permute.xlu1 %3153  ;;  %3540 = vrot.lane.b32.xlu2 %v7488_v8, %s8348_s9 }
 0xa4b   :  { %3232 = vrot.lane.b32.xlu1 %v7432_v13, %s8350_s28 }
 0xa4c   :  { %5055 = vmatmul.msk.bf16.vlgmr.msrb.gmra.mxu3 %vm731_vm9, %v3043_v10  ;;  %5059 = vmatmul.msk.bf16.vlgmr.msra.gmra.mxu1 %vm731_vm9, %v3154_v4 }
 0xa52   :  { %3234 = vrot.lane.b32.xlu0 %v2902_v23, %s8350_s28  ;;  %3647 = vrot.lane.b32.xlu2 %v7488_v8, %s8350_s28 }
 0xa53   :  { %3121 = vrot.lane.b32.xlu1 %v7432_v13, %s8349_s26  ;;  %5048 = vmatmul.msk.bf16.gmra.mxu0 %vm731_vm9, %v7450_v21  ;;  %v3156_v13 = vpop.permute.xlu1 %3155 }
 0xa5a   :  { %3506 = vrot.lane.b32.xlu0 %v7543_v12, %s5874_s0  ;;  %3012 = vrot.lane.b32.xlu2 %v2902_v23, %s5874_s0 }
 0xa5b   :  { %3504 = vrot.lane.b32.xlu1 %v7545_v7, %s5874_s0 }
 0xa5c   :  { %5056 = vmatmul.msk.bf16.gmra.mxu3 %vm731_vm9, %v3045_v17  ;;  %5060 = vmatmul.msk.bf16.gmra.mxu1 %vm731_vm9, %v3156_v13 }
 0xa62   :  { %3123 = vrot.lane.b32.xlu2 %v2902_v23, %s8349_s26 }
 0xa8c   :  { %v3320_v33 = vpop.permute.xlu2 %3319 }
 0xa8d   :  { %v3331_v22 = vsel %vm731_vm9, %v3320_v33, 0 }
 0xa8e   :  { %3339 = vmatpush.bf16.xpose.msra.mxu3 %v3331_v22 }
 0xa94   :  { %v3318_v36 = vpop.permute.xlu2 %3317 }
 0xa95   :  { %v3328_v14 = vsel %vm731_vm9, %v3318_v36, 0 }
 0xa96   :  { %3340 = vmatpush.bf16.xpose.msra.mxu3 %v3328_v14 }
 0xa9c   :  { %v3430_v48 = vpop.permute.xlu1 %3429  ;;  %v3543_v44 = vpop.permute.xlu2 %3542 }
 0xa9d   :  { %5063 = vmatmul.msk.bf16.vlgmr.msra.gmra.mxu3 %vm731_vm9, %v7488_v8  ;;  %v3554_v21 = vsel %vm731_vm9, %v3543_v44, 0  ;;  %v3440_v60 = vsel %vm731_vm9, %v3430_v48, 0 }
 0xa9e   :  { %3562 = vmatpush.bf16.xpose.msrb.mxu3 %v3554_v21 }
 0xaa4   :  { %v3432_v32 = vpop.permute.xlu0 %3431  ;;  %v3541_v26 = vpop.permute.xlu2 %3540 }
 0xaa5   :  { %v3443_v27 = vsel %vm731_vm9, %v3432_v32, 0  ;;  %v3428_v19 = vpop.permute.xlu1 %3427  ;;  %v3551_v59 = vsel %vm731_vm9, %v3541_v26, 0 }
 0xaa6   :  { %3451 = vmatpush.bf16.xpose.msrb.mxu1 %v3443_v27  ;;  %3563 = vmatpush.bf16.xpose.msrb.mxu3 %v3551_v59 }
 0xaa9   :  { %v2960_v3 = vpop.f32.mrf.mxu1 }
 0xaaa   :  { %v2969_v11 = vmul.f32 0.25, %v2960_v3 }
 0xaac   :  { %v7568_v61 = vadd.f32 %v7565_v28, %v2969_v11  ;;  %v3426_v49 = vpop.permute.xlu0 %3425  ;;  %v3648_v37 = vpop.permute.xlu2 %3647 }
 0xaad   :  { %v3652_v43 = vpop.permute.xlu1 %3651  ;;  %5064 = vmatmul.msk.bf16.gmra.mxu3 %vm731_vm9, %v7496_v5 }
 0xaae   :  { %3452 = vmatpush.bf16.xpose.msrb.mxu1 %v3440_v60  ;;  %v2975_v58 = vsel %vm771_vm10, %v7568_v61, -inf  ;;  %v3662_v16 = vsel %vm731_vm9, %v3652_v43, 0 }
 0xaaf   :  { %2976 = vmax.xlane.f32.xlu1 %v2975_v58 }
 0xab1   :  { %v2962_v54 = vpop.f32.mrf.mxu1 }
 0xab2   :  { %v2970_v52 = vmul.f32 0.25, %v2962_v54 }
 0xab4   :  { %v7576_v41 = vadd.f32 %v7565_v28, %v2970_v52  ;;  %v3654_v8 = vpop.permute.xlu0 %3653  ;;  %v3013_v63 = vpop.permute.xlu2 %3012 }
 0xab5   :  { %v3665_v47 = vsel %vm731_vm9, %v3654_v8, 0  ;;  %v3011_v9 = vpop.permute.xlu1 %3010  ;;  %5067 = vmatmul.msk.bf16.vlgmr.msrb.gmra.mxu1 %vm731_vm9, %v3426_v49  ;;  %v3022_v45 = vsel %vm819_vm8, %v3013_v63, 0 }
 0xab6   :  { %3673 = vmatpush.bf16.xpose.msra.mxu1 %v3665_v47  ;;  %v2978_v6 = vsel %vm771_vm10, %v7576_v41, -inf  ;;  %3030 = vmatpush.bf16.msrb.mxu2 %v3022_v45 }
 0xab7   :  { %2979 = vmax.xlane.f32.xlu0 %v2978_v6 }
 0xab9   :  { %v2965_v20 = vpop.f32.mrf.mxu1 }
 0xaba   :  { %v2971_v62 = vmul.f32 0.25, %v2965_v20  ;;  %3031 = vmatpush.bf16.msrb.mxu2 %v3011_v9 }
 0xabc   :  { %v7584_v15 = vadd.f32 %v7565_v28, %v2971_v62  ;;  %v3537_v55 = vpop.permute.xlu0 %3536  ;;  %v3124_v29 = vpop.permute.xlu2 %3123 }
 0xabd   :  { %v3233_v34 = vpop.permute.xlu1 %3232  ;;  %5071 = vmatmul.msk.bf16.vlgmr.msrb.gmra.mxu3 %vm731_vm9, %v3537_v55  ;;  %v3133_v1 = vsel %vm819_vm8, %v3124_v29, 0 }
 0xabe   :  { %3674 = vmatpush.bf16.xpose.msra.mxu1 %v3662_v16  ;;  %v2981_v23 = vsel %vm771_vm10, %v7584_v15, -inf  ;;  %3141 = vmatpush.bf16.msra.mxu0 %v3133_v1 }
 0xabf   :  { %2982 = vmax.xlane.f32.xlu0 %v2981_v23 }
 0xac0   :  { %v2848_v2 = vpop.f32.mrf.mxu0 }
 0xac1   :  { %v2967_v24 = vpop.f32.mrf.mxu1  ;;  %v2857_v30 = vmul.f32 0.25, %v2848_v2 }
 0xac3   :  { %v7592_v56 = vadd.f32 %v7565_v28, %v2857_v30 }
 0xac4   :  { %v3235_v31 = vpop.permute.xlu0 %3234 }
 0xac5   :  { %v3244_v40 = vsel %vm819_vm8, %v3235_v31, 0  ;;  %v3122_v25 = vpop.permute.xlu1 %3121  ;;  %5068 = vmatmul.msk.bf16.gmra.mxu1 %vm731_vm9, %v3428_v19  ;;  %v2863_v0 = vsel %vm771_vm10, %v7592_v56, -inf }
 0xac6   :  { %3142 = vmatpush.bf16.msra.mxu0 %v3122_v25  ;;  %3252 = vmatpush.bf16.msra.mxu2 %v3244_v40 }
 0xac7   :  { %2864 = vmax.xlane.f32.xlu2 %v2863_v0 }
 0xac8   :  { %v2850_v4 = vpop.f32.mrf.mxu0 }
 0xac9   :  { %v3182_v10 = vpop.f32.mrf.mxu1  ;;  %v2858_v38 = vmul.f32 0.25, %v2850_v4 }
 0xaca   :  { %3253 = vmatpush.bf16.msra.mxu2 %v3233_v34  ;;  %v3191_v54 = vmul.f32 0.25, %v3182_v10 }
 0xacb   :  { %v7599_v51 = vadd.f32 %v7565_v28, %v2858_v38 }
 0xacc   :  { %v7629_v52 = vadd.f32 %v7565_v28, %v3191_v54  ;;  %v7648_v23 = vpop.permute.xlu0 %3506 }
 0xacd   :  { %v2866_v46 = vsel %vm771_vm10, %v7599_v51, -inf  ;;  %v7660_v4 = vpop.permute.xlu1 %3504 }
 0xace   :  { %2867 = vmax.xlane.f32.xlu1 %v2866_v46  ;;  %v3197_v8 = vsel %vm771_vm10, %v7629_v52, -inf }
 0xacf   :  { %v3071_v17 = vpop.f32.mrf.mxu3 }
 0xad0   :  { %v3080_v13 = vmul.f32 0.25, %v3071_v17  ;;  %v2853_v33 = vpop.f32.mrf.mxu0 }
 0xad1   :  { %v3184_v22 = vpop.f32.mrf.mxu1  ;;  %v2859_v14 = vmul.f32 0.25, %v2853_v33 }
 0xad2   :  { %v7604_v36 = vadd.f32 %v7565_v28, %v3080_v13  ;;  %v3192_v45 = vmul.f32 0.25, %v3184_v22 }
 0xad3   :  { %v7610_v21 = vadd.f32 %v7565_v28, %v2859_v14 }
 0xad4   :  { %v3086_v48 = vsel %vm771_vm10, %v7604_v36, -inf }
 0xad5   :  { %3087 = vmax.xlane.f32.xlu2 %v3086_v48  ;;  %5075 = vmatmul.msk.bf16.vlgmr.msra.gmra.mxu1 %vm731_vm9, %v3648_v37  ;;  %v2869_v59 = vsel %vm771_vm10, %v7610_v21, -inf }
 0xad7   :  { %v3073_v44 = vpop.f32.mrf.mxu3 }
 0xad8   :  { %v3081_v32 = vmul.f32 0.25, %v3073_v44  ;;  %v2855_v27 = vpop.f32.mrf.mxu0 }
 0xad9   :  { %v3187_v19 = vpop.f32.mrf.mxu1 }
 0xada   :  { %v7613_v26 = vadd.f32 %v7565_v28, %v3081_v32  ;;  %v3193_v16 = vmul.f32 0.25, %v3187_v19 }
 0xadc   :  { %v3089_v3 = vsel %vm771_vm10, %v7613_v26, -inf  ;;  %v7651_v2 = vadd.f32 %v7565_v28, %v3193_v16 }
 0xadd   :  { %2870 = vmax.xlane.f32.xlu2 %v2869_v59  ;;  %3090 = vmax.xlane.f32.xlu1 %v3089_v3 }
 0xade   :  { %v3203_v25 = vsel %vm771_vm10, %v7651_v2, -inf }
 0xadf   :  { %v3076_v11 = vpop.f32.mrf.mxu3 }
 0xae0   :  { %v3082_v49 = vmul.f32 0.25, %v3076_v11 }
 0xae1   :  { %v3189_v60 = vpop.f32.mrf.mxu1 }
 0xae2   :  { %v7620_v43 = vadd.f32 %v7565_v28, %v3082_v49 }
 0xae4   :  { %v3092_v37 = vsel %vm771_vm10, %v7620_v43, -inf }
 0xae5   :  { %3093 = vmax.xlane.f32.xlu0 %v3092_v37 }
 0xae7   :  { %v3078_v58 = vpop.f32.mrf.mxu3 }
 0xaf5   :  { %3538 = vrot.lane.b32.xlu2 %v7496_v5, %s8349_s26 }
 0xaf6   :  { %3649 = vrot.lane.b32.xlu1 %v7496_v5, %s8350_s28  ;;  %v7639_v5 = vadd.f32 %v7565_v28, %v3192_v45 }
 0xaf8   :  { %v3200_v34 = vsel %vm771_vm10, %v7639_v5, -inf }
 0xb20   :  { %3198 = vmax.xlane.f32.xlu1 %v3197_v8  ;;  %v3342_v47 = vpop.f32.mrf.mxu3 }
 0xb21   :  { %v3351_v9 = vmul.f32 0.25, %v3342_v47 }
 0xb22   :  { %v2977_v44 = vpop.xlane.xlu1 %2976 }
 0xb23   :  { %v7634_v63 = vadd.f32 %v7565_v28, %v3351_v9 }
 0xb25   :  { %v3357_v6 = vsel %vm771_vm10, %v7634_v63, -inf }
 0xb26   :  { %3358 = vmax.xlane.f32.xlu0 %v3357_v6 }
 0xb28   :  { %v3344_v20 = vpop.f32.mrf.mxu3 }
 0xb29   :  { %v3352_v62 = vmul.f32 0.25, %v3344_v20 }
 0xb2a   :  { %v2980_v38 = vpop.xlane.xlu0 %2979 }
 0xb2b   :  { %v7642_v55 = vadd.f32 %v7565_v28, %v3352_v62  ;;  %v2985_v22 = vsub.f32 %v7576_v41, %v2980_v38 }
 0xb2d   :  { %v3360_v29 = vsel %vm771_vm10, %v7642_v55, -inf  ;;  %v2989_v27 = vmul.f32 1.442695, %v2985_v22 }
 0xb2e   :  { %3201 = vmax.xlane.f32.xlu0 %v3200_v34  ;;  %3361 = vmax.xlane.f32.xlu1 %v3360_v29 }
 0xb30   :  { %v3347_v1 = vpop.f32.mrf.mxu3 }
 0xb31   :  { %v3353_v24 = vmul.f32 0.25, %v3347_v1 }
 0xb32   :  { %v3454_v30 = vpop.f32.mrf.mxu1 }
 0xb33   :  { %v7654_v31 = vadd.f32 %v7565_v28, %v3353_v24  ;;  %v3463_v40 = vmul.f32 0.25, %v3454_v30 }
 0xb35   :  { %v3363_v0 = vsel %vm771_vm10, %v7654_v31, -inf  ;;  %v7663_v46 = vadd.f32 %v7565_v28, %v3463_v40  ;;  %v2984_v40 = vsub.f32 %v7568_v61, %v2977_v44 }
 0xb36   :  { %3204 = vmax.xlane.f32.xlu0 %v3203_v25  ;;  %3364 = vmax.xlane.f32.xlu2 %v3363_v0 }
 0xb37   :  { %v3469_v48 = vsel %vm771_vm10, %v7663_v46, -inf }
 0xb38   :  { %v3349_v10 = vpop.f32.mrf.mxu3 }
 0xb39   :  { %v2987_v10 = vmul.f32 1.442695, %v2984_v40 }
 0xb3a   :  { %v3456_v17 = vpop.f32.mrf.mxu1  ;;  %v2865_v13 = vpop.xlane.xlu2 %2864 }
 0xb3b   :  { %v2872_v33 = vsub.f32 %v7592_v56, %v2865_v13  ;;  %v3464_v56 = vmul.f32 0.25, %v3456_v17 }
 0xb3d   :  { %v2875_v14 = vmul.f32 1.442695, %v2872_v33  ;;  %v7679_v58 = vadd.f32 %v7565_v28, %v3464_v56 }
 0xb3e   :  { %3470 = vmax.xlane.f32.xlu0 %v3469_v48 }
 0xb3f   :  { %5687 = vpow2.f32 %v2875_v14  ;;  %v3472_v45 = vsel %vm771_vm10, %v7679_v58, -inf }
 0xb40   :  { %v3565_v32 = vpop.f32.mrf.mxu3  ;;  %5689 = vpow2.f32 %v2989_v27 }
 0xb41   :  { %v3574_v19 = vmul.f32 0.25, %v3565_v32  ;;  %v2868_v60 = vpop.xlane.xlu1 %2867 }
 0xb42   :  { %v3459_v59 = vpop.f32.mrf.mxu1  ;;  %v2873_v13 = vsub.f32 %v7599_v51, %v2868_v60 }
 0xb43   :  { %v7670_v3 = vadd.f32 %v7565_v28, %v3574_v19  ;;  %v3465_v24 = vmul.f32 0.25, %v3459_v59  ;;  %v2983_v19 = vpop.xlane.xlu0 %2982 }
 0xb44   :  { %v2877_v32 = vmul.f32 1.442695, %v2873_v13 }
 0xb45   :  { %v7672_v11 = vpop.eup %5687  ;;  %v3580_v41 = vsel %vm771_vm10, %v7670_v3, -inf  ;;  %v7695_v0 = vadd.f32 %v7565_v28, %v3465_v24 }
 0xb46   :  { %3581 = vmax.xlane.f32.xlu0 %v3580_v41  ;;  %v2881_v49 = vsel %vm771_vm10, %v7672_v11, 0.0  ;;  %v7681_v47 = vpop.eup %5689 }
 0xb47   :  { %2882 = vadd.xlane.f32.xlu1 %v2881_v49  ;;  %v2996_v6 = vsel %vm771_vm10, %v7681_v47, 0.0  ;;  %v3475_v14 = vsel %vm771_vm10, %v7695_v0, -inf }
 0xb48   :  { %v3088_v37 = vpop.xlane.xlu2 %3087  ;;  %v3567_v54 = vpop.f32.mrf.mxu3 }
 0xb49   :  { %v3575_v9 = vmul.f32 0.25, %v3567_v54  ;;  %v3095_v48 = vsub.f32 %v7604_v36, %v3088_v37  ;;  %v2986_v36 = vsub.f32 %v7584_v15, %v2983_v19 }
 0xb4a   :  { %v3461_v8 = vpop.f32.mrf.mxu1 }
 0xb4b   :  { %v7688_v16 = vadd.f32 %v7565_v28, %v3575_v9  ;;  %v3098_v27 = vmul.f32 1.442695, %v3095_v48  ;;  %v2991_v8 = vmul.f32 1.442695, %v2986_v36 }
 0xb4d   :  { %v3583_v30 = vsel %vm771_vm10, %v7688_v16, -inf }
 0xb4e   :  { %3473 = vmax.xlane.f32.xlu0 %v3472_v45 }
 0xb4f   :  { %2997 = vadd.xlane.f32.xlu1 %v2996_v6 }
 0xb50   :  { %v3091_v20 = vpop.xlane.xlu1 %3090  ;;  %v2871_v62 = vpop.xlane.xlu2 %2870 }
 0xb51   :  { %v3096_v34 = vsub.f32 %v7613_v26, %v3091_v20  ;;  %v2874_v56 = vsub.f32 %v7610_v21, %v2871_v62 }
 0xb52   :  { %v3676_v29 = vpop.f32.mrf.mxu1 }
 0xb53   :  { %v3100_v1 = vmul.f32 1.442695, %v3096_v34  ;;  %v3685_v22 = vmul.f32 0.25, %v3676_v29  ;;  %v2879_v60 = vmul.f32 1.442695, %v2874_v56 }
 0xb55   :  { %5691 = vpow2.f32 %v3100_v1  ;;  %v7712_v51 = vadd.f32 %v7565_v28, %v3685_v22 }
 0xb56   :  { %3584 = vmax.xlane.f32.xlu0 %v3583_v30  ;;  %5693 = vpow2.f32 %v2987_v10 }
 0xb57   :  { %5695 = vpow2.f32 %v2877_v32  ;;  %v3691_v41 = vsel %vm771_vm10, %v7712_v51, -inf }
 0xb58   :  { %v3539_v25 = vpop.permute.xlu2 %3538  ;;  %5697 = vpow2.f32 %v3098_v27  ;;  %v3094_v9 = vpop.xlane.xlu0 %3093 }
 0xb59   :  { %5072 = vmatmul.msk.bf16.gmra.mxu3 %vm731_vm9, %v3539_v25  ;;  %5699 = vpow2.f32 %v2879_v60  ;;  %v3097_v45 = vsub.f32 %v7620_v43, %v3094_v9 }
 0xb5a   :  { %v3678_v38 = vpop.f32.mrf.mxu1  ;;  %5701 = vpow2.f32 %v2991_v8 }
 0xb5b   :  { %v7698_v17 = vpop.eup %5691  ;;  %v3686_v26 = vmul.f32 0.25, %v3678_v38  ;;  %v3102_v62 = vmul.f32 1.442695, %v3097_v45 }
 0xb5c   :  { %v3107_v33 = vsel %vm771_vm10, %v7698_v17, 0.0  ;;  %v7714_v59 = vpop.eup %5693 }
 0xb5d   :  { %v7704_v61 = vadd.f32 %v7565_v28, %v3686_v26  ;;  %3108 = vadd.xlane.f32.xlu1 %v3107_v33  ;;  %v2993_v49 = vsel %vm771_vm10, %v7714_v59, 0.0  ;;  %v7723_v54 = vpop.eup %5695  ;;  %5703 = vpow2.f32 %v3102_v62 }
 0xb5e   :  { %3476 = vmax.xlane.f32.xlu0 %v3475_v14  ;;  %v7725_v21 = vpop.eup %5697  ;;  %v2884_v15 = vsel %vm771_vm10, %v7723_v54, 0.0 }
 0xb5f   :  { %v3694_v44 = vsel %vm771_vm10, %v7704_v61, -inf  ;;  %v3104_v6 = vsel %vm771_vm10, %v7725_v21, 0.0  ;;  %v7732_v20 = vpop.eup %5699 }
 0xb60   :  { %3695 = vmax.xlane.f32.xlu2 %v3694_v44  ;;  %v7734_v34 = vpop.eup %5701  ;;  %v2887_v29 = vsel %vm771_vm10, %v7732_v20, 0.0 }
 0xb61   :  { %v2999_v1 = vsel %vm771_vm10, %v7734_v34, 0.0 }
 0xb63   :  { %v7740_v43 = vpop.eup %5703 }
 0xb64   :  { %v3110_v24 = vsel %vm771_vm10, %v7740_v43, 0.0 }
 0xb66   :  { %3692 = vmax.xlane.f32.xlu0 %v3691_v41 }
 0xb68   :  { %v3650_v37 = vpop.permute.xlu1 %3649  ;;  %2994 = vadd.xlane.f32.xlu2 %v2993_v49 }
 0xb69   :  { %5076 = vmatmul.msk.bf16.gmra.mxu1 %vm731_vm9, %v3650_v37 }
 0xb6e   :  { %2885 = vadd.xlane.f32.xlu0 %v2884_v15 }
 0xb70   :  { %3105 = vadd.xlane.f32.xlu2 %v3104_v6 }
 0xb76   :  { %2888 = vadd.xlane.f32.xlu0 %v2887_v29 }
 0xb78   :  { %3000 = vadd.xlane.f32.xlu2 %v2999_v1 }
 0xb80   :  { %3111 = vadd.xlane.f32.xlu2 %v3110_v24 }
 0xb93   :  { %v3199_v30 = vpop.xlane.xlu1 %3198 }
 0xb94   :  { %v3206_v40 = vsub.f32 %v7629_v52, %v3199_v30 }
 0xb96   :  { %v3209_v25 = vmul.f32 1.442695, %v3206_v40 }
 0xb98   :  { %5705 = vpow2.f32 %v3209_v25 }
 0xb99   :  { %v3359_v10 = vpop.xlane.xlu0 %3358 }
 0xb9a   :  { %v3366_v38 = vsub.f32 %v7634_v63, %v3359_v10 }
 0xb9c   :  { %v3369_v26 = vmul.f32 1.442695, %v3366_v38 }
 0xb9e   :  { %v7746_v13 = vpop.eup %5705  ;;  %5707 = vpow2.f32 %v3369_v26 }
 0xb9f   :  { %v3215_v33 = vsel %vm771_vm10, %v7746_v13, 0.0 }
 0xba0   :  { %3216 = vadd.xlane.f32.xlu0 %v3215_v33 }
 0xba1   :  { %v3202_v22 = vpop.xlane.xlu0 %3201  ;;  %v3362_v14 = vpop.xlane.xlu1 %3361 }
 0xba2   :  { %v3207_v48 = vsub.f32 %v7639_v5, %v3202_v22  ;;  %v3367_v44 = vsub.f32 %v7642_v55, %v3362_v14 }
 0xba4   :  { %v7752_v52 = vpop.eup %5707  ;;  %v3211_v32 = vmul.f32 1.442695, %v3207_v48  ;;  %v3371_v27 = vmul.f32 1.442695, %v3367_v44 }
 0xba5   :  { %v3375_v63 = vsel %vm771_vm10, %v7752_v52, 0.0 }
 0xba6   :  { %5709 = vpow2.f32 %v3211_v32  ;;  %3376 = vadd.xlane.f32.xlu1 %v3375_v63 }
 0xba7   :  { %5711 = vpow2.f32 %v3371_v27 }
 0xba9   :  { %v3205_v19 = vpop.xlane.xlu0 %3204  ;;  %v3365_v56 = vpop.xlane.xlu2 %3364 }
 0xbaa   :  { %v3208_v41 = vsub.f32 %v7651_v2, %v3205_v19  ;;  %v3368_v36 = vsub.f32 %v7654_v31, %v3365_v56 }
 0xbac   :  { %v7758_v49 = vpop.eup %5709  ;;  %v3213_v5 = vmul.f32 1.442695, %v3208_v41  ;;  %v3373_v55 = vmul.f32 1.442695, %v3368_v36 }
 0xbad   :  { %v7760_v60 = vpop.eup %5711  ;;  %v3218_v37 = vsel %vm771_vm10, %v7758_v49, 0.0 }
 0xbae   :  { %5713 = vpow2.f32 %v3213_v5  ;;  %v3378_v8 = vsel %vm771_vm10, %v7760_v60, 0.0  ;;  %3219 = vadd.xlane.f32.xlu0 %v3218_v37 }
 0xbaf   :  { %5715 = vpow2.f32 %v3373_v55  ;;  %3379 = vadd.xlane.f32.xlu2 %v3378_v8 }
 0xbb1   :  { %v3471_v9 = vpop.xlane.xlu0 %3470 }
 0xbb2   :  { %v3478_v2 = vsub.f32 %v7663_v46, %v3471_v9 }
 0xbb4   :  { %v7767_v31 = vpop.eup %5713  ;;  %v3481_v15 = vmul.f32 1.442695, %v3478_v2 }
 0xbb5   :  { %v7769_v45 = vpop.eup %5715  ;;  %v3221_v6 = vsel %vm771_vm10, %v7767_v31, 0.0 }
 0xbb6   :  { %5717 = vpow2.f32 %v3481_v15  ;;  %3222 = vadd.xlane.f32.xlu1 %v3221_v6  ;;  %v3381_v62 = vsel %vm771_vm10, %v7769_v45, 0.0 }
 0xbb7   :  { %3382 = vadd.xlane.f32.xlu0 %v3381_v62 }
 0xbb9   :  { %v7775_v29 = vpop.xlane.xlu0 %3581 }
 0xbba   :  { %v2883_v33 = vpop.xlane.xlu1 %2882 }
 0xbbc   :  { %v7777_v1 = vpop.eup %5717 }
 0xbbd   :  { %v3487_v46 = vsel %vm771_vm10, %v7777_v1, 0.0 }
 0xbbf   :  { %3488 = vadd.xlane.f32.xlu0 %v3487_v46 }
 0xbc1   :  { %v3474_v24 = vpop.xlane.xlu0 %3473 }
 0xbc2   :  { %v3479_v30 = vsub.f32 %v7679_v58, %v3474_v24  ;;  %v2998_v27 = vpop.xlane.xlu1 %2997 }
 0xbc4   :  { %v3483_v40 = vmul.f32 1.442695, %v3479_v30 }
 0xbc6   :  { %5719 = vpow2.f32 %v3483_v40  ;;  %v3516_v40 = vsel %vm819_vm8, %v7648_v23, 0  ;;  %v3405_v23 = vsel %vm819_vm8, %v7543_v12, 0 }
 0xbc9   :  { %v3585_v25 = vpop.xlane.xlu0 %3584 }
 0xbca   :  { %v3590_v10 = vsub.f32 %v7688_v16, %v3585_v25 }
 0xbcc   :  { %v7783_v38 = vpop.eup %5719  ;;  %v3594_v26 = vmul.f32 1.442695, %v3590_v10 }
 0xbcd   :  { %v3490_v22 = vsel %vm771_vm10, %v7783_v38, 0.0 }
 0xbce   :  { %5721 = vpow2.f32 %v3594_v26  ;;  %3491 = vadd.xlane.f32.xlu2 %v3490_v22  ;;  %v3589_v26 = vsub.f32 %v7670_v3, %v7775_v29 }
 0xbcf   :  { %3617 = vrot.lane.b32.xlu1 %v7543_v12, %s8349_s26 }
 0xbd1   :  { %v3477_v14 = vpop.xlane.xlu0 %3476 }
 0xbd2   :  { %v3480_v58 = vsub.f32 %v7695_v0, %v3477_v14 }
 0xbd3   :  { %3728 = vrot.lane.b32.xlu0 %v7543_v12, %s8350_s28  ;;  %v3696_v48 = vpop.xlane.xlu2 %3695 }
 0xbd4   :  { %v7792_v16 = vpop.eup %5721  ;;  %v3485_v44 = vmul.f32 1.442695, %v3480_v58  ;;  %v3701_v25 = vsub.f32 %v7704_v61, %v3696_v48  ;;  %v3592_v61 = vmul.f32 1.442695, %v3589_v26 }
 0xbd5   :  { %v3601_v32 = vsel %vm771_vm10, %v7792_v16, 0.0 }
 0xbd6   :  { %5723 = vpow2.f32 %v3485_v44  ;;  %3602 = vadd.xlane.f32.xlu2 %v3601_v32 }
 0xbd7   :  { %5725 = vrcp.f32 %v2998_v27 }
 0xbd9   :  { %v3693_v63 = vpop.xlane.xlu0 %3692 }
 0xbda   :  { %v3700_v19 = vsub.f32 %v7712_v51, %v3693_v63 }
 0xbdb   :  { %v2995_v56 = vpop.xlane.xlu2 %2994 }
 0xbdc   :  { %v7797_v41 = vpop.eup %5723  ;;  %v3703_v0 = vmul.f32 1.442695, %v3700_v19  ;;  %5727 = vrcp.f32 %v2995_v56  ;;  %v7799_v36 = vpop.f32.mrf.mxu3 }
 0xbdd   :  { %v3493_v5 = vsel %vm771_vm10, %v7797_v41, 0.0  ;;  %v5726_v55 = vpop.eup %5725 }
 0xbde   :  { %5729 = vpow2.f32 %v3703_v0  ;;  %3494 = vadd.xlane.f32.xlu2 %v3493_v5  ;;  %v3006_v9 = vmul.f32 %v5726_v55, %v7681_v47 }
 0xbdf   :  { %5731 = vrcp.f32 %v2883_v33  ;;  %v3705_v33 = vmul.f32 1.442695, %v3701_v25 }
 0xbe1   :  { %v2886_v37 = vpop.xlane.xlu0 %2885 }
 0xbe2   :  { %v5728_v8 = vpop.eup %5727  ;;  %5733 = vrcp.f32 %v2886_v37 }
 0xbe3   :  { %v3005_v51 = vmul.f32 %v5728_v8, %v7714_v59  ;;  %v3106_v2 = vpop.xlane.xlu2 %3105 }
 0xbe4   :  { %v7805_v15 = vpop.eup %5729  ;;  %v3572_v6 = vpop.f32.mrf.mxu3 }
 0xbe5   :  { %v3008_v62 = vpack.c.bf16 %v3006_v9, %v3005_v51  ;;  %v3709_v46 = vsel %vm771_vm10, %v7805_v15, 0.0  ;;  %v5732_v24 = vpop.eup %5731 }
 0xbe6   :  { %v3681_v30 = vpop.f32.mrf.mxu1  ;;  %3710 = vadd.xlane.f32.xlu2 %v3709_v46  ;;  %v2893_v59 = vmul.f32 %v5732_v24, %v7672_v11 }
 0xbe7   :  { %5053 = vmatmul.msk.bf16.vlgmr.msrb.gmra.mxu2 %vm771_vm10, %v3008_v62  ;;  %v3687_v63 = vmul.f32 0.25, %v3681_v30 }
 0xbe8   :  { %v5734_v47 = vpop.eup %5733  ;;  %3524 = vmatpush.bf16.msrb.mxu2 %v3516_v40 }
 0xbe9   :  { %v2894_v10 = vmul.f32 %v5734_v47, %v7723_v54  ;;  %v2889_v14 = vpop.xlane.xlu0 %2888 }
 0xbeb   :  { %v2896_v22 = vpack.c.bf16 %v2894_v10, %v2893_v59  ;;  %v3001_v58 = vpop.xlane.xlu2 %3000 }
 0xbec   :  { %3525 = vmatpush.bf16.msrb.mxu2 %v7660_v4  ;;  %5735 = vrcp.f32 %v3001_v58 }
 0xbed   :  { %5049 = vmatmul.msk.bf16.vlgmr.msrb.gmra.mxu0 %vm771_vm10, %v2896_v22  ;;  %5737 = vrcp.f32 %v2889_v14 }
 0xbee   :  { %3413 = vmatpush.bf16.msrb.mxu0 %v3405_v23  ;;  %v3683_v11 = vpop.f32.mrf.mxu1  ;;  %5739 = vpow2.f32 %v3705_v33 }
 0xbef   :  { %5741 = vpow2.f32 %v3592_v61 }
 0xbf0   :  { %5743 = vrcp.f32 %v3106_v2 }
 0xbf2   :  { %v5736_v54 = vpop.eup %5735  ;;  %3414 = vmatpush.bf16.msrb.mxu0 %v7545_v7 }
 0xbf3   :  { %v3007_v3 = vmul.f32 %v5736_v54, %v7734_v34  ;;  %v5738_v29 = vpop.eup %5737  ;;  %v3109_v34 = vpop.xlane.xlu1 %3108 }
 0xbf4   :  { %v7823_v48 = vpop.eup %5739  ;;  %v2895_v44 = vmul.f32 %v5738_v29, %v7732_v20  ;;  %5745 = vrcp.f32 %v3109_v34  ;;  %v7837_v20 = vadd.f32 %v7565_v28, %v3687_v63  ;;  %v3112_v9 = vpop.xlane.xlu2 %3111 }
 0xbf5   :  { %v3009_v4 = vpack.c.bf16 %v3007_v3, %v3007_v3  ;;  %v3712_v12 = vsel %vm771_vm10, %v7823_v48, 0.0  ;;  %v7829_v32 = vpop.eup %5741  ;;  %5747 = vrcp.f32 %v3112_v9 }
 0xbf6   :  { %v2897_v27 = vpack.c.bf16 %v2895_v44, %v2895_v44  ;;  %v3598_v19 = vsel %vm771_vm10, %v7829_v32, 0.0  ;;  %v5744_v56 = vpop.eup %5743  ;;  %v3697_v0 = vsel %vm771_vm10, %v7837_v20, -inf }
 0xbf7   :  { %5054 = vmatmul.msk.bf16.gmra.mxu2 %vm771_vm10, %v3009_v4  ;;  %v3116_v55 = vmul.f32 %v5744_v56, %v7725_v21 }
 0xbf9   :  { %3713 = vadd.xlane.f32.xlu1 %v3712_v12 }
 0xbfa   :  { %v5746_v5 = vpop.eup %5745 }
 0xbfb   :  { %v3117_v37 = vmul.f32 %v5746_v5, %v7698_v17  ;;  %v5748_v51 = vpop.eup %5747 }
 0xbfc   :  { %v3118_v2 = vmul.f32 %v5748_v51, %v7740_v43 }
 0xbfd   :  { %3599 = vadd.xlane.f32.xlu0 %v3598_v19  ;;  %5050 = vmatmul.msk.bf16.gmra.mxu0 %vm771_vm10, %v2897_v27  ;;  %v3119_v8 = vpack.c.bf16 %v3117_v37, %v3116_v55 }
 0xbfe   :  { %3726 = vrot.lane.b32.xlu2 %v7545_v7, %s8350_s28  ;;  %v3120_v62 = vpack.c.bf16 %v3118_v2, %v3118_v2 }
 0xc05   :  { %3698 = vmax.xlane.f32.xlu0 %v3697_v0 }
 0xc0d   :  { %5057 = vmatmul.msk.bf16.vlgmr.msra.gmra.mxu0 %vm771_vm10, %v3119_v8 }
 0xc12   :  { %3615 = vrot.lane.b32.xlu1 %v7545_v7, %s8349_s26 }
 0xc13   :  { %v3217_v6 = vpop.xlane.xlu0 %3216 }
 0xc14   :  { %5749 = vrcp.f32 %v3217_v6 }
 0xc19   :  { %v3377_v46 = vpop.xlane.xlu1 %3376 }
 0xc1a   :  { %5751 = vrcp.f32 %v3377_v46  ;;  %v5750_v24 = vpop.eup %5749 }
 0xc1b   :  { %v3227_v7 = vmul.f32 %v5750_v24, %v7746_v13 }
 0xc1d   :  { %5058 = vmatmul.msk.bf16.gmra.mxu0 %vm771_vm10, %v3120_v62 }
 0xc20   :  { %v5752_v30 = vpop.eup %5751 }
 0xc21   :  { %v3220_v21 = vpop.xlane.xlu0 %3219  ;;  %v3387_v43 = vmul.f32 %v5752_v30, %v7752_v52 }
 0xc22   :  { %5753 = vrcp.f32 %v3220_v21  ;;  %v3380_v17 = vpop.xlane.xlu2 %3379 }
 0xc23   :  { %5755 = vrcp.f32 %v3380_v17 }
 0xc28   :  { %v5754_v40 = vpop.eup %5753 }
 0xc29   :  { %v5756_v25 = vpop.eup %5755  ;;  %v3228_v47 = vmul.f32 %v5754_v40, %v7758_v49  ;;  %v3223_v26 = vpop.xlane.xlu1 %3222 }
 0xc2a   :  { %v3388_v59 = vmul.f32 %v5756_v25, %v7760_v60  ;;  %v3383_v22 = vpop.xlane.xlu0 %3382  ;;  %5757 = vrcp.f32 %v3223_v26 }
 0xc2b   :  { %v3230_v10 = vpack.c.bf16 %v3228_v47, %v3227_v7  ;;  %5759 = vrcp.f32 %v3383_v22 }
 0xc2c   :  { %v3390_v33 = vpack.c.bf16 %v3388_v59, %v3387_v43 }
 0xc2d   :  { %5061 = vmatmul.msk.bf16.vlgmr.msra.gmra.mxu2 %vm771_vm10, %v3230_v10 }
 0xc2e   :  { %5065 = vmatmul.msk.bf16.vlgmr.msrb.gmra.mxu0 %vm771_vm10, %v3390_v33 }
 0xc30   :  { %v5758_v14 = vpop.eup %5757 }
 0xc31   :  { %v5760_v58 = vpop.eup %5759  ;;  %v3229_v13 = vmul.f32 %v5758_v14, %v7767_v31 }
 0xc32   :  { %v3389_v49 = vmul.f32 %v5760_v58, %v7769_v45  ;;  %v3489_v11 = vpop.xlane.xlu0 %3488  ;;  %v3576_v58 = vmul.f32 0.25, %v7799_v36 }
 0xc33   :  { %v3231_v23 = vpack.c.bf16 %v3229_v13, %v3229_v13  ;;  %5761 = vrcp.f32 %v3489_v11 }
 0xc34   :  { %v3391_v52 = vpack.c.bf16 %v3389_v49, %v3389_v49  ;;  %v3579_v49 = vadd.f32 %v7565_v28, %v3576_v58 }
 0xc39   :  { %v5762_v29 = vpop.eup %5761 }
 0xc3a   :  { %v3499_v4 = vmul.f32 %v5762_v29, %v7777_v1 }
 0xc3d   :  { %5062 = vmatmul.msk.bf16.gmra.mxu2 %vm771_vm10, %v3231_v23 }
 0xc3e   :  { %5066 = vmatmul.msk.bf16.gmra.mxu0 %vm771_vm10, %v3391_v52  ;;  %v3586_v52 = vsel %vm771_vm10, %v3579_v49, -inf }
 0xc41   :  { %v3618_v60 = vpop.permute.xlu1 %3617  ;;  %v3492_v61 = vpop.xlane.xlu2 %3491 }
 0xc42   :  { %v3627_v54 = vsel %vm819_vm8, %v3618_v60, 0  ;;  %5763 = vrcp.f32 %v3492_v61 }
 0xc43   :  { %3635 = vmatpush.bf16.msra.mxu0 %v3627_v54 }
 0xc45   :  { %v3729_v3 = vpop.permute.xlu0 %3728 }
 0xc46   :  { %v3738_v31 = vsel %vm819_vm8, %v3729_v3, 0  ;;  %vm8351_vm8 = vcmask 392192  }
 0xc47   :  { %3746 = vmatpush.bf16.msra.mxu2 %v3738_v31  ;;  %vm8352_vm13 = vmmov %vm8351_vm8 }
 0xc48   :  { %v5764_v45 = vpop.eup %5763  ;;  %vm8353_vm5 = vmmov %vm8351_vm8 }
 0xc49   :  { %v3500_v44 = vmul.f32 %v5764_v45, %v7783_v38  ;;  %v3603_v12 = vpop.xlane.xlu2 %3602  ;;  %v5347_v45 = vld [vmem:[%s8295_s10 + $0x38] sm:$0xff]  ;;  %vm8354_vm14 = vmmov %vm8353_vm5 }
 0xc4a   :  { %3852 = vmatpush.bf16.msra.mxu3 %v5347_v45 }
 0xc4b   :  { %v3502_v27 = vpack.c.bf16 %v3500_v44, %v3499_v4  ;;  %v5346_v4 = vld [vmem:[%s8295_s10 + $0x30] sm:$0xff]  ;;  %v5345_v44 = vld [vmem:[%s8295_s10 + $0x28] sm:$0xff] }
 0xc4d   :  { %5069 = vmatmul.msk.bf16.vlgmr.msrb.gmra.mxu2 %vm771_vm10, %v3502_v27 }
 0xc4e   :  { %3853 = vmatpush.bf16.msra.mxu3 %v5346_v4 }
 0xc51   :  { %v3495_v63 = vpop.xlane.xlu2 %3494 }
 0xc52   :  { %5765 = vrcp.f32 %v3495_v63  ;;  %3854 = vmatpush.bf16.msra.mxu3 %v5345_v44 }
 0xc58   :  { %v5766_v19 = vpop.eup %5765 }
 0xc59   :  { %v3501_v34 = vmul.f32 %v5766_v19, %v7797_v41  ;;  %v3711_v56 = vpop.xlane.xlu2 %3710 }
 0xc5a   :  { %5767 = vrcp.f32 %v3711_v56 }
 0xc5b   :  { %v3503_v0 = vpack.c.bf16 %v3501_v34, %v3501_v34 }
 0xc5d   :  { %5070 = vmatmul.msk.bf16.gmra.mxu2 %vm771_vm10, %v3503_v0 }
 0xc60   :  { %v5768_v37 = vpop.eup %5767 }
 0xc61   :  { %v3727_v5 = vpop.permute.xlu2 %3726  ;;  %v3721_v41 = vmul.f32 %v5768_v37, %v7805_v15 }
 0xc62   :  { %3747 = vmatpush.bf16.msra.mxu2 %v3727_v5 }
 0xc6a   :  { %v7865_v55 = vpop.f32.mrf.mxu0  ;;  %v3033_v1 = vpop.f32.mrf.mxu2 }
 0xc6c   :  { %v3714_v38 = vpop.xlane.xlu1 %3713 }
 0xc6d   :  { %5769 = vrcp.f32 %v3714_v38 }
 0xc70   :  { %v3600_v46 = vpop.xlane.xlu0 %3599 }
 0xc71   :  { %5771 = vrcp.f32 %v3600_v46 }
 0xc72   :  { %v7867_v8 = vpop.f32.mrf.mxu0  ;;  %v3035_v9 = vpop.f32.mrf.mxu2  ;;  %5773 = vrcp.f32 %v3603_v12  ;;  %v5344_v12 = vld [vmem:[%s8295_s10 + $0x20] sm:$0xff]  ;;  %s4708_s10 = sshll.u32 %s8306_s21, 4  ;;  %s4709_s10 = int_to_ptr.hbm [resolvable:$true] %s4708_s10 }
 0xc73   :  { %v5770_v51 = vpop.eup %5769  ;;  %v5431_v2 = vpack.i.bf16 %v3035_v9, %v3033_v1  ;;  %3855 = vmatpush.bf16.msra.mxu3 %v5344_v12 }
 0xc74   :  { %v3722_v6 = vmul.f32 %v5770_v51, %v7823_v48 }
 0xc75   :  { %5432 = vrot.lane.b32.xlu2 %v5431_v2, %s5876_s30 }
 0xc76   :  { %v3724_v62 = vpack.c.bf16 %v3722_v6, %v3721_v41 }
 0xc77   :  { %v5772_v24 = vpop.eup %5771 }
 0xc78   :  { %5077 = vmatmul.msk.bf16.vlgmr.msra.gmra.mxu2 %vm771_vm10, %v3724_v62  ;;  %v5774_v30 = vpop.eup %5773  ;;  %v3610_v40 = vmul.f32 %v5772_v24, %v7829_v32 }
 0xc79   :  { %v3611_v15 = vmul.f32 %v5774_v30, %v7792_v16 }
 0xc7a   :  { %v7873_v21 = vpop.f32.mrf.mxu0  ;;  %v3038_v17 = vpop.f32.mrf.mxu2 }
 0xc7b   :  { %v3613_v47 = vpack.c.bf16 %v3611_v15, %v3610_v40  ;;  %v3699_v40 = vpop.xlane.xlu0 %3698 }
 0xc82   :  { %v2929_v25 = vpop.f32.mrf.mxu0  ;;  %v3040_v7 = vpop.f32.mrf.mxu2 }
 0xc83   :  { %v3702_v25 = vsub.f32 %v7837_v20, %v3699_v40 }
 0xc84   :  { %v3616_v48 = vpop.permute.xlu1 %3615 }
 0xc85   :  { %3636 = vmatpush.bf16.msra.mxu0 %v3616_v48 }
 0xc88   :  { %5073 = vmatmul.msk.bf16.vlgmr.msra.gmra.mxu0 %vm771_vm10, %v3613_v47 }
 0xc8a   :  { %v3144_v43 = vpop.f32.mrf.mxu0 }
 0xc92   :  { %v3146_v59 = vpop.f32.mrf.mxu0 }
 0xc93   :  { %v5436_v10 = vpack.i.bf16 %v3146_v59, %v3144_v43 }
 0xc95   :  { %5437 = vrot.lane.b32.xlu1 %v5436_v10, %s8348_s9 }
 0xc9a   :  { %v3149_v26 = vpop.f32.mrf.mxu0 }
 0xca2   :  { %v3151_v33 = vpop.f32.mrf.mxu0 }
 0xcab   :  { %v7879_v22 = vpop.f32.mrf.mxu0 }
 0xcb0   :  { %v3255_v14 = vpop.f32.mrf.mxu2 }
 0xcb3   :  { %v7881_v32 = vpop.f32.mrf.mxu0 }
 0xcb8   :  { %v3257_v16 = vpop.f32.mrf.mxu2 }
 0xcb9   :  { %v5441_v13 = vpack.i.bf16 %v3257_v16, %v3255_v14 }
 0xcbb   :  { %v7885_v23 = vpop.f32.mrf.mxu0  ;;  %5442 = vrot.lane.b32.xlu2 %v5441_v13, %s5875_s4 }
 0xcbf   :  { %3587 = vmax.xlane.f32.xlu1 %v3586_v52 }
 0xcc0   :  { %v3260_v11 = vpop.f32.mrf.mxu2 }
 0xcc3   :  { %v3423_v60 = vpop.f32.mrf.mxu0 }
 0xcc8   :  { %v3262_v61 = vpop.f32.mrf.mxu2 }
 0xccf   :  { %v5433_v34 = vpop.permute.xlu2 %5432 }
 0xcd0   :  { %v3527_v54 = vpop.f32.mrf.mxu2  ;;  %v5435_v5 = vunpack.i.h.bf16 %v5433_v34  ;;  %v5434_v1 = vunpack.i.l.bf16 %v5433_v34 }
 0xcd1   :  { %v5446_v3 = vpack.i.bf16 %v3527_v54, %v3038_v17 }
 0xcd2   :  { %v3301_v51 = vsel %vm731_vm9, %v7867_v8, %v5435_v5  ;;  %v3300_v2 = vsel %vm731_vm9, %v7865_v55, %v5434_v1  ;;  %v3707_v8 = vmul.f32 1.442695, %v3702_v25 }
 0xcd3   :  { %5447 = vrot.lane.b32.xlu0 %v5446_v3, %s5876_s30 }
 0xcd4   :  { %5775 = vpow2.f32 %v3707_v8 }
 0xcd8   :  { %v7890_v29 = vpop.f32.mrf.mxu2 }
 0xcda   :  { %v5776_v15 = vpop.eup %5775 }
 0xcdb   :  { %v3715_v47 = vsel %vm771_vm10, %v5776_v15, 0.0 }
 0xce0   :  { %v7892_v36 = vpop.f32.mrf.mxu2 }
 0xce1   :  { %v5461_v28 = vpack.i.bf16 %v7892_v36, %v7890_v29  ;;  %v5353_v29 = vld [vmem:[%s8299_s14 + $0x64] sm:$0xf0]  ;;  %v5352_v36 = vld [vmem:[%s8299_s14 + $0x64] sm:$0xf] }
 0xce8   :  { %v3534_v31 = vpop.f32.mrf.mxu2 }
 0xcfb   :  { %v3749_v19 = vpop.f32.mrf.mxu2 }
 0xcfc   :  { %v5456_v56 = vpack.i.bf16 %v3749_v19, %v3260_v11 }
 0xd05   :  { %v3638_v27 = vpop.f32.mrf.mxu0 }
 0xd06   :  { %v5451_v63 = vpack.i.bf16 %v3638_v27, %v3149_v26 }
 0xd07   :  { %v5438_v0 = vpop.permute.xlu1 %5437 }
 0xd08   :  { %5452 = vrot.lane.b32.xlu2 %v5451_v63, %s8348_s9  ;;  %v5440_v38 = vunpack.i.h.bf16 %v5438_v0  ;;  %v5439_v37 = vunpack.i.l.bf16 %v5438_v0 }
 0xd0a   :  { %v3303_v62 = vsel %vm1213_vm11, %v3300_v2, %v5439_v37  ;;  %v3304_v46 = vsel %vm1213_vm11, %v3301_v51, %v5440_v38 }
 0xd10   :  { %5457 = vrot.lane.b32.xlu2 %v5456_v56, %s5875_s4 }
 0xd15   :  { %v5443_v9 = vpop.permute.xlu2 %5442 }
 0xd16   :  { %v5445_v41 = vunpack.i.h.bf16 %v5443_v9  ;;  %v5444_v6 = vunpack.i.l.bf16 %v5443_v9 }
 0xd18   :  { %v3306_v17 = vsel %vm8351_vm8, %v3303_v62, %v5444_v6  ;;  %v3307_v24 = vsel %vm8352_vm13, %v3304_v46, %v5445_v41 }
 0xd19   :  { %v3812_v30 = vpack.c.bf16 %v3307_v24, %v3306_v17 }
 0xd1b   :  { %5103 = vmatmul.msk.bf16.vlgmr.msra.gmra.mxu3 %vm205_vm0, %v3812_v30 }
 0xd32   :  { %v3588_v7 = vpop.xlane.xlu1 %3587 }
 0xd33   :  { %v3591_v55 = vsub.f32 %v3579_v49, %v3588_v7 }
 0xd35   :  { %v3596_v48 = vmul.f32 1.442695, %v3591_v55 }
 0xd37   :  { %5777 = vpow2.f32 %v3596_v48  ;;  %v5354_v48 = vld [vmem:[%s8299_s14 + $0x74] sm:$0xf] }
 0xd39   :  { %3716 = vadd.xlane.f32.xlu2 %v3715_v47 }
 0xd3d   :  { %v5778_v43 = vpop.eup %5777 }
 0xd3e   :  { %v3604_v59 = vsel %vm771_vm10, %v5778_v43, 0.0 }
 0xd3f   :  { %3605 = vadd.xlane.f32.xlu0 %v3604_v59 }
 0xd45   :  { %v5448_v26 = vpop.permute.xlu0 %5447 }
 0xd46   :  { %v5450_v33 = vunpack.i.h.bf16 %v5448_v26  ;;  %v5449_v14 = vunpack.i.l.bf16 %v5448_v26  ;;  %v5136_v26 = vld [vmem:[%s8299_s14 + $0x60] sm:$0xf] }
 0xd48   :  { %v3794_v13 = vsel %vm731_vm9, %v7879_v22, %v5450_v33  ;;  %v3302_v49 = vsel %vm731_vm9, %v7873_v21, %v5449_v14  ;;  %v7934_v22 = vld [vmem:[%s8296_s11 + $0x1] ss:$0 sm:$0xff]  ;;  %v5138_v33 = vld [vmem:[%s8299_s14 + $0x68] sm:$0xf0] }
 0xd62   :  { %v5453_v10 = vpop.permute.xlu2 %5452 }
 0xd63   :  { %v5455_v58 = vunpack.i.h.bf16 %v5453_v10  ;;  %v5454_v20 = vunpack.i.l.bf16 %v5453_v10 }
 0xd65   :  { %v3797_v60 = vsel %vm1213_vm11, %v3794_v13, %v5455_v58  ;;  %v3305_v61 = vsel %vm1213_vm11, %v3302_v49, %v5454_v20  ;;  %v5141_v58 = vor.u32 %v5352_v36, %v5138_v33  ;;  %v5128_v13 = vld [vmem:[%s8299_s14 + $0x50] sm:$0xf]  ;;  %v5351_v49 = vld [vmem:[%s8299_s14 + $0x54] sm:$0xf0] }
 0xd6a   :  { %v5458_v16 = vpop.permute.xlu2 %5457 }
 0xd6b   :  { %v5460_v52 = vunpack.i.h.bf16 %v5458_v16  ;;  %v5459_v11 = vunpack.i.l.bf16 %v5458_v16 }
 0xd6d   :  { %v3308_v54 = vsel %vm8353_vm5, %v3305_v61, %v5459_v11  ;;  %v3800_v3 = vsel %vm8354_vm14, %v3797_v60, %v5460_v52  ;;  %v5350_v52 = vld [vmem:[%s8299_s14 + $0x54] sm:$0xf]  ;;  %v5129_v60 = vor.u32 %v5351_v49, %v5128_v13  ;;  %v5130_v61 = vld [vmem:[%s8299_s14 + $0x58] sm:$0xf0] }
 0xd6e   :  { %v3813_v31 = vpack.c.bf16 %v3800_v3, %v3308_v54  ;;  %v5133_v54 = vor.u32 %v5350_v52, %v5130_v61 }
 0xd70   :  { %5104 = vmatmul.msk.bf16.gmra.mxu3 %vm205_vm0, %v3813_v31  ;;  %v5120_v31 = vld [vmem:[%s8299_s14 + $0x40] sm:$0xf] }
 0xd9e   :  { %v3857_v45 = vpop.f32.mrf.mxu3 }
 0xd9f   :  { %v3872_v21 = vadd.f32 %v3857_v45, %v7250_v42  ;;  %v5349_v45 = vld [vmem:[%s8299_s14 + $0x44] sm:$0xf0] }
 0xda1   :  { %v7938_v4 = vadd.f32 %v7934_v22, %v3872_v21  ;;  %v5348_v21 = vld [vmem:[%s8299_s14 + $0x44] sm:$0xf] }
 0xda3   :  { %v3893_v44 = vsel %vm205_vm0, %v7938_v4, 0.0  ;;  %v3917_v63 = vmul.f32 %v7938_v4, %v7938_v4 }
 0xda4   :  { %3894 = vadd.xlane.f32.xlu1 %v3893_v44  ;;  %v5121_v44 = vor.u32 %v5349_v45, %v5120_v31 }
 0xda5   :  { %v3923_v34 = vsel %vm205_vm0, %v3917_v63, 0.0 }
 0xda6   :  { %v3859_v12 = vpop.f32.mrf.mxu3 }
 0xda7   :  { %v3873_v27 = vadd.f32 %v3859_v12, %v7259_v53  ;;  %v5122_v12 = vld [vmem:[%s8299_s14 + $0x48] sm:$0xf0] }
 0xda9   :  { %v7946_v19 = vadd.f32 %v7934_v22, %v3873_v27 }
 0xdab   :  { %v3918_v42 = vmul.f32 %v7946_v19, %v7946_v19  ;;  %v3896_v53 = vsel %vm205_vm0, %v7946_v19, 0.0 }
 0xdac   :  { %v3717_v56 = vpop.xlane.xlu2 %3716  ;;  %3924 = vadd.xlane.f32.xlu1 %v3923_v34  ;;  %v5125_v34 = vor.u32 %v5348_v21, %v5122_v12 }
 0xdad   :  { %5779 = vrcp.f32 %v3717_v56  ;;  %v3926_v0 = vsel %vm205_vm0, %v3918_v42, 0.0 }
 0xdae   :  { %3927 = vadd.xlane.f32.xlu2 %v3926_v0 }
 0xdb2   :  { %v3606_v5 = vpop.xlane.xlu0 %3605 }
 0xdb3   :  { %v5780_v1 = vpop.eup %5779  ;;  %5781 = vrcp.f32 %v3606_v5 }
 0xdb4   :  { %v3723_v38 = vmul.f32 %v5780_v1, %v5776_v15  ;;  %3897 = vadd.xlane.f32.xlu1 %v3896_v53  ;;  %v5144_v15 = vld [vmem:[%s8299_s14 + $0x70] sm:$0xf] }
 0xdb6   :  { %v3725_v37 = vpack.c.bf16 %v3723_v38, %v3723_v38 }
 0xdb8   :  { %5078 = vmatmul.msk.bf16.gmra.mxu2 %vm771_vm10, %v3725_v37 }
 0xdb9   :  { %v5782_v9 = vpop.eup %5781 }
 0xdba   :  { %v3612_v51 = vmul.f32 %v5782_v9, %v5778_v43  ;;  %v5146_v43 = vld [vmem:[%s8299_s14 + $0x78] sm:$0xf0] }
 0xdbb   :  { %v5149_v59 = vor.u32 %v5354_v48, %v5146_v43  ;;  %v8039_v48 = vld [vmem:[%s8297_s12 + $0x1] ss:$0 sm:$0xff]  ;;  %s5881_s12 = smov 1  }
 0xdbc   :  { %v3614_v2 = vpack.c.bf16 %v3612_v51, %v3612_v51  ;;  %v3751_v51 = vpop.f32.mrf.mxu2 }
 0xdbd   :  { %4151 = vmatpush.bf16.msrb.mxu1 %v5149_v59 }
 0xdbe   :  { %5074 = vmatmul.msk.bf16.gmra.mxu0 %vm771_vm10, %v3614_v2  ;;  %v3640_v2 = vpop.f32.mrf.mxu0 }
 0xdc1   :  { %4152 = vmatpush.bf16.msrb.mxu1 %v5141_v58 }
 0xdc5   :  { %4153 = vmatpush.bf16.msrb.mxu1 %v5133_v54 }
 0xdc9   :  { %4154 = vmatpush.bf16.msrb.mxu1 %v5125_v34 }
 0xdf3   :  { %v3862_v41 = vpop.f32.mrf.mxu3 }
 0xdf4   :  { %v3874_v6 = vadd.f32 %v3862_v41, %v7301_v50 }
 0xdf6   :  { %v7958_v62 = vadd.f32 %v7934_v22, %v3874_v6 }
 0xdf8   :  { %v3899_v46 = vsel %vm205_vm0, %v7958_v62, 0.0  ;;  %v3919_v17 = vmul.f32 %v7958_v62, %v7958_v62 }
 0xdf9   :  { %3900 = vadd.xlane.f32.xlu0 %v3899_v46 }
 0xdfa   :  { %v3929_v24 = vsel %vm205_vm0, %v3919_v17, 0.0 }
 0xdfb   :  { %3930 = vadd.xlane.f32.xlu2 %v3929_v24  ;;  %v3864_v30 = vpop.f32.mrf.mxu3 }
 0xdfc   :  { %v3875_v40 = vadd.f32 %v3864_v30, %v7310_v39  ;;  %v5355_v39 = vld [vmem:[%s8299_s14 + $0x74] sm:$0xf0] }
 0xdfd   :  { %v5145_v47 = vor.u32 %v5355_v39, %v5144_v15 }
 0xdfe   :  { %v7967_v25 = vadd.f32 %v7934_v22, %v3875_v40 }
 0xdff   :  { %4127 = vmatpush.bf16.msrb.mxu0 %v5145_v47 }
 0xe00   :  { %v3902_v50 = vsel %vm205_vm0, %v7967_v25, 0.0  ;;  %v3920_v8 = vmul.f32 %v7967_v25, %v7967_v25 }
 0xe01   :  { %3903 = vadd.xlane.f32.xlu1 %v3902_v50 }
 0xe02   :  { %v3932_v7 = vsel %vm205_vm0, %v3920_v8, 0.0 }
 0xe03   :  { %3933 = vadd.xlane.f32.xlu0 %v3932_v7 }
 0xe17   :  { %v3895_v55 = vpop.xlane.xlu1 %3894 }
 0xe18   :  { %v7991_v10 = vmul.f32 %v3895_v55, %v6124_v18 }
 0xe1a   :  { %5462 = vrot.lane.b32.xlu1 %v5461_v28, %s5876_s30  ;;  %v5137_v28 = vor.u32 %v5353_v29, %v5136_v26  ;;  %v3947_v20 = vmul.f32 %v7991_v10, %v7991_v10  ;;  %v3959_v7 = vsub.f32 %v7938_v4, %v7991_v10  ;;  %v8048_v29 = vld [vmem:[%s8298_s13 + $0x1] ss:$0 sm:$0xff] }
 0xe1c   :  { %4128 = vmatpush.bf16.msrb.mxu0 %v5137_v28 }
 0xe1f   :  { %v3925_v14 = vpop.xlane.xlu1 %3924 }
 0xe20   :  { %v3941_v16 = vmul.f32 %v3925_v14, %v6124_v18  ;;  %4129 = vmatpush.bf16.msrb.mxu0 %v5129_v60 }
 0xe21   :  { %v3928_v27 = vpop.xlane.xlu2 %3927 }
 0xe22   :  { %v3953_v11 = vsub.f32 %v3941_v16, %v3947_v20  ;;  %v3942_v56 = vmul.f32 %v3928_v27, %v6124_v18 }
 0xe24   :  { %v3965_v3 = vadd.f32 1e-05, %v3953_v11  ;;  %4130 = vmatpush.bf16.msrb.mxu0 %v5121_v44 }
 0xe26   :  { %5783 = vrsqrt.f32 %v3965_v3  ;;  %vm3977_vm12 = vweird.f32 %v3965_v3 }
 0xe27   :  { %v3898_v63 = vpop.xlane.xlu1 %3897 }
 0xe28   :  { %v3912_v42 = vmul.f32 %v3898_v63, %v6124_v18 }
 0xe2a   :  { %v3948_v0 = vmul.f32 %v3912_v42, %v3912_v42  ;;  %v3960_v59 = vsub.f32 %v7946_v19, %v3912_v42 }
 0xe2c   :  { %v5784_v5 = vpop.eup %5783  ;;  %v3954_v1 = vsub.f32 %v3942_v56, %v3948_v0 }
 0xe2d   :  { %v3972_v53 = vmul.f32 %v5784_v5, %v3965_v3  ;;  %vm3978_vm10 = vweird.f32 %v5784_v5 }
 0xe2e   :  { %v3966_v38 = vadd.f32 1e-05, %v3954_v1  ;;  %vm3979_vm4 = vmor %vm3977_vm12, %vm3978_vm10 }
 0xe2f   :  { %v3973_v37 = vmul.f32 %v5784_v5, %v3972_v53  ;;  %vm8355_vm10 = vmmov %vm8354_vm14 }
 0xe30   :  { %5785 = vrsqrt.f32 %v3966_v38  ;;  %vm3987_vm1 = vweird.f32 %v3966_v38 }
 0xe31   :  { %v3974_v9 = vmul.f32 0.5, %v3973_v37 }
 0xe33   :  { %v3975_v41 = vsub.f32 1.5, %v3974_v9 }
 0xe35   :  { %v3976_v46 = vmul.f32 %v5784_v5, %v3975_v41 }
 0xe36   :  { %v5786_v6 = vpop.eup %5785 }
 0xe37   :  { %v3982_v17 = vmul.f32 %v5786_v6, %v3966_v38  ;;  %v3980_v30 = vsel %vm3979_vm4, %v5784_v5, %v3976_v46  ;;  %vm3988_vm15 = vweird.f32 %v5786_v6 }
 0xe38   :  { %v4031_v47 = vmul.f32 %v3980_v30, %v3959_v7  ;;  %vm3989_vm3 = vmor %vm3987_vm1, %vm3988_vm15 }
 0xe39   :  { %v3983_v24 = vmul.f32 %v5786_v6, %v3982_v17 }
 0xe3a   :  { %v4040_v26 = vmul.f32 %v8039_v48, %v4031_v47 }
 0xe3b   :  { %v3984_v40 = vmul.f32 0.5, %v3983_v24  ;;  %v3643_v50 = vpop.f32.mrf.mxu0  ;;  %v3754_v8 = vpop.f32.mrf.mxu2 }
 0xe3c   :  { %v5466_v55 = vpack.i.bf16 %v3643_v50, %v3640_v2  ;;  %v5471_v15 = vpack.i.bf16 %v3754_v8, %v3751_v51  ;;  %v4049_v58 = vadd.f32 %v8048_v29, %v4040_v26 }
 0xe3d   :  { %v3985_v39 = vsub.f32 1.5, %v3984_v40 }
 0xe3e   :  { %5467 = vrot.lane.b32.xlu2 %v5466_v55, %s8348_s9  ;;  %5472 = vrot.lane.b32.xlu0 %v5471_v15, %s5875_s4 }
 0xe3f   :  { %v3986_v43 = vmul.f32 %v5786_v6, %v3985_v39 }
 0xe41   :  { %v3990_v10 = vsel %vm3989_vm3, %v5786_v6, %v3986_v43 }
 0xe42   :  { %v4032_v36 = vmul.f32 %v3990_v10, %v3960_v59 }
 0xe43   :  { %v3645_v28 = vpop.f32.mrf.mxu0  ;;  %v3756_v33 = vpop.f32.mrf.mxu2 }
 0xe44   :  { %v4041_v14 = vmul.f32 %v8039_v48, %v4032_v36 }
 0xe46   :  { %v4050_v20 = vadd.f32 %v8048_v29, %v4041_v14 }
 0xe48   :  { %v4064_v16 = vpack.c.bf16 %v4050_v20, %v4049_v58 }
 0xe4a   :  { %5150 = vmatmul.msk.bf16.vlgmr.msrb.gmra.mxu0 %vm205_vm0, %v4064_v16  ;;  %5153 = vmatmul.msk.bf16.vlgmr.msrb.gmra.mxu1 %vm205_vm0, %v4064_v16  ;;  %v5362_v16 = vld [vmem:[%s8301_s16 + $0xb0] sm:$0xff] }
 0xe6c   :  { %v3901_v19 = vpop.xlane.xlu0 %3900 }
 0xe6d   :  { %v3913_v13 = vmul.f32 %v3901_v19, %v6124_v18  ;;  %v5370_v19 = vld [vmem:[%s8301_s16 + $0xf0] sm:$0xff] }
 0xe6e   :  { %v3931_v49 = vpop.xlane.xlu2 %3930 }
 0xe6f   :  { %v3949_v52 = vmul.f32 %v3913_v13, %v3913_v13  ;;  %v3943_v11 = vmul.f32 %v3931_v49, %v6124_v18  ;;  %v3961_v9 = vsub.f32 %v7958_v62, %v3913_v13  ;;  %v5361_v13 = vld [vmem:[%s8301_s16 + $0xa8] sm:$0xff] }
 0xe70   :  { %v5369_v49 = vld [vmem:[%s8301_s16 + $0xe8] sm:$0xff] }
 0xe71   :  { %v3955_v60 = vsub.f32 %v3943_v11, %v3949_v52  ;;  %v5117_v52 = vld [vmem:[%s8300_s15 + $0x2] sm:$0x3] }
 0xe72   :  { %v5360_v11 = vld [vmem:[%s8301_s16 + $0xa0] sm:$0xff] }
 0xe73   :  { %v3967_v61 = vadd.f32 1e-05, %v3955_v60  ;;  %v5368_v60 = vld [vmem:[%s8301_s16 + $0xe0] sm:$0xff] }
 0xe74   :  { %v3904_v54 = vpop.xlane.xlu1 %3903 }
 0xe75   :  { %5787 = vrsqrt.f32 %v3967_v61  ;;  %v3914_v3 = vmul.f32 %v3904_v54, %v6124_v18  ;;  %vm3997_vm2 = vweird.f32 %v3967_v61  ;;  %v8105_v54 = vperm.slane %v5117_v52, 1 }
 0xe76   :  { %v3934_v31 = vpop.xlane.xlu0 %3933 }
 0xe77   :  { %v3950_v45 = vmul.f32 %v3914_v3, %v3914_v3  ;;  %v3944_v21 = vmul.f32 %v3934_v31, %v6124_v18  ;;  %v3962_v6 = vsub.f32 %v7967_v25, %v3914_v3 }
 0xe79   :  { %v3956_v44 = vsub.f32 %v3944_v21, %v3950_v45  ;;  %v5359_v45 = vld [vmem:[%s8301_s16 + $0x98] sm:$0xff] }
 0xe7a   :  { %v5367_v21 = vld [vmem:[%s8301_s16 + $0xd8] sm:$0xff] }
 0xe7b   :  { %v5788_v12 = vpop.eup %5787  ;;  %v3968_v27 = vadd.f32 1e-05, %v3956_v44 }
 0xe7c   :  { %v3992_v63 = vmul.f32 %v5788_v12, %v3967_v61  ;;  %vm3998_vm6 = vweird.f32 %v5788_v12  ;;  %v8103_v61 = vperm.slane %v5117_v52, 0 }
 0xe7d   :  { %5789 = vrsqrt.f32 %v3968_v27  ;;  %vm3999_vm7 = vmor %vm3997_vm2, %vm3998_vm6  ;;  %vm4007_vm13 = vweird.f32 %v3968_v27 }
 0xe7e   :  { %v3993_v34 = vmul.f32 %v5788_v12, %v3992_v63 }
 0xe80   :  { %v3994_v42 = vmul.f32 0.5, %v3993_v34  ;;  %v5358_v34 = vld [vmem:[%s8301_s16 + $0x90] sm:$0xff] }
 0xe82   :  { %v3995_v56 = vsub.f32 1.5, %v3994_v42  ;;  %v5366_v42 = vld [vmem:[%s8301_s16 + $0xd0] sm:$0xff] }
 0xe83   :  { %v5790_v0 = vpop.eup %5789 }
 0xe84   :  { %v3996_v5 = vmul.f32 %v5788_v12, %v3995_v56  ;;  %v4002_v1 = vmul.f32 %v5790_v0, %v3968_v27  ;;  %vm4008_vm8 = vweird.f32 %v5790_v0 }
 0xe85   :  { %vm4009_vm5 = vmor %vm4007_vm13, %vm4008_vm8 }
 0xe86   :  { %v4003_v53 = vmul.f32 %v5790_v0, %v4002_v1  ;;  %v4000_v38 = vsel %vm3999_vm7, %v5788_v12, %v3996_v5 }
 0xe87   :  { %v4033_v2 = vmul.f32 %v4000_v38, %v3961_v9  ;;  %v5365_v38 = vld [vmem:[%s8301_s16 + $0xc8] sm:$0xff] }
 0xe88   :  { %v4004_v37 = vmul.f32 0.5, %v4003_v53  ;;  %v5357_v53 = vld [vmem:[%s8301_s16 + $0x88] sm:$0xff] }
 0xe89   :  { %v4042_v24 = vmul.f32 %v8039_v48, %v4033_v2 }
 0xe8a   :  { %v4005_v51 = vsub.f32 1.5, %v4004_v37 }
 0xe8b   :  { %v4051_v40 = vadd.f32 %v8048_v29, %v4042_v24 }
 0xe8c   :  { %v4006_v41 = vmul.f32 %v5790_v0, %v4005_v51  ;;  %v5463_v62 = vpop.permute.xlu1 %5462 }
 0xe8d   :  { %v5465_v55 = vunpack.i.h.bf16 %v5463_v62  ;;  %v5464_v15 = vunpack.i.l.bf16 %v5463_v62 }
 0xe8e   :  { %v4010_v46 = vsel %vm4009_vm5, %v5790_v0, %v4006_v41  ;;  %v5356_v41 = vld [vmem:[%s8301_s16 + $0x80] sm:$0xff] }
 0xe8f   :  { %v4034_v17 = vmul.f32 %v4010_v46, %v3962_v6  ;;  %v3796_v59 = vsel %vm731_vm9, %v7885_v23, %v5465_v55  ;;  %v3795_v10 = vsel %vm731_vm9, %v7881_v32, %v5464_v15  ;;  %v5363_v23 = vld [vmem:[%s8301_s16 + $0xb8] sm:$0xff]  ;;  %v5364_v6 = vld [vmem:[%s8301_s16 + $0xc0] sm:$0xff] }
 0xe90   :  { %v5371_v32 = vld [vmem:[%s8301_s16 + $0xf8] sm:$0xff]  ;;  %4558 = vmatpush.bf16.msrb.mxu2 %v5363_v23 }
 0xe91   :  { %v4043_v30 = vmul.f32 %v8039_v48, %v4034_v17  ;;  %4578 = vmatpush.bf16.msrb.mxu3 %v5371_v32 }
 0xe93   :  { %v4052_v50 = vadd.f32 %v8048_v29, %v4043_v30 }
 0xe94   :  { %4559 = vmatpush.bf16.msrb.mxu2 %v5362_v16 }
 0xe95   :  { %v4065_v8 = vpack.c.bf16 %v4052_v50, %v4051_v40  ;;  %4579 = vmatpush.bf16.msrb.mxu3 %v5370_v19 }
 0xe97   :  { %5151 = vmatmul.msk.bf16.gmra.mxu0 %vm205_vm0, %v4065_v8  ;;  %5154 = vmatmul.msk.bf16.gmra.mxu1 %vm205_vm0, %v4065_v8 }
 0xe98   :  { %v5468_v7 = vpop.permute.xlu2 %5467  ;;  %4560 = vmatpush.bf16.msrb.mxu2 %v5361_v13 }
 0xe99   :  { %v5470_v39 = vunpack.i.h.bf16 %v5468_v7  ;;  %v5469_v47 = vunpack.i.l.bf16 %v5468_v7  ;;  %4580 = vmatpush.bf16.msrb.mxu3 %v5369_v49 }
 0xe9b   :  { %v3798_v28 = vsel %vm1213_vm11, %v3795_v10, %v5469_v47  ;;  %v3799_v33 = vsel %vm1213_vm11, %v3796_v59, %v5470_v39 }
 0xe9c   :  { %4561 = vmatpush.bf16.msrb.mxu2 %v5360_v11 }
 0xe9d   :  { %4581 = vmatpush.bf16.msrb.mxu3 %v5368_v60 }
 0xea0   :  { %4562 = vmatpush.bf16.msrb.mxu2 %v5359_v45 }
 0xea1   :  { %4582 = vmatpush.bf16.msrb.mxu3 %v5367_v21 }
 0xea4   :  { %4563 = vmatpush.bf16.msrb.mxu2 %v5358_v34 }
 0xea5   :  { %4583 = vmatpush.bf16.msrb.mxu3 %v5366_v42 }
 0xea8   :  { %4564 = vmatpush.bf16.msrb.mxu2 %v5357_v53 }
 0xea9   :  { %4584 = vmatpush.bf16.msrb.mxu3 %v5365_v38 }
 0xeac   :  { %4565 = vmatpush.bf16.msrb.mxu2 %v5356_v41 }
 0xead   :  { %4585 = vmatpush.bf16.msrb.mxu3 %v5364_v6 }
 0xeb0   :  { %v5473_v43 = vpop.permute.xlu0 %5472 }
 0xeb1   :  { %v5475_v26 = vunpack.i.h.bf16 %v5473_v43  ;;  %v5474_v36 = vunpack.i.l.bf16 %v5473_v43 }
 0xeb3   :  { %v3801_v14 = vsel %vm8354_vm14, %v3798_v28, %v5474_v36  ;;  %v3802_v58 = vsel %vm8355_vm10, %v3799_v33, %v5475_v26 }
 0xeb4   :  { %v3814_v20 = vpack.c.bf16 %v3802_v58, %v3801_v14 }
 0xeb6   :  { %5105 = vmatmul.msk.bf16.gmra.mxu3 %vm205_vm0, %v3814_v20 }
 0xec7   :  { %v4132_v3 = vpop.f32.mrf.mxu0  ;;  %v4156_v31 = vpop.f32.mrf.mxu1 }
 0xec8   :  { %v8114_v44 = vadd.f32 %v4132_v3, %v8103_v61  ;;  %v8117_v12 = vadd.f32 %v4156_v31, %v8105_v54 }
 0xeca   :  { %v5156_v27 = vmul.f32 -1.702, %v8114_v44  ;;  %v5157_v63 = vmul.f32 -1.702, %v8117_v12 }
 0xecc   :  { %v4195_v56 = vmul.f32 1.442695, %v5156_v27  ;;  %v4197_v0 = vmul.f32 1.442695, %v5157_v63 }
 0xece   :  { %5791 = vpow2.f32 %v4195_v56 }
 0xecf   :  { %5793 = vpow2.f32 %v4197_v0  ;;  %v4134_v5 = vpop.f32.mrf.mxu0  ;;  %v4158_v1 = vpop.f32.mrf.mxu1 }
 0xed0   :  { %v8134_v37 = vadd.f32 %v4134_v5, %v8103_v61  ;;  %v8137_v9 = vadd.f32 %v4158_v1, %v8105_v54 }
 0xed2   :  { %v5158_v51 = vmul.f32 -1.702, %v8134_v37  ;;  %v5159_v2 = vmul.f32 -1.702, %v8137_v9 }
 0xed4   :  { %v5792_v46 = vpop.eup %5791  ;;  %v4199_v17 = vmul.f32 1.442695, %v5158_v51  ;;  %v4201_v40 = vmul.f32 1.442695, %v5159_v2 }
 0xed5   :  { %v5794_v24 = vpop.eup %5793  ;;  %v4219_v30 = vadd.f32 1.0, %v5792_v46 }
 0xed6   :  { %v4220_v50 = vadd.f32 1.0, %v5794_v24  ;;  %5795 = vpow2.f32 %v4199_v17 }
 0xed7   :  { %5797 = vrcp.f32 %v4219_v30  ;;  %vm4236_vm11 = vweird.f32 %v4219_v30  ;;  %v4240_v58 = vand.u32 2147483647, %v4219_v30  ;;  %v4242_v20 = vand.u32 2147483648, %v4219_v30 }
 0xed8   :  { %5799 = vrcp.f32 %v4220_v50  ;;  %vm4251_vm12 = vweird.f32 %v4220_v50  ;;  %v4255_v32 = vand.u32 2147483647, %v4220_v50  ;;  %v4257_v52 = vand.u32 2147483648, %v4220_v50 }
 0xed9   :  { %5801 = vpow2.f32 %v4201_v40  ;;  %vm4241_vm3 = vcmp.eq.f32.partialorder %v4240_v58, 8.507059e+37  ;;  %v4243_v45 = vor.u32 1.1754944e-38, %v4242_v20 }
 0xeda   :  { %v4258_v53 = vor.u32 1.1754944e-38, %v4257_v52  ;;  %vm4256_vm5 = vcmp.eq.f32.partialorder %v4255_v32, 8.507059e+37 }
 0xedc   :  { %v5796_v8 = vpop.eup %5795 }
 0xedd   :  { %v5798_v62 = vpop.eup %5797  ;;  %v4221_v7 = vadd.f32 1.0, %v5796_v8 }
 0xede   :  { %v5800_v55 = vpop.eup %5799  ;;  %v4232_v15 = vmul.f32 %v5798_v62, %v4219_v30  ;;  %vm4237_vm9 = vweird.f32 %v5798_v62 }
 0xedf   :  { %v5802_v39 = vpop.eup %5801  ;;  %v4247_v47 = vmul.f32 %v5800_v55, %v4220_v50  ;;  %5803 = vrcp.f32 %v4221_v7  ;;  %v4272_v19 = vand.u32 2147483648, %v4221_v7  ;;  %vm8147_vm4 = vmor %vm4236_vm11, %vm4237_vm9  ;;  %vm4252_vm15 = vweird.f32 %v5800_v55 }
 0xee0   :  { %v4233_v43 = vsub.f32 1.0, %v4232_v15  ;;  %v4222_v59 = vadd.f32 1.0, %v5802_v39  ;;  %v4270_v31 = vand.u32 2147483647, %v4221_v7  ;;  %vm4266_vm6 = vweird.f32 %v4221_v7  ;;  %vm8154_vm2 = vmor %vm4251_vm12, %vm4252_vm15 }
 0xee1   :  { %v4248_v10 = vsub.f32 1.0, %v4247_v47  ;;  %v4273_v34 = vor.u32 1.1754944e-38, %v4272_v19 }
 0xee2   :  { %v4234_v26 = vmul.f32 %v5798_v62, %v4233_v43  ;;  %5805 = vrcp.f32 %v4222_v59  ;;  %v4285_v42 = vand.u32 2147483647, %v4222_v59  ;;  %v4287_v56 = vand.u32 2147483648, %v4222_v59 }
 0xee3   :  { %v4249_v28 = vmul.f32 %v5800_v55, %v4248_v10  ;;  %vm4271_vm13 = vcmp.eq.f32.partialorder %v4270_v31, 8.507059e+37  ;;  %vm4281_vm14 = vweird.f32 %v4222_v59 }
 0xee4   :  { %v4235_v33 = vadd.f32 %v5798_v62, %v4234_v26  ;;  %v4288_v17 = vor.u32 1.1754944e-38, %v4287_v56  ;;  %vm4286_vm9 = vcmp.eq.f32.partialorder %v4285_v42, 8.507059e+37 }
 0xee5   :  { %v5804_v36 = vpop.eup %5803  ;;  %v4250_v49 = vadd.f32 %v5800_v55, %v4249_v28 }
 0xee6   :  { %v4262_v14 = vmul.f32 %v5804_v36, %v4221_v7  ;;  %v4239_v60 = vsel %vm8147_vm4, %v5798_v62, %v4235_v33  ;;  %vm4267_vm1 = vweird.f32 %v5804_v36 }
 0xee7   :  { %v4244_v0 = vsel %vm4241_vm3, %v4243_v45, %v4239_v60  ;;  %v4254_v5 = vsel %vm8154_vm2, %v5800_v55, %v4250_v49  ;;  %vm4268_vm7 = vmor %vm4266_vm6, %vm4267_vm1 }
 0xee8   :  { %v5806_v23 = vpop.eup %5805  ;;  %v4263_v16 = vsub.f32 1.0, %v4262_v14  ;;  %v4411_v41 = vmul.f32 %v4244_v0, %v8114_v44  ;;  %v4259_v6 = vsel %vm4256_vm5, %v4258_v53, %v4254_v5 }
 0xee9   :  { %v4277_v11 = vmul.f32 %v5806_v23, %v4222_v59  ;;  %vm4282_vm8 = vweird.f32 %v5806_v23  ;;  %v4412_v50 = vmul.f32 %v4259_v6, %v8117_v12 }
 0xeea   :  { %v4264_v3 = vmul.f32 %v5804_v36, %v4263_v16  ;;  %vm4283_vm10 = vmor %vm4281_vm14, %vm4282_vm8 }
 0xeeb   :  { %v4278_v21 = vsub.f32 1.0, %v4277_v11 }
 0xeec   :  { %v4265_v63 = vadd.f32 %v5804_v36, %v4264_v3 }
 0xeed   :  { %v4279_v1 = vmul.f32 %v5806_v23, %v4278_v21 }
 0xeee   :  { %v4269_v38 = vsel %vm4268_vm7, %v5804_v36, %v4265_v63 }
 0xeef   :  { %v4274_v51 = vsel %vm4271_vm13, %v4273_v34, %v4269_v38  ;;  %v4280_v2 = vadd.f32 %v5806_v23, %v4279_v1 }
 0xef0   :  { %v4413_v46 = vmul.f32 %v4274_v51, %v8134_v37 }
 0xef1   :  { %v4284_v24 = vsel %vm4283_vm10, %v5806_v23, %v4280_v2 }
 0xef2   :  { %v4456_v30 = vpack.c.bf16 %v4413_v46, %v4411_v41  ;;  %v4289_v40 = vsel %vm4286_vm9, %v4288_v17, %v4284_v24 }
 0xef3   :  { %v4414_v8 = vmul.f32 %v4289_v40, %v8137_v9 }
 0xef4   :  { %4566 = vmatmul.bf16.vlgmr.msrb.gmra.mxu2 %v4456_v30 }
 0xef5   :  { %v4457_v62 = vpack.c.bf16 %v4414_v8, %v4412_v50 }
 0xef7   :  { %4586 = vmatmul.bf16.vlgmr.msrb.gmra.mxu3 %v4457_v62 }
 0xf14   :  { %v4137_v7 = vpop.f32.mrf.mxu0  ;;  %v4161_v55 = vpop.f32.mrf.mxu1 }
 0xf15   :  { %v8165_v44 = vadd.f32 %v4137_v7, %v8103_v61  ;;  %v8168_v37 = vadd.f32 %v4161_v55, %v8105_v54 }
 0xf17   :  { %v5160_v15 = vmul.f32 -1.702, %v8165_v44  ;;  %v5161_v39 = vmul.f32 -1.702, %v8168_v37 }
 0xf19   :  { %v4203_v47 = vmul.f32 1.442695, %v5160_v15  ;;  %v4205_v43 = vmul.f32 1.442695, %v5161_v39 }
 0xf1b   :  { %5807 = vpow2.f32 %v4203_v47 }
 0xf1c   :  { %5809 = vpow2.f32 %v4205_v43  ;;  %v4139_v12 = vpop.f32.mrf.mxu0  ;;  %v4163_v9 = vpop.f32.mrf.mxu1 }
 0xf1d   :  { %v8173_v59 = vadd.f32 %v4139_v12, %v8103_v61  ;;  %v8176_v10 = vadd.f32 %v4163_v9, %v8105_v54 }
 0xf1f   :  { %v5162_v26 = vmul.f32 -1.702, %v8173_v59  ;;  %v5163_v36 = vmul.f32 -1.702, %v8176_v10 }
 0xf21   :  { %v5808_v28 = vpop.eup %5807  ;;  %v4207_v33 = vmul.f32 1.442695, %v5162_v26  ;;  %v4209_v20 = vmul.f32 1.442695, %v5163_v36 }
 0xf22   :  { %v5810_v14 = vpop.eup %5809  ;;  %v4223_v58 = vadd.f32 1.0, %v5808_v28 }
 0xf23   :  { %v4224_v23 = vadd.f32 1.0, %v5810_v14  ;;  %5811 = vpow2.f32 %v4207_v33 }
 0xf24   :  { %5813 = vrcp.f32 %v4223_v58  ;;  %v4302_v34 = vand.u32 2147483648, %v4223_v58  ;;  %vm4296_vm12 = vweird.f32 %v4223_v58  ;;  %v4300_v56 = vand.u32 2147483647, %v4223_v58 }
 0xf25   :  { %5815 = vrcp.f32 %v4224_v23  ;;  %vm4311_vm15 = vweird.f32 %v4224_v23  ;;  %v4315_v53 = vand.u32 2147483647, %v4224_v23  ;;  %v4317_v38 = vand.u32 2147483648, %v4224_v23 }
 0xf26   :  { %5817 = vpow2.f32 %v4209_v20  ;;  %v4303_v46 = vor.u32 1.1754944e-38, %v4302_v34  ;;  %vm4301_vm6 = vcmp.eq.f32.partialorder %v4300_v56, 8.507059e+37 }
 0xf27   :  { %vm4316_vm5 = vcmp.eq.f32.partialorder %v4315_v53, 8.507059e+37  ;;  %v4318_v12 = vor.u32 1.1754944e-38, %v4317_v38 }
 0xf29   :  { %v5812_v32 = vpop.eup %5811 }
 0xf2a   :  { %v5814_v16 = vpop.eup %5813  ;;  %v4225_v19 = vadd.f32 1.0, %v5812_v32 }
 0xf2b   :  { %v5816_v13 = vpop.eup %5815  ;;  %v4292_v49 = vmul.f32 %v5814_v16, %v4223_v58  ;;  %vm4297_vm11 = vweird.f32 %v5814_v16 }
 0xf2c   :  { %v5818_v52 = vpop.eup %5817  ;;  %v4307_v11 = vmul.f32 %v5816_v13, %v4224_v23  ;;  %5819 = vrcp.f32 %v4225_v19  ;;  %v4332_v0 = vand.u32 2147483648, %v4225_v19  ;;  %vm8180_vm4 = vmor %vm4296_vm12, %vm4297_vm11  ;;  %vm4312_vm1 = vweird.f32 %v5816_v13 }
 0xf2d   :  { %v4293_v60 = vsub.f32 1.0, %v4292_v49  ;;  %v4226_v3 = vadd.f32 1.0, %v5818_v52  ;;  %v4330_v24 = vand.u32 2147483647, %v4225_v19  ;;  %vm4326_vm2 = vweird.f32 %v4225_v19  ;;  %vm8187_vm7 = vmor %vm4311_vm15, %vm4312_vm1 }
 0xf2e   :  { %v4308_v31 = vsub.f32 1.0, %v4307_v11  ;;  %v4333_v30 = vor.u32 1.1754944e-38, %v4332_v0 }
 0xf2f   :  { %v4294_v45 = vmul.f32 %v5814_v16, %v4293_v60  ;;  %5821 = vrcp.f32 %v4226_v3  ;;  %v4345_v7 = vand.u32 2147483647, %v4226_v3  ;;  %v4347_v55 = vand.u32 2147483648, %v4226_v3 }
 0xf30   :  { %v4309_v63 = vmul.f32 %v5816_v13, %v4308_v31  ;;  %vm4331_vm14 = vcmp.eq.f32.partialorder %v4330_v24, 8.507059e+37  ;;  %vm4341_vm10 = vweird.f32 %v4226_v3 }
 0xf31   :  { %v4295_v27 = vadd.f32 %v5814_v16, %v4294_v45  ;;  %v4348_v20 = vor.u32 1.1754944e-38, %v4347_v55  ;;  %vm4346_vm11 = vcmp.eq.f32.partialorder %v4345_v7, 8.507059e+37 }
 0xf32   :  { %v5820_v21 = vpop.eup %5819  ;;  %v4310_v41 = vadd.f32 %v5816_v13, %v4309_v63 }
 0xf33   :  { %v4322_v42 = vmul.f32 %v5820_v21, %v4225_v19  ;;  %v4299_v2 = vsel %vm8180_vm4, %v5814_v16, %v4295_v27  ;;  %vm4327_vm3 = vweird.f32 %v5820_v21 }
 0xf34   :  { %v4304_v50 = vsel %vm4301_vm6, %v4303_v46, %v4299_v2  ;;  %v4314_v39 = vsel %vm8187_vm7, %v5816_v13, %v4310_v41  ;;  %vm4328_vm8 = vmor %vm4326_vm2, %vm4327_vm3  ;;  %vm4610_vm2 = vcmask 1040384   ;;  %vm4614_vm7 = vcmask 517120  }
 0xf35   :  { %v5822_v5 = vpop.eup %5821  ;;  %v4323_v51 = vsub.f32 1.0, %v4322_v42  ;;  %v4415_v33 = vmul.f32 %v4304_v50, %v8165_v44  ;;  %v4319_v14 = vsel %vm4316_vm5, %v4318_v12, %v4314_v39 }
 0xf36   :  { %v4337_v6 = vmul.f32 %v5822_v5, %v4226_v3  ;;  %vm4342_vm13 = vweird.f32 %v5822_v5  ;;  %v4416_v13 = vmul.f32 %v4319_v14, %v8168_v37 }
 0xf37   :  { %v4324_v17 = vmul.f32 %v5820_v21, %v4323_v51  ;;  %vm4343_vm9 = vmor %vm4341_vm10, %vm4342_vm13 }
 0xf38   :  { %v4338_v40 = vsub.f32 1.0, %v4337_v6 }
 0xf39   :  { %v4325_v62 = vadd.f32 %v5820_v21, %v4324_v17  ;;  %v3867_v15 = vpop.f32.mrf.mxu3 }
 0xf3a   :  { %v4339_v47 = vmul.f32 %v5822_v5, %v4338_v40  ;;  %v3876_v43 = vadd.f32 %v3867_v15, %v7389_v57 }
 0xf3b   :  { %v4329_v9 = vsel %vm4328_vm8, %v5820_v21, %v4325_v62 }
 0xf3c   :  { %v4334_v26 = vsel %vm4331_vm14, %v4333_v30, %v4329_v9  ;;  %v4340_v36 = vadd.f32 %v5822_v5, %v4339_v47  ;;  %v8195_v28 = vadd.f32 %v7934_v22, %v3876_v43 }
 0xf3d   :  { %v4417_v58 = vmul.f32 %v4334_v26, %v8173_v59 }
 0xf3e   :  { %v4344_v23 = vsel %vm4343_vm9, %v5822_v5, %v4340_v36  ;;  %v3905_v57 = vsel %vm205_vm0, %v8195_v28, 0.0  ;;  %v3921_v32 = vmul.f32 %v8195_v28, %v8195_v28 }
 0xf3f   :  { %v4349_v16 = vsel %vm4346_vm11, %v4348_v20, %v4344_v23  ;;  %3906 = vadd.xlane.f32.xlu1 %v3905_v57  ;;  %v4458_v19 = vpack.c.bf16 %v4417_v58, %v4415_v33  ;;  %v5490_v58 = vld [vmem:[%s8302_s17 + $0x1] ss:$0 sm:$0xff] }
 0xf40   :  { %v4418_v44 = vmul.f32 %v4349_v16, %v8176_v10  ;;  %v3935_v49 = vsel %vm205_vm0, %v3921_v32, 0.0 }
 0xf41   :  { %4570 = vmatmul.bf16.gmra.mxu2 %v4458_v19  ;;  %3936 = vadd.xlane.f32.xlu2 %v3935_v49  ;;  %v3869_v59 = vpop.f32.mrf.mxu3 }
 0xf42   :  { %v4459_v52 = vpack.c.bf16 %v4418_v44, %v4416_v13  ;;  %v3877_v11 = vadd.f32 %v3869_v59, %v7398_v35 }
 0xf44   :  { %4590 = vmatmul.bf16.gmra.mxu3 %v4459_v52  ;;  %v3888_v60 = vadd.f32 %v7934_v22, %v3877_v11 }
 0xf46   :  { %v3908_v3 = vsel %vm205_vm0, %v3888_v60, 0.0  ;;  %v3922_v31 = vmul.f32 %v3888_v60, %v3888_v60 }
 0xf47   :  { %3909 = vadd.xlane.f32.xlu0 %v3908_v3 }
 0xf48   :  { %v3938_v45 = vsel %vm205_vm0, %v3922_v31, 0.0  ;;  %v5375_v31 = vld [vmem:[%s8305_s20 + $0x18] sm:$0xff] }
 0xf49   :  { %3939 = vadd.xlane.f32.xlu1 %v3938_v45  ;;  %4687 = vmatpush.bf16.msra.mxu0 %v5375_v31  ;;  %v5372_v45 = vld [vmem:[%s8305_s20] sm:$0xff] }
 0xf77   :  { %v4567_v37 = vpop.f32.mrf.mxu2 }
 0xf7a   :  { %v4587_v10 = vpop.f32.mrf.mxu3 }
 0xf7b   :  { %v4588_v21 = vadd.f32 %v4587_v10, %v4567_v37 }
 0xf7d   :  { %v4598_v14 = vadd.f32 %v4588_v21, %v7938_v4 }
 0xf7f   :  { %v4569_v27 = vpop.f32.mrf.mxu2  ;;  %v4605_v13 = vadd.f32 %v5490_v58, %v4598_v14 }
 0xf82   :  { %v4589_v63 = vpop.f32.mrf.mxu3 }
 0xfb2   :  { %v3907_v34 = vpop.xlane.xlu1 %3906 }
 0xfb3   :  { %v3915_v42 = vmul.f32 %v3907_v34, %v6124_v18 }
 0xfb4   :  { %v3937_v56 = vpop.xlane.xlu2 %3936 }
 0xfb5   :  { %v3951_v35 = vmul.f32 %v3915_v42, %v3915_v42  ;;  %v3945_v0 = vmul.f32 %v3937_v56, %v6124_v18  ;;  %v3963_v12 = vsub.f32 %v8195_v28, %v3915_v42 }
 0xfb7   :  { %v3957_v22 = vsub.f32 %v3945_v0, %v3951_v35 }
 0xfb9   :  { %v3969_v5 = vadd.f32 1e-05, %v3957_v22 }
 0xfba   :  { %v3910_v1 = vpop.xlane.xlu0 %3909 }
 0xfbb   :  { %5823 = vrsqrt.f32 %v3969_v5  ;;  %v3916_v53 = vmul.f32 %v3910_v1, %v6124_v18  ;;  %vm4017_vm4 = vweird.f32 %v3969_v5 }
 0xfbc   :  { %v3940_v38 = vpop.xlane.xlu1 %3939 }
 0xfbd   :  { %v3952_v51 = vmul.f32 %v3916_v53, %v3916_v53  ;;  %v3946_v2 = vmul.f32 %v3940_v38, %v6124_v18  ;;  %v3964_v57 = vsub.f32 %v3888_v60, %v3916_v53 }
 0xfbf   :  { %v3958_v41 = vsub.f32 %v3946_v2, %v3952_v51 }
 0xfc1   :  { %v5824_v6 = vpop.eup %5823  ;;  %v3970_v46 = vadd.f32 1e-05, %v3958_v41 }
 0xfc2   :  { %v4012_v17 = vmul.f32 %v5824_v6, %v3969_v5  ;;  %vm4018_vm12 = vweird.f32 %v5824_v6 }
 0xfc3   :  { %5825 = vrsqrt.f32 %v3970_v46  ;;  %vm4019_vm15 = vmor %vm4017_vm4, %vm4018_vm12  ;;  %vm4027_vm3 = vweird.f32 %v3970_v46 }
 0xfc4   :  { %v4013_v24 = vmul.f32 %v5824_v6, %v4012_v17  ;;  %v4571_v30 = vpop.f32.mrf.mxu2 }
 0xfc6   :  { %v4014_v40 = vmul.f32 0.5, %v4013_v24 }
 0xfc7   :  { %v4591_v50 = vpop.f32.mrf.mxu3 }
 0xfc8   :  { %v4015_v8 = vsub.f32 1.5, %v4014_v40 }
 0xfc9   :  { %v5826_v62 = vpop.eup %5825 }
 0xfca   :  { %v4016_v7 = vmul.f32 %v5824_v6, %v4015_v8  ;;  %v4022_v55 = vmul.f32 %v5826_v62, %v3970_v46  ;;  %vm4028_vm1 = vweird.f32 %v5826_v62 }
 0xfcb   :  { %vm4029_vm6 = vmor %vm4027_vm3, %vm4028_vm1 }
 0xfcc   :  { %v4023_v15 = vmul.f32 %v5826_v62, %v4022_v55  ;;  %v4572_v39 = vpop.f32.mrf.mxu2  ;;  %v4020_v47 = vsel %vm4019_vm15, %v5824_v6, %v4016_v7  ;;  %v5491_v7 = vld [vmem:[%s8303_s18] ss:$0 sm:$0xff]  ;;  %s5880_s18 = smov [#allocation2]  }
 0xfcd   :  { %v4035_v33 = vmul.f32 %v4020_v47, %v3963_v12 }
 0xfce   :  { %v4024_v43 = vmul.f32 0.5, %v4023_v15 }
 0xfcf   :  { %v4592_v9 = vpop.f32.mrf.mxu3  ;;  %v4044_v19 = vmul.f32 %v8039_v48, %v4035_v33 }
 0xfd0   :  { %v4025_v26 = vsub.f32 1.5, %v4024_v43  ;;  %v4593_v36 = vadd.f32 %v4592_v9, %v4572_v39 }
 0xfd1   :  { %v4053_v11 = vadd.f32 %v8048_v29, %v4044_v19 }
 0xfd2   :  { %v4026_v20 = vmul.f32 %v5826_v62, %v4025_v26  ;;  %v4599_v23 = vadd.f32 %v4593_v36, %v7967_v25 }
 0xfd4   :  { %v4030_v32 = vsel %vm4029_vm6, %v5826_v62, %v4026_v20  ;;  %v4606_v16 = vadd.f32 %v5490_v58, %v4599_v23 }
 0xfd5   :  { %v4036_v28 = vmul.f32 %v4030_v32, %v3964_v57 }
 0xfd6   :  { %v4608_v44 = vrot.slane %v4606_v16, 7 }
 0xfd7   :  { %v4045_v4 = vmul.f32 %v8039_v48, %v4036_v28  ;;  %v5374_v48 = vld [vmem:[%s8305_s20 + $0x10] sm:$0xff] }
 0xfd8   :  { %v4611_v49 = vsel %vm4610_vm2, %v4605_v13, %v4608_v44  ;;  %4688 = vmatpush.bf16.msra.mxu0 %v5374_v48 }
 0xfd9   :  { %v4615_v59 = vsel %vm4614_vm7, %v4611_v49, 0.0  ;;  %v4619_v52 = vmul.f32 %v4611_v49, %v4611_v49  ;;  %v4054_v25 = vadd.f32 %v8048_v29, %v4045_v4  ;;  %v5373_v29 = vld [vmem:[%s8305_s20 + $0x8] sm:$0xff] }
 0xfda   :  { %4616 = vadd.xlane.f32.xlu2 %v4615_v59 }
 0xfdb   :  { %v4620_v60 = vsel %vm4614_vm7, %v4619_v52, 0.0  ;;  %v4066_v3 = vpack.c.bf16 %v4054_v25, %v4053_v11 }
 0xfdc   :  { %4621 = vadd.xlane.f32.xlu0 %v4620_v60  ;;  %4689 = vmatpush.bf16.msra.mxu0 %v5373_v29 }
 0xfdd   :  { %5152 = vmatmul.msk.bf16.gmra.mxu0 %vm205_vm0, %v4066_v3  ;;  %5155 = vmatmul.msk.bf16.gmra.mxu1 %vm205_vm0, %v4066_v3 }
 0xfe0   :  { %4690 = vmatpush.bf16.msra.mxu0 %v5372_v45 }
0x104d   :  { %v4617_v37 = vpop.xlane.xlu2 %4616 }
0x104e   :  { %v4618_v10 = vmul.f32 %v4617_v37, %v6124_v18 }
0x104f   :  { %v4622_v21 = vpop.xlane.xlu0 %4621 }
0x1050   :  { %v4624_v27 = vmul.f32 %v4618_v10, %v4618_v10  ;;  %v4623_v63 = vmul.f32 %v4622_v21, %v6124_v18  ;;  %v4626_v62 = vsub.f32 %v4611_v49, %v4618_v10 }
0x1052   :  { %v4625_v34 = vsub.f32 %v4623_v63, %v4624_v27 }
0x1054   :  { %v4627_v42 = vadd.f32 1e-05, %v4625_v34 }
0x1056   :  { %5827 = vrsqrt.f32 %v4627_v42  ;;  %vm4634_vm13 = vweird.f32 %v4627_v42 }
0x105a   :  { %v4142_v56 = vpop.f32.mrf.mxu0  ;;  %v4166_v35 = vpop.f32.mrf.mxu1 }
0x105b   :  { %v8241_v0 = vadd.f32 %v4142_v56, %v8103_v61  ;;  %v8244_v22 = vadd.f32 %v4166_v35, %v8105_v54 }
0x105c   :  { %v5828_v5 = vpop.eup %5827 }
0x105d   :  { %v4629_v1 = vmul.f32 %v5828_v5, %v4627_v42  ;;  %v5164_v53 = vmul.f32 -1.702, %v8241_v0  ;;  %v5165_v38 = vmul.f32 -1.702, %v8244_v22  ;;  %vm4635_vm8 = vweird.f32 %v5828_v5 }
0x105e   :  { %vm4636_vm5 = vmor %vm4634_vm13, %vm4635_vm8 }
0x105f   :  { %v4630_v51 = vmul.f32 %v5828_v5, %v4629_v1  ;;  %v4211_v2 = vmul.f32 1.442695, %v5164_v53  ;;  %v4213_v18 = vmul.f32 1.442695, %v5165_v38 }
0x1061   :  { %v4631_v41 = vmul.f32 0.5, %v4630_v51  ;;  %5829 = vpow2.f32 %v4211_v2 }
0x1062   :  { %5831 = vpow2.f32 %v4213_v18  ;;  %v4144_v6 = vpop.f32.mrf.mxu0  ;;  %v4168_v46 = vpop.f32.mrf.mxu1 }
0x1063   :  { %v4632_v17 = vsub.f32 1.5, %v4631_v41  ;;  %v8249_v24 = vadd.f32 %v4144_v6, %v8103_v61  ;;  %v8252_v30 = vadd.f32 %v4168_v46, %v8105_v54  ;;  %v5492_v54 = vld [vmem:[%s8304_s19] ss:$0 sm:$0xff]  ;;  %s4706_s19 = sshll.u32 %s5880_s18, 4  ;;  %s4707_s19 = int_to_ptr.vmem [resolvable:$true] %s4706_s19 }
0x1065   :  { %v4633_v40 = vmul.f32 %v5828_v5, %v4632_v17  ;;  %v5166_v50 = vmul.f32 -1.702, %v8249_v24  ;;  %v5167_v8 = vmul.f32 -1.702, %v8252_v30 }
0x1067   :  { %v5830_v55 = vpop.eup %5829  ;;  %v4637_v15 = vsel %vm4636_vm5, %v5828_v5, %v4633_v40  ;;  %v4215_v39 = vmul.f32 1.442695, %v5166_v50  ;;  %v4217_v12 = vmul.f32 1.442695, %v5167_v8 }
0x1068   :  { %v5832_v61 = vpop.eup %5831  ;;  %v4638_v47 = vmul.f32 %v4637_v15, %v4626_v62  ;;  %v4227_v43 = vadd.f32 1.0, %v5830_v55 }
0x1069   :  { %v4228_v9 = vadd.f32 1.0, %v5832_v61  ;;  %5833 = vpow2.f32 %v4215_v39 }
0x106a   :  { %v4642_v26 = vmul.f32 %v5491_v7, %v4638_v47  ;;  %5835 = vrcp.f32 %v4227_v43  ;;  %vm4356_vm10 = vweird.f32 %v4227_v43  ;;  %v4360_v11 = vand.u32 2147483647, %v4227_v43 }
0x106b   :  { %5837 = vrcp.f32 %v4228_v9  ;;  %v4362_v25 = vand.u32 2147483648, %v4227_v43  ;;  %v4375_v3 = vand.u32 2147483647, %v4228_v9  ;;  %v4377_v37 = vand.u32 2147483648, %v4228_v9 }
0x106c   :  { %v4646_v36 = vadd.f32 %v5492_v54, %v4642_v26  ;;  %5839 = vpow2.f32 %v4217_v12  ;;  %vm4361_vm4 = vcmp.eq.f32.partialorder %v4360_v11, 8.507059e+37 }
0x106d   :  { %v4363_v34 = vor.u32 1.1754944e-38, %v4362_v25  ;;  %v4378_v18 = vor.u32 1.1754944e-38, %v4377_v37  ;;  %vm4376_vm7 = vcmp.eq.f32.partialorder %v4375_v3, 8.507059e+37 }
0x106e   :  { %v4655_v33 = vpack.c.bf16 %v4646_v36, %v4646_v36 }
0x106f   :  { %v5834_v14 = vpop.eup %5833 }
0x1070   :  { %v5836_v58 = vpop.eup %5835  ;;  %v4229_v20 = vadd.f32 1.0, %v5834_v14  ;;  %5281 = vmatmul.msk.bf16.vlgmr.msra.gmra.mxu0 %vm205_vm0, %v4655_v33  ;;  %vm4371_vm0 = vweird.f32 %v4228_v9 }
0x1071   :  { %v5838_v23 = vpop.eup %5837  ;;  %v4352_v57 = vmul.f32 %v5836_v58, %v4227_v43  ;;  %vm4357_vm14 = vweird.f32 %v5836_v58 }
0x1072   :  { %v5840_v32 = vpop.eup %5839  ;;  %v4367_v16 = vmul.f32 %v5838_v23, %v4228_v9  ;;  %5841 = vrcp.f32 %v4229_v20  ;;  %v4392_v48 = vand.u32 2147483648, %v4229_v20  ;;  %vm8263_vm9 = vmor %vm4356_vm10, %vm4357_vm14  ;;  %vm4372_vm11 = vweird.f32 %v5838_v23 }
0x1073   :  { %v4353_v28 = vsub.f32 1.0, %v4352_v57  ;;  %v4230_v19 = vadd.f32 1.0, %v5840_v32  ;;  %v4390_v63 = vand.u32 2147483647, %v4229_v20  ;;  %vm4386_vm15 = vweird.f32 %v4229_v20  ;;  %vm8270_vm1 = vmor %vm4371_vm0, %vm4372_vm11 }
0x1074   :  { %v4368_v13 = vsub.f32 1.0, %v4367_v16  ;;  %v4393_v5 = vor.u32 1.1754944e-38, %v4392_v48  ;;  %vm4699_vm14 = vcmask 253952  }
0x1075   :  { %v4354_v44 = vmul.f32 %v5836_v58, %v4353_v28  ;;  %5843 = vrcp.f32 %v4230_v19  ;;  %v4405_v1 = vand.u32 2147483647, %v4230_v19  ;;  %v4407_v53 = vand.u32 2147483648, %v4230_v19 }
0x1076   :  { %v4369_v49 = vmul.f32 %v5838_v23, %v4368_v13  ;;  %vm4391_vm2 = vcmp.eq.f32.partialorder %v4390_v63, 8.507059e+37  ;;  %vm4401_vm8 = vweird.f32 %v4230_v19 }
0x1077   :  { %v4355_v59 = vadd.f32 %v5836_v58, %v4354_v44  ;;  %v4408_v8 = vor.u32 1.1754944e-38, %v4407_v53  ;;  %vm4406_vm5 = vcmp.eq.f32.partialorder %v4405_v1, 8.507059e+37 }
0x1078   :  { %v5842_v4 = vpop.eup %5841  ;;  %v4370_v45 = vadd.f32 %v5838_v23, %v4369_v49 }
0x1079   :  { %v4382_v52 = vmul.f32 %v5842_v4, %v4229_v20  ;;  %v4359_v21 = vsel %vm8263_vm9, %v5836_v58, %v4355_v59  ;;  %vm4387_vm12 = vweird.f32 %v5842_v4 }
0x107a   :  { %v4364_v38 = vsel %vm4361_vm4, %v4363_v34, %v4359_v21  ;;  %v4374_v51 = vsel %vm8270_vm1, %v5838_v23, %v4370_v45  ;;  %vm4388_vm3 = vmor %vm4386_vm15, %vm4387_vm12 }
0x107b   :  { %v5844_v60 = vpop.eup %5843  ;;  %v4383_v31 = vsub.f32 1.0, %v4382_v52  ;;  %v4419_v17 = vmul.f32 %v4364_v38, %v8241_v0  ;;  %v4379_v40 = vsel %vm4376_vm7, %v4378_v18, %v4374_v51 }
0x107c   :  { %v4397_v10 = vmul.f32 %v5844_v60, %v4230_v19  ;;  %vm4402_vm6 = vweird.f32 %v5844_v60  ;;  %v4420_v15 = vmul.f32 %v4379_v40, %v8244_v22 }
0x107d   :  { %v4384_v27 = vmul.f32 %v5842_v4, %v4383_v31  ;;  %vm4403_vm13 = vmor %vm4401_vm8, %vm4402_vm6 }
0x107e   :  { %v4398_v42 = vsub.f32 1.0, %v4397_v10 }
0x107f   :  { %v4385_v35 = vadd.f32 %v5842_v4, %v4384_v27 }
0x1080   :  { %v4399_v2 = vmul.f32 %v5844_v60, %v4398_v42 }
0x1081   :  { %v4389_v41 = vsel %vm4388_vm3, %v5842_v4, %v4385_v35 }
0x1082   :  { %v4394_v6 = vsel %vm4391_vm2, %v4393_v5, %v4389_v41  ;;  %v4400_v46 = vadd.f32 %v5844_v60, %v4399_v2 }
0x1083   :  { %v4421_v50 = vmul.f32 %v4394_v6, %v8249_v24 }
0x1084   :  { %v4404_v62 = vsel %vm4403_vm13, %v5844_v60, %v4400_v46 }
0x1085   :  { %v4409_v7 = vsel %vm4406_vm5, %v4408_v8, %v4404_v62  ;;  %v4460_v55 = vpack.c.bf16 %v4421_v50, %v4419_v17 }
0x1086   :  { %v4422_v39 = vmul.f32 %v4409_v7, %v8252_v30 }
0x1087   :  { %4574 = vmatmul.bf16.gmra.mxu2 %v4460_v55 }
0x1088   :  { %v4461_v61 = vpack.c.bf16 %v4422_v39, %v4420_v15 }
0x108a   :  { %4594 = vmatmul.bf16.gmra.mxu3 %v4461_v61 }
0x10ed   :  { %v4692_v0 = vpop.f32.mrf.mxu0 }
0x10ee   :  { %v4697_v24 = vrot.slane %v4692_v0, 1  ;;  %4700 = vst.msk [vmem:[#allocation2] sm:$0x1] %vm4699_vm14, %v4692_v0 }
0x10f0   :  { %4701 = vst.msk [vmem:[#allocation2 + $0x1] sm:$0x1] %vm4699_vm14, %v4697_v24 }
0x10f1   :  { %4714 = dma.vmem_to_hbm [thread:$0]  %s4707_s19, 32, %s4709_s10, [#allocation3], %s5876_s30, %s5876_s30, %s5881_s12  }
0x10f5   :  { %v4694_v22 = vpop.f32.mrf.mxu0 }
0x110a   :  { %v4575_v30 = vpop.f32.mrf.mxu2 }
0x110d   :  { %v4595_v54 = vpop.f32.mrf.mxu3 }
0x1112   :  { %v4576_v47 = vpop.f32.mrf.mxu2 }
0x1115   :  { %v4596_v43 = vpop.f32.mrf.mxu3 }
0x1116   :  { %5870 = dma.done.wait [#allocation3], 32  }
0x1117   :  { %5871 = vsyncadd [#allocation3], 4294967264 }
0x1118   :  { %4719 = vsyncpa [#allocation3], 1 }

</bundles_post_ra>
